<compile_context>
chip_gen: v7x
topology: tpu7x:2x2x1
jax: 0.10.0
libtpu: 0.0.40
codegen_flags: <defaults>
</compile_context>

<pallas_src>
import math

import jax
import jax.numpy as jnp
from jax.experimental import pallas as pl
from jax.experimental.pallas import tpu as pltpu

# ---- small, lane-friendly hyperparameters consistent with the module ----
BATCH = 8            # batch_size
SEQ = 8              # max_seq_len (<= 9: positional_encoding has 9 slots)
INPUT_DIM = 16       # input_dim
MODEL_DIM = 128      # model_dim (lane-dense)
NUM_HEADS = 4        # num_heads
HEAD_DIM = MODEL_DIM // NUM_HEADS
NUM_LAYERS = 2       # num_layers
FFN_DIM = 2048       # nn.TransformerEncoderLayer default dim_feedforward
FFN_CHUNKS = 4       # FFN hidden dim processed in 4 chunks of 512
LN_EPS = 1e-5        # nn.LayerNorm default eps
NEG_INF = -1e30      # key-padding additive bias


def _layer_norm(x, g, b):
    mu = jnp.mean(x, axis=-1, keepdims=True)
    xc = x - mu
    var = jnp.mean(xc * xc, axis=-1, keepdims=True)
    return xc * jax.lax.rsqrt(var + LN_EPS) * g + b


# ------------------------------ fused kernel ------------------------------

def _transformer_kernel(paths_ref, kb_ref, valid_ref, sel_ref, hm_ref,
                        emb_w_ref, emb_b_ref, pos_ref, fc_w_ref, fc_b_ref,
                        wqkv_ref, bqkv_ref, wo_ref, bo_ref, g1_ref, be1_ref,
                        w1_ref, b1_ref, w2_ref, b2_ref, g2_ref, be2_ref,
                        out_ref, h_ref):
    """One encoder layer per grid step; h carried in VMEM scratch."""
    layer = pl.program_id(0)
    B, S, _ = kb_ref.shape
    M, D = pos_ref.shape
    H = hm_ref.shape[0]
    Hd = D // H
    F = b1_ref.shape[-1]
    cs = F // FFN_CHUNKS

    # ---- prologue (first grid step): embedding + positional encoding ----
    @pl.when(layer == 0)
    def _():
        emb_w = emb_w_ref[...].astype(jnp.float32)
        h_ref[...] = (jnp.dot(paths_ref[...], emb_w,
                              preferred_element_type=jnp.float32)
                      + emb_b_ref[...] + pos_ref[...])

    h = h_ref[...]                       # [M, D] residual stream (f32)
    kb = kb_ref[...]                     # [B, S, S] additive key-padding bias
    hm = hm_ref[...]                     # [H, 1, D] per-head lane masks

    # ---- self-attention: fused QKV projection (single MXU pass) ----
    wqkv = wqkv_ref[...].astype(jnp.float32)
    qkv = jnp.dot(h, wqkv, preferred_element_type=jnp.float32) + bqkv_ref[...]
    q = qkv[:, 0 * D:1 * D].reshape(B, S, D)
    k = qkv[:, 1 * D:2 * D].reshape(B, S, D)
    v = qkv[:, 2 * D:3 * D].reshape(B, S, D)

    scale = 1.0 / math.sqrt(Hd)
    ctx = jnp.zeros((B, S, D), jnp.float32)
    for hh in range(H):                  # heads via lane masks: no 32-lane
        m = hm[hh]                       # slices, no lane-axis concatenate.
        s = jnp.einsum('bqd,bkd->bqk', q * m, k,
                       preferred_element_type=jnp.float32) * scale
        s = s + kb
        s = s - jnp.max(s, axis=-1, keepdims=True)   # keeps masked rows NaN-free
        e = jnp.exp(s)
        a = e * pl.reciprocal(jnp.sum(e, axis=-1, keepdims=True), approx=True)
        ctx = ctx + jnp.einsum('bqk,bkd->bqd', a, v * m,
                               preferred_element_type=jnp.float32)
    ctx = ctx.reshape(M, D)

    wo = wo_ref[...].astype(jnp.float32)
    attn = jnp.dot(ctx, wo, preferred_element_type=jnp.float32) + bo_ref[...]
    # post-norm residual blocks (norm_first=False); dropout = identity (eval).
    h = _layer_norm(h + attn, g1_ref[...], be1_ref[...])

    # ---- feed-forward, chunked over the hidden dim ----
    ffn = jnp.zeros((M, D), jnp.float32)
    for c in range(FFN_CHUNKS):
        sl = slice(c * cs, (c + 1) * cs)
        w1c = w1_ref[:, sl].astype(jnp.float32)
        w2c = w2_ref[sl, :].astype(jnp.float32)
        hid = jnp.maximum(
            jnp.dot(h, w1c, preferred_element_type=jnp.float32) + b1_ref[:, sl],
            0.0)
        ffn = ffn + jnp.dot(hid, w2c, preferred_element_type=jnp.float32)
    h = _layer_norm(h + ffn + b2_ref[...], g2_ref[...], be2_ref[...])
    h_ref[...] = h

    # ---- epilogue (last grid step): last token -> fc_out -> row masking ----
    @pl.when(layer == NUM_LAYERS - 1)
    def _():
        # transformer_out[-1, :, :] via a one-hot selection matmul (no strided
        # sublane gather).
        last = jnp.dot(sel_ref[...], h, preferred_element_type=jnp.float32)
        fc_w = fc_w_ref[...].astype(jnp.float32)
        out = (jnp.dot(last, fc_w, preferred_element_type=jnp.float32)
               + fc_b_ref[...])
        # result[valid_rows] = final_output; all-False-mask rows stay zero.
        out_ref[...] = jnp.where(valid_ref[...] > 0.0, out, 0.0)


# ------------------------------ spec helpers -------------------------------

def _resident_spec(shape):
    """Full-array block whose index never changes -> fetched once, stays resident."""
    nd = len(shape)
    return pl.BlockSpec(tuple(shape), lambda l, _nd=nd: (0,) * _nd)


def _layer_spec(shape):
    """Per-layer slab: leading layer dim squeezed, streamed as grid advances."""
    nz = len(shape) - 1
    return pl.BlockSpec((None,) + tuple(shape[1:]),
                        lambda l, _nz=nz: (l,) + (0,) * _nz)


# -------------------------------- wrapper ----------------------------------

def prepare_params(params, batch, seq):
    """One-time host-side packing: stack per-layer weights, cast big ones to bf16."""
    f32, bf16 = jnp.float32, jnp.bfloat16

    def stack(name):
        return jnp.stack([lp[name] for lp in params["layers"]])

    sel = (jnp.arange(batch * seq)[None, :]
           == (jnp.arange(batch) * seq + (seq - 1))[:, None]).astype(f32)
    head_mask = (jnp.arange(MODEL_DIM)[None, :] // HEAD_DIM
                 == jnp.arange(NUM_HEADS)[:, None]).astype(f32)
    head_mask = head_mask.reshape(NUM_HEADS, 1, MODEL_DIM)
    pos_tiled = jnp.tile(params["pos"][:seq], (batch, 1)).astype(f32)

    return (
        sel, head_mask,
        params["emb_w"].astype(bf16), params["emb_b"].astype(f32), pos_tiled,
        params["fc_w"].astype(bf16), params["fc_b"].astype(f32),
        stack("wqkv").astype(bf16), stack("bqkv").astype(f32),
        stack("wo").astype(bf16), stack("bo").astype(f32),
        stack("ln1_g").astype(f32), stack("ln1_b").astype(f32),
        stack("w1").astype(bf16), stack("b1").astype(f32),
        stack("w2").astype(bf16), stack("b2").astype(f32),
        stack("ln2_g").astype(f32), stack("ln2_b").astype(f32),
    )


@jax.jit
def label_seq_transformer(paths, mask, prepared):
    """paths: [B, S, INPUT_DIM] f32, mask: [B, S] bool -> [B, MODEL_DIM] f32."""
    b, s, _ = paths.shape
    maskf = mask.astype(jnp.float32)
    key_bias = (1.0 - maskf) * NEG_INF                          # [B, S]
    kb3 = jnp.broadcast_to(key_bias[:, None, :], (b, s, s))     # pre-broadcast
    valid = (jnp.sum(maskf, axis=1, keepdims=True) > 0.0).astype(jnp.float32)
    paths2d = paths.reshape(b * s, INPUT_DIM)

    resident = (paths2d, kb3, valid) + tuple(prepared[:7])
    per_layer = tuple(prepared[7:])
    in_specs = ([_resident_spec(a.shape) for a in resident]
                + [_layer_spec(a.shape) for a in per_layer])

    return pl.pallas_call(
        _transformer_kernel,
        out_shape=jax.ShapeDtypeStruct((b, MODEL_DIM), jnp.float32),
        grid_spec=pltpu.PrefetchScalarGridSpec(
            num_scalar_prefetch=0,
            grid=(NUM_LAYERS,),
            in_specs=in_specs,
            out_specs=pl.BlockSpec((b, MODEL_DIM), lambda l: (0, 0)),
            scratch_shapes=[pltpu.VMEM((b * s, MODEL_DIM), jnp.float32)],
        ),
        compiler_params=pltpu.CompilerParams(
            dimension_semantics=("arbitrary",),      # sequential layer dependence
            vmem_limit_bytes=32 * 1024 * 1024,
        ),
    )(*(resident + per_layer))


# --------------------------- deterministic params ---------------------------

def init_params(key):
    keys = iter(jax.random.split(key, 64))

    def nrm(shape, scale=0.05):
        return scale * jax.random.normal(next(keys), shape, jnp.float32)

    p = {
        "emb_w": nrm((INPUT_DIM, MODEL_DIM)),
        "emb_b": nrm((1, MODEL_DIM)),
        "pos": nrm((9, MODEL_DIM)),           # positional_encoding [1, 9, D]
        "fc_w": nrm((MODEL_DIM, MODEL_DIM)),
        "fc_b": nrm((1, MODEL_DIM)),
        "layers": [],
    }
    for _ in range(NUM_LAYERS):
        p["layers"].append({
            "wqkv": nrm((MODEL_DIM, 3 * MODEL_DIM)),
            "bqkv": nrm((1, 3 * MODEL_DIM)),
            "wo": nrm((MODEL_DIM, MODEL_DIM)),
            "bo": nrm((1, MODEL_DIM)),
            "ln1_g": 1.0 + nrm((1, MODEL_DIM)),
            "ln1_b": nrm((1, MODEL_DIM)),
            "w1": nrm((MODEL_DIM, FFN_DIM)),
            "b1": nrm((1, FFN_DIM)),
            "w2": nrm((FFN_DIM, MODEL_DIM)),
            "b2": nrm((1, MODEL_DIM)),
            "ln2_g": 1.0 + nrm((1, MODEL_DIM)),
            "ln2_b": nrm((1, MODEL_DIM)),
        })
    return p


# ------------------------------- reference ----------------------------------

def reference_forward(paths, mask, params):
    """Pure-JAX mirror of LabelSeqTransformer.forward (eval mode), f32 weights."""
    b, s, _ = paths.shape
    maskf = mask.astype(jnp.float32)
    key_bias = (1.0 - maskf) * NEG_INF
    h = paths.reshape(b * s, INPUT_DIM) @ params["emb_w"] + params["emb_b"]
    h = h + jnp.tile(params["pos"][:s], (b, 1))
    for lp in params["layers"]:
        qkv = h @ lp["wqkv"] + lp["bqkv"]
        q = qkv[:, :MODEL_DIM].reshape(b, s, NUM_HEADS, HEAD_DIM)
        k = qkv[:, MODEL_DIM:2 * MODEL_DIM].reshape(b, s, NUM_HEADS, HEAD_DIM)
        v = qkv[:, 2 * MODEL_DIM:].reshape(b, s, NUM_HEADS, HEAD_DIM)
        sc = jnp.einsum('bqhd,bkhd->bhqk', q, k) / math.sqrt(HEAD_DIM)
        sc = sc + key_bias[:, None, None, :]
        sc = sc - sc.max(-1, keepdims=True)
        e = jnp.exp(sc)
        attn = e / e.sum(-1, keepdims=True)
        ctx = jnp.einsum('bhqk,bkhd->bqhd', attn, v).reshape(b * s, MODEL_DIM)
        h = _layer_norm(h + ctx @ lp["wo"] + lp["bo"], lp["ln1_g"], lp["ln1_b"])
        ff = jnp.maximum(h @ lp["w1"] + lp["b1"], 0.0) @ lp["w2"] + lp["b2"]
        h = _layer_norm(h + ff, lp["ln2_g"], lp["ln2_b"])
    last = h.reshape(b, s, MODEL_DIM)[:, s - 1, :]
    out = last @ params["fc_w"] + params["fc_b"]
    valid = maskf.sum(axis=1, keepdims=True) > 0.0
    return jnp.where(valid, out, 0.0)


if __name__ == "__main__":
    key = jax.random.PRNGKey(0)
    k_p, k_x = jax.random.split(key)

    params = init_params(k_p)
    prepared = prepare_params(params, BATCH, SEQ)

    paths = jax.random.normal(k_x, (BATCH, SEQ, INPUT_DIM), jnp.float32)
    # variable-length sequences; rows 3 and 6 are fully padded (all-False mask)
    lengths = jnp.array([8, 5, 3, 0, 8, 1, 0, 6], jnp.int32)
    mask = jnp.arange(SEQ)[None, :] < lengths[:, None]          # [B, S] bool

    out = jax.block_until_ready(label_seq_transformer(paths, mask, prepared))

    with jax.default_matmul_precision("highest"):
        ref = reference_forward(paths, mask, params)

    assert out.shape == (BATCH, MODEL_DIM), out.shape
    assert bool(jnp.all(out[3] == 0.0)) and bool(jnp.all(out[6] == 0.0))
    assert jnp.allclose(out, ref, atol=2e-2, rtol=2e-2), float(
        jnp.max(jnp.abs(out - ref)))

    print("KERNEL_OK")
</pallas_src>

<mosaic_0001>
module attributes {stable_mosaic.version = 11 : i64} {
  func.func @_transformer_kernel(%arg0: i32, %arg1: memref<64x16xf32, #tpu.memory_space<vmem>>, %arg2: memref<8x8x8xf32, #tpu.memory_space<vmem>>, %arg3: memref<8x1xf32, #tpu.memory_space<vmem>>, %arg4: memref<8x64xf32, #tpu.memory_space<vmem>>, %arg5: memref<4x1x128xf32, #tpu.memory_space<vmem>>, %arg6: memref<16x128xbf16, #tpu.memory_space<vmem>>, %arg7: memref<1x128xf32, #tpu.memory_space<vmem>>, %arg8: memref<64x128xf32, #tpu.memory_space<vmem>>, %arg9: memref<128x128xbf16, #tpu.memory_space<vmem>>, %arg10: memref<1x128xf32, #tpu.memory_space<vmem>>, %arg11: memref<1x128x384xbf16, #tpu.memory_space<vmem>>, %arg12: memref<1x1x384xf32, #tpu.memory_space<vmem>>, %arg13: memref<1x128x128xbf16, #tpu.memory_space<vmem>>, %arg14: memref<1x1x128xf32, #tpu.memory_space<vmem>>, %arg15: memref<1x1x128xf32, #tpu.memory_space<vmem>>, %arg16: memref<1x1x128xf32, #tpu.memory_space<vmem>>, %arg17: memref<1x128x2048xbf16, #tpu.memory_space<vmem>>, %arg18: memref<1x1x2048xf32, #tpu.memory_space<vmem>>, %arg19: memref<1x2048x128xbf16, #tpu.memory_space<vmem>>, %arg20: memref<1x1x128xf32, #tpu.memory_space<vmem>>, %arg21: memref<1x1x128xf32, #tpu.memory_space<vmem>>, %arg22: memref<1x1x128xf32, #tpu.memory_space<vmem>>, %arg23: memref<8x128xf32, #tpu.memory_space<vmem>>, %arg24: memref<64x128xf32, #tpu.memory_space<vmem>>) attributes {dimension_semantics = [#tpu.dimension_semantics<arbitrary>], iteration_bounds = array<i64: 2>, scalar_prefetch = 0 : i64, scratch_operands = 1 : i64, tpu.core_type = #tpu.core_type<tc>, window_params = [{pipeline_mode = #tpu.pipeline_mode<synchronous>, transform_indices = @transform_0, window_bounds = array<i64: 64, 16>}, {pipeline_mode = #tpu.pipeline_mode<synchronous>, transform_indices = @transform_1, window_bounds = array<i64: 8, 8, 8>}, {pipeline_mode = #tpu.pipeline_mode<synchronous>, transform_indices = @transform_2, window_bounds = array<i64: 8, 1>}, {pipeline_mode = #tpu.pipeline_mode<synchronous>, transform_indices = @transform_3, window_bounds = array<i64: 8, 64>}, {pipeline_mode = #tpu.pipeline_mode<synchronous>, transform_indices = @transform_4, window_bounds = array<i64: 4, 1, 128>}, {pipeline_mode = #tpu.pipeline_mode<synchronous>, transform_indices = @transform_5, window_bounds = array<i64: 16, 128>}, {pipeline_mode = #tpu.pipeline_mode<synchronous>, transform_indices = @transform_6, window_bounds = array<i64: 1, 128>}, {pipeline_mode = #tpu.pipeline_mode<synchronous>, transform_indices = @transform_7, window_bounds = array<i64: 64, 128>}, {pipeline_mode = #tpu.pipeline_mode<synchronous>, transform_indices = @transform_8, window_bounds = array<i64: 128, 128>}, {pipeline_mode = #tpu.pipeline_mode<synchronous>, transform_indices = @transform_9, window_bounds = array<i64: 1, 128>}, {transform_indices = @transform_10, window_bounds = array<i64: 1, 128, 384>}, {transform_indices = @transform_11, window_bounds = array<i64: 1, 1, 384>}, {transform_indices = @transform_12, window_bounds = array<i64: 1, 128, 128>}, {transform_indices = @transform_13, window_bounds = array<i64: 1, 1, 128>}, {transform_indices = @transform_14, window_bounds = array<i64: 1, 1, 128>}, {transform_indices = @transform_15, window_bounds = array<i64: 1, 1, 128>}, {transform_indices = @transform_16, window_bounds = array<i64: 1, 128, 2048>}, {transform_indices = @transform_17, window_bounds = array<i64: 1, 1, 2048>}, {transform_indices = @transform_18, window_bounds = array<i64: 1, 2048, 128>}, {transform_indices = @transform_19, window_bounds = array<i64: 1, 1, 128>}, {transform_indices = @transform_20, window_bounds = array<i64: 1, 1, 128>}, {transform_indices = @transform_21, window_bounds = array<i64: 1, 1, 128>}, {pipeline_mode = #tpu.pipeline_mode<synchronous>, transform_indices = @transform_22, window_bounds = array<i64: 8, 128>}]} {
    %c0_i32 = arith.constant 0 : i32
    %0 = arith.cmpi eq, %arg0, %c0_i32 : i32
    %1 = arith.extui %0 : i1 to i32
    %c0_i32_0 = arith.constant 0 : i32
    %2 = arith.cmpi ne, %1, %c0_i32_0 : i32
    scf.if %2 {
      %c0_116 = arith.constant 0 : index
      %c0_117 = arith.constant 0 : index
      %245 = vector.load %arg6[%c0_116, %c0_117] : memref<16x128xbf16, #tpu.memory_space<vmem>>, vector<16x128xbf16>
      %246 = arith.extf %245 : vector<16x128xbf16> to vector<16x128xf32>
      %c0_118 = arith.constant 0 : index
      %c0_119 = arith.constant 0 : index
      %247 = vector.load %arg1[%c0_118, %c0_119] : memref<64x16xf32, #tpu.memory_space<vmem>>, vector<64x16xf32>
      %cst_120 = arith.constant dense<0.000000e+00> : vector<64x128xf32>
      %248 = tpu.matmul %247, %246, %cst_120 {dimension_numbers = #tpu.dot_dimension_numbers<[1], [0], [0], [1], [0, 0, 1, 1], [], []>} : vector<64x16xf32>, vector<16x128xf32>, vector<64x128xf32> -> vector<64x128xf32>
      %c0_121 = arith.constant 0 : index
      %c0_122 = arith.constant 0 : index
      %249 = vector.load %arg7[%c0_121, %c0_122] : memref<1x128xf32, #tpu.memory_space<vmem>>, vector<1x128xf32>
      %250 = vector.broadcast %249 : vector<1x128xf32> to vector<64x128xf32>
      %251 = arith.addf %248, %250 : vector<64x128xf32>
      %c0_123 = arith.constant 0 : index
      %c0_124 = arith.constant 0 : index
      %252 = vector.load %arg8[%c0_123, %c0_124] : memref<64x128xf32, #tpu.memory_space<vmem>>, vector<64x128xf32>
      %253 = arith.addf %251, %252 : vector<64x128xf32>
      %c0_125 = arith.constant 0 : index
      %c0_126 = arith.constant 0 : index
      %254 = vector.load %arg24[%c0_125, %c0_126] : memref<64x128xf32, #tpu.memory_space<vmem>>, vector<64x128xf32>
      tpu.vector_store %arg24[%c0_125, %c0_126], %253 {strides = array<i32>} : memref<64x128xf32, #tpu.memory_space<vmem>>, vector<64x128xf32>,
    } else {
    }
    %c0 = arith.constant 0 : index
    %c0_1 = arith.constant 0 : index
    %3 = vector.load %arg24[%c0, %c0_1] : memref<64x128xf32, #tpu.memory_space<vmem>>, vector<64x128xf32>
    %c0_2 = arith.constant 0 : index
    %c0_3 = arith.constant 0 : index
    %c0_4 = arith.constant 0 : index
    %4 = vector.load %arg2[%c0_2, %c0_3, %c0_4] : memref<8x8x8xf32, #tpu.memory_space<vmem>>, vector<8x8x8xf32>
    %c0_5 = arith.constant 0 : index
    %c0_6 = arith.constant 0 : index
    %c0_7 = arith.constant 0 : index
    %5 = vector.load %arg5[%c0_5, %c0_6, %c0_7] : memref<4x1x128xf32, #tpu.memory_space<vmem>>, vector<4x1x128xf32>
    %c0_8 = arith.constant 0 : index
    %c0_9 = arith.constant 0 : index
    %c0_10 = arith.constant 0 : index
    %6 = vector.load %arg11[%c0_8, %c0_9, %c0_10] : memref<1x128x384xbf16, #tpu.memory_space<vmem>>, vector<1x128x384xbf16>
    %7 = vector.shape_cast %6 : vector<1x128x384xbf16> to vector<128x384xbf16>
    %8 = arith.extf %7 : vector<128x384xbf16> to vector<128x384xf32>
    %cst = arith.constant dense<0.000000e+00> : vector<64x384xf32>
    %9 = tpu.matmul %3, %8, %cst {dimension_numbers = #tpu.dot_dimension_numbers<[1], [0], [0], [1], [0, 0, 1, 1], [], []>} : vector<64x128xf32>, vector<128x384xf32>, vector<64x384xf32> -> vector<64x384xf32>
    %c0_11 = arith.constant 0 : index
    %c0_12 = arith.constant 0 : index
    %c0_13 = arith.constant 0 : index
    %10 = vector.load %arg12[%c0_11, %c0_12, %c0_13] : memref<1x1x384xf32, #tpu.memory_space<vmem>>, vector<1x1x384xf32>
    %11 = vector.shape_cast %10 : vector<1x1x384xf32> to vector<1x384xf32>
    %12 = vector.broadcast %11 : vector<1x384xf32> to vector<64x384xf32>
    %13 = arith.addf %9, %12 : vector<64x384xf32>
    %14 = vector.extract_strided_slice %13 {offsets = [0, 0], sizes = [64, 128], strides = [1, 1]} : vector<64x384xf32> to vector<64x128xf32>
    %15 = vector.shape_cast %14 : vector<64x128xf32> to vector<8x8x128xf32>
    %16 = vector.extract_strided_slice %13 {offsets = [0, 128], sizes = [64, 128], strides = [1, 1]} : vector<64x384xf32> to vector<64x128xf32>
    %17 = vector.shape_cast %16 : vector<64x128xf32> to vector<8x8x128xf32>
    %18 = vector.extract_strided_slice %13 {offsets = [0, 256], sizes = [64, 128], strides = [1, 1]} : vector<64x384xf32> to vector<64x128xf32>
    %19 = vector.shape_cast %18 : vector<64x128xf32> to vector<8x8x128xf32>
    %cst_14 = arith.constant 0.000000e+00 : f32
    %20 = vector.broadcast %cst_14 : f32 to vector<8x8x128xf32>
    %21 = vector.extract_strided_slice %5 {offsets = [0, 0, 0], sizes = [1, 1, 128], strides = [1, 1, 1]} : vector<4x1x128xf32> to vector<1x1x128xf32>
    %22 = vector.shape_cast %21 : vector<1x1x128xf32> to vector<1x128xf32>
    %23 = vector.shape_cast %22 : vector<1x128xf32> to vector<1x1x128xf32>
    %24 = vector.broadcast %23 : vector<1x1x128xf32> to vector<8x8x128xf32>
    %25 = arith.mulf %15, %24 : vector<8x8x128xf32>
    "tpu.trace_start"() <{level = 10 : i32, message = "bqd,bkd->bqk"}> : () -> ()
    %cst_15 = arith.constant dense<0.000000e+00> : vector<8x8x8xf32>
    %26 = tpu.matmul %25, %17, %cst_15 {dimension_numbers = #tpu.dot_dimension_numbers<[2], [2], [1], [1], [0, 0, 0, 1, 1, 1], [0], [0]>} : vector<8x8x128xf32>, vector<8x8x128xf32>, vector<8x8x8xf32> -> vector<8x8x8xf32>
    "tpu.trace_stop"() : () -> ()
    %cst_16 = arith.constant 0.176776692 : f32
    %27 = vector.broadcast %cst_16 : f32 to vector<8x8x8xf32>
    %28 = arith.mulf %26, %27 : vector<8x8x8xf32>
    %29 = arith.addf %28, %4 : vector<8x8x8xf32>
    %cst_17 = arith.constant dense<0xFF800000> : vector<8x8xf32>
    %30 = vector.multi_reduction <maximumf>, %29, %cst_17 [2] : vector<8x8x8xf32> to vector<8x8xf32>
    %31 = vector.shape_cast %30 : vector<8x8xf32> to vector<8x8x1xf32>
    %32 = vector.broadcast %31 : vector<8x8x1xf32> to vector<8x8x8xf32>
    %33 = arith.subf %29, %32 : vector<8x8x8xf32>
    %34 = math.exp %33 : vector<8x8x8xf32>
    %cst_18 = arith.constant dense<0.000000e+00> : vector<8x8xf32>
    %35 = vector.multi_reduction <add>, %34, %cst_18 [2] : vector<8x8x8xf32> to vector<8x8xf32>
    %36 = vector.shape_cast %35 : vector<8x8xf32> to vector<8x8x1xf32>
    %37 = tpu.reciprocal %36 {approx = true} : vector<8x8x1xf32> -> vector<8x8x1xf32>
    %38 = vector.broadcast %37 : vector<8x8x1xf32> to vector<8x8x8xf32>
    %39 = arith.mulf %34, %38 : vector<8x8x8xf32>
    %40 = vector.shape_cast %22 : vector<1x128xf32> to vector<1x1x128xf32>
    %41 = vector.broadcast %40 : vector<1x1x128xf32> to vector<8x8x128xf32>
    %42 = arith.mulf %19, %41 : vector<8x8x128xf32>
    "tpu.trace_start"() <{level = 10 : i32, message = "bqk,bkd->bqd"}> : () -> ()
    %cst_19 = arith.constant dense<0.000000e+00> : vector<8x8x128xf32>
    %43 = tpu.matmul %39, %42, %cst_19 {dimension_numbers = #tpu.dot_dimension_numbers<[2], [1], [1], [2], [0, 0, 0, 1, 1, 2], [0], [0]>} : vector<8x8x8xf32>, vector<8x8x128xf32>, vector<8x8x128xf32> -> vector<8x8x128xf32>
    "tpu.trace_stop"() : () -> ()
    %44 = arith.addf %20, %43 : vector<8x8x128xf32>
    %45 = vector.extract_strided_slice %5 {offsets = [1, 0, 0], sizes = [1, 1, 128], strides = [1, 1, 1]} : vector<4x1x128xf32> to vector<1x1x128xf32>
    %46 = vector.shape_cast %45 : vector<1x1x128xf32> to vector<1x128xf32>
    %47 = vector.shape_cast %46 : vector<1x128xf32> to vector<1x1x128xf32>
    %48 = vector.broadcast %47 : vector<1x1x128xf32> to vector<8x8x128xf32>
    %49 = arith.mulf %15, %48 : vector<8x8x128xf32>
    "tpu.trace_start"() <{level = 10 : i32, message = "bqd,bkd->bqk"}> : () -> ()
    %cst_20 = arith.constant dense<0.000000e+00> : vector<8x8x8xf32>
    %50 = tpu.matmul %49, %17, %cst_20 {dimension_numbers = #tpu.dot_dimension_numbers<[2], [2], [1], [1], [0, 0, 0, 1, 1, 1], [0], [0]>} : vector<8x8x128xf32>, vector<8x8x128xf32>, vector<8x8x8xf32> -> vector<8x8x8xf32>
    "tpu.trace_stop"() : () -> ()
    %cst_21 = arith.constant 0.176776692 : f32
    %51 = vector.broadcast %cst_21 : f32 to vector<8x8x8xf32>
    %52 = arith.mulf %50, %51 : vector<8x8x8xf32>
    %53 = arith.addf %52, %4 : vector<8x8x8xf32>
    %cst_22 = arith.constant dense<0xFF800000> : vector<8x8xf32>
    %54 = vector.multi_reduction <maximumf>, %53, %cst_22 [2] : vector<8x8x8xf32> to vector<8x8xf32>
    %55 = vector.shape_cast %54 : vector<8x8xf32> to vector<8x8x1xf32>
    %56 = vector.broadcast %55 : vector<8x8x1xf32> to vector<8x8x8xf32>
    %57 = arith.subf %53, %56 : vector<8x8x8xf32>
    %58 = math.exp %57 : vector<8x8x8xf32>
    %cst_23 = arith.constant dense<0.000000e+00> : vector<8x8xf32>
    %59 = vector.multi_reduction <add>, %58, %cst_23 [2] : vector<8x8x8xf32> to vector<8x8xf32>
    %60 = vector.shape_cast %59 : vector<8x8xf32> to vector<8x8x1xf32>
    %61 = tpu.reciprocal %60 {approx = true} : vector<8x8x1xf32> -> vector<8x8x1xf32>
    %62 = vector.broadcast %61 : vector<8x8x1xf32> to vector<8x8x8xf32>
    %63 = arith.mulf %58, %62 : vector<8x8x8xf32>
    %64 = vector.shape_cast %46 : vector<1x128xf32> to vector<1x1x128xf32>
    %65 = vector.broadcast %64 : vector<1x1x128xf32> to vector<8x8x128xf32>
    %66 = arith.mulf %19, %65 : vector<8x8x128xf32>
    "tpu.trace_start"() <{level = 10 : i32, message = "bqk,bkd->bqd"}> : () -> ()
    %cst_24 = arith.constant dense<0.000000e+00> : vector<8x8x128xf32>
    %67 = tpu.matmul %63, %66, %cst_24 {dimension_numbers = #tpu.dot_dimension_numbers<[2], [1], [1], [2], [0, 0, 0, 1, 1, 2], [0], [0]>} : vector<8x8x8xf32>, vector<8x8x128xf32>, vector<8x8x128xf32> -> vector<8x8x128xf32>
    "tpu.trace_stop"() : () -> ()
    %68 = arith.addf %44, %67 : vector<8x8x128xf32>
    %69 = vector.extract_strided_slice %5 {offsets = [2, 0, 0], sizes = [1, 1, 128], strides = [1, 1, 1]} : vector<4x1x128xf32> to vector<1x1x128xf32>
    %70 = vector.shape_cast %69 : vector<1x1x128xf32> to vector<1x128xf32>
    %71 = vector.shape_cast %70 : vector<1x128xf32> to vector<1x1x128xf32>
    %72 = vector.broadcast %71 : vector<1x1x128xf32> to vector<8x8x128xf32>
    %73 = arith.mulf %15, %72 : vector<8x8x128xf32>
    "tpu.trace_start"() <{level = 10 : i32, message = "bqd,bkd->bqk"}> : () -> ()
    %cst_25 = arith.constant dense<0.000000e+00> : vector<8x8x8xf32>
    %74 = tpu.matmul %73, %17, %cst_25 {dimension_numbers = #tpu.dot_dimension_numbers<[2], [2], [1], [1], [0, 0, 0, 1, 1, 1], [0], [0]>} : vector<8x8x128xf32>, vector<8x8x128xf32>, vector<8x8x8xf32> -> vector<8x8x8xf32>
    "tpu.trace_stop"() : () -> ()
    %cst_26 = arith.constant 0.176776692 : f32
    %75 = vector.broadcast %cst_26 : f32 to vector<8x8x8xf32>
    %76 = arith.mulf %74, %75 : vector<8x8x8xf32>
    %77 = arith.addf %76, %4 : vector<8x8x8xf32>
    %cst_27 = arith.constant dense<0xFF800000> : vector<8x8xf32>
    %78 = vector.multi_reduction <maximumf>, %77, %cst_27 [2] : vector<8x8x8xf32> to vector<8x8xf32>
    %79 = vector.shape_cast %78 : vector<8x8xf32> to vector<8x8x1xf32>
    %80 = vector.broadcast %79 : vector<8x8x1xf32> to vector<8x8x8xf32>
    %81 = arith.subf %77, %80 : vector<8x8x8xf32>
    %82 = math.exp %81 : vector<8x8x8xf32>
    %cst_28 = arith.constant dense<0.000000e+00> : vector<8x8xf32>
    %83 = vector.multi_reduction <add>, %82, %cst_28 [2] : vector<8x8x8xf32> to vector<8x8xf32>
    %84 = vector.shape_cast %83 : vector<8x8xf32> to vector<8x8x1xf32>
    %85 = tpu.reciprocal %84 {approx = true} : vector<8x8x1xf32> -> vector<8x8x1xf32>
    %86 = vector.broadcast %85 : vector<8x8x1xf32> to vector<8x8x8xf32>
    %87 = arith.mulf %82, %86 : vector<8x8x8xf32>
    %88 = vector.shape_cast %70 : vector<1x128xf32> to vector<1x1x128xf32>
    %89 = vector.broadcast %88 : vector<1x1x128xf32> to vector<8x8x128xf32>
    %90 = arith.mulf %19, %89 : vector<8x8x128xf32>
    "tpu.trace_start"() <{level = 10 : i32, message = "bqk,bkd->bqd"}> : () -> ()
    %cst_29 = arith.constant dense<0.000000e+00> : vector<8x8x128xf32>
    %91 = tpu.matmul %87, %90, %cst_29 {dimension_numbers = #tpu.dot_dimension_numbers<[2], [1], [1], [2], [0, 0, 0, 1, 1, 2], [0], [0]>} : vector<8x8x8xf32>, vector<8x8x128xf32>, vector<8x8x128xf32> -> vector<8x8x128xf32>
    "tpu.trace_stop"() : () -> ()
    %92 = arith.addf %68, %91 : vector<8x8x128xf32>
    %93 = vector.extract_strided_slice %5 {offsets = [3, 0, 0], sizes = [1, 1, 128], strides = [1, 1, 1]} : vector<4x1x128xf32> to vector<1x1x128xf32>
    %94 = vector.shape_cast %93 : vector<1x1x128xf32> to vector<1x128xf32>
    %95 = vector.shape_cast %94 : vector<1x128xf32> to vector<1x1x128xf32>
    %96 = vector.broadcast %95 : vector<1x1x128xf32> to vector<8x8x128xf32>
    %97 = arith.mulf %15, %96 : vector<8x8x128xf32>
    "tpu.trace_start"() <{level = 10 : i32, message = "bqd,bkd->bqk"}> : () -> ()
    %cst_30 = arith.constant dense<0.000000e+00> : vector<8x8x8xf32>
    %98 = tpu.matmul %97, %17, %cst_30 {dimension_numbers = #tpu.dot_dimension_numbers<[2], [2], [1], [1], [0, 0, 0, 1, 1, 1], [0], [0]>} : vector<8x8x128xf32>, vector<8x8x128xf32>, vector<8x8x8xf32> -> vector<8x8x8xf32>
    "tpu.trace_stop"() : () -> ()
    %cst_31 = arith.constant 0.176776692 : f32
    %99 = vector.broadcast %cst_31 : f32 to vector<8x8x8xf32>
    %100 = arith.mulf %98, %99 : vector<8x8x8xf32>
    %101 = arith.addf %100, %4 : vector<8x8x8xf32>
    %cst_32 = arith.constant dense<0xFF800000> : vector<8x8xf32>
    %102 = vector.multi_reduction <maximumf>, %101, %cst_32 [2] : vector<8x8x8xf32> to vector<8x8xf32>
    %103 = vector.shape_cast %102 : vector<8x8xf32> to vector<8x8x1xf32>
    %104 = vector.broadcast %103 : vector<8x8x1xf32> to vector<8x8x8xf32>
    %105 = arith.subf %101, %104 : vector<8x8x8xf32>
    %106 = math.exp %105 : vector<8x8x8xf32>
    %cst_33 = arith.constant dense<0.000000e+00> : vector<8x8xf32>
    %107 = vector.multi_reduction <add>, %106, %cst_33 [2] : vector<8x8x8xf32> to vector<8x8xf32>
    %108 = vector.shape_cast %107 : vector<8x8xf32> to vector<8x8x1xf32>
    %109 = tpu.reciprocal %108 {approx = true} : vector<8x8x1xf32> -> vector<8x8x1xf32>
    %110 = vector.broadcast %109 : vector<8x8x1xf32> to vector<8x8x8xf32>
    %111 = arith.mulf %106, %110 : vector<8x8x8xf32>
    %112 = vector.shape_cast %94 : vector<1x128xf32> to vector<1x1x128xf32>
    %113 = vector.broadcast %112 : vector<1x1x128xf32> to vector<8x8x128xf32>
    %114 = arith.mulf %19, %113 : vector<8x8x128xf32>
    "tpu.trace_start"() <{level = 10 : i32, message = "bqk,bkd->bqd"}> : () -> ()
    %cst_34 = arith.constant dense<0.000000e+00> : vector<8x8x128xf32>
    %115 = tpu.matmul %111, %114, %cst_34 {dimension_numbers = #tpu.dot_dimension_numbers<[2], [1], [1], [2], [0, 0, 0, 1, 1, 2], [0], [0]>} : vector<8x8x8xf32>, vector<8x8x128xf32>, vector<8x8x128xf32> -> vector<8x8x128xf32>
    "tpu.trace_stop"() : () -> ()
    %116 = arith.addf %92, %115 : vector<8x8x128xf32>
    %117 = vector.shape_cast %116 : vector<8x8x128xf32> to vector<64x128xf32>
    %c0_35 = arith.constant 0 : index
    %c0_36 = arith.constant 0 : index
    %c0_37 = arith.constant 0 : index
    %118 = vector.load %arg13[%c0_35, %c0_36, %c0_37] : memref<1x128x128xbf16, #tpu.memory_space<vmem>>, vector<1x128x128xbf16>
    %119 = vector.shape_cast %118 : vector<1x128x128xbf16> to vector<128x128xbf16>
    %120 = arith.extf %119 : vector<128x128xbf16> to vector<128x128xf32>
    %cst_38 = arith.constant dense<0.000000e+00> : vector<64x128xf32>
    %121 = tpu.matmul %117, %120, %cst_38 {dimension_numbers = #tpu.dot_dimension_numbers<[1], [0], [0], [1], [0, 0, 1, 1], [], []>} : vector<64x128xf32>, vector<128x128xf32>, vector<64x128xf32> -> vector<64x128xf32>
    %c0_39 = arith.constant 0 : index
    %c0_40 = arith.constant 0 : index
    %c0_41 = arith.constant 0 : index
    %122 = vector.load %arg14[%c0_39, %c0_40, %c0_41] : memref<1x1x128xf32, #tpu.memory_space<vmem>>, vector<1x1x128xf32>
    %123 = vector.shape_cast %122 : vector<1x1x128xf32> to vector<1x128xf32>
    %124 = vector.broadcast %123 : vector<1x128xf32> to vector<64x128xf32>
    %125 = arith.addf %121, %124 : vector<64x128xf32>
    %126 = arith.addf %3, %125 : vector<64x128xf32>
    %c0_42 = arith.constant 0 : index
    %c0_43 = arith.constant 0 : index
    %c0_44 = arith.constant 0 : index
    %127 = vector.load %arg15[%c0_42, %c0_43, %c0_44] : memref<1x1x128xf32, #tpu.memory_space<vmem>>, vector<1x1x128xf32>
    %128 = vector.shape_cast %127 : vector<1x1x128xf32> to vector<1x128xf32>
    %c0_45 = arith.constant 0 : index
    %c0_46 = arith.constant 0 : index
    %c0_47 = arith.constant 0 : index
    %129 = vector.load %arg16[%c0_45, %c0_46, %c0_47] : memref<1x1x128xf32, #tpu.memory_space<vmem>>, vector<1x1x128xf32>
    %130 = vector.shape_cast %129 : vector<1x1x128xf32> to vector<1x128xf32>
    %cst_48 = arith.constant dense<0.000000e+00> : vector<64xf32>
    %131 = vector.multi_reduction <add>, %126, %cst_48 [1] : vector<64x128xf32> to vector<64xf32>
    %132 = vector.shape_cast %131 : vector<64xf32> to vector<64x1xf32>
    %cst_49 = arith.constant 1.280000e+02 : f32
    %133 = vector.broadcast %cst_49 : f32 to vector<64x1xf32>
    %134 = arith.divf %132, %133 : vector<64x1xf32>
    %135 = vector.broadcast %134 : vector<64x1xf32> to vector<64x128xf32>
    %136 = arith.subf %126, %135 : vector<64x128xf32>
    %137 = arith.mulf %136, %136 : vector<64x128xf32>
    %cst_50 = arith.constant dense<0.000000e+00> : vector<64xf32>
    %138 = vector.multi_reduction <add>, %137, %cst_50 [1] : vector<64x128xf32> to vector<64xf32>
    %139 = vector.shape_cast %138 : vector<64xf32> to vector<64x1xf32>
    %cst_51 = arith.constant 1.280000e+02 : f32
    %140 = vector.broadcast %cst_51 : f32 to vector<64x1xf32>
    %141 = arith.divf %139, %140 : vector<64x1xf32>
    %cst_52 = arith.constant 9.99999974E-6 : f32
    %142 = vector.broadcast %cst_52 : f32 to vector<64x1xf32>
    %143 = arith.addf %141, %142 : vector<64x1xf32>
    %144 = math.rsqrt %143 : vector<64x1xf32>
    %145 = vector.broadcast %144 : vector<64x1xf32> to vector<64x128xf32>
    %146 = arith.mulf %136, %145 : vector<64x128xf32>
    %147 = vector.broadcast %128 : vector<1x128xf32> to vector<64x128xf32>
    %148 = arith.mulf %146, %147 : vector<64x128xf32>
    %149 = vector.broadcast %130 : vector<1x128xf32> to vector<64x128xf32>
    %150 = arith.addf %148, %149 : vector<64x128xf32>
    %cst_53 = arith.constant 0.000000e+00 : f32
    %151 = vector.broadcast %cst_53 : f32 to vector<64x128xf32>
    %c0_54 = arith.constant 0 : index
    %c0_55 = arith.constant 0 : index
    %c0_56 = arith.constant 0 : index
    %152 = vector.load %arg17[%c0_54, %c0_55, %c0_56] : memref<1x128x2048xbf16, #tpu.memory_space<vmem>>, vector<1x128x512xbf16>
    %153 = vector.shape_cast %152 : vector<1x128x512xbf16> to vector<128x512xbf16>
    %154 = arith.extf %153 : vector<128x512xbf16> to vector<128x512xf32>
    %c0_57 = arith.constant 0 : index
    %c0_58 = arith.constant 0 : index
    %c0_59 = arith.constant 0 : index
    %155 = vector.load %arg19[%c0_57, %c0_58, %c0_59] : memref<1x2048x128xbf16, #tpu.memory_space<vmem>>, vector<1x512x128xbf16>
    %156 = vector.shape_cast %155 : vector<1x512x128xbf16> to vector<512x128xbf16>
    %157 = arith.extf %156 : vector<512x128xbf16> to vector<512x128xf32>
    %cst_60 = arith.constant dense<0.000000e+00> : vector<64x512xf32>
    %158 = tpu.matmul %150, %154, %cst_60 {dimension_numbers = #tpu.dot_dimension_numbers<[1], [0], [0], [1], [0, 0, 1, 1], [], []>} : vector<64x128xf32>, vector<128x512xf32>, vector<64x512xf32> -> vector<64x512xf32>
    %c0_61 = arith.constant 0 : index
    %c0_62 = arith.constant 0 : index
    %c0_63 = arith.constant 0 : index
    %159 = vector.load %arg18[%c0_61, %c0_62, %c0_63] : memref<1x1x2048xf32, #tpu.memory_space<vmem>>, vector<1x1x512xf32>
    %160 = vector.shape_cast %159 : vector<1x1x512xf32> to vector<1x512xf32>
    %161 = vector.broadcast %160 : vector<1x512xf32> to vector<64x512xf32>
    %162 = arith.addf %158, %161 : vector<64x512xf32>
    %cst_64 = arith.constant 0.000000e+00 : f32
    %163 = vector.broadcast %cst_64 : f32 to vector<64x512xf32>
    %164 = arith.maximumf %162, %163 : vector<64x512xf32>
    %cst_65 = arith.constant dense<0.000000e+00> : vector<64x128xf32>
    %165 = tpu.matmul %164, %157, %cst_65 {dimension_numbers = #tpu.dot_dimension_numbers<[1], [0], [0], [1], [0, 0, 1, 1], [], []>} : vector<64x512xf32>, vector<512x128xf32>, vector<64x128xf32> -> vector<64x128xf32>
    %166 = arith.addf %151, %165 : vector<64x128xf32>
    %c0_66 = arith.constant 0 : index
    %c0_67 = arith.constant 0 : index
    %c512 = arith.constant 512 : index
    %167 = vector.load %arg17[%c0_66, %c0_67, %c512] : memref<1x128x2048xbf16, #tpu.memory_space<vmem>>, vector<1x128x512xbf16>
    %168 = vector.shape_cast %167 : vector<1x128x512xbf16> to vector<128x512xbf16>
    %169 = arith.extf %168 : vector<128x512xbf16> to vector<128x512xf32>
    %c0_68 = arith.constant 0 : index
    %c512_69 = arith.constant 512 : index
    %c0_70 = arith.constant 0 : index
    %170 = vector.load %arg19[%c0_68, %c512_69, %c0_70] : memref<1x2048x128xbf16, #tpu.memory_space<vmem>>, vector<1x512x128xbf16>
    %171 = vector.shape_cast %170 : vector<1x512x128xbf16> to vector<512x128xbf16>
    %172 = arith.extf %171 : vector<512x128xbf16> to vector<512x128xf32>
    %cst_71 = arith.constant dense<0.000000e+00> : vector<64x512xf32>
    %173 = tpu.matmul %150, %169, %cst_71 {dimension_numbers = #tpu.dot_dimension_numbers<[1], [0], [0], [1], [0, 0, 1, 1], [], []>} : vector<64x128xf32>, vector<128x512xf32>, vector<64x512xf32> -> vector<64x512xf32>
    %c0_72 = arith.constant 0 : index
    %c0_73 = arith.constant 0 : index
    %c512_74 = arith.constant 512 : index
    %174 = vector.load %arg18[%c0_72, %c0_73, %c512_74] : memref<1x1x2048xf32, #tpu.memory_space<vmem>>, vector<1x1x512xf32>
    %175 = vector.shape_cast %174 : vector<1x1x512xf32> to vector<1x512xf32>
    %176 = vector.broadcast %175 : vector<1x512xf32> to vector<64x512xf32>
    %177 = arith.addf %173, %176 : vector<64x512xf32>
    %cst_75 = arith.constant 0.000000e+00 : f32
    %178 = vector.broadcast %cst_75 : f32 to vector<64x512xf32>
    %179 = arith.maximumf %177, %178 : vector<64x512xf32>
    %cst_76 = arith.constant dense<0.000000e+00> : vector<64x128xf32>
    %180 = tpu.matmul %179, %172, %cst_76 {dimension_numbers = #tpu.dot_dimension_numbers<[1], [0], [0], [1], [0, 0, 1, 1], [], []>} : vector<64x512xf32>, vector<512x128xf32>, vector<64x128xf32> -> vector<64x128xf32>
    %181 = arith.addf %166, %180 : vector<64x128xf32>
    %c0_77 = arith.constant 0 : index
    %c0_78 = arith.constant 0 : index
    %c1024 = arith.constant 1024 : index
    %182 = vector.load %arg17[%c0_77, %c0_78, %c1024] : memref<1x128x2048xbf16, #tpu.memory_space<vmem>>, vector<1x128x512xbf16>
    %183 = vector.shape_cast %182 : vector<1x128x512xbf16> to vector<128x512xbf16>
    %184 = arith.extf %183 : vector<128x512xbf16> to vector<128x512xf32>
    %c0_79 = arith.constant 0 : index
    %c1024_80 = arith.constant 1024 : index
    %c0_81 = arith.constant 0 : index
    %185 = vector.load %arg19[%c0_79, %c1024_80, %c0_81] : memref<1x2048x128xbf16, #tpu.memory_space<vmem>>, vector<1x512x128xbf16>
    %186 = vector.shape_cast %185 : vector<1x512x128xbf16> to vector<512x128xbf16>
    %187 = arith.extf %186 : vector<512x128xbf16> to vector<512x128xf32>
    %cst_82 = arith.constant dense<0.000000e+00> : vector<64x512xf32>
    %188 = tpu.matmul %150, %184, %cst_82 {dimension_numbers = #tpu.dot_dimension_numbers<[1], [0], [0], [1], [0, 0, 1, 1], [], []>} : vector<64x128xf32>, vector<128x512xf32>, vector<64x512xf32> -> vector<64x512xf32>
    %c0_83 = arith.constant 0 : index
    %c0_84 = arith.constant 0 : index
    %c1024_85 = arith.constant 1024 : index
    %189 = vector.load %arg18[%c0_83, %c0_84, %c1024_85] : memref<1x1x2048xf32, #tpu.memory_space<vmem>>, vector<1x1x512xf32>
    %190 = vector.shape_cast %189 : vector<1x1x512xf32> to vector<1x512xf32>
    %191 = vector.broadcast %190 : vector<1x512xf32> to vector<64x512xf32>
    %192 = arith.addf %188, %191 : vector<64x512xf32>
    %cst_86 = arith.constant 0.000000e+00 : f32
    %193 = vector.broadcast %cst_86 : f32 to vector<64x512xf32>
    %194 = arith.maximumf %192, %193 : vector<64x512xf32>
    %cst_87 = arith.constant dense<0.000000e+00> : vector<64x128xf32>
    %195 = tpu.matmul %194, %187, %cst_87 {dimension_numbers = #tpu.dot_dimension_numbers<[1], [0], [0], [1], [0, 0, 1, 1], [], []>} : vector<64x512xf32>, vector<512x128xf32>, vector<64x128xf32> -> vector<64x128xf32>
    %196 = arith.addf %181, %195 : vector<64x128xf32>
    %c0_88 = arith.constant 0 : index
    %c0_89 = arith.constant 0 : index
    %c1536 = arith.constant 1536 : index
    %197 = vector.load %arg17[%c0_88, %c0_89, %c1536] : memref<1x128x2048xbf16, #tpu.memory_space<vmem>>, vector<1x128x512xbf16>
    %198 = vector.shape_cast %197 : vector<1x128x512xbf16> to vector<128x512xbf16>
    %199 = arith.extf %198 : vector<128x512xbf16> to vector<128x512xf32>
    %c0_90 = arith.constant 0 : index
    %c1536_91 = arith.constant 1536 : index
    %c0_92 = arith.constant 0 : index
    %200 = vector.load %arg19[%c0_90, %c1536_91, %c0_92] : memref<1x2048x128xbf16, #tpu.memory_space<vmem>>, vector<1x512x128xbf16>
    %201 = vector.shape_cast %200 : vector<1x512x128xbf16> to vector<512x128xbf16>
    %202 = arith.extf %201 : vector<512x128xbf16> to vector<512x128xf32>
    %cst_93 = arith.constant dense<0.000000e+00> : vector<64x512xf32>
    %203 = tpu.matmul %150, %199, %cst_93 {dimension_numbers = #tpu.dot_dimension_numbers<[1], [0], [0], [1], [0, 0, 1, 1], [], []>} : vector<64x128xf32>, vector<128x512xf32>, vector<64x512xf32> -> vector<64x512xf32>
    %c0_94 = arith.constant 0 : index
    %c0_95 = arith.constant 0 : index
    %c1536_96 = arith.constant 1536 : index
    %204 = vector.load %arg18[%c0_94, %c0_95, %c1536_96] : memref<1x1x2048xf32, #tpu.memory_space<vmem>>, vector<1x1x512xf32>
    %205 = vector.shape_cast %204 : vector<1x1x512xf32> to vector<1x512xf32>
    %206 = vector.broadcast %205 : vector<1x512xf32> to vector<64x512xf32>
    %207 = arith.addf %203, %206 : vector<64x512xf32>
    %cst_97 = arith.constant 0.000000e+00 : f32
    %208 = vector.broadcast %cst_97 : f32 to vector<64x512xf32>
    %209 = arith.maximumf %207, %208 : vector<64x512xf32>
    %cst_98 = arith.constant dense<0.000000e+00> : vector<64x128xf32>
    %210 = tpu.matmul %209, %202, %cst_98 {dimension_numbers = #tpu.dot_dimension_numbers<[1], [0], [0], [1], [0, 0, 1, 1], [], []>} : vector<64x512xf32>, vector<512x128xf32>, vector<64x128xf32> -> vector<64x128xf32>
    %211 = arith.addf %196, %210 : vector<64x128xf32>
    %212 = arith.addf %150, %211 : vector<64x128xf32>
    %c0_99 = arith.constant 0 : index
    %c0_100 = arith.constant 0 : index
    %c0_101 = arith.constant 0 : index
    %213 = vector.load %arg20[%c0_99, %c0_100, %c0_101] : memref<1x1x128xf32, #tpu.memory_space<vmem>>, vector<1x1x128xf32>
    %214 = vector.shape_cast %213 : vector<1x1x128xf32> to vector<1x128xf32>
    %215 = vector.broadcast %214 : vector<1x128xf32> to vector<64x128xf32>
    %216 = arith.addf %212, %215 : vector<64x128xf32>
    %c0_102 = arith.constant 0 : index
    %c0_103 = arith.constant 0 : index
    %c0_104 = arith.constant 0 : index
    %217 = vector.load %arg21[%c0_102, %c0_103, %c0_104] : memref<1x1x128xf32, #tpu.memory_space<vmem>>, vector<1x1x128xf32>
    %218 = vector.shape_cast %217 : vector<1x1x128xf32> to vector<1x128xf32>
    %c0_105 = arith.constant 0 : index
    %c0_106 = arith.constant 0 : index
    %c0_107 = arith.constant 0 : index
    %219 = vector.load %arg22[%c0_105, %c0_106, %c0_107] : memref<1x1x128xf32, #tpu.memory_space<vmem>>, vector<1x1x128xf32>
    %220 = vector.shape_cast %219 : vector<1x1x128xf32> to vector<1x128xf32>
    %cst_108 = arith.constant dense<0.000000e+00> : vector<64xf32>
    %221 = vector.multi_reduction <add>, %216, %cst_108 [1] : vector<64x128xf32> to vector<64xf32>
    %222 = vector.shape_cast %221 : vector<64xf32> to vector<64x1xf32>
    %cst_109 = arith.constant 1.280000e+02 : f32
    %223 = vector.broadcast %cst_109 : f32 to vector<64x1xf32>
    %224 = arith.divf %222, %223 : vector<64x1xf32>
    %225 = vector.broadcast %224 : vector<64x1xf32> to vector<64x128xf32>
    %226 = arith.subf %216, %225 : vector<64x128xf32>
    %227 = arith.mulf %226, %226 : vector<64x128xf32>
    %cst_110 = arith.constant dense<0.000000e+00> : vector<64xf32>
    %228 = vector.multi_reduction <add>, %227, %cst_110 [1] : vector<64x128xf32> to vector<64xf32>
    %229 = vector.shape_cast %228 : vector<64xf32> to vector<64x1xf32>
    %cst_111 = arith.constant 1.280000e+02 : f32
    %230 = vector.broadcast %cst_111 : f32 to vector<64x1xf32>
    %231 = arith.divf %229, %230 : vector<64x1xf32>
    %cst_112 = arith.constant 9.99999974E-6 : f32
    %232 = vector.broadcast %cst_112 : f32 to vector<64x1xf32>
    %233 = arith.addf %231, %232 : vector<64x1xf32>
    %234 = math.rsqrt %233 : vector<64x1xf32>
    %235 = vector.broadcast %234 : vector<64x1xf32> to vector<64x128xf32>
    %236 = arith.mulf %226, %235 : vector<64x128xf32>
    %237 = vector.broadcast %218 : vector<1x128xf32> to vector<64x128xf32>
    %238 = arith.mulf %236, %237 : vector<64x128xf32>
    %239 = vector.broadcast %220 : vector<1x128xf32> to vector<64x128xf32>
    %240 = arith.addf %238, %239 : vector<64x128xf32>
    %c0_113 = arith.constant 0 : index
    %c0_114 = arith.constant 0 : index
    %241 = vector.load %arg24[%c0_113, %c0_114] : memref<64x128xf32, #tpu.memory_space<vmem>>, vector<64x128xf32>
    tpu.vector_store %arg24[%c0_113, %c0_114], %240 {strides = array<i32>} : memref<64x128xf32, #tpu.memory_space<vmem>>, vector<64x128xf32>,
    %c1_i32 = arith.constant 1 : i32
    %242 = arith.cmpi eq, %arg0, %c1_i32 : i32
    %243 = arith.extui %242 : i1 to i32
    %c0_i32_115 = arith.constant 0 : i32
    %244 = arith.cmpi ne, %243, %c0_i32_115 : i32
    scf.if %244 {
      %c0_116 = arith.constant 0 : index
      %c0_117 = arith.constant 0 : index
      %245 = vector.load %arg4[%c0_116, %c0_117] : memref<8x64xf32, #tpu.memory_space<vmem>>, vector<8x64xf32>
      %cst_118 = arith.constant dense<0.000000e+00> : vector<8x128xf32>
      %246 = tpu.matmul %245, %240, %cst_118 {dimension_numbers = #tpu.dot_dimension_numbers<[1], [0], [0], [1], [0, 0, 1, 1], [], []>} : vector<8x64xf32>, vector<64x128xf32>, vector<8x128xf32> -> vector<8x128xf32>
      %c0_119 = arith.constant 0 : index
      %c0_120 = arith.constant 0 : index
      %247 = vector.load %arg9[%c0_119, %c0_120] : memref<128x128xbf16, #tpu.memory_space<vmem>>, vector<128x128xbf16>
      %248 = arith.extf %247 : vector<128x128xbf16> to vector<128x128xf32>
      %cst_121 = arith.constant dense<0.000000e+00> : vector<8x128xf32>
      %249 = tpu.matmul %246, %248, %cst_121 {dimension_numbers = #tpu.dot_dimension_numbers<[1], [0], [0], [1], [0, 0, 1, 1], [], []>} : vector<8x128xf32>, vector<128x128xf32>, vector<8x128xf32> -> vector<8x128xf32>
      %c0_122 = arith.constant 0 : index
      %c0_123 = arith.constant 0 : index
      %250 = vector.load %arg10[%c0_122, %c0_123] : memref<1x128xf32, #tpu.memory_space<vmem>>, vector<1x128xf32>
      %251 = vector.broadcast %250 : vector<1x128xf32> to vector<8x128xf32>
      %252 = arith.addf %249, %251 : vector<8x128xf32>
      %c0_124 = arith.constant 0 : index
      %c0_125 = arith.constant 0 : index
      %253 = vector.load %arg3[%c0_124, %c0_125] : memref<8x1xf32, #tpu.memory_space<vmem>>, vector<8x1xf32>
      %cst_126 = arith.constant 0.000000e+00 : f32
      %254 = vector.broadcast %cst_126 : f32 to vector<8x1xf32>
      %255 = arith.cmpf ogt, %253, %254 : vector<8x1xf32>
      %cst_127 = arith.constant 0.000000e+00 : f32
      %256 = vector.shape_cast %255 : vector<8x1xi1> to vector<8x1xi1>
      %257 = vector.broadcast %256 : vector<8x1xi1> to vector<8x128xi1>
      %258 = vector.broadcast %cst_127 : f32 to vector<8x128xf32>
      %259 = arith.select %257, %252, %258 : vector<8x128xi1>, vector<8x128xf32>
      %c0_128 = arith.constant 0 : index
      %c0_129 = arith.constant 0 : index
      %260 = vector.load %arg23[%c0_128, %c0_129] : memref<8x128xf32, #tpu.memory_space<vmem>>, vector<8x128xf32>
      tpu.vector_store %arg23[%c0_128, %c0_129], %259 {strides = array<i32>} : memref<8x128xf32, #tpu.memory_space<vmem>>, vector<8x128xf32>,
    } else {
    }
    return
  }
  func.func @transform_0(%arg0: i32) -> (i32, i32) {
    %c0_i32 = arith.constant 0 : i32
    %c0_i32_0 = arith.constant 0 : i32
    %c0_i32_1 = arith.constant 0 : i32
    return %c0_i32, %c0_i32_0 : i32, i32
  }
  func.func @transform_1(%arg0: i32) -> (i32, i32, i32) {
    %c0_i32 = arith.constant 0 : i32
    %c0_i32_0 = arith.constant 0 : i32
    %c0_i32_1 = arith.constant 0 : i32
    %c0_i32_2 = arith.constant 0 : i32
    return %c0_i32, %c0_i32_0, %c0_i32_1 : i32, i32, i32
  }
  func.func @transform_2(%arg0: i32) -> (i32, i32) {
    %c0_i32 = arith.constant 0 : i32
    %c0_i32_0 = arith.constant 0 : i32
    %c0_i32_1 = arith.constant 0 : i32
    return %c0_i32, %c0_i32_0 : i32, i32
  }
  func.func @transform_3(%arg0: i32) -> (i32, i32) {
    %c0_i32 = arith.constant 0 : i32
    %c0_i32_0 = arith.constant 0 : i32
    %c0_i32_1 = arith.constant 0 : i32
    return %c0_i32, %c0_i32_0 : i32, i32
  }
  func.func @transform_4(%arg0: i32) -> (i32, i32, i32) {
    %c0_i32 = arith.constant 0 : i32
    %c0_i32_0 = arith.constant 0 : i32
    %c0_i32_1 = arith.constant 0 : i32
    %c0_i32_2 = arith.constant 0 : i32
    return %c0_i32, %c0_i32_0, %c0_i32_1 : i32, i32, i32
  }
  func.func @transform_5(%arg0: i32) -> (i32, i32) {
    %c0_i32 = arith.constant 0 : i32
    %c0_i32_0 = arith.constant 0 : i32
    %c0_i32_1 = arith.constant 0 : i32
    return %c0_i32, %c0_i32_0 : i32, i32
  }
  func.func @transform_6(%arg0: i32) -> (i32, i32) {
    %c0_i32 = arith.constant 0 : i32
    %c0_i32_0 = arith.constant 0 : i32
    %c0_i32_1 = arith.constant 0 : i32
    return %c0_i32, %c0_i32_0 : i32, i32
  }
  func.func @transform_7(%arg0: i32) -> (i32, i32) {
    %c0_i32 = arith.constant 0 : i32
    %c0_i32_0 = arith.constant 0 : i32
    %c0_i32_1 = arith.constant 0 : i32
    return %c0_i32, %c0_i32_0 : i32, i32
  }
  func.func @transform_8(%arg0: i32) -> (i32, i32) {
    %c0_i32 = arith.constant 0 : i32
    %c0_i32_0 = arith.constant 0 : i32
    %c0_i32_1 = arith.constant 0 : i32
    return %c0_i32, %c0_i32_0 : i32, i32
  }
  func.func @transform_9(%arg0: i32) -> (i32, i32) {
    %c0_i32 = arith.constant 0 : i32
    %c0_i32_0 = arith.constant 0 : i32
    %c0_i32_1 = arith.constant 0 : i32
    return %c0_i32, %c0_i32_0 : i32, i32
  }
  func.func @transform_10(%arg0: i32) -> (i32, i32, i32) {
    %c0_i32 = arith.constant 0 : i32
    %c0_i32_0 = arith.constant 0 : i32
    %c0_i32_1 = arith.constant 0 : i32
    return %arg0, %c0_i32, %c0_i32_0 : i32, i32, i32
  }
  func.func @transform_11(%arg0: i32) -> (i32, i32, i32) {
    %c0_i32 = arith.constant 0 : i32
    %c0_i32_0 = arith.constant 0 : i32
    %c0_i32_1 = arith.constant 0 : i32
    return %arg0, %c0_i32, %c0_i32_0 : i32, i32, i32
  }
  func.func @transform_12(%arg0: i32) -> (i32, i32, i32) {
    %c0_i32 = arith.constant 0 : i32
    %c0_i32_0 = arith.constant 0 : i32
    %c0_i32_1 = arith.constant 0 : i32
    return %arg0, %c0_i32, %c0_i32_0 : i32, i32, i32
  }
  func.func @transform_13(%arg0: i32) -> (i32, i32, i32) {
    %c0_i32 = arith.constant 0 : i32
    %c0_i32_0 = arith.constant 0 : i32
    %c0_i32_1 = arith.constant 0 : i32
    return %arg0, %c0_i32, %c0_i32_0 : i32, i32, i32
  }
  func.func @transform_14(%arg0: i32) -> (i32, i32, i32) {
    %c0_i32 = arith.constant 0 : i32
    %c0_i32_0 = arith.constant 0 : i32
    %c0_i32_1 = arith.constant 0 : i32
    return %arg0, %c0_i32, %c0_i32_0 : i32, i32, i32
  }
  func.func @transform_15(%arg0: i32) -> (i32, i32, i32) {
    %c0_i32 = arith.constant 0 : i32
    %c0_i32_0 = arith.constant 0 : i32
    %c0_i32_1 = arith.constant 0 : i32
    return %arg0, %c0_i32, %c0_i32_0 : i32, i32, i32
  }
  func.func @transform_16(%arg0: i32) -> (i32, i32, i32) {
    %c0_i32 = arith.constant 0 : i32
    %c0_i32_0 = arith.constant 0 : i32
    %c0_i32_1 = arith.constant 0 : i32
    return %arg0, %c0_i32, %c0_i32_0 : i32, i32, i32
  }
  func.func @transform_17(%arg0: i32) -> (i32, i32, i32) {
    %c0_i32 = arith.constant 0 : i32
    %c0_i32_0 = arith.constant 0 : i32
    %c0_i32_1 = arith.constant 0 : i32
    return %arg0, %c0_i32, %c0_i32_0 : i32, i32, i32
  }
  func.func @transform_18(%arg0: i32) -> (i32, i32, i32) {
    %c0_i32 = arith.constant 0 : i32
    %c0_i32_0 = arith.constant 0 : i32
    %c0_i32_1 = arith.constant 0 : i32
    return %arg0, %c0_i32, %c0_i32_0 : i32, i32, i32
  }
  func.func @transform_19(%arg0: i32) -> (i32, i32, i32) {
    %c0_i32 = arith.constant 0 : i32
    %c0_i32_0 = arith.constant 0 : i32
    %c0_i32_1 = arith.constant 0 : i32
    return %arg0, %c0_i32, %c0_i32_0 : i32, i32, i32
  }
  func.func @transform_20(%arg0: i32) -> (i32, i32, i32) {
    %c0_i32 = arith.constant 0 : i32
    %c0_i32_0 = arith.constant 0 : i32
    %c0_i32_1 = arith.constant 0 : i32
    return %arg0, %c0_i32, %c0_i32_0 : i32, i32, i32
  }
  func.func @transform_21(%arg0: i32) -> (i32, i32, i32) {
    %c0_i32 = arith.constant 0 : i32
    %c0_i32_0 = arith.constant 0 : i32
    %c0_i32_1 = arith.constant 0 : i32
    return %arg0, %c0_i32, %c0_i32_0 : i32, i32, i32
  }
  func.func @transform_22(%arg0: i32) -> (i32, i32) {
    %c0_i32 = arith.constant 0 : i32
    %c0_i32_0 = arith.constant 0 : i32
    %c0_i32_1 = arith.constant 0 : i32
    return %c0_i32, %c0_i32_0 : i32, i32
  }
}

</mosaic_0001>

<bundles_post_ra>
// kernel: label_seq_transformer.1
= control target key start
LH: loop header
LB: loop body
LE: loop exit
PB: predicated region body
PF: predicated region fallthrough
CT: control target
= control target key end

     0   :  { %s16834_s0 = inlined_call_operand.hbm [shape: f32[64,16], index: 0, kind: input, shape index: {}]   ;;  %s16835_s1 = inlined_call_operand.vmem [shape: f32[8,8,8], index: 1, kind: input, shape index: {}]   ;;  %s16836_s2 = inlined_call_operand.vmem [shape: f32[8,1], index: 2, kind: input, shape index: {}]   ;;  %s16837_s3 = inlined_call_operand.hbm [shape: f32[8,64], index: 3, kind: input, shape index: {}]   ;;  %s16838_s4 = inlined_call_operand.hbm [shape: f32[4,1,128], index: 4, kind: input, shape index: {}]   ;;  %s16839_s5 = inlined_call_operand.hbm [shape: bf16[16,128], index: 5, kind: input, shape index: {}]   ;;  %s16840_s6 = inlined_call_operand.hbm [shape: f32[1,128], index: 6, kind: input, shape index: {}]   ;;  %s16841_s7 = inlined_call_operand.hbm [shape: f32[64,128], index: 7, kind: input, shape index: {}]   ;;  %s16842_s8 = inlined_call_operand.hbm [shape: bf16[128,128], index: 8, kind: input, shape index: {}]   ;;  %s16843_s9 = inlined_call_operand.hbm [shape: f32[1,128], index: 9, kind: input, shape index: {}]   ;;  %s16844_s10 = inlined_call_operand.hbm [shape: bf16[2,128,384], index: 10, kind: input, shape index: {}]   ;;  %s16845_s11 = inlined_call_operand.hbm [shape: f32[2,1,384], index: 11, kind: input, shape index: {}]   ;;  %s16846_s12 = inlined_call_operand.vmem [shape: bf16[2,128,128], index: 12, kind: input, shape index: {}]   ;;  %s16847_s13 = inlined_call_operand.hbm [shape: f32[2,1,128], index: 13, kind: input, shape index: {}]   ;;  %s16848_s14 = inlined_call_operand.hbm [shape: f32[2,1,128], index: 14, kind: input, shape index: {}]   ;;  %s16849_s15 = inlined_call_operand.hbm [shape: f32[2,1,128], index: 15, kind: input, shape index: {}]   ;;  %s16850_s16 = inlined_call_operand.hbm [shape: bf16[2,128,2048], index: 16, kind: input, shape index: {}]   ;;  %s16851_s17 = inlined_call_operand.vmem [shape: f32[2,1,2048], index: 17, kind: input, shape index: {}]   ;;  %s16852_s18 = inlined_call_operand.hbm [shape: bf16[2,2048,128], index: 18, kind: input, shape index: {}]   ;;  %s16853_s19 = inlined_call_operand.vmem [shape: f32[2,1,128], index: 19, kind: input, shape index: {}]   ;;  %s16854_s20 = inlined_call_operand.vmem [shape: f32[2,1,128], index: 20, kind: input, shape index: {}]   ;;  %s16855_s21 = inlined_call_operand.vmem [shape: f32[2,1,128], index: 21, kind: input, shape index: {}]   ;;  %s16856_s22 = inlined_call_operand.hbm [shape: f32[8,128], index: 22, kind: output, shape index: {}]  }
   0x1   :  { %16920 = sst [smem:[#allocation48_spill]] %s16834_s0 }
   0x2   :  { %16921 = sst [smem:[#allocation49_spill]] %s16835_s1 }
   0x3   :  { %16922 = sst [smem:[#allocation50_spill]] %s16836_s2 }
   0x4   :  { %16923 = sst [smem:[#allocation51_spill]] %s16837_s3 }
   0x5   :  { %16924 = sst [smem:[#allocation52_spill]] %s16838_s4 }
   0x6   :  { %16925 = sst [smem:[#allocation53_spill]] %s16839_s5 }
   0x7   :  { %16926 = sst [smem:[#allocation54_spill]] %s16840_s6 }
   0x8   :  { %16927 = sst [smem:[#allocation55_spill]] %s16841_s7 }
   0x9   :  { %16928 = sst [smem:[#allocation56_spill]] %s16842_s8 }
   0xa   :  { %16929 = sst [smem:[#allocation57_spill]] %s16843_s9 }
   0xb   :  { %16930 = sst [smem:[#allocation58_spill]] %s16844_s10 }
   0xc   :  { %16931 = sst [smem:[#allocation59_spill]] %s16845_s11 }
   0xd   :  { %16932 = sst [smem:[#allocation60_spill]] %s16846_s12 }
   0xe   :  { %16933 = sst [smem:[#allocation61_spill]] %s16847_s13 }
   0xf   :  { %16934 = sst [smem:[#allocation62_spill]] %s16848_s14 }
  0x10   :  { %16935 = sst [smem:[#allocation63_spill]] %s16849_s15 }
  0x11   :  { %16936 = sst [smem:[#allocation64_spill]] %s16850_s16 }
  0x12   :  { %16937 = sst [smem:[#allocation65_spill]] %s16851_s17 }
  0x13   :  { %16938 = sst [smem:[#allocation66_spill]] %s16852_s18 }
  0x14   :  { %16939 = sst [smem:[#allocation67_spill]] %s16853_s19 }
  0x15   :  { %16940 = sst [smem:[#allocation68_spill]] %s16854_s20 }
  0x16   :  { %16941 = sst [smem:[#allocation69_spill]] %s16855_s21 }
  0x17   :  { %16942 = sst [smem:[#allocation70_spill]] %s16856_s22 }
  0x18   :  { %27 = vsyncpa [#allocation4], 0 }
  0x19   :  { %28 = vsyncpa [#allocation7], 0 }
  0x1a   :  { %29 = vsyncpa [#allocation10], 0 }
  0x1b   :  { %30 = vsyncpa [#allocation13], 0 }
  0x1c   :  { %31 = vsyncpa [#allocation16], 0 }
  0x1d   :  { %32 = vsyncpa [#allocation5], 0  ;;  %s14356_s3 = smov 0   ;;  %s14358_s28 = smov 0  }
  0x1e   :  { %s14360_s29 = smov 0   ;;  %s14362_s30 = smov 0  }
  0x1f LB: > { %16943 = sst [smem:[#allocation32_spill]] %s14200_s28  ;;  %s14210_s4 = smov [#allocation3]   ;;  %s14208_s30 = sphi %s14362_s30, %s17041_s30   ;;  %s14204_s29 = sphi %s14360_s29, %s17044_s29   ;;  %s14200_s28 = sphi %s14358_s28, %s17043_s28   ;;  %s14196_s3 = sphi %s14356_s3, %s17042_s3  }
  0x20   : > { %16944 = sst [smem:[#allocation33_spill]] %s14204_s29  ;;  %s598_s0 = sshll.u32 %s14210_s4, 4  ;;  %s599_s0 = int_to_ptr.vmem [resolvable:$true] %s598_s0 }
  0x21   : > { %s14377_s23 = sadd.s32 4294967295, %s14208_s30   ;;  %p10473_p0 = scmp.ge.s32.totalorder %s14208_s30, 1 }
  0x22   : > { %16945 = sst [smem:[#allocation34_spill]] %s14377_s23  ;;  %p16864_p1 = scmp.eq.s32.totalorder %s14377_s23, 0 }
  0x23   : > { %p586_p2 = scmp.lt.s32.totalorder %s14208_s30, 3  ;;  %s14396_s24 = sadd.s32 1, %s14208_s30  }
  0x24   : > { %16948 = sst [smem:[#allocation35_spill]] %s14396_s24  ;;  %s16949_s26 = sld [smem:[#allocation48_spill]] }
  0x25   : > { %p14383_p4 = pnand %p10473_p0, %p586_p2 }
  0x27   : > { %s16946_s1 = scalar_select %p14383_p4, 1, 0 }
  0x28   : > { %p13359_p5 = pneg %p14383_p4 }
  0x2a   : > { %p14391_p6 = pnand %p13359_p5, %p16864_p1  ;;  %s13690_s2 = scalar_lea.hbm %s16949_s26, 1024 }
  0x2b   : > { %p13691_p7 = scmp.ne.s32.totalorder %s16949_s26, %s13690_s2  ;;  %p13697_p11 = scmp.lt.u32.totalorder %s13690_s2, %s16949_s26 }
  0x2c   : > { %s16947_s5 = scalar_select %p14391_p6, 1, 0 }
  0x2d   : > { %p14406_p8 = pneg %p14391_p6 }
  0x2f   : > { %s16950_s22 = scalar_select %p14406_p8, 1, 0 }
  0x30   : > { %p13693_p9 = pnand %p14406_p8, %p13691_p7 }
  0x32   : > { %p13694_p10 = pneg %p13693_p9 }
  0x34   : > { %p13699_p12 = pnand %p13697_p11, %p13694_p10 }
  0x36   : > { %13702 = shalt.err (!%p13699_p12)
}
  0x37   : > { %s13703_s6 = scalar_lea.vmem %s599_s0, 1024  ;;  %p13711_p5 = scmp.lt.s32.totalorder %s599_s0, %s599_s0 }
  0x38   : > { %p13704_p13 = scmp.ne.s32.totalorder %s599_s0, %s13703_s6  ;;  %p13712_p3 = scmp.lt.s32.totalorder %s13703_s6, %s13703_s6 }
  0x3a   : > { %p13706_p0 = pnand %p13704_p13, %p14406_p8  ;;  %p13713_p1 = por %p13712_p3, %p13711_p5 }
  0x3c   : > { %p13707_p2 = pneg %p13706_p0 }
  0x3e   : > { %p13714_p4 = pnand %p13713_p1, %p13707_p2 }
  0x40   : > { %13717 = shalt.err (!%p13714_p4)
}
  0x41   : > { %s16866_s25 = smov 128   ;;  %s16867_s20 = smov 8  }
  0x42   : > { %13362 = dma.hbm_to_vmem [thread:$0]  (!%p14391_p6), %s16949_s26, 1024, %s599_s0, [#allocation4], %s16866_s25, %s16866_s25, %s16867_s20  }
  0x43   : > { %s252_s27 = ssub.s32 %s14208_s30, %s14396_s24  ;;  %s255_s4 = sadd.s32 1, %s14204_s29 }
  0x44   : > { %p253_p1 = scmp.eq.s32.totalorder %s252_s27, 0  ;;  %p262_p3 = scmp.ne.s32.totalorder %s14204_s29, %s14200_s28 }
  0x45   : > { %p263_p4 = scmp.eq.s32.totalorder %s14208_s30, 0  ;;  %p268_p7 = scmp.ne.s32.totalorder %s14200_s28, %s14196_s3 }
  0x46   : > { %s14434_s6 = scalar_select %p253_p1, %s14204_s29, %s255_s4  }
  0x47   : > { %p264_p9 = por %p263_p4, %p262_p3  ;;  %p16952_p10 = scmp.eq.s32.totalorder %s14377_s23, 0 }
  0x48   : > { %16951 = sst [smem:[#allocation36_spill]] %s14434_s6  ;;  %p13414_p12 = scmp.lt.s32.totalorder %s14208_s30, 2 }
  0x49   : > { %p14438_p11 = por %p16952_p10, %p268_p7  ;;  %s703_s17 = sand.u32 1, %s14208_s30  }
  0x4a   : > { %s14445_s12 = sand.u32 1, %s14204_s29   ;;  %p14448_p13 = pnand %p13414_p12, %p264_p9 }
  0x4b   : > { %s16953_s19 = scalar_select %p14438_p11, 1, 0 }
  0x4c   : > { %s13303_s0 = smul.u32 192, %s14445_s12  ;;  %s16956_s10 = sld [smem:[#allocation58_spill]] }
  0x4d   : > { %16954 = sst [smem:[#allocation37_spill]] %s16953_s19  ;;  %s13304_s3 = smul.u32 3072, %s14208_s30 }
  0x4e   : > { %s16955_s21 = scalar_select %p14448_p13, 1, 0 }
  0x4f   : > { %s707_s25 = scalar_lea.vmem [#allocation17], %s13303_s0  ;;  %s14460_s26 = scalar_lea.sflag [#allocation4], %s703_s17 }
  0x50   : > { %s714_s20 = sshll.u32 %s707_s25, 4  ;;  %p14466_p2 = pneg %p14448_p13  ;;  %s14458_s20 = int_to_ptr.vmem [resolvable:$true] %s714_s20 }
  0x52   : > { %s14456_s4 = scalar_lea.hbm %s16956_s10, %s13304_s3  ;;  %s13723_s0 = scalar_lea.hbm %s16956_s10, 6144 }
  0x53   : > { %s13718_s6 = scalar_lea.hbm %s14456_s4, 3072  ;;  %p13724_p3 = scmp.lt.u32.totalorder %s14456_s4, %s16956_s10 }
  0x54   : > { %p13719_p0 = scmp.ne.s32.totalorder %s14456_s4, %s13718_s6  ;;  %p13725_p4 = scmp.lt.u32.totalorder %s13723_s0, %s13718_s6 }
  0x55   : > { %s16957_s29 = scalar_select %p14466_p2, 1, 0 }
  0x56   : > { %p13721_p5 = pnand %p14466_p2, %p13719_p0  ;;  %p13726_p7 = por %p13725_p4, %p13724_p3 }
  0x57   : > { %p13727_p9 = scmp.lt.u32.totalorder %s13718_s6, %s14456_s4 }
  0x58   : > { %p13722_p1 = pneg %p13721_p5 }
  0x59   : > { %p13728_p10 = por %p13727_p9, %p13726_p7 }
  0x5b   : > { %p13729_p12 = pnand %p13728_p10, %p13722_p1 }
  0x5d   : > { %13732 = shalt.err (!%p13729_p12)
}
  0x5e   : > { %s13733_s17 = scalar_lea.vmem %s14458_s20, 3072  ;;  %s14213_s3 = smov [#allocation17]  }
  0x5f   : > { %p13734_p0 = scmp.ne.s32.totalorder %s14458_s20, %s13733_s17  ;;  %s13738_s2 = sshll.u32 %s14213_s3, 4  ;;  %s13739_s2 = int_to_ptr.vmem [resolvable:$false] %s13738_s2 }
  0x60   : > { %s13740_s25 = scalar_lea.vmem %s13739_s2, 6144  ;;  %p13741_p6 = scmp.lt.s32.totalorder %s14458_s20, %s13739_s2 }
  0x61   : > { %p13736_p5 = pnand %p13734_p0, %p14466_p2  ;;  %p13742_p8 = scmp.lt.s32.totalorder %s13740_s25, %s13733_s17 }
  0x63   : > { %p13737_p11 = pneg %p13736_p5  ;;  %p13743_p3 = por %p13742_p8, %p13741_p6 }
  0x65   : > { %p13744_p4 = pnand %p13743_p3, %p13737_p11 }
  0x67   : > { %13747 = shalt.err (!%p13744_p4)
}
  0x68   : > { %s14214_s6 = smov 192   ;;  %s14215_s0 = smov 12  }
  0x69   : > { %13387 = dma.hbm_to_vmem [thread:$0]  (!%p14448_p13), %s14456_s4, 3072, %s14458_s20, %s14460_s26, %s14214_s6, %s14214_s6, %s14215_s0  }
  0x6a   : > { %s13305_s27 = smul.u32 3, %s14445_s12  ;;  %s14493_s2 = sshll.u32 %s14208_s30, 4 }
  0x6b   : > { %s13306_s3 = smul.u32 48, %s14208_s30  ;;  %s16958_s13 = sld [smem:[#allocation61_spill]] }
  0x6c   : > { %s16959_s11 = sld [smem:[#allocation59_spill]]  ;;  %s728_s20 = scalar_lea.vmem [#allocation18], %s13305_s27 }
  0x6d   : > { %s736_s4 = sshll.u32 %s728_s20, 4  ;;  %s754_s6 = scalar_lea.vmem [#allocation19], %s14445_s12  ;;  %s14506_s4 = int_to_ptr.vmem [resolvable:$true] %s736_s4 }
  0x6e   : > { %s761_s0 = sshll.u32 %s754_s6, 4  ;;  %s762_s0 = int_to_ptr.vmem [resolvable:$true] %s761_s0 }
  0x71   : > { %s14499_s10 = scalar_lea.hbm %s16958_s13, %s14493_s2 }
  0x72   : > { %s14504_s28 = scalar_lea.hbm %s16959_s11, %s13306_s3  ;;  %s13753_s19 = scalar_lea.hbm %s16959_s11, 96 }
  0x73   : > { %s13748_s23 = scalar_lea.hbm %s14504_s28, 48  ;;  %p13754_p1 = scmp.lt.u32.totalorder %s14504_s28, %s16959_s11 }
  0x74   : > { %p13749_p6 = scmp.ne.s32.totalorder %s14504_s28, %s13748_s23  ;;  %p13755_p7 = scmp.lt.u32.totalorder %s13753_s19, %s13748_s23 }
  0x75   : > { %p13757_p10 = scmp.lt.u32.totalorder %s13748_s23, %s14504_s28 }
  0x76   : > { %p13751_p8 = pnand %p13749_p6, %p14466_p2  ;;  %p13756_p9 = por %p13755_p7, %p13754_p1 }
  0x78   : > { %p13752_p11 = pneg %p13751_p8  ;;  %p13758_p12 = por %p13757_p10, %p13756_p9 }
  0x7a   : > { %p13759_p0 = pnand %p13758_p12, %p13752_p11 }
  0x7c   : > { %13762 = shalt.err (!%p13759_p0)
}
  0x7d   : > { %s13763_s27 = scalar_lea.vmem %s14506_s4, 48  ;;  %s14216_s20 = smov [#allocation18]  }
  0x7e   : > { %p13764_p5 = scmp.ne.s32.totalorder %s14506_s4, %s13763_s27  ;;  %s13768_s6 = sshll.u32 %s14216_s20, 4  ;;  %s13769_s6 = int_to_ptr.vmem [resolvable:$false] %s13768_s6 }
  0x7f   : > { %s13770_s17 = scalar_lea.vmem %s13769_s6, 96  ;;  %p13771_p6 = scmp.lt.s32.totalorder %s14506_s4, %s13769_s6 }
  0x80   : > { %p13766_p3 = pnand %p13764_p5, %p14466_p2  ;;  %p13772_p8 = scmp.lt.s32.totalorder %s13770_s17, %s13763_s27 }
  0x82   : > { %p13767_p4 = pneg %p13766_p3  ;;  %p13773_p1 = por %p13772_p8, %p13771_p6 }
  0x84   : > { %p13774_p7 = pnand %p13773_p1, %p13767_p4 }
  0x86   : > { %13777 = shalt.err (!%p13774_p7)
}
  0x87   : > { %13390 = dma.hbm_to_vmem [thread:$0]  (!%p14448_p13), %s14504_s28, 48, %s14506_s4, %s14460_s26  }
  0x88   : > { %s13778_s23 = scalar_lea.hbm %s14499_s10, 16  ;;  %s13783_s24 = scalar_lea.hbm %s16958_s13, 32 }
  0x89   : > { %p13779_p11 = scmp.ne.s32.totalorder %s14499_s10, %s13778_s23  ;;  %p13784_p12 = scmp.lt.u32.totalorder %s14499_s10, %s16958_s13 }
  0x8a   : > { %p13785_p0 = scmp.lt.u32.totalorder %s13783_s24, %s13778_s23  ;;  %p13787_p3 = scmp.lt.u32.totalorder %s13778_s23, %s14499_s10 }
  0x8b   : > { %p13781_p9 = pnand %p13779_p11, %p14466_p2 }
  0x8c   : > { %p13786_p5 = por %p13785_p0, %p13784_p12 }
  0x8d   : > { %p13782_p10 = pneg %p13781_p9 }
  0x8e   : > { %p13788_p4 = por %p13787_p3, %p13786_p5 }
  0x90   : > { %p13789_p6 = pnand %p13788_p4, %p13782_p10 }
  0x92   : > { %13792 = shalt.err (!%p13789_p6)
}
  0x93   : > { %s13793_s28 = scalar_lea.vmem %s762_s0, 16  ;;  %s14217_s4 = smov [#allocation19]  }
  0x94   : > { %p13794_p8 = scmp.ne.s32.totalorder %s762_s0, %s13793_s28  ;;  %s13798_s20 = sshll.u32 %s14217_s4, 4  ;;  %s13799_s20 = int_to_ptr.vmem [resolvable:$false] %s13798_s20 }
  0x95   : > { %s13800_s6 = scalar_lea.vmem %s13799_s20, 32  ;;  %p13801_p11 = scmp.lt.s32.totalorder %s762_s0, %s13799_s20 }
  0x96   : > { %p13796_p1 = pnand %p13794_p8, %p14466_p2  ;;  %p13802_p9 = scmp.lt.s32.totalorder %s13800_s6, %s13793_s28 }
  0x98   : > { %p13797_p7 = pneg %p13796_p1  ;;  %p13803_p13 = por %p13802_p9, %p13801_p11 }
  0x9a   : > { %p13804_p0 = pnand %p13803_p13, %p13797_p7 }
  0x9c   : > { %13807 = shalt.err (!%p13804_p0)
}
  0x9d   : > { %p16960_p12 = scmp.ne.s32.totalorder %s16955_s21, 0  ;;  %s16961_s14 = sld [smem:[#allocation62_spill]] }
  0x9e   : > { %s771_s19 = scalar_lea.vmem [#allocation20], %s14445_s12 }
  0x9f   : > { %13393 = dma.hbm_to_vmem [thread:$0]  (!%p16960_p12), %s14499_s10, 16, %s762_s0, %s14460_s26  }
  0xa0   : > { %s778_s24 = sshll.u32 %s771_s19, 4  ;;  %s779_s24 = int_to_ptr.vmem [resolvable:$true] %s778_s24 }
  0xa3   : > { %s14553_s25 = scalar_lea.hbm %s16961_s14, %s14493_s2  ;;  %s13813_s10 = scalar_lea.hbm %s16961_s14, 32 }
  0xa4   : > { %s13808_s3 = scalar_lea.hbm %s14553_s25, 16  ;;  %p13814_p3 = scmp.lt.u32.totalorder %s14553_s25, %s16961_s14 }
  0xa5   : > { %p13809_p13 = scmp.ne.s32.totalorder %s14553_s25, %s13808_s3  ;;  %p13815_p4 = scmp.lt.u32.totalorder %s13813_s10, %s13808_s3 }
  0xa6   : > { %p13817_p8 = scmp.lt.u32.totalorder %s13808_s3, %s14553_s25 }
  0xa7   : > { %p13811_p10 = pnand %p13809_p13, %p14466_p2  ;;  %p13816_p6 = por %p13815_p4, %p13814_p3 }
  0xa9   : > { %p13812_p5 = pneg %p13811_p10  ;;  %p13818_p1 = por %p13817_p8, %p13816_p6 }
  0xab   : > { %p13819_p7 = pnand %p13818_p1, %p13812_p5 }
  0xad   : > { %13822 = shalt.err (!%p13819_p7)
}
  0xae   : > { %s13823_s20 = scalar_lea.vmem %s779_s24, 16  ;;  %s14218_s6 = smov [#allocation20]  }
  0xaf   : > { %p13824_p11 = scmp.ne.s32.totalorder %s779_s24, %s13823_s20  ;;  %s13828_s17 = sshll.u32 %s14218_s6, 4  ;;  %s13829_s17 = int_to_ptr.vmem [resolvable:$false] %s13828_s17 }
  0xb0   : > { %s13830_s23 = scalar_lea.vmem %s13829_s17, 32  ;;  %p13831_p13 = scmp.lt.s32.totalorder %s779_s24, %s13829_s17 }
  0xb1   : > { %p13826_p9 = pnand %p13824_p11, %p14466_p2  ;;  %p13832_p10 = scmp.lt.s32.totalorder %s13830_s23, %s13823_s20 }
  0xb3   : > { %p13827_p0 = pneg %p13826_p9  ;;  %p13833_p12 = por %p13832_p10, %p13831_p13 }
  0xb5   : > { %p13834_p3 = pnand %p13833_p12, %p13827_p0 }
  0xb7   : > { %13837 = shalt.err (!%p13834_p3)
}
  0xb8   : > { %p16962_p4 = scmp.ne.s32.totalorder %s16955_s21, 0  ;;  %s16963_s15 = sld [smem:[#allocation63_spill]] }
  0xb9   : > { %s788_s28 = scalar_lea.vmem [#allocation21], %s14445_s12 }
  0xba   : > { %13396 = dma.hbm_to_vmem [thread:$0]  (!%p16962_p4), %s14553_s25, 16, %s779_s24, %s14460_s26  }
  0xbb   : > { %s795_s10 = sshll.u32 %s788_s28, 4  ;;  %s796_s10 = int_to_ptr.vmem [resolvable:$true] %s795_s10 }
  0xbe   : > { %s14578_s27 = scalar_lea.hbm %s16963_s15, %s14493_s2  ;;  %s13843_s25 = scalar_lea.hbm %s16963_s15, 32 }
  0xbf   : > { %s13838_s0 = scalar_lea.hbm %s14578_s27, 16  ;;  %p13844_p8 = scmp.lt.u32.totalorder %s14578_s27, %s16963_s15 }
  0xc0   : > { %p13839_p12 = scmp.ne.s32.totalorder %s14578_s27, %s13838_s0  ;;  %p13845_p1 = scmp.lt.u32.totalorder %s13843_s25, %s13838_s0 }
  0xc1   : > { %p13847_p11 = scmp.lt.u32.totalorder %s13838_s0, %s14578_s27 }
  0xc2   : > { %p13841_p5 = pnand %p13839_p12, %p14466_p2  ;;  %p13846_p7 = por %p13845_p1, %p13844_p8 }
  0xc4   : > { %p13842_p6 = pneg %p13841_p5  ;;  %p13848_p9 = por %p13847_p11, %p13846_p7 }
  0xc6   : > { %p13849_p0 = pnand %p13848_p9, %p13842_p6 }
  0xc8   : > { %13852 = shalt.err (!%p13849_p0)
}
  0xc9   : > { %s13853_s2 = scalar_lea.vmem %s796_s10, 16  ;;  %s14219_s17 = smov [#allocation21]  }
  0xca   : > { %p13854_p13 = scmp.ne.s32.totalorder %s796_s10, %s13853_s2  ;;  %s13858_s23 = sshll.u32 %s14219_s17, 4  ;;  %s13859_s23 = int_to_ptr.vmem [resolvable:$false] %s13858_s23 }
  0xcb   : > { %s13860_s19 = scalar_lea.vmem %s13859_s23, 32  ;;  %p13861_p12 = scmp.lt.s32.totalorder %s796_s10, %s13859_s23 }
  0xcc   : > { %p13856_p10 = pnand %p13854_p13, %p14466_p2  ;;  %p13862_p5 = scmp.lt.s32.totalorder %s13860_s19, %s13853_s2 }
  0xce   : > { %p13857_p3 = pneg %p13856_p10  ;;  %p13863_p4 = por %p13862_p5, %p13861_p12 }
  0xd0   : > { %p13864_p1 = pnand %p13863_p4, %p13857_p3 }
  0xd2   : > { %13867 = shalt.err (!%p13864_p1)
}
  0xd3   : > { %p16964_p8 = scmp.ne.s32.totalorder %s16955_s21, 0  ;;  %s14220_s3 = smov [#allocation6]  }
  0xd4   : > { %s618_s28 = sshll.u32 %s14220_s3, 4  ;;  %s14221_s0 = smov [#allocation9]   ;;  %s619_s28 = int_to_ptr.vmem [resolvable:$true] %s618_s28 }
  0xd5   : > { %13399 = dma.hbm_to_vmem [thread:$0]  (!%p16964_p8), %s14578_s27, 16, %s796_s10, %s14460_s26  }
  0xd6   : > { %s641_s4 = sshll.u32 %s14221_s0, 4  ;;  %s16965_s24 = sld [smem:[#allocation51_spill]]  ;;  %s642_s4 = int_to_ptr.vmem [resolvable:$true] %s641_s4 }
  0xd7   : > { %p16966_p6 = scmp.ne.s32.totalorder %s16950_s22, 0 }
  0xdc   : > { %s13868_s6 = scalar_lea.hbm %s16965_s24, 128 }
  0xdd   : > { %p13869_p4 = scmp.ne.s32.totalorder %s16965_s24, %s13868_s6  ;;  %p13875_p9 = scmp.lt.u32.totalorder %s13868_s6, %s16965_s24 }
  0xdf   : > { %p13871_p7 = pnand %p13869_p4, %p16966_p6 }
  0xe1   : > { %p13872_p11 = pneg %p13871_p7 }
  0xe3   : > { %p13877_p0 = pnand %p13875_p9, %p13872_p11 }
  0xe5   : > { %13880 = shalt.err (!%p13877_p0)
}
  0xe6   : > { %s13881_s27 = scalar_lea.vmem %s619_s28, 128  ;;  %p13889_p12 = scmp.lt.s32.totalorder %s619_s28, %s619_s28 }
  0xe7   : > { %p13882_p13 = scmp.ne.s32.totalorder %s619_s28, %s13881_s27  ;;  %p13890_p5 = scmp.lt.s32.totalorder %s13881_s27, %s13881_s27 }
  0xe9   : > { %p13884_p10 = pnand %p13882_p13, %p16966_p6  ;;  %p13891_p1 = por %p13890_p5, %p13889_p12 }
  0xeb   : > { %p13885_p3 = pneg %p13884_p10 }
  0xed   : > { %p13892_p8 = pnand %p13891_p1, %p13885_p3 }
  0xef   : > { %13895 = shalt.err (!%p13892_p8)
}
  0xf0   : > { %p16967_p4 = scmp.ne.s32.totalorder %s16947_s5, 0  ;;  %s16968_s25 = sld [smem:[#allocation53_spill]] }
  0xf2   : > { %13365 = dma.hbm_to_vmem [thread:$0]  (!%p16967_p4), %s16965_s24, 128, %s619_s28, [#allocation7]  }
  0xf6   : > { %s13896_s6 = scalar_lea.hbm %s16968_s25, 128 }
  0xf7   : > { %p13897_p7 = scmp.ne.s32.totalorder %s16968_s25, %s13896_s6  ;;  %p13903_p8 = scmp.lt.u32.totalorder %s13896_s6, %s16968_s25 }
  0xf9   : > { %p13899_p11 = pnand %p13897_p7, %p16966_p6 }
  0xfb   : > { %p13900_p9 = pneg %p13899_p11 }
  0xfd   : > { %p13905_p0 = pnand %p13903_p8, %p13900_p9 }
  0xff   : > { %13908 = shalt.err (!%p13905_p0)
}
 0x100   : > { %s13909_s27 = scalar_lea.vmem %s642_s4, 128  ;;  %p13917_p12 = scmp.lt.s32.totalorder %s642_s4, %s642_s4 }
 0x101   : > { %p13910_p13 = scmp.ne.s32.totalorder %s642_s4, %s13909_s27  ;;  %p13918_p5 = scmp.lt.s32.totalorder %s13909_s27, %s13909_s27 }
 0x103   : > { %p13912_p10 = pnand %p13910_p13, %p16966_p6  ;;  %p13919_p1 = por %p13918_p5, %p13917_p12 }
 0x105   : > { %p13913_p3 = pneg %p13912_p10 }
 0x107   : > { %p13920_p2 = pnand %p13919_p1, %p13913_p3 }
 0x109   : > { %13923 = shalt.err (!%p13920_p2)
}
 0x10a   : > { %s16890_s28 = smov 64   ;;  %s16892_s10 = smov 4  }
 0x10b   : > { %13371 = dma.hbm_to_vmem [thread:$0]  (!%p16967_p4), %s16968_s25, 128, %s642_s4, [#allocation10], %s16890_s28, %s16890_s28, %s16892_s10  }
 0x10c   : > { %s14224_s20 = smov [#allocation12]   ;;  %s16888_s17 = sshll.u32 %s14445_s12, 10 }
 0x10d   : > { %s665_s6 = sshll.u32 %s14224_s20, 4  ;;  %s16969_s7 = sld [smem:[#allocation55_spill]]  ;;  %s666_s6 = int_to_ptr.vmem [resolvable:$true] %s665_s6 }
 0x113   : > { %s13924_s19 = scalar_lea.hbm %s16969_s7, 1024 }
 0x114   : > { %p13925_p2 = scmp.ne.s32.totalorder %s16969_s7, %s13924_s19  ;;  %p13931_p9 = scmp.lt.u32.totalorder %s13924_s19, %s16969_s7 }
 0x116   : > { %p13927_p7 = pnand %p13925_p2, %p16966_p6 }
 0x118   : > { %p13928_p11 = pneg %p13927_p7 }
 0x11a   : > { %p13933_p8 = pnand %p13931_p9, %p13928_p11 }
 0x11c   : > { %13936 = shalt.err (!%p13933_p8)
}
 0x11d   : > { %s13937_s4 = scalar_lea.vmem %s666_s6, 1024  ;;  %p13945_p3 = scmp.lt.s32.totalorder %s666_s6, %s666_s6 }
 0x11e   : > { %p13938_p0 = scmp.ne.s32.totalorder %s666_s6, %s13937_s4  ;;  %p13946_p12 = scmp.lt.s32.totalorder %s13937_s4, %s13937_s4 }
 0x120   : > { %p13940_p13 = pnand %p13938_p0, %p16966_p6  ;;  %p13947_p5 = por %p13946_p12, %p13945_p3 }
 0x122   : > { %p13941_p10 = pneg %p13940_p13 }
 0x124   : > { %p13948_p1 = pnand %p13947_p5, %p13941_p10 }
 0x126   : > { %13951 = shalt.err (!%p13948_p1)
}
 0x127   : > { %s16970_s11 = smov 8   ;;  %s16971_s3 = smov 128  }
 0x128   : > { %13377 = dma.hbm_to_vmem [thread:$0]  (!%p16967_p4), %s16969_s7, 1024, %s666_s6, [#allocation13], %s16971_s3, %s16971_s3, %s16970_s11  }
 0x129   : > { %s16889_s0 = sshll.u32 %s14208_s30, 14  ;;  %s806_s20 = scalar_lea.vmem [#allocation22], %s16888_s17 }
 0x12a   : > { %s813_s2 = sshll.u32 %s806_s20, 4  ;;  %s16972_s16 = sld [smem:[#allocation64_spill]]  ;;  %s14670_s2 = int_to_ptr.vmem [resolvable:$true] %s813_s2 }
 0x12b   : > { %p16973_p7 = scmp.ne.s32.totalorder %s16957_s29, 0 }
 0x130   : > { %s14668_s27 = scalar_lea.hbm %s16972_s16, %s16889_s0  ;;  %s13957_s3 = scalar_lea.hbm %s16972_s16, 32768 }
 0x131   : > { %s13952_s4 = scalar_lea.hbm %s14668_s27, 16384  ;;  %p13958_p8 = scmp.lt.u32.totalorder %s14668_s27, %s16972_s16 }
 0x132   : > { %p13953_p2 = scmp.ne.s32.totalorder %s14668_s27, %s13952_s4  ;;  %p13959_p0 = scmp.lt.u32.totalorder %s13957_s3, %s13952_s4 }
 0x133   : > { %p13961_p10 = scmp.lt.u32.totalorder %s13952_s4, %s14668_s27 }
 0x134   : > { %p13955_p11 = pnand %p13953_p2, %p16973_p7  ;;  %p13960_p13 = por %p13959_p0, %p13958_p8 }
 0x136   : > { %p13956_p9 = pneg %p13955_p11  ;;  %p13962_p3 = por %p13961_p10, %p13960_p13 }
 0x138   : > { %p13963_p12 = pnand %p13962_p3, %p13956_p9 }
 0x13a   : > { %13966 = shalt.err (!%p13963_p12)
}
 0x13b   : > { %s13967_s20 = scalar_lea.vmem %s14670_s2, 16384  ;;  %s14225_s23 = smov [#allocation22]  }
 0x13c   : > { %p13968_p5 = scmp.ne.s32.totalorder %s14670_s2, %s13967_s20  ;;  %s13972_s19 = sshll.u32 %s14225_s23, 4  ;;  %s13973_s19 = int_to_ptr.vmem [resolvable:$false] %s13972_s19 }
 0x13d   : > { %s13974_s6 = scalar_lea.vmem %s13973_s19, 32768  ;;  %p13975_p11 = scmp.lt.s32.totalorder %s14670_s2, %s13973_s19 }
 0x13e   : > { %p13970_p1 = pnand %p13968_p5, %p16973_p7  ;;  %p13976_p4 = scmp.lt.s32.totalorder %s13974_s6, %s13967_s20 }
 0x140   : > { %p13971_p2 = pneg %p13970_p1  ;;  %p13977_p8 = por %p13976_p4, %p13975_p11 }
 0x142   : > { %p13978_p0 = pnand %p13977_p8, %p13971_p2 }
 0x144   : > { %13981 = shalt.err (!%p13978_p0)
}
 0x145   : > { %s14226_s4 = smov 1024   ;;  %p16974_p9 = scmp.ne.s32.totalorder %s16955_s21, 0 }
 0x146   : > { %s14227_s11 = smov [#allocation8]   ;;  %s16975_s23 = sld [smem:[#allocation52_spill]] }
 0x147   : > { %13402 = dma.hbm_to_vmem [thread:$0]  (!%p16974_p9), %s14668_s27, 16384, %s14670_s2, %s14460_s26, %s14226_s4, %s14226_s4, %s16890_s28  }
 0x148   : > { %s628_s3 = sshll.u32 %s14227_s11, 4  ;;  %s629_s3 = int_to_ptr.vmem [resolvable:$true] %s628_s3 }
 0x14c   : > { %s13982_s19 = scalar_lea.hbm %s16975_s23, 64 }
 0x14d   : > { %p13983_p4 = scmp.ne.s32.totalorder %s16975_s23, %s13982_s19  ;;  %p13989_p3 = scmp.lt.u32.totalorder %s13982_s19, %s16975_s23 }
 0x14f   : > { %p13985_p13 = pnand %p13983_p4, %p16966_p6 }
 0x151   : > { %p13986_p10 = pneg %p13985_p13 }
 0x153   : > { %p13991_p12 = pnand %p13989_p3, %p13986_p10 }
 0x155   : > { %13994 = shalt.err (!%p13991_p12)
}
 0x156   : > { %s13995_s2 = scalar_lea.vmem %s629_s3, 64  ;;  %p14003_p11 = scmp.lt.s32.totalorder %s629_s3, %s629_s3 }
 0x157   : > { %p13996_p5 = scmp.ne.s32.totalorder %s629_s3, %s13995_s2  ;;  %p14004_p8 = scmp.lt.s32.totalorder %s13995_s2, %s13995_s2 }
 0x159   : > { %p13998_p1 = pnand %p13996_p5, %p16966_p6  ;;  %p14005_p0 = por %p14004_p8, %p14003_p11 }
 0x15b   : > { %p13999_p2 = pneg %p13998_p1 }
 0x15d   : > { %p14006_p9 = pnand %p14005_p0, %p13999_p2 }
 0x15f   : > { %14009 = shalt.err (!%p14006_p9)
}
 0x160   : > { %s14228_s27 = smov 16   ;;  %s14229_s4 = smov 1  }
 0x161   : > { %p16976_p4 = scmp.ne.s32.totalorder %s16947_s5, 0  ;;  %s14230_s11 = smov [#allocation11]  }
 0x162   : > { %s655_s13 = sshll.u32 %s14230_s11, 4  ;;  %s14231_s14 = smov [#allocation14]   ;;  %s656_s13 = int_to_ptr.vmem [resolvable:$true] %s655_s13 }
 0x163   : > { %13368 = dma.hbm_to_vmem [thread:$0]  (!%p16976_p4), %s16975_s23, 64, %s629_s3, [#allocation7], %s14228_s27, %s14228_s27, %s14229_s4  }
 0x164   : > { %s678_s19 = sshll.u32 %s14231_s14, 4  ;;  %s16977_s2 = sld [smem:[#allocation54_spill]]  ;;  %s14713_s19 = int_to_ptr.vmem [resolvable:$true] %s678_s19 }
 0x16a   : > { %s14010_s28 = scalar_lea.hbm %s16977_s2, 16 }
 0x16b   : > { %p14011_p9 = scmp.ne.s32.totalorder %s16977_s2, %s14010_s28  ;;  %p14017_p3 = scmp.lt.u32.totalorder %s14010_s28, %s16977_s2 }
 0x16d   : > { %p14013_p13 = pnand %p14011_p9, %p16966_p6 }
 0x16f   : > { %p14014_p10 = pneg %p14013_p13 }
 0x171   : > { %p14019_p12 = pnand %p14017_p3, %p14014_p10 }
 0x173   : > { %14022 = shalt.err (!%p14019_p12)
}
 0x174   : > { %s14023_s27 = scalar_lea.vmem %s656_s13, 16  ;;  %s14030_s4 = scalar_lea.vmem %s656_s13, 32 }
 0x175   : > { %p14024_p5 = scmp.ne.s32.totalorder %s656_s13, %s14023_s27  ;;  %p14031_p11 = scmp.lt.s32.totalorder %s656_s13, %s656_s13 }
 0x176   : > { %p14032_p8 = scmp.lt.s32.totalorder %s14030_s4, %s14023_s27 }
 0x177   : > { %p14026_p1 = pnand %p14024_p5, %p16966_p6 }
 0x178   : > { %p14033_p0 = por %p14032_p8, %p14031_p11 }
 0x179   : > { %p14027_p2 = pneg %p14026_p1 }
 0x17b   : > { %p14034_p7 = pnand %p14033_p0, %p14027_p2 }
 0x17d   : > { %14037 = shalt.err (!%p14034_p7)
}
 0x17e   : > { %13374 = dma.hbm_to_vmem [thread:$0]  (!%p16976_p4), %s16977_s2, 16, %s656_s13, [#allocation10]  }
 0x17f   : > { %s16978_s8 = sld [smem:[#allocation56_spill]] }
 0x185   : > { %s14038_s11 = scalar_lea.hbm %s16978_s8, 1024 }
 0x186   : > { %p14039_p9 = scmp.ne.s32.totalorder %s16978_s8, %s14038_s11  ;;  %p14045_p7 = scmp.lt.u32.totalorder %s14038_s11, %s16978_s8 }
 0x188   : > { %p14041_p13 = pnand %p14039_p9, %p16966_p6 }
 0x18a   : > { %p14042_p10 = pneg %p14041_p13 }
 0x18c   : > { %p14047_p3 = pnand %p14045_p7, %p14042_p10 }
 0x18e   : > { %14050 = shalt.err (!%p14047_p3)
}
 0x18f   : > { %s14051_s13 = scalar_lea.vmem %s14713_s19, 1024  ;;  %p14059_p2 = scmp.lt.s32.totalorder %s14713_s19, %s14713_s19 }
 0x190   : > { %p14052_p12 = scmp.ne.s32.totalorder %s14713_s19, %s14051_s13  ;;  %p14060_p11 = scmp.lt.s32.totalorder %s14051_s13, %s14051_s13 }
 0x192   : > { %p14054_p5 = pnand %p14052_p12, %p16966_p6  ;;  %p14061_p8 = por %p14060_p11, %p14059_p2 }
 0x194   : > { %p14055_p1 = pneg %p14054_p5 }
 0x196   : > { %p14062_p0 = pnand %p14061_p8, %p14055_p1 }
 0x198   : > { %14065 = shalt.err (!%p14062_p0)
}
 0x199   : > { %s16979_s3 = smov 4   ;;  %s16980_s27 = smov 64  }
 0x19a   : > { %13380 = dma.hbm_to_vmem [thread:$0]  (!%p16976_p4), %s16978_s8, 1024, %s14713_s19, [#allocation13], %s16980_s27, %s16980_s27, %s16979_s3  }
 0x19b   : > { %s14232_s10 = smov [#allocation15]   ;;  %s16981_s0 = sshll.u32 %s14208_s30, 14 }
 0x19c   : > { %s692_s28 = sshll.u32 %s14232_s10, 4  ;;  %s16982_s18 = sld [smem:[#allocation66_spill]]  ;;  %s693_s28 = int_to_ptr.vmem [resolvable:$true] %s692_s28 }
 0x19d   : > { %s16983_s6 = sshll.u32 %s14445_s12, 10  ;;  %s16984_s9 = sld [smem:[#allocation57_spill]] }
 0x19e   : > { %s834_s17 = scalar_lea.vmem [#allocation23], %s16983_s6 }
 0x19f   : > { %s841_s13 = sshll.u32 %s834_s17, 4  ;;  %s14786_s13 = int_to_ptr.vmem [resolvable:$true] %s841_s13 }
 0x1a2   : > { %s14764_s20 = scalar_lea.hbm %s16982_s18, %s16981_s0 }
 0x1a3   : > { %s14066_s4 = scalar_lea.hbm %s16984_s9, 16 }
 0x1a4   : > { %p14067_p9 = scmp.ne.s32.totalorder %s16984_s9, %s14066_s4  ;;  %p14073_p7 = scmp.lt.u32.totalorder %s14066_s4, %s16984_s9 }
 0x1a6   : > { %p14069_p13 = pnand %p14067_p9, %p16966_p6 }
 0x1a8   : > { %p14070_p10 = pneg %p14069_p13 }
 0x1aa   : > { %p14075_p3 = pnand %p14073_p7, %p14070_p10 }
 0x1ac   : > { %14078 = shalt.err (!%p14075_p3)
}
 0x1ad   : > { %s14079_s12 = scalar_lea.vmem %s693_s28, 16  ;;  %s14086_s15 = scalar_lea.vmem %s693_s28, 32 }
 0x1ae   : > { %p14080_p12 = scmp.ne.s32.totalorder %s693_s28, %s14079_s12  ;;  %p14087_p2 = scmp.lt.s32.totalorder %s693_s28, %s693_s28 }
 0x1af   : > { %p14088_p11 = scmp.lt.s32.totalorder %s14086_s15, %s14079_s12 }
 0x1b0   : > { %p14082_p5 = pnand %p14080_p12, %p16966_p6 }
 0x1b1   : > { %p14089_p8 = por %p14088_p11, %p14087_p2 }
 0x1b2   : > { %p14083_p1 = pneg %p14082_p5 }
 0x1b4   : > { %p14090_p0 = pnand %p14089_p8, %p14083_p1 }
 0x1b6   : > { %14093 = shalt.err (!%p14090_p0)
}
 0x1b7   : > { %13383 = dma.hbm_to_vmem [thread:$0]  (!%p16976_p4), %s16984_s9, 16, %s693_s28, [#allocation16]  }
 0x1b8   : > { %s14094_s22 = scalar_lea.hbm %s14764_s20, 16384  ;;  %p16985_p9 = scmp.ne.s32.totalorder %s16957_s29, 0 }
 0x1b9   : > { %p14095_p6 = scmp.ne.s32.totalorder %s14764_s20, %s14094_s22  ;;  %s14099_s5 = scalar_lea.hbm %s16982_s18, 32768 }
 0x1ba   : > { %p14100_p7 = scmp.lt.u32.totalorder %s14764_s20, %s16982_s18  ;;  %p14101_p3 = scmp.lt.u32.totalorder %s14099_s5, %s14094_s22 }
 0x1bb   : > { %p14097_p13 = pnand %p14095_p6, %p16985_p9  ;;  %p14103_p5 = scmp.lt.u32.totalorder %s14094_s22, %s14764_s20 }
 0x1bc   : > { %p14102_p12 = por %p14101_p3, %p14100_p7 }
 0x1bd   : > { %p14098_p10 = pneg %p14097_p13 }
 0x1be   : > { %p14104_p1 = por %p14103_p5, %p14102_p12 }
 0x1c0   : > { %p14105_p4 = pnand %p14104_p1, %p14098_p10 }
 0x1c2   : > { %14108 = shalt.err (!%p14105_p4)
}
 0x1c3   : > { %s14109_s28 = scalar_lea.vmem %s14786_s13, 16384  ;;  %s14233_s6 = smov [#allocation23]  }
 0x1c4   : > { %p14110_p2 = scmp.ne.s32.totalorder %s14786_s13, %s14109_s28  ;;  %s14114_s17 = sshll.u32 %s14233_s6, 4  ;;  %s14115_s17 = int_to_ptr.vmem [resolvable:$false] %s14114_s17 }
 0x1c5   : > { %s14116_s4 = scalar_lea.vmem %s14115_s17, 32768  ;;  %p14117_p0 = scmp.lt.s32.totalorder %s14786_s13, %s14115_s17 }
 0x1c6   : > { %p14112_p11 = pnand %p14110_p2, %p16985_p9  ;;  %p14118_p6 = scmp.lt.s32.totalorder %s14116_s4, %s14109_s28 }
 0x1c8   : > { %p14113_p8 = pneg %p14112_p11  ;;  %p14119_p13 = por %p14118_p6, %p14117_p0 }
 0x1ca   : > { %p14120_p7 = pnand %p14119_p13, %p14113_p8 }
 0x1cc   : > { %14123 = shalt.err (!%p14120_p7)
}
 0x1cd   : > { %p16986_p10 = scmp.ne.s32.totalorder %s16955_s21, 0  ;;  %p16987_p9 = scmp.ne.s32.totalorder %s16946_s1, 0 }
 0x1cf   : > { %13405 = dma.hbm_to_vmem [thread:$0]  (!%p16986_p10), %s14764_s20, 16384, %s14786_s13, %s14460_s26, %s16980_s27, %s16980_s27, %s16979_s3  }
 0x1d0   : > { %871 = sbr.rel (%p16987_p9) target bundleno = 5240 (0x1478), region = 108 }
 0x1d7   : > { %s16988_s29 = sld [smem:[#allocation34_spill]] }
 0x1dd   : > { %p16989_p3 = scmp.eq.s32.totalorder %s16988_s29, 0 }
 0x1df   : > { %14167 = dma.done.wait (%p16989_p3), [#allocation4], 1024   ;;  %p16990_p12 = pmov %p16989_p3 }
 0x1e0   : > { %p16991_p5 = pmov %p16989_p3 }
 0x1e1   : > { %14169 = vsyncadd (%p16990_p12), [#allocation4], 4294966272 }
 0x1e2   : > { %14171 = dma.done.wait (%p16991_p5), [#allocation7], 192   ;;  %p16992_p1 = pmov %p16989_p3 }
 0x1e4   : > { %14173 = vsyncadd (%p16992_p1), [#allocation7], 4294967104  ;;  %p16993_p4 = pmov %p16992_p1 }
 0x1e5   : > { %p16994_p2 = pmov %p16992_p1 }
 0x1e6   : > { %14175 = dma.done.wait (%p16993_p4), [#allocation10], 144  }
 0x1e7   : > { %14177 = vsyncadd (%p16994_p2), [#allocation10], 4294967152  ;;  %p16995_p11 = pmov %p16992_p1 }
 0x1e8   : > { %p16996_p8 = pmov %p16992_p1 }
 0x1e9   : > { %14179 = dma.done.wait (%p16995_p11), [#allocation13], 2048  }
 0x1ea   : > { %14181 = vsyncadd (%p16996_p8), [#allocation13], 4294965248  ;;  %p16997_p0 = pmov %p16992_p1 }
 0x1ec   : > { %14183 = dma.done.wait (%p16997_p0), [#allocation16], 16   ;;  %p16998_p6 = pmov %p16997_p0 }
 0x1ed   : > { %s16999_s1 = sld [smem:[#allocation32_spill]]  ;;  %s17000_s26 = sld [smem:[#allocation37_spill]] }
 0x1ee   : > { %14185 = vsyncadd (%p16998_p6), [#allocation16], 4294967280  ;;  %s905_s21 = sand.u32 1, %s16988_s29  }
 0x1ef   : > { %s906_s20 = scalar_lea.sflag [#allocation4], %s905_s21 }
 0x1f3   : > { %s14837_s3 = sand.u32 1, %s16999_s1   ;;  %p17001_p13 = scmp.ne.s32.totalorder %s17000_s26, 0 }
 0x1f4   : > { %s13307_s27 = smul.u32 192, %s14837_s3 }
 0x1f6   : > { %s14840_s13 = scalar_lea.vmem [#allocation17], %s13307_s27 }
 0x1f7   : > { %14187 = dma.done.wait (%p17001_p13), %s906_s20, 35936  }
 0x1f8   : > { %14189 = vsyncadd (%p17001_p13), %s906_s20, 4294931360  ;;  %s13308_s7 = smul.u32 3, %s14837_s3  ;;  %s10503_s30 = sshll.u32 %s14837_s3, 10 }
 0x1f9   : > { %p1061_p7 = scmp.lt.s32.totalorder %s16988_s29, 1  ;;  %s17002_s22 = sld [smem:[#allocation60_spill]] }
 0x1fa   : > { %s17003_s11 = sld [smem:[#allocation65_spill]]  ;;  %s17004_s17 = sld [smem:[#allocation67_spill]] }
 0x1fb   : > { %s14850_s19 = scalar_select %p1061_p7, %s16988_s29, 1 }
 0x1fc   : > { %s17005_s21 = sld [smem:[#allocation68_spill]]  ;;  %s17006_s9 = sld [smem:[#allocation69_spill]] }
 0x1fd   : > { %s10569_s12 = sshll.u32 %s14850_s19, 6  ;;  %s10507_s15 = sshll.u32 %s14850_s19, 4 }
 0x1fe   : > { %s14876_s16 = scalar_lea.vmem [#allocation18], %s13308_s7  ;;  %s934_s2 = scalar_lea.vmem [#allocation20], %s14837_s3 }
 0x1ff   : > { %s14857_s10 = scalar_lea.vmem %s17002_s22, %s10569_s12  ;;  %s926_s12 = scalar_lea.vmem [#allocation19], %s14837_s3 }
 0x200   : > { %s14862_s14 = scalar_lea.vmem %s17003_s11, %s10507_s15  ;;  %s1072_s4 = scalar_lea.vmem %s17004_s17, %s14850_s19 }
 0x201   : > { %s942_s22 = scalar_lea.vmem [#allocation21], %s14837_s3  ;;  %s14881_s0 = scalar_lea.vmem [#allocation22], %s10503_s30 }
 0x202   : > { %s1075_s27 = scalar_lea.vmem %s17005_s21, %s14850_s19  ;;  %s1078_s18 = scalar_lea.vmem %s17006_s9, %s14850_s19 }
 0x203   : > { %s14883_s15 = scalar_lea.vmem [#allocation23], %s10503_s30  ;;  %p17007_p10 = scmp.ne.s32.totalorder %s16988_s29, 0 }
 0x204   : > { %v10571_v0 = vld [vmem:[#allocation9] sm:$0xff] (!%p17007_p10)   ;;  %v1087_v1 = vld [vmem:[#allocation3] sm:$0xff] (!%p17007_p10)  ;;  %vm1102_vm0 = vcmask (!%p17007_p10), 130048   ;;  %v1090_v7 = vld [vmem:[#allocation3 + $0x18] sm:$0xff] (!%p17007_p10) }
 0x205   : > { %1082 = sbr.rel (%p17007_p10) target bundleno = 743 (0x2e7), region = 172  ;;  %v1091_v2 = vld [vmem:[#allocation3 + $0x20] sm:$0xff] (!%p17007_p10)  ;;  %12430 = vmatprep.subr.bf16.mxu0 (!%p17007_p10), %v10571_v0  ;;  %13077 = vmatprep.subr.bf16.mxu1 (!%p17007_p10), %v10571_v0  ;;  %v1088_v3 = vld [vmem:[#allocation3 + $0x8] sm:$0xff] (!%p17007_p10)  ;;  %v1089_v5 = vld [vmem:[#allocation3 + $0x10] sm:$0xff] (!%p17007_p10) }
 0x206   : > { %12432 = vmatpush3.bf16.msra.mxu0 (!%p17007_p10), %v10571_v0  ;;  %13078 = vmatpush3.bf16.msra.mxu1 (!%p17007_p10), %v10571_v0  ;;  %v1092_v4 = vld [vmem:[#allocation3 + $0x28] sm:$0xff] (!%p17007_p10)  ;;  %v1093_v6 = vld [vmem:[#allocation3 + $0x30] sm:$0xff] (!%p17007_p10)  ;;  %v1094_v8 = vld [vmem:[#allocation3 + $0x38] sm:$0xff] (!%p17007_p10) }
 0x207   : > { %11955 = vmatprep.mubr.msk.f32.mxu0 (!%p17007_p10), %vm1102_vm0, %v1087_v1  ;;  %11961 = vmatprep.mubr.msk.f32.mxu1 (!%p17007_p10), %vm1102_vm0, %v1091_v2  ;;  %v10509_v9 = vld [vmem:[#allocation11] ss:$0 sm:$0xff] (!%p17007_p10)  ;;  %v1233_v11 = vld [vmem:[#allocation12 + $0x8] sm:$0xff] (!%p17007_p10)  ;;  %v1232_v17 = vld [vmem:[#allocation12] sm:$0xff] (!%p17007_p10) }
 0x208   : > { %v1237_v13 = vld [vmem:[#allocation12 + $0x28] sm:$0xff] (!%p17007_p10)  ;;  %v1236_v19 = vld [vmem:[#allocation12 + $0x20] sm:$0xff] (!%p17007_p10)  ;;  %v1235_v27 = vld [vmem:[#allocation12 + $0x18] sm:$0xff] (!%p17007_p10) }
 0x209   : > { %11956 = vmatmul.mubr.msk.f32.vlgmr.msra.gmra.mrb[0].mxu0 (!%p17007_p10), %vm1102_vm0, %v1088_v3  ;;  %11962 = vmatmul.mubr.msk.f32.vlgmr.msra.gmra.mrb[0].mxu1 (!%p17007_p10), %vm1102_vm0, %v1092_v4  ;;  %v1239_v29 = vld [vmem:[#allocation12 + $0x38] sm:$0xff] (!%p17007_p10)  ;;  %v1234_v33 = vld [vmem:[#allocation12 + $0x10] sm:$0xff] (!%p17007_p10) }
 0x20a   : > { %11958 = vmatprep.mubr.msk.f32.mxu0 (!%p17007_p10), %vm1102_vm0, %v1089_v5  ;;  %11964 = vmatprep.mubr.msk.f32.mxu1 (!%p17007_p10), %vm1102_vm0, %v1093_v6  ;;  %v1238_v35 = vld [vmem:[#allocation12 + $0x30] sm:$0xff] (!%p17007_p10) }
 0x20d   : > { %11959 = vmatmul.mubr.msk.f32.gmra.mrb[2].mxu0 %vm1102_vm0, %v1090_v7  ;;  %11965 = vmatmul.mubr.msk.f32.gmra.mrb[2].mxu1 %vm1102_vm0, %v1094_v8 }
 0x2dc   : > { %v11957_v10 = vpop.f32.mrb[0].mxu0  ;;  %v11963_v12 = vpop.f32.mrb[0].mxu1 }
 0x2dd   : > { %v1199_v14 = vadd.f32 %v11957_v10, %v10509_v9  ;;  %v1219_v15 = vadd.f32 %v11963_v12, %v10509_v9  ;;  %v1193_v16 = vpop.f32.mrb[1].mxu0  ;;  %v1213_v18 = vpop.f32.mrb[1].mxu1 }
 0x2de   : > { %v1194_v20 = vadd.f32 %v10509_v9, %v1193_v16  ;;  %v1214_v21 = vadd.f32 %v10509_v9, %v1213_v18 }
 0x2df   : > { %v1241_v22 = vadd.f32 %v1233_v11, %v1199_v14  ;;  %v1245_v23 = vadd.f32 %v1237_v13, %v1219_v15 }
 0x2e0   : > { %v1240_v24 = vadd.f32 %v1232_v17, %v1194_v20  ;;  %v1244_v25 = vadd.f32 %v1236_v19, %v1214_v21  ;;  %v11960_v26 = vpop.f32.mrb[2].mxu0  ;;  %v11966_v28 = vpop.f32.mrb[2].mxu1 }
 0x2e1   : > { %1249 = vst [vmem:[#allocation2 + $0x8] sm:$0xff] %v1241_v22  ;;  %1253 = vst [vmem:[#allocation2 + $0x28] sm:$0xff] %v1245_v23  ;;  %v1209_v30 = vadd.f32 %v11960_v26, %v10509_v9  ;;  %v1229_v31 = vadd.f32 %v11966_v28, %v10509_v9  ;;  %v1203_v32 = vpop.f32.mrb[3].mxu0  ;;  %v1223_v34 = vpop.f32.mrb[3].mxu1 }
 0x2e2   : > { %1248 = vst [vmem:[#allocation2] sm:$0xff] %v1240_v24  ;;  %1252 = vst [vmem:[#allocation2 + $0x20] sm:$0xff] %v1244_v25  ;;  %v1204_v36 = vadd.f32 %v10509_v9, %v1203_v32  ;;  %v1224_v37 = vadd.f32 %v10509_v9, %v1223_v34 }
 0x2e3   : > { %v1243_v38 = vadd.f32 %v1235_v27, %v1209_v30  ;;  %v1247_v39 = vadd.f32 %v1239_v29, %v1229_v31 }
 0x2e4   : > { %v1242_v40 = vadd.f32 %v1234_v33, %v1204_v36  ;;  %v1246_v41 = vadd.f32 %v1238_v35, %v1224_v37 }
 0x2e5   : > { %1251 = vst [vmem:[#allocation2 + $0x18] sm:$0xff] %v1243_v38  ;;  %1255 = vst [vmem:[#allocation2 + $0x38] sm:$0xff] %v1247_v39 }
 0x2e6   : > { %1250 = vst [vmem:[#allocation2 + $0x10] sm:$0xff] %v1242_v40  ;;  %1254 = vst [vmem:[#allocation2 + $0x30] sm:$0xff] %v1246_v41 }
 0x2e7 PF: > { %v13481_v42 = vld [vmem:[%s14840_s13 + $0x4] ss:$12 sps:$4 sm:$0xff]   ;;  %v13483_v43 = vld [vmem:[%s14840_s13] ss:$12 sps:$4 sm:$0xff]   ;;  %v16896_v44 = vmov 0.0   ;;  %vm14235_vm1 = vmmov 0   ;;  %v1358_v11 = vlaneseq }
 0x2e8   : > { %1437 = vmatprep.mubr.f32.mxu0 %v16896_v44  ;;  %12434 = vmatprep.subr.bf16.mxu0 %v13481_v42  ;;  %v13484_v45 = vld [vmem:[%s14840_s13 + $0x1c] ss:$12 sps:$4 sm:$0xff]   ;;  %v13486_v46 = vld [vmem:[%s14840_s13 + $0x18] ss:$12 sps:$4 sm:$0xff]   ;;  %v13487_v47 = vld [vmem:[%s14840_s13 + $0x34] ss:$12 sps:$4 sm:$0xff]  }
 0x2e9   : > { %12436 = vmatpush1.bf16.msra.mxu0 %v13483_v43  ;;  %v13489_v48 = vld [vmem:[%s14840_s13 + $0x30] ss:$12 sps:$4 sm:$0xff]   ;;  %v13490_v49 = vld [vmem:[%s14840_s13 + $0x4c] ss:$12 sps:$4 sm:$0xff]   ;;  %v13492_v51 = vld [vmem:[%s14840_s13 + $0x48] ss:$12 sps:$4 sm:$0xff]  }
 0x2ea   : > { %12438 = vmatprep.subr.bf16.mxu0 %v13484_v45  ;;  %v1256_v50 = vld [vmem:[#allocation2] sm:$0xff]  ;;  %v13493_v52 = vld [vmem:[%s14840_s13 + $0x64] ss:$12 sps:$4 sm:$0xff]   ;;  %v13499_v59 = vld [vmem:[%s14840_s13 + $0x94] ss:$12 sps:$4 sm:$0xff]   ;;  %v14933_v12 = vshrl.u32 %v1358_v11, 7 }
 0x2eb   : > { %11999 = vmatprep.mubr.f32.mxu1 %v1256_v50  ;;  %v13495_v53 = vld [vmem:[%s14840_s13 + $0x60] ss:$12 sps:$4 sm:$0xff]   ;;  %v13505_v54 = vld [vmem:[%s14840_s13 + $0x8] ss:$12 sps:$4 sm:$0xff]   ;;  %v13507_v57 = vld [vmem:[%s14840_s13 + $0x38] ss:$12 sps:$4 sm:$0xff]  }
 0x2ec   : > { %v13506_v55 = vld [vmem:[%s14840_s13 + $0x20] ss:$12 sps:$4 sm:$0xff]   ;;  %v13496_v56 = vld [vmem:[%s14840_s13 + $0x7c] ss:$12 sps:$4 sm:$0xff]   ;;  %12466 = vmatprep.subr.bf16.mxu1 %v13505_v54  ;;  %v13498_v58 = vld [vmem:[%s14840_s13 + $0x78] ss:$12 sps:$4 sm:$0xff]  }
 0x2ed   : > { %12440 = vmatpush1.bf16.msra.mxu0 %v13486_v46  ;;  %12468 = vmatpush3.bf16.msra.mxu1 %v13505_v54  ;;  %v13508_v60 = vld [vmem:[%s14840_s13 + $0x50] ss:$12 sps:$4 sm:$0xff]   ;;  %v13502_v62 = vld [vmem:[%s14840_s13 + $0xac] ss:$12 sps:$4 sm:$0xff]   ;;  %v13509_v63 = vld [vmem:[%s14840_s13 + $0x68] ss:$12 sps:$4 sm:$0xff]  }
 0x2ee   : > { %12442 = vmatprep.subr.bf16.mxu0 %v13487_v47  ;;  %12470 = vmatprep.subr.bf16.mxu1 %v13506_v55  ;;  %v13501_v61 = vld [vmem:[%s14840_s13 + $0x90] ss:$12 sps:$4 sm:$0xff]   ;;  %v13504_v0 = vld [vmem:[%s14840_s13 + $0xa8] ss:$12 sps:$4 sm:$0xff]   ;;  %v13510_v1 = vld [vmem:[%s14840_s13 + $0x80] ss:$12 sps:$4 sm:$0xff]  }
 0x2ef   : > { %v13511_v2 = vld [vmem:[%s14840_s13 + $0x98] ss:$12 sps:$4 sm:$0xff]   ;;  %v1257_v3 = vld [vmem:[#allocation2 + $0x8] sm:$0xff]  ;;  %v1260_v7 = vld [vmem:[#allocation2 + $0x20] sm:$0xff]  ;;  %17008 = vst [vmem:[#allocation38_spill] sm:$0xff] %v14933_v12  ;;  %v14936_v13 = vsub.s32 0, %v14933_v12 }
 0x2f0   : > { %v13512_v4 = vld [vmem:[%s14840_s13 + $0xb0] ss:$12 sps:$4 sm:$0xff]   ;;  %v1259_v6 = vld [vmem:[#allocation2 + $0x18] sm:$0xff]  ;;  %v14940_v15 = vsub.s32 1, %v14933_v12  ;;  %v14988_v37 = vsub.s32 2, %v14933_v12  ;;  %s17012_s29 = sld [smem:[#allocation49_spill]] }
 0x2f1   : > { %12444 = vmatpush1.bf16.msra.mxu0 %v13489_v48  ;;  %12472 = vmatpush3.bf16.msra.mxu1 %v13506_v55  ;;  %v1258_v5 = vld [vmem:[#allocation2 + $0x10] sm:$0xff]  ;;  %v1261_v8 = vld [vmem:[#allocation2 + $0x28] sm:$0xff]  ;;  %v1263_v10 = vld [vmem:[#allocation2 + $0x38] sm:$0xff]  ;;  %17009 = vst [vmem:[#allocation39_spill] sm:$0xff] %v14936_v13  ;;  %vm2181_vm2 = vcmask 64512  }
 0x2f2   : > { %12446 = vmatprep.subr.bf16.mxu0 %v13490_v49  ;;  %12474 = vmatprep.subr.bf16.mxu1 %v13507_v57  ;;  %v1262_v9 = vld [vmem:[#allocation2 + $0x30] sm:$0xff]  ;;  %v1356_v14 = vld [vmem:[%s14876_s16] sm:$0x7]  ;;  %17010 = vst [vmem:[#allocation40_spill] sm:$0xff] %v14940_v15  ;;  %v14951_v21 = vld [vmem:[#allocation8] ss:$0 sm:$0xff] }
 0x2f3   : > { %v14943_v16 = vrot.slane %v1356_v14, %v14936_v13  ;;  %v14946_v17 = vrot.slane %v1356_v14, %v14940_v15  ;;  %17011 = vst [vmem:[#allocation41_spill] sm:$0xff] %v14988_v37  ;;  %v15007_v46 = vrot.slane %v1356_v14, %v14988_v37  ;;  %v15066_v11 = vld [vmem:[#allocation8 + $0x1] ss:$0 sm:$0xff] }
 0x2f5   : > { %12448 = vmatpush1.bf16.msra.mxu0 %v13492_v51  ;;  %12476 = vmatpush3.bf16.msra.mxu1 %v13507_v57 }
 0x2f6   : > { %12450 = vmatprep.subr.bf16.mxu0 %v13493_v52  ;;  %12478 = vmatprep.subr.bf16.mxu1 %v13508_v60  ;;  %s17013_s13 = smov %s17012_s29 }
 0x2f9   : > { %12452 = vmatpush1.bf16.msra.mxu0 %v13495_v53  ;;  %12480 = vmatpush3.bf16.msra.mxu1 %v13508_v60 }
 0x2fa   : > { %12454 = vmatprep.subr.bf16.mxu0 %v13496_v56  ;;  %12482 = vmatprep.subr.bf16.mxu1 %v13509_v63 }
 0x2fd   : > { %12456 = vmatpush1.bf16.msra.mxu0 %v13498_v58  ;;  %12484 = vmatpush3.bf16.msra.mxu1 %v13509_v63 }
 0x2fe   : > { %12458 = vmatprep.subr.bf16.mxu0 %v13499_v59  ;;  %12486 = vmatprep.subr.bf16.mxu1 %v13510_v1 }
 0x301   : > { %12460 = vmatpush1.bf16.msra.mxu0 %v13501_v61  ;;  %12488 = vmatpush3.bf16.msra.mxu1 %v13510_v1 }
 0x302   : > { %12462 = vmatprep.subr.bf16.mxu0 %v13502_v62  ;;  %12490 = vmatprep.subr.bf16.mxu1 %v13511_v2 }
 0x305   : > { %12464 = vmatpush1.bf16.msra.mxu0 %v13504_v0  ;;  %12492 = vmatpush3.bf16.msra.mxu1 %v13511_v2 }
 0x306   : > { %12031 = vmatprep.subr.mxu0 %v16896_v44  ;;  %12494 = vmatprep.subr.bf16.mxu1 %v13512_v4 }
 0x308   : > { %1438 = vmatmul.mubr.f32.vlgmr.msra.gmra.mrb[0].mxu0 %v1256_v50 }
 0x309   : > { %1443 = vmatprep.mubr.f32.mxu0 %v16896_v44  ;;  %12496 = vmatpush3.bf16.msra.mxu1 %v13512_v4 }
 0x30a   : > { %12011 = vmatprep.subr.mxu1 %v16896_v44 }
 0x30c   : > { %1444 = vmatmul.mubr.f32.gmra.mrb[2].mxu0 %v1257_v3  ;;  %12000 = vmatmul.mubr.f32.vlgmr.msra.gmra.mrb[0].mxu1 %v1257_v3 }
 0x30d   : > { %1449 = vmatprep.mubr.f32.mxu0 %v16896_v44  ;;  %12002 = vmatprep.mubr.f32.mxu1 %v1258_v5 }
 0x310   : > { %1450 = vmatmul.mubr.f32.gmra.mrb[4].mxu0 %v1258_v5  ;;  %12003 = vmatmul.mubr.f32.gmra.mrb[2].mxu1 %v1259_v6 }
 0x311   : > { %1455 = vmatprep.mubr.f32.mxu0 %v16896_v44  ;;  %12005 = vmatprep.mubr.f32.mxu1 %v1260_v7 }
 0x314   : > { %1456 = vmatmul.mubr.f32.gmra.mrb[6].mxu0 %v1259_v6  ;;  %12006 = vmatmul.mubr.f32.gmra.mrb[4].mxu1 %v1261_v8 }
 0x315   : > { %1461 = vmatprep.mubr.f32.mxu0 %v16896_v44  ;;  %12008 = vmatprep.mubr.f32.mxu1 %v1262_v9 }
 0x318   : > { %1462 = vmatmul.mubr.f32.gmra.mrb[8].mxu0 %v1260_v7  ;;  %12009 = vmatmul.mubr.f32.gmra.mrb[6].mxu1 %v1263_v10 }
 0x319   : > { %1467 = vmatprep.mubr.f32.mxu0 %v16896_v44  ;;  %12013 = vmatprep.mubr.msk.f32.mxu1 %vm14235_vm1, %v16896_v44 }
 0x31c   : > { %1468 = vmatmul.mubr.f32.gmra.mrb[10].mxu0 %v1261_v8 }
 0x31d   : > { %1473 = vmatprep.mubr.f32.mxu0 %v16896_v44 }
 0x320   : > { %1474 = vmatmul.mubr.f32.gmra.mrb[12].mxu0 %v1262_v9 }
 0x321   : > { %1479 = vmatprep.mubr.f32.mxu0 %v16896_v44 }
 0x324   : > { %1480 = vmatmul.mubr.f32.gmra.mrb[14].mxu0 %v1263_v10 }
 0x325   : > { %12033 = vmatprep.mubr.msk.f32.mxu0 %vm14235_vm1, %v16896_v44 }
 0x3db   : > { %v1439_v18 = vpop.f32.mrb[0].mxu0 }
 0x3dc   : > { %v14949_v19 = vadd.f32 %v1439_v18, %v14943_v16  ;;  %v1441_v20 = vpop.f32.mrb[1].mxu0 }
 0x3dd   : > { %v14954_v22 = vadd.f32 %v1441_v20, %v14946_v17 }
 0x3de   : > { %v1597_v24 = vmul.f32 %v14951_v21, %v14949_v19 }
 0x3df   : > { %v1445_v23 = vpop.f32.mrb[2].mxu0  ;;  %12012 = vmatpush3.xpose.msra.mxu1 %v14954_v22  ;;  %v14993_v39 = vpop.f32.mrb[0].mxu1 }
 0x3e0   : > { %v14960_v25 = vadd.f32 %v1445_v23, %v14943_v16  ;;  %v1447_v26 = vpop.f32.mrb[3].mxu0  ;;  %12016 = vmatprep.subr.mxu1 %v16896_v44  ;;  %v14995_v40 = vpop.f32.mrb[1].mxu1 }
 0x3e1   : > { %v14964_v27 = vadd.f32 %v1447_v26, %v14946_v17 }
 0x3e2   : > { %12014 = vmatmul.mubr.f32.vlgmr.msra.gmra.mrb[8].mxu1 %v1597_v24  ;;  %v1598_v31 = vmul.f32 %v14951_v21, %v14960_v25 }
 0x3e3   : > { %v1451_v28 = vpop.f32.mrb[4].mxu0  ;;  %12017 = vmatpush3.xpose.msra.mxu1 %v14964_v27  ;;  %12018 = vmatprep.mubr.msk.f32.mxu1 %vm14235_vm1, %v16896_v44  ;;  %v12004_v48 = vpop.f32.mrb[2].mxu1 }
 0x3e4   : > { %v14970_v29 = vadd.f32 %v1451_v28, %v14943_v16  ;;  %v1453_v30 = vpop.f32.mrb[5].mxu0  ;;  %12021 = vmatprep.subr.mxu1 %v16896_v44  ;;  %v15013_v49 = vadd.f32 %v12004_v48, %v15007_v46  ;;  %v1562_v50 = vpop.f32.mrb[3].mxu1 }
 0x3e5   : > { %v14976_v32 = vadd.f32 %v1453_v30, %v14946_v17  ;;  %v15019_v52 = vadd.f32 %v1562_v50, %v15007_v46  ;;  %v15126_v30 = vadd.f32 %v14993_v39, %v15007_v46 }
 0x3e6   : > { %12019 = vmatmul.mubr.f32.vlgmr.msra.gmra.mrb[10].mxu1 %v1598_v31  ;;  %v1599_v36 = vmul.f32 %v14951_v21, %v14970_v29  ;;  %v2286_v18 = vmul.f32 %v15066_v11, %v14970_v29  ;;  %v15130_v31 = vadd.f32 %v14995_v40, %v15007_v46 }
 0x3e7   : > { %v1457_v33 = vpop.f32.mrb[6].mxu0  ;;  %12022 = vmatpush3.xpose.msra.mxu1 %v14976_v32  ;;  %12023 = vmatprep.mubr.msk.f32.mxu1 %vm14235_vm1, %v16896_v44  ;;  %v12007_v57 = vpop.f32.mrb[4].mxu1 }
 0x3e8   : > { %v14982_v34 = vadd.f32 %v1457_v33, %v14943_v16  ;;  %v1459_v35 = vpop.f32.mrb[7].mxu0  ;;  %12026 = vmatprep.subr.mxu1 %v16896_v44  ;;  %v15031_v58 = vadd.f32 %v12007_v57, %v15007_v46  ;;  %v1572_v59 = vpop.f32.mrb[5].mxu1  ;;  %v2956_v33 = vmul.f32 %v15066_v11, %v15130_v31 }
 0x3e9   : > { %v14991_v38 = vadd.f32 %v1459_v35, %v14946_v17  ;;  %v15037_v61 = vadd.f32 %v1572_v59, %v15007_v46  ;;  %v2957_v35 = vmul.f32 %v15066_v11, %v15126_v30 }
 0x3ea   : > { %12024 = vmatmul.mubr.f32.vlgmr.msra.gmra.mrb[12].mxu1 %v1599_v36  ;;  %v1600_v45 = vmul.f32 %v14951_v21, %v14982_v34  ;;  %v2287_v20 = vmul.f32 %v15066_v11, %v14982_v34 }
 0x3eb   : > { %v1463_v41 = vpop.f32.mrb[8].mxu0  ;;  %12027 = vmatpush3.xpose.msra.mxu1 %v14991_v38  ;;  %12028 = vmatprep.mubr.msk.f32.mxu1 %vm14235_vm1, %v16896_v44  ;;  %v12010_v2 = vpop.f32.mrb[6].mxu1 }
 0x3ec   : > { %v15001_v42 = vadd.f32 %v1463_v41, %v14943_v16  ;;  %v1465_v43 = vpop.f32.mrb[9].mxu0  ;;  %12036 = vmatprep.subr.mxu1 %v16896_v44  ;;  %v15049_v3 = vadd.f32 %v12010_v2, %v15007_v46  ;;  %v1582_v4 = vpop.f32.mrb[7].mxu1 }
 0x3ed   : > { %v15010_v47 = vadd.f32 %v1465_v43, %v14946_v17  ;;  %v15055_v6 = vadd.f32 %v1582_v4, %v15007_v46 }
 0x3ee   : > { %12029 = vmatmul.mubr.f32.vlgmr.msra.gmra.mrb[14].mxu1 %v1600_v45  ;;  %v1601_v53 = vmul.f32 %v14951_v21, %v15001_v42  ;;  %v2288_v23 = vmul.f32 %v15066_v11, %v15001_v42 }
 0x3ef   : > { %12032 = vmatpush3.xpose.msra.mxu0 %v15010_v47  ;;  %v1469_v51 = vpop.f32.mrb[10].mxu0  ;;  %12038 = vmatprep.mubr.msk.f32.mxu1 %vm14235_vm1, %v16896_v44 }
 0x3f0   : > { %v15024_v54 = vadd.f32 %v1469_v51, %v14943_v16  ;;  %v1471_v55 = vpop.f32.mrb[11].mxu0  ;;  %12041 = vmatprep.subr.mxu0 %v16896_v44 }
 0x3f1   : > { %v15028_v56 = vadd.f32 %v1471_v55, %v14946_v17 }
 0x3f2   : > { %12034 = vmatmul.mubr.f32.vlgmr.msra.gmra.mrb[16].mxu0 %v1601_v53  ;;  %v1602_v0 = vmul.f32 %v14951_v21, %v15024_v54  ;;  %v2289_v24 = vmul.f32 %v15066_v11, %v15024_v54 }
 0x3f3   : > { %v1475_v60 = vpop.f32.mrb[12].mxu0  ;;  %12037 = vmatpush3.xpose.msra.mxu1 %v15028_v56  ;;  %12043 = vmatprep.mubr.msk.f32.mxu0 %vm14235_vm1, %v16896_v44 }
 0x3f4   : > { %v15040_v62 = vadd.f32 %v1475_v60, %v14943_v16  ;;  %v1477_v63 = vpop.f32.mrb[13].mxu0  ;;  %12046 = vmatprep.subr.mxu1 %v16896_v44 }
 0x3f5   : > { %v15046_v1 = vadd.f32 %v1477_v63, %v14946_v17 }
 0x3f6   : > { %12039 = vmatmul.mubr.f32.vlgmr.msra.gmra.mrb[16].mxu1 %v1602_v0  ;;  %v1603_v9 = vmul.f32 %v14951_v21, %v15040_v62  ;;  %v2290_v26 = vmul.f32 %v15066_v11, %v15040_v62 }
 0x3f7   : > { %v1481_v5 = vpop.f32.mrb[14].mxu0  ;;  %12042 = vmatpush3.xpose.msra.mxu0 %v15046_v1  ;;  %12048 = vmatprep.mubr.msk.f32.mxu1 %vm14235_vm1, %v16896_v44 }
 0x3f8   : > { %v15058_v7 = vadd.f32 %v1481_v5, %v14943_v16  ;;  %v1483_v8 = vpop.f32.mrb[15].mxu0  ;;  %12051 = vmatprep.subr.mxu0 %v16896_v44  ;;  %v2284_v16 = vmul.f32 %v15066_v11, %v14949_v19  ;;  %v15153_v5 = vld [vmem:[%s17012_s29] sm:$0xff] }
 0x3f9   : > { %v15064_v10 = vadd.f32 %v1483_v8, %v14946_v17  ;;  %v2285_v17 = vmul.f32 %v15066_v11, %v14960_v25 }
 0x3fa   : > { %12044 = vmatmul.mubr.f32.vlgmr.msra.gmra.mrb[18].mxu0 %v1603_v9  ;;  %v1604_v14 = vmul.f32 %v14951_v21, %v15058_v7  ;;  %v2291_v28 = vmul.f32 %v15066_v11, %v15058_v7 }
 0x3fb   : > { %12047 = vmatpush3.xpose.msra.mxu1 %v15064_v10  ;;  %12052 = vmatpush3.xpose.msra.mxu0 %v14954_v22 }
 0x3fc   : > { %12053 = vmatprep.mubr.msk.f32.mxu0 %vm14235_vm1, %v16896_v44  ;;  %12056 = vmatprep.subr.mxu1 %v16896_v44 }
 0x3fd   : > { %12061 = vmatprep.subr.mxu0 %v16896_v44 }
 0x3fe   : > { %12049 = vmatmul.mubr.f32.vlgmr.msra.gmra.mrb[18].mxu1 %v1604_v14  ;;  %12054 = vmatmul.mubr.f32.vlgmr.msra.gmra.mrb[20].mxu0 %v2284_v16 }
 0x3ff   : > { %12057 = vmatpush3.xpose.msra.mxu1 %v14964_v27  ;;  %12062 = vmatpush3.xpose.msra.mxu0 %v14976_v32 }
 0x400   : > { %12058 = vmatprep.mubr.msk.f32.mxu1 %vm14235_vm1, %v16896_v44  ;;  %12063 = vmatprep.mubr.msk.f32.mxu0 %vm14235_vm1, %v16896_v44 }
 0x401   : > { %12066 = vmatprep.subr.mxu1 %v16896_v44  ;;  %12071 = vmatprep.subr.mxu0 %v16896_v44 }
 0x402   : > { %12059 = vmatmul.mubr.f32.vlgmr.msra.gmra.mrb[20].mxu1 %v2285_v17  ;;  %12064 = vmatmul.mubr.f32.vlgmr.msra.gmra.mrb[22].mxu0 %v2286_v18 }
 0x403   : > { %12067 = vmatpush3.xpose.msra.mxu1 %v14991_v38  ;;  %12072 = vmatpush3.xpose.msra.mxu0 %v15010_v47 }
 0x404   : > { %12068 = vmatprep.mubr.msk.f32.mxu1 %vm14235_vm1, %v16896_v44  ;;  %12073 = vmatprep.mubr.msk.f32.mxu0 %vm14235_vm1, %v16896_v44 }
 0x405   : > { %12076 = vmatprep.subr.mxu1 %v16896_v44  ;;  %12081 = vmatprep.subr.mxu0 %v16896_v44 }
 0x406   : > { %12069 = vmatmul.mubr.f32.vlgmr.msra.gmra.mrb[22].mxu1 %v2287_v20  ;;  %12074 = vmatmul.mubr.f32.vlgmr.msra.gmra.mrb[24].mxu0 %v2288_v23 }
 0x407   : > { %12077 = vmatpush3.xpose.msra.mxu1 %v15028_v56  ;;  %12082 = vmatpush3.xpose.msra.mxu0 %v15046_v1 }
 0x408   : > { %12078 = vmatprep.mubr.msk.f32.mxu1 %vm14235_vm1, %v16896_v44  ;;  %12083 = vmatprep.mubr.msk.f32.mxu0 %vm14235_vm1, %v16896_v44 }
 0x409   : > { %12086 = vmatprep.subr.mxu1 %v16896_v44  ;;  %12091 = vmatprep.subr.mxu0 %v16896_v44 }
 0x40a   : > { %12079 = vmatmul.mubr.f32.vlgmr.msra.gmra.mrb[24].mxu1 %v2289_v24  ;;  %12084 = vmatmul.mubr.f32.vlgmr.msra.gmra.mrb[26].mxu0 %v2290_v26  ;;  %v15163_v24 = vld [vmem:[%s17013_s13 + $0x10] sm:$0xff]  ;;  %v15168_v26 = vld [vmem:[%s17013_s13 + $0x8] sm:$0xff] }
 0x40b   : > { %12087 = vmatpush3.xpose.msra.mxu1 %v15064_v10  ;;  %12088 = vmatprep.mubr.msk.f32.mxu1 %vm14235_vm1, %v16896_v44 }
 0x40c   : > { %12096 = vmatprep.subr.mxu1 %v16896_v44  ;;  %12093 = vmatprep.mubr.msk.f32.mxu0 %vm14235_vm1, %v16896_v44 }
 0x40d   : > { %12092 = vmatpush3.msra.mxu0 %v2956_v33 }
 0x40e   : > { %12089 = vmatmul.mubr.f32.vlgmr.msra.gmra.mrb[26].mxu1 %v2291_v28  ;;  %12101 = vmatprep.subr.mxu0 %v16896_v44 }
 0x40f   : > { %12098 = vmatprep.mubr.msk.f32.mxu1 %vm14235_vm1, %v16896_v44  ;;  %12097 = vmatpush3.msra.mxu1 %v2957_v35 }
 0x410   : > { %12106 = vmatprep.subr.mxu1 %v16896_v44 }
 0x4b5   : > { %v1671_v36 = vpop.f32.mrb[8].mxu1 }
 0x4b6   : > { %v12015_v41 = vpop.f32.mrb[9].mxu1 }
 0x4b9   : > { %v1741_v39 = vpop.f32.mrb[10].mxu1 }
 0x4ba   : > { %v12020_v43 = vpop.f32.mrb[11].mxu1 }
 0x4bd   : > { %v15138_v45 = vpop.f32.mrb[12].mxu1 }
 0x4be   : > { %v12025_v40 = vpop.f32.mrb[13].mxu1 }
 0x4c1   : > { %v15140_v46 = vpop.f32.mrb[14].mxu1 }
 0x4c2   : > { %v12030_v48 = vpop.f32.mrb[15].mxu1 }
 0x4c5   : > { %v15142_v50 = vpop.f32.mrb[16].mxu0 }
 0x4c6   : > { %v12035_v51 = vpop.f32.mrb[17].mxu0 }
 0x4c9   : > { %v15144_v53 = vpop.f32.mrb[16].mxu1 }
 0x4ca   : > { %v12040_v55 = vpop.f32.mrb[17].mxu1 }
 0x4cd   : > { %v15146_v57 = vpop.f32.mrb[18].mxu0 }
 0x4ce   : > { %v12045_v59 = vpop.f32.mrb[19].mxu0 }
 0x4d1   : > { %v2358_v60 = vpop.f32.mrb[20].mxu0  ;;  %v15148_v63 = vpop.f32.mrb[18].mxu1 }
 0x4d2   : > { %v2852_v0 = vmul.f32 0.17677669, %v2358_v60  ;;  %v12055_v2 = vpop.f32.mrb[21].mxu0  ;;  %v12050_v4 = vpop.f32.mrb[19].mxu1  ;;  %v15183_v60 = vld [vmem:[%s17013_s13 + $0x20] sm:$0xff] }
 0x4d4   : > { %v15156_v8 = vadd.f32 %v2852_v0, %v15153_v5  ;;  %v15188_v0 = vld [vmem:[%s17013_s13 + $0x18] sm:$0xff] }
 0x4d5   : > { %v2428_v9 = vpop.f32.mrb[20].mxu1  ;;  %v2498_v14 = vpop.f32.mrb[22].mxu0 }
 0x4d6   : > { %v2853_v16 = vmul.f32 0.17677669, %v2428_v9  ;;  %v2854_v17 = vmul.f32 0.17677669, %v2498_v14  ;;  %v12060_v18 = vpop.f32.mrb[21].mxu1  ;;  %v12065_v20 = vpop.f32.mrb[23].mxu0 }
 0x4d7   : > { %v2868_v23 = vsel %vm2181_vm2, %v15156_v8, -inf }
 0x4d8   : > { %2869 = vmax.xlane.f32.xlu0 %v2868_v23  ;;  %v15171_v28 = vadd.f32 %v2854_v17, %v15163_v24  ;;  %v15174_v33 = vadd.f32 %v2853_v16, %v15168_v26  ;;  %v2165_v23 = vmul.f32 0.17677669, %v1671_v36  ;;  %v2166_v36 = vmul.f32 0.17677669, %v1741_v39 }
 0x4d9   : > { %v2568_v35 = vpop.f32.mrb[22].mxu1  ;;  %v2638_v41 = vpop.f32.mrb[24].mxu0 }
 0x4da   : > { %v2855_v43 = vmul.f32 0.17677669, %v2568_v35  ;;  %v2856_v40 = vmul.f32 0.17677669, %v2638_v41  ;;  %v12070_v48 = vpop.f32.mrb[23].mxu1  ;;  %v12075_v51 = vpop.f32.mrb[25].mxu0 }
 0x4db   : > { %v2874_v55 = vsel %vm2181_vm2, %v15171_v28, -inf  ;;  %v2871_v59 = vsel %vm2181_vm2, %v15174_v33, -inf }
 0x4dc   : > { %2875 = vmax.xlane.f32.xlu1 %v2874_v55  ;;  %2872 = vmax.xlane.f32.xlu0 %v2871_v59  ;;  %v15191_v2 = vadd.f32 %v2856_v40, %v15183_v60  ;;  %v15194_v4 = vadd.f32 %v2855_v43, %v15188_v0  ;;  %v15203_v40 = vld [vmem:[%s17013_s13 + $0x30] sm:$0xff]  ;;  %v15208_v43 = vld [vmem:[%s17013_s13 + $0x28] sm:$0xff] }
 0x4dd   : > { %v2708_v9 = vpop.f32.mrb[24].mxu1  ;;  %v2778_v14 = vpop.f32.mrb[26].mxu0 }
 0x4de   : > { %v2857_v16 = vmul.f32 0.17677669, %v2708_v9  ;;  %v2858_v17 = vmul.f32 0.17677669, %v2778_v14  ;;  %v2880_v18 = vsel %vm2181_vm2, %v15191_v2, -inf  ;;  %v2877_v20 = vsel %vm2181_vm2, %v15194_v4, -inf }
 0x4df   : > { %v12080_v35 = vpop.f32.mrb[25].mxu1  ;;  %v12085_v41 = vpop.f32.mrb[27].mxu0 }
 0x4e0   : > { %2881 = vmax.xlane.f32.xlu0 %v2880_v18  ;;  %2878 = vmax.xlane.f32.xlu1 %v2877_v20  ;;  %v15211_v48 = vadd.f32 %v2858_v17, %v15203_v40  ;;  %v15214_v51 = vadd.f32 %v2857_v16, %v15208_v43  ;;  %v2167_v41 = vmul.f32 0.17677669, %v15138_v45  ;;  %v15222_v18 = vadd.f32 %v2165_v23, %v15153_v5  ;;  %v15227_v16 = vld [vmem:[%s17013_s13 + $0x38] sm:$0xff] }
 0x4e1   : > { %v2848_v55 = vpop.f32.mrb[26].mxu1  ;;  %v2168_v17 = vmul.f32 0.17677669, %v15140_v46  ;;  %v15236_v45 = vadd.f32 %v2166_v36, %v15168_v26  ;;  %v2169_v23 = vmul.f32 0.17677669, %v15142_v50 }
 0x4e2   : > { %v2859_v59 = vmul.f32 0.17677669, %v2848_v55  ;;  %v2886_v9 = vsel %vm2181_vm2, %v15211_v48, -inf  ;;  %v2883_v14 = vsel %vm2181_vm2, %v15214_v51, -inf  ;;  %v12090_v35 = vpop.f32.mrb[27].mxu1  ;;  %v2182_v55 = vsel %vm2181_vm2, %v15222_v18, -inf }
 0x4e3   : > { %v15242_v35 = vadd.f32 %v2167_v41, %v15163_v24  ;;  %v15247_v46 = vadd.f32 %v2168_v17, %v15188_v0  ;;  %v2170_v36 = vmul.f32 0.17677669, %v15144_v53 }
 0x4e4   : > { %2887 = vmax.xlane.f32.xlu0 %v2886_v9  ;;  %2884 = vmax.xlane.f32.xlu1 %v2883_v14  ;;  %v15230_v39 = vadd.f32 %v2859_v59, %v15227_v16  ;;  %v2185_v59 = vsel %vm2181_vm2, %v15236_v45, -inf  ;;  %v2171_v9 = vmul.f32 0.17677669, %v15146_v57  ;;  %v15254_v14 = vadd.f32 %v2169_v23, %v15183_v60 }
 0x4e5   : > { %v2188_v50 = vsel %vm2181_vm2, %v15242_v35, -inf  ;;  %v2191_v41 = vsel %vm2181_vm2, %v15247_v46, -inf  ;;  %v15265_v53 = vadd.f32 %v2170_v36, %v15208_v43 }
 0x4e6   : > { %v2889_v20 = vsel %vm2181_vm2, %v15230_v39, -inf  ;;  %v2194_v17 = vsel %vm2181_vm2, %v15254_v14, -inf  ;;  %v15262_v57 = vadd.f32 %v2171_v9, %v15203_v40 }
 0x4e8   : > { %2183 = vmax.xlane.f32.xlu0 %v2182_v55  ;;  %2890 = vmax.xlane.f32.xlu1 %v2889_v20  ;;  %v2172_v20 = vmul.f32 0.17677669, %v15148_v63  ;;  %v2200_v23 = vsel %vm2181_vm2, %v15262_v57, -inf  ;;  %v2197_v55 = vsel %vm2181_vm2, %v15265_v53, -inf }
 0x4ec   : > { %2189 = vmax.xlane.f32.xlu0 %v2188_v50  ;;  %2186 = vmax.xlane.f32.xlu1 %v2185_v59  ;;  %v15272_v59 = vadd.f32 %v2172_v20, %v15227_v16 }
 0x4ee   : > { %v2203_v63 = vsel %vm2181_vm2, %v15272_v59, -inf }
 0x4f0   : > { %2195 = vmax.xlane.f32.xlu0 %v2194_v17  ;;  %2192 = vmax.xlane.f32.xlu1 %v2191_v41 }
 0x4f4   : > { %2201 = vmax.xlane.f32.xlu0 %v2200_v23  ;;  %2198 = vmax.xlane.f32.xlu1 %v2197_v55 }
 0x4f8   : > { %2204 = vmax.xlane.f32.xlu1 %v2203_v63 }
 0x565   : > { %v2870_v9 = vpop.xlane.xlu0 %2869 }
 0x566   : > { %v2892_v36 = vsub.f32 %v15156_v8, %v2870_v9 }
 0x568   : > { %v2900_v50 = vmul.f32 1.442695, %v2892_v36 }
 0x569   : > { %v2876_v41 = vpop.xlane.xlu1 %2875  ;;  %v2873_v17 = vpop.xlane.xlu0 %2872 }
 0x56a   : > { %13513 = vpow2.f32 %v2900_v50  ;;  %v2894_v44 = vsub.f32 %v15171_v28, %v2876_v41  ;;  %v2893_v15 = vsub.f32 %v15174_v33, %v2873_v17 }
 0x56c   : > { %v2904_v37 = vmul.f32 1.442695, %v2894_v44  ;;  %v2902_v20 = vmul.f32 1.442695, %v2893_v15 }
 0x56d   : > { %v2882_v13 = vpop.xlane.xlu0 %2881  ;;  %v2879_v23 = vpop.xlane.xlu1 %2878 }
 0x56e   : > { %13515 = vpow2.f32 %v2904_v37  ;;  %v2896_v55 = vsub.f32 %v15191_v2, %v2882_v13  ;;  %v2895_v63 = vsub.f32 %v15194_v4, %v2879_v23 }
 0x56f   : > { %13517 = vpow2.f32 %v2902_v20 }
 0x570   : > { %v2908_v12 = vmul.f32 1.442695, %v2896_v55  ;;  %v2906_v8 = vmul.f32 1.442695, %v2895_v63 }
 0x571   : > { %v2888_v9 = vpop.xlane.xlu0 %2887  ;;  %v2885_v36 = vpop.xlane.xlu1 %2884 }
 0x572   : > { %13519 = vpow2.f32 %v2908_v12  ;;  %v2898_v50 = vsub.f32 %v15211_v48, %v2888_v9  ;;  %v2897_v28 = vsub.f32 %v15214_v51, %v2885_v36 }
 0x573   : > { %13521 = vpow2.f32 %v2906_v8 }
 0x574   : > { %v15283_v44 = vpop.eup %13513  ;;  %v2912_v15 = vmul.f32 1.442695, %v2898_v50  ;;  %v2910_v33 = vmul.f32 1.442695, %v2897_v28 }
 0x575   : > { %v2184_v37 = vpop.xlane.xlu0 %2183  ;;  %v2891_v41 = vpop.xlane.xlu1 %2890  ;;  %v2916_v13 = vsel %vm2181_vm2, %v15283_v44, 0.0 }
 0x576   : > { %13523 = vpow2.f32 %v2912_v15  ;;  %v2206_v2 = vsub.f32 %v15222_v18, %v2184_v37  ;;  %v2899_v4 = vsub.f32 %v15230_v39, %v2891_v41  ;;  %2917 = vadd.xlane.f32.xlu0 %v2916_v13 }
 0x577   : > { %13525 = vpow2.f32 %v2910_v33 }
 0x578   : > { %v15289_v12 = vpop.eup %13515  ;;  %v2214_v48 = vmul.f32 1.442695, %v2206_v2  ;;  %v2914_v51 = vmul.f32 1.442695, %v2899_v4 }
 0x579   : > { %v15291_v17 = vpop.eup %13517  ;;  %v2190_v20 = vpop.xlane.xlu0 %2189  ;;  %v2922_v55 = vsel %vm2181_vm2, %v15289_v12, 0.0 }
 0x57a   : > { %v2187_v23 = vpop.xlane.xlu1 %2186  ;;  %13527 = vpow2.f32 %v2214_v48  ;;  %v2208_v63 = vsub.f32 %v15242_v35, %v2190_v20  ;;  %2923 = vadd.xlane.f32.xlu0 %v2922_v55  ;;  %v2919_v39 = vsel %vm2181_vm2, %v15291_v17, 0.0 }
 0x57b   : > { %v2207_v18 = vsub.f32 %v15236_v45, %v2187_v23  ;;  %13529 = vpow2.f32 %v2914_v51  ;;  %2920 = vadd.xlane.f32.xlu1 %v2919_v39 }
 0x57c   : > { %v15299_v8 = vpop.eup %13519  ;;  %v2218_v9 = vmul.f32 1.442695, %v2208_v63 }
 0x57d   : > { %v2216_v36 = vmul.f32 1.442695, %v2207_v18  ;;  %v15301_v50 = vpop.eup %13521  ;;  %v2196_v28 = vpop.xlane.xlu0 %2195  ;;  %v2928_v33 = vsel %vm2181_vm2, %v15299_v8, 0.0 }
 0x57e   : > { %v2193_v15 = vpop.xlane.xlu1 %2192  ;;  %13531 = vpow2.f32 %v2218_v9  ;;  %v2210_v45 = vsub.f32 %v15254_v14, %v2196_v28  ;;  %2929 = vadd.xlane.f32.xlu0 %v2928_v33  ;;  %v2925_v37 = vsel %vm2181_vm2, %v15301_v50, 0.0 }
 0x57f   : > { %v2209_v35 = vsub.f32 %v15247_v46, %v2193_v15  ;;  %13533 = vpow2.f32 %v2216_v36  ;;  %2926 = vadd.xlane.f32.xlu1 %v2925_v37 }
 0x580   : > { %v15309_v41 = vpop.eup %13523  ;;  %v2222_v13 = vmul.f32 1.442695, %v2210_v45 }
 0x581   : > { %v2220_v2 = vmul.f32 1.442695, %v2209_v35  ;;  %v15311_v4 = vpop.eup %13525  ;;  %v2202_v48 = vpop.xlane.xlu0 %2201  ;;  %v2934_v20 = vsel %vm2181_vm2, %v15309_v41, 0.0 }
 0x582   : > { %v2199_v51 = vpop.xlane.xlu1 %2198  ;;  %13535 = vpow2.f32 %v2222_v13  ;;  %v2212_v46 = vsub.f32 %v15262_v57, %v2202_v48  ;;  %2935 = vadd.xlane.f32.xlu0 %v2934_v20  ;;  %v2931_v23 = vsel %vm2181_vm2, %v15311_v4, 0.0 }
 0x583   : > { %v2211_v14 = vsub.f32 %v15265_v53, %v2199_v51  ;;  %13537 = vpow2.f32 %v2220_v2  ;;  %2932 = vadd.xlane.f32.xlu1 %v2931_v23 }
 0x584   : > { %v15319_v55 = vpop.eup %13527  ;;  %v2226_v63 = vmul.f32 1.442695, %v2212_v46 }
 0x585   : > { %v2224_v18 = vmul.f32 1.442695, %v2211_v14  ;;  %v15321_v39 = vpop.eup %13529  ;;  %v2230_v36 = vsel %vm2181_vm2, %v15319_v55, 0.0 }
 0x586   : > { %v2205_v9 = vpop.xlane.xlu1 %2204  ;;  %13539 = vpow2.f32 %v2226_v63  ;;  %2231 = vadd.xlane.f32.xlu0 %v2230_v36  ;;  %v2937_v53 = vsel %vm2181_vm2, %v15321_v39, 0.0 }
 0x587   : > { %v2213_v57 = vsub.f32 %v15272_v59, %v2205_v9  ;;  %13541 = vpow2.f32 %v2224_v18  ;;  %2938 = vadd.xlane.f32.xlu1 %v2937_v53 }
 0x588   : > { %v15328_v28 = vpop.eup %13531 }
 0x589   : > { %v2228_v15 = vmul.f32 1.442695, %v2213_v57  ;;  %v15330_v33 = vpop.eup %13533  ;;  %v2236_v45 = vsel %vm2181_vm2, %v15328_v28, 0.0 }
 0x58a   : > { %2237 = vadd.xlane.f32.xlu0 %v2236_v45  ;;  %v2233_v35 = vsel %vm2181_vm2, %v15330_v33, 0.0 }
 0x58b   : > { %13543 = vpow2.f32 %v2228_v15  ;;  %2234 = vadd.xlane.f32.xlu1 %v2233_v35 }
 0x58c   : > { %v15336_v59 = vpop.eup %13535 }
 0x58d   : > { %v15338_v37 = vpop.eup %13537  ;;  %v2242_v13 = vsel %vm2181_vm2, %v15336_v59, 0.0 }
 0x58e   : > { %2243 = vadd.xlane.f32.xlu0 %v2242_v13  ;;  %v2239_v2 = vsel %vm2181_vm2, %v15338_v37, 0.0  ;;  %v2958_v13 = vmul.f32 %v15066_v11, %v15019_v52 }
 0x58f   : > { %2240 = vadd.xlane.f32.xlu1 %v2239_v2 }
 0x590   : > { %v15344_v48 = vpop.eup %13539 }
 0x591   : > { %v15346_v51 = vpop.eup %13541  ;;  %v2248_v20 = vsel %vm2181_vm2, %v15344_v48, 0.0 }
 0x592   : > { %2249 = vadd.xlane.f32.xlu0 %v2248_v20  ;;  %v2245_v46 = vsel %vm2181_vm2, %v15346_v51, 0.0  ;;  %v17014_v20 = vmov 0.0  }
 0x593   : > { %2246 = vadd.xlane.f32.xlu1 %v2245_v46 }
 0x595   : > { %v15352_v14 = vpop.eup %13543 }
 0x596   : > { %v2251_v23 = vsel %vm2181_vm2, %v15352_v14, 0.0 }
 0x597   : > { %2252 = vadd.xlane.f32.xlu1 %v2251_v23 }
 0x603   : > { %v2918_v63 = vpop.xlane.xlu0 %2917 }
 0x604   : > { %13545 = vrcp.f32 %v2918_v63 }
 0x607   : > { %v2924_v18 = vpop.xlane.xlu0 %2923 }
 0x608   : > { %13547 = vrcp.f32 %v2924_v18  ;;  %v2921_v9 = vpop.xlane.xlu1 %2920 }
 0x609   : > { %13549 = vrcp.f32 %v2921_v9  ;;  %v2960_v9 = vmul.f32 %v15066_v11, %v15037_v61 }
 0x60b   : > { %v2930_v36 = vpop.xlane.xlu0 %2929 }
 0x60c   : > { %13551 = vrcp.f32 %v2930_v36  ;;  %v2927_v57 = vpop.xlane.xlu1 %2926  ;;  %v2959_v36 = vmul.f32 %v15066_v11, %v15013_v49 }
 0x60d   : > { %13553 = vrcp.f32 %v2927_v57 }
 0x60e   : > { %v13546_v53 = vpop.eup %13545 }
 0x60f   : > { %v2948_v15 = vmul.f32 %v13546_v53, %v15283_v44  ;;  %v2936_v45 = vpop.xlane.xlu0 %2935 }
 0x610   : > { %13555 = vrcp.f32 %v2936_v45  ;;  %v2933_v35 = vpop.xlane.xlu1 %2932 }
 0x611   : > { %13557 = vrcp.f32 %v2933_v35  ;;  %12094 = vmatmul.mubr.msk.f32.vlgmr.msra.gmra.mrb[28].mxu0 %vm2181_vm2, %v2948_v15  ;;  %v2962_v35 = vmul.f32 %v15066_v11, %v15055_v6 }
 0x612   : > { %v13548_v2 = vpop.eup %13547  ;;  %12102 = vmatpush3.msra.mxu0 %v2958_v13  ;;  %12103 = vmatprep.mubr.msk.f32.mxu0 %vm14235_vm1, %v17014_v20 }
 0x613   : > { %v13550_v46 = vpop.eup %13549  ;;  %v2950_v23 = vmul.f32 %v13548_v2, %v15289_v12  ;;  %v2232_v63 = vpop.xlane.xlu0 %2231  ;;  %12111 = vmatprep.subr.mxu0 %v17014_v20 }
 0x614   : > { %v2949_v44 = vmul.f32 %v13550_v46, %v15291_v17  ;;  %13559 = vrcp.f32 %v2232_v63  ;;  %v2939_v18 = vpop.xlane.xlu1 %2938 }
 0x615   : > { %13561 = vrcp.f32 %v2939_v18  ;;  %12104 = vmatmul.mubr.msk.f32.vlgmr.msra.gmra.mrb[30].mxu0 %vm2181_vm2, %v2950_v23 }
 0x616   : > { %v13552_v57 = vpop.eup %13551  ;;  %12099 = vmatmul.mubr.msk.f32.vlgmr.msra.gmra.mrb[28].mxu1 %vm2181_vm2, %v2949_v44  ;;  %12112 = vmatpush3.msra.mxu0 %v2960_v9  ;;  %v2270_v44 = vmul.f32 %v14951_v21, %v15130_v31 }
 0x617   : > { %v13554_v12 = vpop.eup %13553  ;;  %v2952_v53 = vmul.f32 %v13552_v57, %v15299_v8  ;;  %12107 = vmatpush3.msra.mxu1 %v2959_v36  ;;  %v2238_v17 = vpop.xlane.xlu0 %2237  ;;  %12108 = vmatprep.mubr.msk.f32.mxu1 %vm14235_vm1, %v17014_v20  ;;  %v2961_v8 = vmul.f32 %v15066_v11, %v15031_v58 }
 0x618   : > { %v2951_v15 = vmul.f32 %v13554_v12, %v15301_v50  ;;  %13563 = vrcp.f32 %v2238_v17  ;;  %v2235_v45 = vpop.xlane.xlu1 %2234  ;;  %12113 = vmatprep.mubr.msk.f32.mxu0 %vm14235_vm1, %v17014_v20  ;;  %12116 = vmatprep.subr.mxu1 %v17014_v20 }
 0x619   : > { %13565 = vrcp.f32 %v2235_v45  ;;  %12121 = vmatprep.subr.mxu0 %v17014_v20  ;;  %12114 = vmatmul.mubr.msk.f32.vlgmr.msra.gmra.mrb[32].mxu0 %vm2181_vm2, %v2952_v53 }
 0x61a   : > { %v13556_v13 = vpop.eup %13555  ;;  %12109 = vmatmul.mubr.msk.f32.vlgmr.msra.gmra.mrb[30].mxu1 %vm2181_vm2, %v2951_v15  ;;  %12122 = vmatpush3.msra.mxu0 %v2962_v35  ;;  %v2274_v35 = vmul.f32 %v14951_v21, %v15037_v61 }
 0x61b   : > { %v13558_v50 = vpop.eup %13557  ;;  %v2954_v2 = vmul.f32 %v13556_v13, %v15309_v41  ;;  %12117 = vmatpush3.msra.mxu1 %v2961_v8  ;;  %v2244_v46 = vpop.xlane.xlu0 %2243  ;;  %12118 = vmatprep.mubr.msk.f32.mxu1 %vm14235_vm1, %v17014_v20  ;;  %v2963_v41 = vmul.f32 %v15066_v11, %v15049_v3  ;;  %v2272_v11 = vmul.f32 %v14951_v21, %v15019_v52 }
 0x61c   : > { %v2953_v23 = vmul.f32 %v13558_v50, %v15311_v4  ;;  %13567 = vrcp.f32 %v2244_v46  ;;  %v2241_v63 = vpop.xlane.xlu1 %2240  ;;  %12123 = vmatprep.mubr.msk.f32.mxu0 %vm14235_vm1, %v17014_v20  ;;  %12126 = vmatprep.subr.mxu1 %v17014_v20 }
 0x61d   : > { %13569 = vrcp.f32 %v2241_v63  ;;  %12131 = vmatprep.subr.mxu0 %v17014_v20  ;;  %12124 = vmatmul.mubr.msk.f32.vlgmr.msra.gmra.mrb[34].mxu0 %vm2181_vm2, %v2954_v2  ;;  %v2276_v2 = vmul.f32 %v14951_v21, %v15055_v6 }
 0x61e   : > { %v13560_v18 = vpop.eup %13559  ;;  %12119 = vmatmul.mubr.msk.f32.vlgmr.msra.gmra.mrb[32].mxu1 %vm2181_vm2, %v2953_v23  ;;  %12132 = vmatpush3.msra.mxu0 %v2270_v44  ;;  %v2277_v44 = vmul.f32 %v14951_v21, %v15049_v3 }
 0x61f   : > { %v13562_v4 = vpop.eup %13561  ;;  %v2262_v9 = vmul.f32 %v13560_v18, %v15319_v55  ;;  %12127 = vmatpush3.msra.mxu1 %v2963_v41  ;;  %v2250_v36 = vpop.xlane.xlu0 %2249  ;;  %12128 = vmatprep.mubr.msk.f32.mxu1 %vm14235_vm1, %v17014_v20  ;;  %v2271_v55 = vmul.f32 %v14951_v21, %v15126_v30 }
 0x620   : > { %v2955_v57 = vmul.f32 %v13562_v4, %v15321_v39  ;;  %13571 = vrcp.f32 %v2250_v36  ;;  %v2247_v12 = vpop.xlane.xlu1 %2246  ;;  %12133 = vmatprep.mubr.msk.f32.mxu0 %vm14235_vm1, %v17014_v20  ;;  %12136 = vmatprep.subr.mxu1 %v17014_v20 }
 0x621   : > { %13573 = vrcp.f32 %v2247_v12  ;;  %12141 = vmatprep.subr.mxu0 %v17014_v20  ;;  %12134 = vmatmul.mubr.msk.f32.vlgmr.msra.gmra.mrb[28].mxu0 %vm2181_vm2, %v2262_v9 }
 0x622   : > { %v13564_v53 = vpop.eup %13563  ;;  %12129 = vmatmul.mubr.msk.f32.vlgmr.msra.gmra.mrb[34].mxu1 %vm2181_vm2, %v2955_v57  ;;  %12142 = vmatpush3.msra.mxu0 %v2272_v11 }
 0x623   : > { %v13566_v39 = vpop.eup %13565  ;;  %v2264_v17 = vmul.f32 %v13564_v53, %v15328_v28  ;;  %12137 = vmatpush3.msra.mxu1 %v2271_v55  ;;  %12138 = vmatprep.mubr.msk.f32.mxu1 %vm14235_vm1, %v17014_v20  ;;  %v2273_v28 = vmul.f32 %v14951_v21, %v15013_v49 }
 0x624   : > { %v2263_v15 = vmul.f32 %v13566_v39, %v15330_v33  ;;  %v2253_v45 = vpop.xlane.xlu1 %2252  ;;  %12143 = vmatprep.mubr.msk.f32.mxu0 %vm14235_vm1, %v17014_v20  ;;  %12146 = vmatprep.subr.mxu1 %v17014_v20 }
 0x625   : > { %13575 = vrcp.f32 %v2253_v45  ;;  %12151 = vmatprep.subr.mxu0 %v17014_v20  ;;  %12144 = vmatmul.mubr.msk.f32.vlgmr.msra.gmra.mrb[30].mxu0 %vm2181_vm2, %v2264_v17 }
 0x626   : > { %v13568_v8 = vpop.eup %13567  ;;  %12139 = vmatmul.mubr.msk.f32.vlgmr.msra.gmra.mrb[28].mxu1 %vm2181_vm2, %v2263_v15  ;;  %12152 = vmatpush3.msra.mxu0 %v2274_v35 }
 0x627   : > { %v13570_v33 = vpop.eup %13569  ;;  %v2266_v13 = vmul.f32 %v13568_v8, %v15336_v59  ;;  %12147 = vmatpush3.msra.mxu1 %v2273_v28  ;;  %12148 = vmatprep.mubr.msk.f32.mxu1 %vm14235_vm1, %v17014_v20  ;;  %v2275_v59 = vmul.f32 %v14951_v21, %v15031_v58 }
 0x628   : > { %v2265_v50 = vmul.f32 %v13570_v33, %v15338_v37  ;;  %12153 = vmatprep.mubr.msk.f32.mxu0 %vm14235_vm1, %v17014_v20  ;;  %12156 = vmatprep.subr.mxu1 %v17014_v20 }
 0x629   : > { %12161 = vmatprep.subr.mxu0 %v17014_v20  ;;  %12154 = vmatmul.mubr.msk.f32.vlgmr.msra.gmra.mrb[32].mxu0 %vm2181_vm2, %v2266_v13 }
 0x62a   : > { %v13572_v46 = vpop.eup %13571  ;;  %12149 = vmatmul.mubr.msk.f32.vlgmr.msra.gmra.mrb[30].mxu1 %vm2181_vm2, %v2265_v50  ;;  %12162 = vmatpush3.msra.mxu0 %v2276_v2 }
 0x62b   : > { %v13574_v37 = vpop.eup %13573  ;;  %v2268_v23 = vmul.f32 %v13572_v46, %v15344_v48  ;;  %12157 = vmatpush3.msra.mxu1 %v2275_v59  ;;  %12158 = vmatprep.mubr.msk.f32.mxu1 %vm14235_vm1, %v17014_v20 }
 0x62c   : > { %v2267_v63 = vmul.f32 %v13574_v37, %v15346_v51  ;;  %12163 = vmatprep.mubr.msk.f32.mxu0 %vm14235_vm1, %v17014_v20  ;;  %12166 = vmatprep.subr.mxu1 %v17014_v20  ;;  %v15457_v51 = vld [vmem:[#allocation8 + $0x2] ss:$0 sm:$0xff] }
 0x62d   : > { %12164 = vmatmul.mubr.msk.f32.vlgmr.msra.gmra.mrb[34].mxu0 %vm2181_vm2, %v2268_v23  ;;  %12171 = vmatprep.subr.mxu0 %v17014_v20  ;;  %v4138_v21 = vmul.f32 %v15457_v51, %v14949_v19  ;;  %v4139_v18 = vmul.f32 %v15457_v51, %v14960_v25  ;;  %v4142_v4 = vmul.f32 %v15457_v51, %v15001_v42 }
 0x62e   : > { %12159 = vmatmul.mubr.msk.f32.vlgmr.msra.gmra.mrb[32].mxu1 %vm2181_vm2, %v2267_v63  ;;  %12173 = vmatprep.mubr.msk.f32.mxu0 %vm14235_vm1, %v17014_v20  ;;  %v4141_v9 = vmul.f32 %v15457_v51, %v14982_v34  ;;  %v4144_v36 = vmul.f32 %v15457_v51, %v15040_v62  ;;  %v4143_v57 = vmul.f32 %v15457_v51, %v15024_v54 }
 0x62f   : > { %v13576_v48 = vpop.eup %13575  ;;  %12167 = vmatpush3.msra.mxu1 %v2277_v44  ;;  %12168 = vmatprep.mubr.msk.f32.mxu1 %vm14235_vm1, %v17014_v20  ;;  %v4810_v12 = vmul.f32 %v15457_v51, %v15130_v31  ;;  %v4145_v11 = vmul.f32 %v15457_v51, %v15058_v7  ;;  %v4811_v55 = vmul.f32 %v15457_v51, %v15126_v30 }
 0x630   : > { %v2269_v41 = vmul.f32 %v13576_v48, %v15352_v14  ;;  %12176 = vmatprep.subr.mxu1 %v17014_v20  ;;  %v4140_v14 = vmul.f32 %v15457_v51, %v14970_v29 }
 0x631   : > { %12172 = vmatpush3.xpose.msra.mxu0 %v14954_v22 }
 0x632   : > { %12169 = vmatmul.mubr.msk.f32.vlgmr.msra.gmra.mrb[34].mxu1 %vm2181_vm2, %v2269_v41  ;;  %12181 = vmatprep.subr.mxu0 %v17014_v20 }
 0x633   : > { %12178 = vmatprep.mubr.msk.f32.mxu1 %vm14235_vm1, %v17014_v20 }
 0x634   : > { %12174 = vmatmul.mubr.f32.vlgmr.msra.gmra.mrb[36].mxu0 %v4138_v21 }
 0x635   : > { %12182 = vmatpush3.xpose.msra.mxu0 %v14976_v32  ;;  %12183 = vmatprep.mubr.msk.f32.mxu0 %vm14235_vm1, %v17014_v20 }
 0x636   : > { %12177 = vmatpush3.xpose.msra.mxu1 %v14964_v27  ;;  %12191 = vmatprep.subr.mxu0 %v17014_v20 }
 0x637   : > { %12186 = vmatprep.subr.mxu1 %v17014_v20 }
 0x638   : > { %12184 = vmatmul.mubr.f32.vlgmr.msra.gmra.mrb[38].mxu0 %v4140_v14 }
 0x639   : > { %12179 = vmatmul.mubr.f32.vlgmr.msra.gmra.mrb[36].mxu1 %v4139_v18  ;;  %12192 = vmatpush3.xpose.msra.mxu0 %v15010_v47 }
 0x63a   : > { %12187 = vmatpush3.xpose.msra.mxu1 %v14991_v38  ;;  %12188 = vmatprep.mubr.msk.f32.mxu1 %vm14235_vm1, %v17014_v20 }
 0x63b   : > { %12193 = vmatprep.mubr.msk.f32.mxu0 %vm14235_vm1, %v17014_v20  ;;  %12196 = vmatprep.subr.mxu1 %v17014_v20 }
 0x63c   : > { %12194 = vmatmul.mubr.f32.vlgmr.msra.gmra.mrb[40].mxu0 %v4142_v4  ;;  %12201 = vmatprep.subr.mxu0 %v17014_v20 }
 0x63d   : > { %12189 = vmatmul.mubr.f32.vlgmr.msra.gmra.mrb[38].mxu1 %v4141_v9  ;;  %12202 = vmatpush3.xpose.msra.mxu0 %v15046_v1 }
 0x63e   : > { %12197 = vmatpush3.xpose.msra.mxu1 %v15028_v56  ;;  %12198 = vmatprep.mubr.msk.f32.mxu1 %vm14235_vm1, %v17014_v20 }
 0x63f   : > { %12203 = vmatprep.mubr.msk.f32.mxu0 %vm14235_vm1, %v17014_v20  ;;  %12206 = vmatprep.subr.mxu1 %v17014_v20 }
 0x640   : > { %12204 = vmatmul.mubr.f32.vlgmr.msra.gmra.mrb[42].mxu0 %v4144_v36  ;;  %12211 = vmatprep.subr.mxu0 %v17014_v20 }
 0x641   : > { %12199 = vmatmul.mubr.f32.vlgmr.msra.gmra.mrb[40].mxu1 %v4143_v57  ;;  %12212 = vmatpush3.msra.mxu0 %v4810_v12 }
 0x642   : > { %12207 = vmatpush3.xpose.msra.mxu1 %v15064_v10  ;;  %12208 = vmatprep.mubr.msk.f32.mxu1 %vm14235_vm1, %v17014_v20 }
 0x643   : > { %12216 = vmatprep.subr.mxu1 %v17014_v20  ;;  %12213 = vmatprep.mubr.msk.f32.mxu0 %vm14235_vm1, %v17014_v20 }
 0x644   : > { %12221 = vmatprep.subr.mxu0 %v17014_v20 }
 0x645   : > { %12209 = vmatmul.mubr.f32.vlgmr.msra.gmra.mrb[42].mxu1 %v4145_v11 }
 0x646   : > { %12217 = vmatpush3.msra.mxu1 %v4811_v55  ;;  %12218 = vmatprep.mubr.msk.f32.mxu1 %vm14235_vm1, %v17014_v20 }
 0x647   : > { %12226 = vmatprep.subr.mxu1 %v17014_v20 }
 0x707   : > { %v4212_v53 = vpop.f32.mrb[36].mxu0 }
 0x708   : > { %v4706_v39 = vmul.f32 0.17677669, %v4212_v53  ;;  %v12175_v17 = vpop.f32.mrb[37].mxu0 }
 0x70a   : > { %v4714_v15 = vadd.f32 %v4706_v39, %v15153_v5 }
 0x70b   : > { %v4352_v45 = vpop.f32.mrb[38].mxu0 }
 0x70c   : > { %v4282_v35 = vpop.f32.mrb[36].mxu1  ;;  %v4708_v28 = vmul.f32 0.17677669, %v4352_v45  ;;  %v12185_v8 = vpop.f32.mrb[39].mxu0  ;;  %v4722_v33 = vsel %vm2181_vm2, %v4714_v15, -inf }
 0x70d   : > { %v4707_v13 = vmul.f32 0.17677669, %v4282_v35  ;;  %v12180_v50 = vpop.f32.mrb[37].mxu1  ;;  %4723 = vmax.xlane.f32.xlu0 %v4722_v33 }
 0x70e   : > { %v4716_v2 = vadd.f32 %v4708_v28, %v15163_v24 }
 0x70f   : > { %v4492_v59 = vpop.f32.mrb[40].mxu0  ;;  %v4715_v46 = vadd.f32 %v4707_v13, %v15168_v26 }
 0x710   : > { %v4422_v37 = vpop.f32.mrb[38].mxu1  ;;  %v4710_v23 = vmul.f32 0.17677669, %v4492_v59  ;;  %v12195_v63 = vpop.f32.mrb[41].mxu0  ;;  %v4728_v44 = vsel %vm2181_vm2, %v4716_v2, -inf }
 0x711   : > { %v4709_v5 = vmul.f32 0.17677669, %v4422_v37  ;;  %v12190_v48 = vpop.f32.mrb[39].mxu1  ;;  %4729 = vmax.xlane.f32.xlu0 %v4728_v44  ;;  %v4725_v41 = vsel %vm2181_vm2, %v4715_v46, -inf }
 0x712   : > { %4726 = vmax.xlane.f32.xlu1 %v4725_v41  ;;  %v4718_v21 = vadd.f32 %v4710_v23, %v15183_v60 }
 0x713   : > { %v4632_v14 = vpop.f32.mrb[42].mxu0  ;;  %v4717_v18 = vadd.f32 %v4709_v5, %v15188_v0 }
 0x714   : > { %v4562_v24 = vpop.f32.mrb[40].mxu1  ;;  %v4712_v4 = vmul.f32 0.17677669, %v4632_v14  ;;  %v12205_v9 = vpop.f32.mrb[43].mxu0  ;;  %v4734_v26 = vsel %vm2181_vm2, %v4718_v21, -inf }
 0x715   : > { %v4711_v36 = vmul.f32 0.17677669, %v4562_v24  ;;  %v12200_v57 = vpop.f32.mrb[41].mxu1  ;;  %4735 = vmax.xlane.f32.xlu0 %v4734_v26  ;;  %v4731_v12 = vsel %vm2181_vm2, %v4717_v18, -inf }
 0x716   : > { %4732 = vmax.xlane.f32.xlu1 %v4731_v12  ;;  %v4720_v11 = vadd.f32 %v4712_v4, %v15203_v40 }
 0x717   : > { %v4719_v55 = vadd.f32 %v4711_v36, %v15208_v43 }
 0x718   : > { %v4702_v53 = vpop.f32.mrb[42].mxu1  ;;  %v4740_v60 = vsel %vm2181_vm2, %v4720_v11, -inf }
 0x719   : > { %v4713_v39 = vmul.f32 0.17677669, %v4702_v53  ;;  %v12210_v0 = vpop.f32.mrb[43].mxu1  ;;  %4741 = vmax.xlane.f32.xlu0 %v4740_v60  ;;  %v4737_v17 = vsel %vm2181_vm2, %v4719_v55, -inf }
 0x71a   : > { %4738 = vmax.xlane.f32.xlu1 %v4737_v17 }
 0x71b   : > { %v4721_v45 = vadd.f32 %v4713_v39, %v15227_v16 }
 0x71d   : > { %v4743_v35 = vsel %vm2181_vm2, %v4721_v45, -inf }
 0x71e   : > { %4744 = vmax.xlane.f32.xlu1 %v4743_v35 }
 0x79a   : > { %v4724_v28 = vpop.xlane.xlu0 %4723 }
 0x79b   : > { %v4746_v8 = vsub.f32 %v4714_v15, %v4724_v28 }
 0x79d   : > { %v4754_v33 = vmul.f32 1.442695, %v4746_v8 }
 0x79e   : > { %v4730_v40 = vpop.xlane.xlu0 %4729 }
 0x79f   : > { %13577 = vpow2.f32 %v4754_v33  ;;  %v4748_v43 = vsub.f32 %v4716_v2, %v4730_v40  ;;  %v4727_v13 = vpop.xlane.xlu1 %4726 }
 0x7a0   : > { %v4747_v50 = vsub.f32 %v4715_v46, %v4727_v13 }
 0x7a1   : > { %v4758_v59 = vmul.f32 1.442695, %v4748_v43 }
 0x7a2   : > { %v4756_v37 = vmul.f32 1.442695, %v4747_v50  ;;  %v4736_v23 = vpop.xlane.xlu0 %4735 }
 0x7a3   : > { %13579 = vpow2.f32 %v4758_v59  ;;  %v4750_v63 = vsub.f32 %v4718_v21, %v4736_v23  ;;  %v4733_v44 = vpop.xlane.xlu1 %4732 }
 0x7a4   : > { %13581 = vpow2.f32 %v4756_v37  ;;  %v4749_v5 = vsub.f32 %v4717_v18, %v4733_v44  ;;  %v4812_v44 = vmul.f32 %v15457_v51, %v15019_v52 }
 0x7a5   : > { %v4762_v16 = vmul.f32 1.442695, %v4750_v63 }
 0x7a6   : > { %v4760_v48 = vmul.f32 1.442695, %v4749_v5  ;;  %v4742_v41 = vpop.xlane.xlu0 %4741 }
 0x7a7   : > { %13583 = vpow2.f32 %v4762_v16  ;;  %v4752_v14 = vsub.f32 %v4720_v11, %v4742_v41  ;;  %v4739_v15 = vpop.xlane.xlu1 %4738 }
 0x7a8   : > { %13585 = vpow2.f32 %v4760_v48  ;;  %v4751_v24 = vsub.f32 %v4719_v55, %v4739_v15  ;;  %v4814_v15 = vmul.f32 %v15457_v51, %v15037_v61 }
 0x7a9   : > { %v13578_v4 = vpop.eup %13577  ;;  %v4766_v2 = vmul.f32 1.442695, %v4752_v14 }
 0x7aa   : > { %v4764_v9 = vmul.f32 1.442695, %v4751_v24  ;;  %v4770_v46 = vsel %vm2181_vm2, %v13578_v4, 0.0  ;;  %v4813_v24 = vmul.f32 %v15457_v51, %v15013_v49 }
 0x7ab   : > { %13587 = vpow2.f32 %v4766_v2  ;;  %v4745_v26 = vpop.xlane.xlu1 %4744  ;;  %4771 = vadd.xlane.f32.xlu0 %v4770_v46 }
 0x7ac   : > { %13589 = vpow2.f32 %v4764_v9  ;;  %v4753_v21 = vsub.f32 %v4721_v45, %v4745_v26  ;;  %v4816_v26 = vmul.f32 %v15457_v51, %v15055_v6 }
 0x7ad   : > { %v13580_v36 = vpop.eup %13579 }
 0x7ae   : > { %v13582_v18 = vpop.eup %13581  ;;  %v4768_v57 = vmul.f32 1.442695, %v4753_v21  ;;  %v4776_v12 = vsel %vm2181_vm2, %v13580_v36, 0.0  ;;  %v4815_v21 = vmul.f32 %v15457_v51, %v15031_v58 }
 0x7af   : > { %4777 = vadd.xlane.f32.xlu0 %v4776_v12  ;;  %v4773_v11 = vsel %vm2181_vm2, %v13582_v18, 0.0 }
 0x7b0   : > { %13591 = vpow2.f32 %v4768_v57  ;;  %4774 = vadd.xlane.f32.xlu1 %v4773_v11  ;;  %v4817_v11 = vmul.f32 %v15457_v51, %v15049_v3 }
 0x7b1   : > { %v13584_v55 = vpop.eup %13583 }
 0x7b2   : > { %v13586_v53 = vpop.eup %13585  ;;  %v4782_v60 = vsel %vm2181_vm2, %v13584_v55, 0.0 }
 0x7b3   : > { %4783 = vadd.xlane.f32.xlu0 %v4782_v60  ;;  %v4779_v39 = vsel %vm2181_vm2, %v13586_v53, 0.0 }
 0x7b4   : > { %4780 = vadd.xlane.f32.xlu1 %v4779_v39 }
 0x7b5   : > { %v13588_v0 = vpop.eup %13587 }
 0x7b6   : > { %v13590_v17 = vpop.eup %13589  ;;  %v4788_v45 = vsel %vm2181_vm2, %v13588_v0, 0.0 }
 0x7b7   : > { %4789 = vadd.xlane.f32.xlu0 %v4788_v45  ;;  %v4785_v35 = vsel %vm2181_vm2, %v13590_v17, 0.0  ;;  %v13674_v45 = vld [vmem:[%s17013_s13 + $0x10] sm:$0xff] }
 0x7b8   : > { %4786 = vadd.xlane.f32.xlu1 %v4785_v35 }
 0x7ba   : > { %v15541_v28 = vpop.eup %13591 }
 0x7bb   : > { %v4791_v8 = vsel %vm2181_vm2, %v15541_v28, 0.0 }
 0x7bc   : > { %4792 = vadd.xlane.f32.xlu1 %v4791_v8  ;;  %v13675_v8 = vld [vmem:[%s17013_s13 + $0x8] sm:$0xff] }
 0x838   : > { %v4772_v33 = vpop.xlane.xlu0 %4771 }
 0x839   : > { %13593 = vrcp.f32 %v4772_v33 }
 0x83c   : > { %v4778_v40 = vpop.xlane.xlu0 %4777 }
 0x83d   : > { %13595 = vrcp.f32 %v4778_v40  ;;  %v4775_v43 = vpop.xlane.xlu1 %4774 }
 0x83e   : > { %13597 = vrcp.f32 %v4775_v43 }
 0x840   : > { %v4784_v13 = vpop.xlane.xlu0 %4783 }
 0x841   : > { %13599 = vrcp.f32 %v4784_v13  ;;  %v4781_v50 = vpop.xlane.xlu1 %4780 }
 0x842   : > { %13601 = vrcp.f32 %v4781_v50 }
 0x843   : > { %v13594_v59 = vpop.eup %13593 }
 0x844   : > { %v4802_v37 = vmul.f32 %v13594_v59, %v13578_v4  ;;  %v4790_v23 = vpop.xlane.xlu0 %4789 }
 0x845   : > { %13603 = vrcp.f32 %v4790_v23  ;;  %v4787_v63 = vpop.xlane.xlu1 %4786 }
 0x846   : > { %13605 = vrcp.f32 %v4787_v63  ;;  %12214 = vmatmul.mubr.msk.f32.vlgmr.msra.gmra.mrb[28].mxu0 %vm2181_vm2, %v4802_v37  ;;  %v13676_v63 = vld [vmem:[%s17013_s13 + $0x20] sm:$0xff] }
 0x847   : > { %v13596_v5 = vpop.eup %13595  ;;  %12222 = vmatpush3.msra.mxu0 %v4812_v44  ;;  %12223 = vmatprep.mubr.msk.f32.mxu0 %vm14235_vm1, %v17014_v20 }
 0x848   : > { %v13598_v16 = vpop.eup %13597  ;;  %v4804_v48 = vmul.f32 %v13596_v5, %v13580_v36  ;;  %12231 = vmatprep.subr.mxu0 %v17014_v20 }
 0x849   : > { %v4803_v41 = vmul.f32 %v13598_v16, %v13582_v18  ;;  %v4793_v14 = vpop.xlane.xlu1 %4792  ;;  %v13677_v16 = vld [vmem:[%s17013_s13 + $0x18] sm:$0xff] }
 0x84a   : > { %13607 = vrcp.f32 %v4793_v14  ;;  %12224 = vmatmul.mubr.msk.f32.vlgmr.msra.gmra.mrb[30].mxu0 %vm2181_vm2, %v4804_v48 }
 0x84b   : > { %v13600_v4 = vpop.eup %13599  ;;  %12219 = vmatmul.mubr.msk.f32.vlgmr.msra.gmra.mrb[28].mxu1 %vm2181_vm2, %v4803_v41  ;;  %12232 = vmatpush3.msra.mxu0 %v4814_v15 }
 0x84c   : > { %v13602_v2 = vpop.eup %13601  ;;  %v4806_v9 = vmul.f32 %v13600_v4, %v13584_v55  ;;  %12227 = vmatpush3.msra.mxu1 %v4813_v24  ;;  %12228 = vmatprep.mubr.msk.f32.mxu1 %vm14235_vm1, %v17014_v20 }
 0x84d   : > { %v4805_v46 = vmul.f32 %v13602_v2, %v13586_v53  ;;  %12233 = vmatprep.mubr.msk.f32.mxu0 %vm14235_vm1, %v17014_v20  ;;  %12236 = vmatprep.subr.mxu1 %v17014_v20  ;;  %v15583_v53 = vld [vmem:[#allocation8 + $0x3] ss:$0 sm:$0xff] }
 0x84e   : > { %12241 = vmatprep.subr.mxu0 %v17014_v20  ;;  %12234 = vmatmul.mubr.msk.f32.vlgmr.msra.gmra.mrb[32].mxu0 %vm2181_vm2, %v4806_v9  ;;  %v5416_v51 = vmul.f32 %v15583_v53, %v14949_v19  ;;  %v5417_v19 = vmul.f32 %v15583_v53, %v14960_v25  ;;  %v5419_v25 = vmul.f32 %v15583_v53, %v14982_v34 }
 0x84f   : > { %v13604_v36 = vpop.eup %13603  ;;  %12229 = vmatmul.mubr.msk.f32.vlgmr.msra.gmra.mrb[30].mxu1 %vm2181_vm2, %v4805_v46  ;;  %12242 = vmatpush3.msra.mxu0 %v4816_v26  ;;  %v6088_v34 = vmul.f32 %v15583_v53, %v15130_v31  ;;  %v13678_v46 = vld [vmem:[%s17013_s13 + $0x30] sm:$0xff] }
 0x850   : > { %v13606_v18 = vpop.eup %13605  ;;  %v4808_v57 = vmul.f32 %v13604_v36, %v13588_v0  ;;  %12237 = vmatpush3.msra.mxu1 %v4815_v21  ;;  %12238 = vmatprep.mubr.msk.f32.mxu1 %vm14235_vm1, %v17014_v20  ;;  %v13679_v21 = vld [vmem:[%s17013_s13 + $0x28] sm:$0xff] }
 0x851   : > { %v4807_v12 = vmul.f32 %v13606_v18, %v13590_v17  ;;  %12243 = vmatprep.mubr.msk.f32.mxu0 %vm14235_vm1, %v17014_v20  ;;  %12246 = vmatprep.subr.mxu1 %v17014_v20 }
 0x852   : > { %12244 = vmatmul.mubr.msk.f32.vlgmr.msra.gmra.mrb[34].mxu0 %vm2181_vm2, %v4808_v57  ;;  %12251 = vmatprep.subr.mxu0 %v17014_v20 }
 0x853   : > { %12239 = vmatmul.mubr.msk.f32.vlgmr.msra.gmra.mrb[32].mxu1 %vm2181_vm2, %v4807_v12  ;;  %12253 = vmatprep.mubr.msk.f32.mxu0 %vm14235_vm1, %v17014_v20 }
 0x854   : > { %v13608_v55 = vpop.eup %13607  ;;  %12247 = vmatpush3.msra.mxu1 %v4817_v11  ;;  %12248 = vmatprep.mubr.msk.f32.mxu1 %vm14235_vm1, %v17014_v20 }
 0x855   : > { %v4809_v60 = vmul.f32 %v13608_v55, %v15541_v28  ;;  %12256 = vmatprep.subr.mxu1 %v17014_v20 }
 0x856   : > { %12252 = vmatpush3.xpose.msra.mxu0 %v14954_v22  ;;  %v5418_v22 = vmul.f32 %v15583_v53, %v14970_v29  ;;  %v5422_v29 = vmul.f32 %v15583_v53, %v15040_v62  ;;  %v13673_v62 = vld [vmem:[%s17013_s13] sm:$0xff] }
 0x857   : > { %12249 = vmatmul.mubr.msk.f32.vlgmr.msra.gmra.mrb[34].mxu1 %vm2181_vm2, %v4809_v60  ;;  %12261 = vmatprep.subr.mxu0 %v17014_v20  ;;  %v13680_v60 = vld [vmem:[%s17013_s13 + $0x38] sm:$0xff] }
 0x858   : > { %12258 = vmatprep.mubr.msk.f32.mxu1 %vm14235_vm1, %v17014_v20 }
 0x859   : > { %12254 = vmatmul.mubr.f32.vlgmr.msra.gmra.mrb[44].mxu0 %v5416_v51 }
 0x85a   : > { %12262 = vmatpush3.xpose.msra.mxu0 %v14976_v32  ;;  %12263 = vmatprep.mubr.msk.f32.mxu0 %vm14235_vm1, %v17014_v20  ;;  %v5421_v32 = vmul.f32 %v15583_v53, %v15024_v54 }
 0x85b   : > { %12257 = vmatpush3.xpose.msra.mxu1 %v14964_v27  ;;  %12271 = vmatprep.subr.mxu0 %v17014_v20  ;;  %v5420_v27 = vmul.f32 %v15583_v53, %v15001_v42  ;;  %v6089_v42 = vmul.f32 %v15583_v53, %v15126_v30 }
 0x85c   : > { %12266 = vmatprep.subr.mxu1 %v17014_v20 }
 0x85d   : > { %12264 = vmatmul.mubr.f32.vlgmr.msra.gmra.mrb[46].mxu0 %v5418_v22 }
 0x85e   : > { %12259 = vmatmul.mubr.f32.vlgmr.msra.gmra.mrb[44].mxu1 %v5417_v19  ;;  %12272 = vmatpush3.xpose.msra.mxu0 %v15010_v47 }
 0x85f   : > { %12267 = vmatpush3.xpose.msra.mxu1 %v14991_v38  ;;  %12268 = vmatprep.mubr.msk.f32.mxu1 %vm14235_vm1, %v17014_v20  ;;  %v5423_v38 = vmul.f32 %v15583_v53, %v15058_v7 }
 0x860   : > { %12273 = vmatprep.mubr.msk.f32.mxu0 %vm14235_vm1, %v17014_v20  ;;  %12276 = vmatprep.subr.mxu1 %v17014_v20 }
 0x861   : > { %12274 = vmatmul.mubr.f32.vlgmr.msra.gmra.mrb[48].mxu0 %v5420_v27  ;;  %12281 = vmatprep.subr.mxu0 %v17014_v20 }
 0x862   : > { %12269 = vmatmul.mubr.f32.vlgmr.msra.gmra.mrb[46].mxu1 %v5419_v25  ;;  %12282 = vmatpush3.xpose.msra.mxu0 %v15046_v1 }
 0x863   : > { %12277 = vmatpush3.xpose.msra.mxu1 %v15028_v56  ;;  %12278 = vmatprep.mubr.msk.f32.mxu1 %vm14235_vm1, %v17014_v20 }
 0x864   : > { %12283 = vmatprep.mubr.msk.f32.mxu0 %vm14235_vm1, %v17014_v20  ;;  %12286 = vmatprep.subr.mxu1 %v17014_v20 }
 0x865   : > { %12284 = vmatmul.mubr.f32.vlgmr.msra.gmra.mrb[50].mxu0 %v5422_v29  ;;  %12291 = vmatprep.subr.mxu0 %v17014_v20 }
 0x866   : > { %12279 = vmatmul.mubr.f32.vlgmr.msra.gmra.mrb[48].mxu1 %v5421_v32  ;;  %12292 = vmatpush3.msra.mxu0 %v6088_v34 }
 0x867   : > { %12287 = vmatpush3.xpose.msra.mxu1 %v15064_v10  ;;  %12288 = vmatprep.mubr.msk.f32.mxu1 %vm14235_vm1, %v17014_v20 }
 0x868   : > { %12296 = vmatprep.subr.mxu1 %v17014_v20  ;;  %12293 = vmatprep.mubr.msk.f32.mxu0 %vm14235_vm1, %v17014_v20 }
 0x869   : > { %12301 = vmatprep.subr.mxu0 %v17014_v20 }
 0x86a   : > { %12289 = vmatmul.mubr.f32.vlgmr.msra.gmra.mrb[50].mxu1 %v5423_v38 }
 0x86b   : > { %12297 = vmatpush3.msra.mxu1 %v6089_v42  ;;  %12298 = vmatprep.mubr.msk.f32.mxu1 %vm14235_vm1, %v17014_v20 }
 0x86c   : > { %12306 = vmatprep.subr.mxu1 %v17014_v20 }
 0x92c   : > { %v5490_v47 = vpop.f32.mrb[44].mxu0 }
 0x92d   : > { %v5984_v54 = vmul.f32 0.17677669, %v5490_v47  ;;  %v12255_v56 = vpop.f32.mrb[45].mxu0 }
 0x92f   : > { %v5992_v1 = vadd.f32 %v13673_v62, %v5984_v54 }
 0x930   : > { %v5630_v7 = vpop.f32.mrb[46].mxu0 }
 0x931   : > { %v5560_v10 = vpop.f32.mrb[44].mxu1  ;;  %v5986_v30 = vmul.f32 0.17677669, %v5630_v7  ;;  %v12265_v31 = vpop.f32.mrb[47].mxu0  ;;  %v6000_v39 = vsel %vm2181_vm2, %v5992_v1, -inf }
 0x932   : > { %v5985_v0 = vmul.f32 0.17677669, %v5560_v10  ;;  %v12260_v17 = vpop.f32.mrb[45].mxu1  ;;  %6001 = vmax.xlane.f32.xlu0 %v6000_v39 }
 0x933   : > { %v5994_v35 = vadd.f32 %v13674_v45, %v5986_v30 }
 0x934   : > { %v5770_v28 = vpop.f32.mrb[48].mxu0  ;;  %v5993_v33 = vadd.f32 %v13675_v8, %v5985_v0 }
 0x935   : > { %v5700_v40 = vpop.f32.mrb[46].mxu1  ;;  %v5988_v43 = vmul.f32 0.17677669, %v5770_v28  ;;  %v12275_v13 = vpop.f32.mrb[49].mxu0  ;;  %v6006_v50 = vsel %vm2181_vm2, %v5994_v35, -inf }
 0x936   : > { %v5987_v59 = vmul.f32 0.17677669, %v5700_v40  ;;  %v12270_v37 = vpop.f32.mrb[47].mxu1  ;;  %6007 = vmax.xlane.f32.xlu0 %v6006_v50  ;;  %v6003_v23 = vsel %vm2181_vm2, %v5993_v33, -inf }
 0x937   : > { %6004 = vmax.xlane.f32.xlu1 %v6003_v23  ;;  %v5996_v44 = vadd.f32 %v13676_v63, %v5988_v43 }
 0x938   : > { %v5910_v5 = vpop.f32.mrb[50].mxu0  ;;  %v5995_v48 = vadd.f32 %v13677_v16, %v5987_v59 }
 0x939   : > { %v5840_v41 = vpop.f32.mrb[48].mxu1  ;;  %v5990_v14 = vmul.f32 0.17677669, %v5910_v5  ;;  %v12285_v15 = vpop.f32.mrb[51].mxu0  ;;  %v6012_v24 = vsel %vm2181_vm2, %v5996_v44, -inf }
 0x93a   : > { %v5989_v4 = vmul.f32 0.17677669, %v5840_v41  ;;  %v12280_v2 = vpop.f32.mrb[49].mxu1  ;;  %6013 = vmax.xlane.f32.xlu0 %v6012_v24  ;;  %v6009_v9 = vsel %vm2181_vm2, %v5995_v48, -inf }
 0x93b   : > { %6010 = vmax.xlane.f32.xlu1 %v6009_v9  ;;  %v5998_v26 = vadd.f32 %v13678_v46, %v5990_v14 }
 0x93c   : > { %v5997_v36 = vadd.f32 %v13679_v21, %v5989_v4 }
 0x93d   : > { %v5980_v18 = vpop.f32.mrb[50].mxu1  ;;  %v6018_v57 = vsel %vm2181_vm2, %v5998_v26, -inf }
 0x93e   : > { %v5991_v12 = vmul.f32 0.17677669, %v5980_v18  ;;  %v12290_v11 = vpop.f32.mrb[51].mxu1  ;;  %6019 = vmax.xlane.f32.xlu0 %v6018_v57  ;;  %v6015_v55 = vsel %vm2181_vm2, %v5997_v36, -inf  ;;  %v6090_v57 = vmul.f32 %v15583_v53, %v15019_v52  ;;  %v6091_v52 = vmul.f32 %v15583_v53, %v15013_v49 }
 0x93f   : > { %6016 = vmax.xlane.f32.xlu1 %v6015_v55  ;;  %v6094_v49 = vmul.f32 %v15583_v53, %v15055_v6 }
 0x940   : > { %v5999_v51 = vadd.f32 %v13680_v60, %v5991_v12 }
 0x942   : > { %v6021_v22 = vsel %vm2181_vm2, %v5999_v51, -inf }
 0x943   : > { %6022 = vmax.xlane.f32.xlu1 %v6021_v22  ;;  %v6092_v22 = vmul.f32 %v15583_v53, %v15037_v61  ;;  %v6093_v61 = vmul.f32 %v15583_v53, %v15031_v58  ;;  %v6095_v58 = vmul.f32 %v15583_v53, %v15049_v3  ;;  %v11152_v3 = vld [vmem:[%s14857_s10 + $0x18] sm:$0xff]   ;;  %v11153_v53 = vld [vmem:[%s14857_s10 + $0x20] sm:$0xff]  }
 0x9bf   : > { %v6002_v19 = vpop.xlane.xlu0 %6001 }
 0x9c0   : > { %v6024_v27 = vsub.f32 %v5992_v1, %v6002_v19 }
 0x9c2   : > { %v6032_v25 = vmul.f32 1.442695, %v6024_v27 }
 0x9c3   : > { %v6008_v29 = vpop.xlane.xlu0 %6007 }
 0x9c4   : > { %13609 = vpow2.f32 %v6032_v25  ;;  %v6026_v32 = vsub.f32 %v5994_v35, %v6008_v29  ;;  %v6005_v34 = vpop.xlane.xlu1 %6004 }
 0x9c5   : > { %v6025_v38 = vsub.f32 %v5993_v33, %v6005_v34  ;;  %v10575_v34 = vld [vmem:[%s14857_s10] sm:$0xff]  }
 0x9c6   : > { %v6036_v42 = vmul.f32 1.442695, %v6026_v32 }
 0x9c7   : > { %v6034_v47 = vmul.f32 1.442695, %v6025_v38  ;;  %v6014_v54 = vpop.xlane.xlu0 %6013 }
 0x9c8   : > { %13611 = vpow2.f32 %v6036_v42  ;;  %v6028_v56 = vsub.f32 %v5996_v44, %v6014_v54  ;;  %v6011_v62 = vpop.xlane.xlu1 %6010 }
 0x9c9   : > { %13613 = vpow2.f32 %v6034_v47  ;;  %v6027_v7 = vsub.f32 %v5995_v48, %v6011_v62  ;;  %v11150_v47 = vld [vmem:[%s14857_s10 + $0x8] sm:$0xff]   ;;  %v11151_v62 = vld [vmem:[%s14857_s10 + $0x10] sm:$0xff]  }
 0x9ca   : > { %v6040_v10 = vmul.f32 1.442695, %v6028_v56 }
 0x9cb   : > { %v6038_v30 = vmul.f32 1.442695, %v6027_v7  ;;  %v6020_v31 = vpop.xlane.xlu0 %6019  ;;  %v11154_v7 = vld [vmem:[%s14857_s10 + $0x28] sm:$0xff]  }
 0x9cc   : > { %13615 = vpow2.f32 %v6040_v10  ;;  %v6030_v39 = vsub.f32 %v5998_v26, %v6020_v31  ;;  %v6017_v1 = vpop.xlane.xlu1 %6016  ;;  %v11155_v10 = vld [vmem:[%s14857_s10 + $0x30] sm:$0xff]  }
 0x9cd   : > { %13617 = vpow2.f32 %v6038_v30  ;;  %v6029_v0 = vsub.f32 %v5997_v36, %v6017_v1  ;;  %v11156_v30 = vld [vmem:[%s14857_s10 + $0x38] sm:$0xff]  }
 0x9ce   : > { %v13610_v17 = vpop.eup %13609  ;;  %v6044_v45 = vmul.f32 1.442695, %v6030_v39 }
 0x9cf   : > { %v6042_v35 = vmul.f32 1.442695, %v6029_v0  ;;  %v6048_v28 = vsel %vm2181_vm2, %v13610_v17, 0.0 }
 0x9d0   : > { %13619 = vpow2.f32 %v6044_v45  ;;  %v6023_v8 = vpop.xlane.xlu1 %6022  ;;  %6049 = vadd.xlane.f32.xlu0 %v6048_v28 }
 0x9d1   : > { %13621 = vpow2.f32 %v6042_v35  ;;  %v6031_v33 = vsub.f32 %v5999_v51, %v6023_v8 }
 0x9d2   : > { %v13612_v40 = vpop.eup %13611 }
 0x9d3   : > { %v13614_v43 = vpop.eup %13613  ;;  %v6046_v13 = vmul.f32 1.442695, %v6031_v33  ;;  %v6054_v50 = vsel %vm2181_vm2, %v13612_v40, 0.0 }
 0x9d4   : > { %6055 = vadd.xlane.f32.xlu0 %v6054_v50  ;;  %v6051_v59 = vsel %vm2181_vm2, %v13614_v43, 0.0 }
 0x9d5   : > { %13623 = vpow2.f32 %v6046_v13  ;;  %6052 = vadd.xlane.f32.xlu1 %v6051_v59 }
 0x9d6   : > { %v13616_v37 = vpop.eup %13615 }
 0x9d7   : > { %v13618_v23 = vpop.eup %13617  ;;  %v6060_v63 = vsel %vm2181_vm2, %v13616_v37, 0.0 }
 0x9d8   : > { %6061 = vadd.xlane.f32.xlu0 %v6060_v63  ;;  %v6057_v44 = vsel %vm2181_vm2, %v13618_v23, 0.0 }
 0x9d9   : > { %6058 = vadd.xlane.f32.xlu1 %v6057_v44 }
 0x9da   : > { %v13620_v5 = vpop.eup %13619 }
 0x9db   : > { %v13622_v16 = vpop.eup %13621  ;;  %v6066_v48 = vsel %vm2181_vm2, %v13620_v5, 0.0 }
 0x9dc   : > { %6067 = vadd.xlane.f32.xlu0 %v6066_v48  ;;  %v6063_v41 = vsel %vm2181_vm2, %v13622_v16, 0.0  ;;  %v13681_v48 = vld [vmem:[#allocation2 + $0x8] sm:$0xff] }
 0x9dd   : > { %6064 = vadd.xlane.f32.xlu1 %v6063_v41 }
 0x9df   : > { %v15683_v14 = vpop.eup %13623 }
 0x9e0   : > { %v6069_v15 = vsel %vm2181_vm2, %v15683_v14, 0.0 }
 0x9e1   : > { %6070 = vadd.xlane.f32.xlu1 %v6069_v15  ;;  %v13682_v15 = vld [vmem:[#allocation2] sm:$0xff] }
 0xa5d   : > { %v6050_v24 = vpop.xlane.xlu0 %6049 }
 0xa5e   : > { %13625 = vrcp.f32 %v6050_v24 }
 0xa61   : > { %v6056_v4 = vpop.xlane.xlu0 %6055 }
 0xa62   : > { %13627 = vrcp.f32 %v6056_v4  ;;  %v6053_v2 = vpop.xlane.xlu1 %6052 }
 0xa63   : > { %13629 = vrcp.f32 %v6053_v2 }
 0xa65   : > { %v6062_v9 = vpop.xlane.xlu0 %6061 }
 0xa66   : > { %13631 = vrcp.f32 %v6062_v9  ;;  %v6059_v46 = vpop.xlane.xlu1 %6058 }
 0xa67   : > { %13633 = vrcp.f32 %v6059_v46  ;;  %v13683_v46 = vld [vmem:[#allocation2 + $0x18] sm:$0xff] }
 0xa68   : > { %v13626_v26 = vpop.eup %13625 }
 0xa69   : > { %v6080_v21 = vmul.f32 %v13626_v26, %v13610_v17  ;;  %v6068_v36 = vpop.xlane.xlu0 %6067 }
 0xa6a   : > { %13635 = vrcp.f32 %v6068_v36  ;;  %v6065_v18 = vpop.xlane.xlu1 %6064  ;;  %v13684_v36 = vld [vmem:[#allocation2 + $0x10] sm:$0xff] }
 0xa6b   : > { %13637 = vrcp.f32 %v6065_v18  ;;  %12294 = vmatmul.mubr.msk.f32.vlgmr.msra.gmra.mrb[28].mxu0 %vm2181_vm2, %v6080_v21 }
 0xa6c   : > { %v13628_v12 = vpop.eup %13627  ;;  %12302 = vmatpush3.msra.mxu0 %v6090_v57  ;;  %12303 = vmatprep.mubr.msk.f32.mxu0 %vm14235_vm1, %v17014_v20 }
 0xa6d   : > { %v13630_v11 = vpop.eup %13629  ;;  %v6082_v55 = vmul.f32 %v13628_v12, %v13612_v40  ;;  %12311 = vmatprep.subr.mxu0 %v17014_v20 }
 0xa6e   : > { %v6081_v60 = vmul.f32 %v13630_v11, %v13614_v43  ;;  %v6071_v51 = vpop.xlane.xlu1 %6070 }
 0xa6f   : > { %13639 = vrcp.f32 %v6071_v51  ;;  %12304 = vmatmul.mubr.msk.f32.vlgmr.msra.gmra.mrb[30].mxu0 %vm2181_vm2, %v6082_v55  ;;  %v13685_v55 = vld [vmem:[#allocation2 + $0x28] sm:$0xff] }
 0xa70   : > { %v13632_v19 = vpop.eup %13631  ;;  %12299 = vmatmul.mubr.msk.f32.vlgmr.msra.gmra.mrb[28].mxu1 %vm2181_vm2, %v6081_v60  ;;  %12312 = vmatpush3.msra.mxu0 %v6092_v22  ;;  %v13686_v22 = vld [vmem:[#allocation2 + $0x20] sm:$0xff] }
 0xa71   : > { %v13634_v27 = vpop.eup %13633  ;;  %v6084_v25 = vmul.f32 %v13632_v19, %v13616_v37  ;;  %12307 = vmatpush3.msra.mxu1 %v6091_v52  ;;  %12308 = vmatprep.mubr.msk.f32.mxu1 %vm14235_vm1, %v17014_v20 }
 0xa72   : > { %v6083_v29 = vmul.f32 %v13634_v27, %v13618_v23  ;;  %12313 = vmatprep.mubr.msk.f32.mxu0 %vm14235_vm1, %v17014_v20  ;;  %12316 = vmatprep.subr.mxu1 %v17014_v20  ;;  %v10554_v23 = vld [vmem:[%s926_s12] ss:$0 sm:$0xff] }
 0xa73   : > { %12321 = vmatprep.subr.mxu0 %v17014_v20  ;;  %12314 = vmatmul.mubr.msk.f32.vlgmr.msra.gmra.mrb[32].mxu0 %vm2181_vm2, %v6084_v25 }
 0xa74   : > { %v13636_v32 = vpop.eup %13635  ;;  %12309 = vmatmul.mubr.msk.f32.vlgmr.msra.gmra.mrb[30].mxu1 %vm2181_vm2, %v6083_v29  ;;  %12322 = vmatpush3.msra.mxu0 %v6094_v49  ;;  %v13687_v29 = vld [vmem:[#allocation2 + $0x38] sm:$0xff] }
 0xa75   : > { %v13638_v38 = vpop.eup %13637  ;;  %v6086_v42 = vmul.f32 %v13636_v32, %v13620_v5  ;;  %12317 = vmatpush3.msra.mxu1 %v6093_v61  ;;  %12318 = vmatprep.mubr.msk.f32.mxu1 %vm14235_vm1, %v17014_v20  ;;  %v13688_v61 = vld [vmem:[#allocation2 + $0x30] sm:$0xff] }
 0xa76   : > { %v6085_v6 = vmul.f32 %v13638_v38, %v13622_v16  ;;  %12323 = vmatprep.mubr.msk.f32.mxu0 %vm14235_vm1, %v17014_v20  ;;  %12326 = vmatprep.subr.mxu1 %v17014_v20  ;;  %v6961_v38 = vld [vmem:[%s14881_s0 + $0x40] sm:$0xff] }
 0xa77   : > { %12324 = vmatmul.mubr.msk.f32.vlgmr.msra.gmra.mrb[34].mxu0 %vm2181_vm2, %v6086_v42  ;;  %12498 = vmatprep.subr.bf16.mxu0 %v10575_v34  ;;  %v6960_v42 = vld [vmem:[%s14881_s0 + $0x8] sm:$0xff] }
 0xa78   : > { %12319 = vmatmul.mubr.msk.f32.vlgmr.msra.gmra.mrb[32].mxu1 %vm2181_vm2, %v6085_v6  ;;  %12500 = vmatpush3.bf16.msra.mxu0 %v10575_v34  ;;  %v6959_v34 = vld [vmem:[%s14881_s0] sm:$0xff] }
 0xa79   : > { %v13640_v54 = vpop.eup %13639  ;;  %12327 = vmatpush3.msra.mxu1 %v6095_v58  ;;  %12328 = vmatprep.mubr.msk.f32.mxu1 %vm14235_vm1, %v17014_v20  ;;  %v13175_v6 = vcombine.high %v6959_v34, %v6961_v38  ;;  %v13176_v58 = vcombine.low %v6959_v34, %v6961_v38  ;;  %v6975_v38 = vld [vmem:[%s14881_s0 + $0x200] sm:$0xff] }
 0xa7a   : > { %v6087_v56 = vmul.f32 %v13640_v54, %v15683_v14  ;;  %12502 = vmatprep.subr.bf16.mxu0 %v11150_v47  ;;  %v6963_v54 = vld [vmem:[%s14881_s0 + $0x80] sm:$0xff] }
 0xa7b   : > { %12530 = vmatprep.subr.bf16.mxu1 %v13175_v6  ;;  %v6976_v6 = vld [vmem:[%s14881_s0 + $0x208] sm:$0xff] }
 0xa7c   : > { %12329 = vmatmul.mubr.msk.f32.vlgmr.msra.gmra.mrb[34].mxu1 %vm2181_vm2, %v6087_v56  ;;  %12504 = vmatpush3.bf16.msra.mxu0 %v11150_v47  ;;  %v6962_v47 = vld [vmem:[%s14881_s0 + $0x48] sm:$0xff]  ;;  %v6965_v56 = vld [vmem:[%s14881_s0 + $0xc0] sm:$0xff] }
 0xa7d   : > { %12506 = vmatprep.subr.bf16.mxu0 %v11151_v62  ;;  %7269 = vmatprep.mubr.f32.mxu1 %v17014_v20 }
 0xa7e   : > { %12532 = vmatpush1.bf16.msra.mxu1 %v13176_v58 }
 0xa80   : > { %12508 = vmatpush3.bf16.msra.mxu0 %v11151_v62  ;;  %v13191_v62 = vcombine.high %v6960_v42, %v6962_v47 }
 0xa81   : > { %12510 = vmatprep.subr.bf16.mxu0 %v11152_v3 }
 0xa84   : > { %12512 = vmatpush3.bf16.msra.mxu0 %v11152_v3  ;;  %v13192_v3 = vcombine.low %v6960_v42, %v6962_v47  ;;  %v6977_v42 = vld [vmem:[%s14881_s0 + $0x240] sm:$0xff]  ;;  %v6978_v47 = vld [vmem:[%s14881_s0 + $0x248] sm:$0xff] }
 0xa85   : > { %12514 = vmatprep.subr.bf16.mxu0 %v11153_v53  ;;  %v13183_v58 = vcombine.high %v6975_v38, %v6977_v42 }
 0xa88   : > { %12516 = vmatpush3.bf16.msra.mxu0 %v11153_v53  ;;  %v13177_v53 = vcombine.high %v6963_v54, %v6965_v56 }
 0xa89   : > { %12518 = vmatprep.subr.bf16.mxu0 %v11154_v7 }
 0xa8a   : > { %12534 = vmatprep.subr.bf16.mxu1 %v13177_v53  ;;  %v6981_v53 = vld [vmem:[%s14881_s0 + $0x2c0] sm:$0xff] }
 0xa8c   : > { %12520 = vmatpush3.bf16.msra.mxu0 %v11154_v7  ;;  %v6964_v7 = vld [vmem:[%s14881_s0 + $0x88] sm:$0xff] }
 0xa8d   : > { %12522 = vmatprep.subr.bf16.mxu0 %v11155_v10 }
 0xa90   : > { %12524 = vmatpush3.bf16.msra.mxu0 %v11155_v10  ;;  %v6966_v10 = vld [vmem:[%s14881_s0 + $0xc8] sm:$0xff] }
 0xa91   : > { %12526 = vmatprep.subr.bf16.mxu0 %v11156_v30 }
 0xa94   : > { %12528 = vmatpush3.bf16.msra.mxu0 %v11156_v30  ;;  %v6967_v30 = vld [vmem:[%s14881_s0 + $0x100] sm:$0xff] }
 0xa95   : > { %12562 = vmatprep.subr.bf16.mxu0 %v13191_v62  ;;  %v13200_v62 = vcombine.low %v6976_v6, %v6978_v47 }
 0xb3e   : > { %v6165_v31 = vpop.f32.mrb[28].mxu0 }
 0xb3f   : > { %v12295_v39 = vpop.f32.mrb[29].mxu0  ;;  %12363 = vmatprep.mubr.f32.mxu0 %v6165_v31  ;;  %v13193_v31 = vcombine.high %v6964_v7, %v6966_v10 }
 0xb40   : > { %v6969_v39 = vld [vmem:[%s14881_s0 + $0x140] sm:$0xff] }
 0xb42   : > { %v6311_v1 = vpop.f32.mrb[30].mxu0 }
 0xb43   : > { %v6238_v0 = vpop.f32.mrb[28].mxu1  ;;  %v12305_v17 = vpop.f32.mrb[31].mxu0 }
 0xb44   : > { %v12300_v45 = vpop.f32.mrb[29].mxu1  ;;  %12364 = vmatmul.mubr.f32.vlgmr.msra.gmra.mrb[52].mxu0 %v6238_v0  ;;  %v6970_v0 = vld [vmem:[%s14881_s0 + $0x148] sm:$0xff]  ;;  %v13178_v17 = vcombine.low %v6963_v54, %v6965_v56  ;;  %v13184_v54 = vcombine.low %v6975_v38, %v6977_v42  ;;  %v13199_v56 = vcombine.high %v6976_v6, %v6978_v47 }
 0xb45   : > { %12366 = vmatprep.mubr.f32.mxu0 %v6311_v1  ;;  %v6968_v1 = vld [vmem:[%s14881_s0 + $0x108] sm:$0xff]  ;;  %12564 = vmatpush1.bf16.msra.mxu0 %v13192_v3  ;;  %v13194_v45 = vcombine.low %v6964_v7, %v6966_v10  ;;  %v6979_v3 = vld [vmem:[%s14881_s0 + $0x280] sm:$0xff] }
 0xb46   : > { %v6457_v35 = vpop.f32.mrb[32].mxu0  ;;  %12566 = vmatprep.subr.bf16.mxu0 %v13193_v31  ;;  %12536 = vmatpush1.bf16.msra.mxu1 %v13178_v17  ;;  %v6980_v7 = vld [vmem:[%s14881_s0 + $0x288] sm:$0xff]  ;;  %v13185_v10 = vcombine.high %v6979_v3, %v6981_v53  ;;  %v13186_v31 = vcombine.low %v6979_v3, %v6981_v53  ;;  %v6985_v17 = vld [vmem:[%s14881_s0 + $0x340] sm:$0xff] }
 0xb47   : > { %v6384_v28 = vpop.f32.mrb[30].mxu1  ;;  %v12315_v8 = vpop.f32.mrb[33].mxu0 }
 0xb48   : > { %v12310_v33 = vpop.f32.mrb[31].mxu1  ;;  %12367 = vmatmul.mubr.f32.gmra.mrb[54].mxu0 %v6384_v28  ;;  %v13195_v28 = vcombine.high %v6968_v1, %v6970_v0  ;;  %v13180_v8 = vcombine.low %v6967_v30, %v6969_v39 }
 0xb49   : > { %12369 = vmatprep.mubr.f32.mxu0 %v6457_v35  ;;  %v13179_v35 = vcombine.high %v6967_v30, %v6969_v39  ;;  %12568 = vmatpush1.bf16.msra.mxu0 %v13194_v45  ;;  %v13196_v33 = vcombine.low %v6968_v1, %v6970_v0  ;;  %v6982_v30 = vld [vmem:[%s14881_s0 + $0x2c8] sm:$0xff]  ;;  %v6983_v0 = vld [vmem:[%s14881_s0 + $0x300] sm:$0xff] }
 0xb4a   : > { %v6603_v40 = vpop.f32.mrb[34].mxu0  ;;  %12570 = vmatprep.subr.bf16.mxu0 %v13195_v28  ;;  %v13201_v39 = vcombine.high %v6980_v7, %v6982_v30  ;;  %v13202_v1 = vcombine.low %v6980_v7, %v6982_v30  ;;  %v6984_v45 = vld [vmem:[%s14881_s0 + $0x308] sm:$0xff]  ;;  %v7467_v30 = vld [vmem:[%s14881_s0 + $0x90] sm:$0xff] }
 0xb4b   : > { %v6530_v43 = vpop.f32.mrb[32].mxu1  ;;  %v12325_v13 = vpop.f32.mrb[35].mxu0  ;;  %12538 = vmatprep.subr.bf16.mxu1 %v13179_v35  ;;  %v13187_v35 = vcombine.high %v6983_v0, %v6985_v17  ;;  %v6986_v28 = vld [vmem:[%s14881_s0 + $0x348] sm:$0xff] }
 0xb4c   : > { %v12320_v50 = vpop.f32.mrb[33].mxu1  ;;  %12370 = vmatmul.mubr.f32.gmra.mrb[56].mxu0 %v6530_v43  ;;  %12540 = vmatpush1.bf16.msra.mxu1 %v13180_v8  ;;  %v13188_v8 = vcombine.low %v6983_v0, %v6985_v17  ;;  %v7470_v0 = vld [vmem:[%s14881_s0 + $0xd8] sm:$0xff] }
 0xb4d   : > { %12372 = vmatprep.mubr.f32.mxu0 %v6603_v40  ;;  %12572 = vmatpush1.bf16.msra.mxu0 %v13196_v33  ;;  %v13203_v33 = vcombine.high %v6984_v45, %v6986_v28 }
 0xb4f   : > { %v6676_v59 = vpop.f32.mrb[34].mxu1 }
 0xb50   : > { %v12330_v37 = vpop.f32.mrb[35].mxu1  ;;  %12373 = vmatmul.mubr.f32.gmra.mrb[58].mxu0 %v6676_v59 }
 0xb51   : > { %7382 = vmatprep.mubr.f32.mxu0 %v17014_v20 }
 0xc17   : > { %v12365_v63 = vpop.f32.mrb[52].mxu0 }
 0xc18   : > { %v6799_v44 = vadd.f32 %v12365_v63, %v10554_v23  ;;  %v6793_v5 = vpop.f32.mrb[53].mxu0 }
 0xc19   : > { %v6794_v16 = vadd.f32 %v10554_v23, %v6793_v5 }
 0xc1a   : > { %v15736_v41 = vadd.f32 %v13681_v48, %v6799_v44 }
 0xc1b   : > { %v12368_v14 = vpop.f32.mrb[54].mxu0  ;;  %v15738_v24 = vadd.f32 %v13682_v15, %v6794_v16 }
 0xc1c   : > { %v6809_v4 = vadd.f32 %v12368_v14, %v10554_v23  ;;  %6844 = vadd.xlane.f32.xlu1 %v15736_v41  ;;  %v6803_v2 = vpop.f32.mrb[55].mxu0 }
 0xc1d   : > { %v6804_v9 = vadd.f32 %v10554_v23, %v6803_v2  ;;  %6842 = vadd.xlane.f32.xlu0 %v15738_v24 }
 0xc1e   : > { %v15742_v26 = vadd.f32 %v13683_v46, %v6809_v4 }
 0xc1f   : > { %v12371_v21 = vpop.f32.mrb[56].mxu0  ;;  %v15744_v18 = vadd.f32 %v13684_v36, %v6804_v9 }
 0xc20   : > { %v6819_v57 = vadd.f32 %v12371_v21, %v10554_v23  ;;  %6848 = vadd.xlane.f32.xlu1 %v15742_v26  ;;  %v6813_v12 = vpop.f32.mrb[57].mxu0 }
 0xc21   : > { %v6814_v11 = vadd.f32 %v10554_v23, %v6813_v12  ;;  %6846 = vadd.xlane.f32.xlu0 %v15744_v18 }
 0xc22   : > { %v15748_v60 = vadd.f32 %v13685_v55, %v6819_v57 }
 0xc23   : > { %v12374_v51 = vpop.f32.mrb[58].mxu0  ;;  %v15750_v52 = vadd.f32 %v13686_v22, %v6814_v11 }
 0xc24   : > { %v6829_v19 = vadd.f32 %v12374_v51, %v10554_v23  ;;  %6852 = vadd.xlane.f32.xlu1 %v15748_v60  ;;  %v6823_v27 = vpop.f32.mrb[59].mxu0 }
 0xc25   : > { %v6824_v25 = vadd.f32 %v10554_v23, %v6823_v27  ;;  %6850 = vadd.xlane.f32.xlu0 %v15750_v52  ;;  %v6973_v27 = vld [vmem:[%s14881_s0 + $0x1c0] sm:$0xff] }
 0xc26   : > { %v15754_v49 = vadd.f32 %v13687_v29, %v6829_v19  ;;  %v6971_v19 = vld [vmem:[%s14881_s0 + $0x180] sm:$0xff] }
 0xc27   : > { %v15756_v32 = vadd.f32 %v13688_v61, %v6824_v25  ;;  %v6972_v25 = vld [vmem:[%s14881_s0 + $0x188] sm:$0xff]  ;;  %v13181_v29 = vcombine.high %v6971_v19, %v6973_v27  ;;  %v13182_v61 = vcombine.low %v6971_v19, %v6973_v27 }
 0xc28   : > { %6856 = vadd.xlane.f32.xlu1 %v15754_v49 }
 0xc29   : > { %6854 = vadd.xlane.f32.xlu0 %v15756_v32  ;;  %12542 = vmatprep.subr.bf16.mxu1 %v13181_v29 }
 0xc2a   : > { %12544 = vmatpush1.bf16.msra.mxu1 %v13182_v61 }
 0xc2b   : > { %12546 = vmatprep.subr.bf16.mxu1 %v13183_v58 }
 0xc2e   : > { %12548 = vmatpush1.bf16.msra.mxu1 %v13184_v54  ;;  %v15850_v54 = vld [vmem:[%s934_s2] ss:$0 sm:$0xff] }
 0xc2f   : > { %12550 = vmatprep.subr.bf16.mxu1 %v13185_v10  ;;  %v15856_v10 = vld [vmem:[%s942_s22] ss:$0 sm:$0xff] }
 0xc32   : > { %12552 = vmatpush1.bf16.msra.mxu1 %v13186_v31 }
 0xc33   : > { %12554 = vmatprep.subr.bf16.mxu1 %v13187_v35 }
 0xc36   : > { %12556 = vmatpush1.bf16.msra.mxu1 %v13188_v8 }
 0xca9   : > { %v6845_v40 = vpop.xlane.xlu1 %6844 }
 0xcaa   : > { %v6860_v43 = vmul.f32 0.0078125, %v6845_v40  ;;  %v6843_v13 = vpop.xlane.xlu0 %6842  ;;  %v13204_v40 = vcombine.low %v6984_v45, %v6986_v28 }
 0xcab   : > { %v6859_v50 = vmul.f32 0.0078125, %v6843_v13  ;;  %v6989_v13 = vld [vmem:[%s14881_s0 + $0x3c0] sm:$0xff] }
 0xcac   : > { %v15773_v59 = vsub.f32 %v15736_v41, %v6860_v43  ;;  %v6987_v43 = vld [vmem:[%s14881_s0 + $0x380] sm:$0xff] }
 0xcad   : > { %v15776_v37 = vsub.f32 %v15738_v24, %v6859_v50  ;;  %v6849_v23 = vpop.xlane.xlu1 %6848  ;;  %v6988_v50 = vld [vmem:[%s14881_s0 + $0x388] sm:$0xff] }
 0xcae   : > { %v6862_v63 = vmul.f32 0.0078125, %v6849_v23  ;;  %v6847_v44 = vpop.xlane.xlu0 %6846  ;;  %v6876_v5 = vmul.f32 %v15773_v59, %v15773_v59  ;;  %v13189_v23 = vcombine.high %v6987_v43, %v6989_v13 }
 0xcaf   : > { %v6861_v16 = vmul.f32 0.0078125, %v6847_v44  ;;  %v6875_v48 = vmul.f32 %v15776_v37, %v15776_v37  ;;  %v13190_v44 = vcombine.low %v6987_v43, %v6989_v13  ;;  %v7471_v43 = vld [vmem:[%s14881_s0 + $0x110] sm:$0xff] }
 0xcb0   : > { %v15783_v14 = vsub.f32 %v15742_v26, %v6862_v63  ;;  %6885 = vadd.xlane.f32.xlu1 %v6876_v5  ;;  %v6990_v63 = vld [vmem:[%s14881_s0 + $0x3c8] sm:$0xff]  ;;  %12558 = vmatprep.subr.bf16.mxu1 %v13189_v23  ;;  %v7473_v13 = vld [vmem:[%s14881_s0 + $0x150] sm:$0xff]  ;;  %v7474_v23 = vld [vmem:[%s14881_s0 + $0x158] sm:$0xff] }
 0xcb1   : > { %v15786_v41 = vsub.f32 %v15744_v18, %v6861_v16  ;;  %v6853_v15 = vpop.xlane.xlu1 %6852  ;;  %6883 = vadd.xlane.f32.xlu0 %v6875_v48  ;;  %v13205_v5 = vcombine.high %v6988_v50, %v6990_v63  ;;  %v13206_v16 = vcombine.low %v6988_v50, %v6990_v63  ;;  %12560 = vmatpush1.bf16.msra.mxu1 %v13190_v44  ;;  %v15833_v48 = vld [vmem:[%s14881_s0 + $0x10] sm:$0xff]  ;;  %v7472_v50 = vld [vmem:[%s14881_s0 + $0x118] sm:$0xff] }
 0xcb2   : > { %v6864_v24 = vmul.f32 0.0078125, %v6853_v15  ;;  %v6851_v4 = vpop.xlane.xlu0 %6850  ;;  %v6878_v2 = vmul.f32 %v15783_v14, %v15783_v14  ;;  %v15836_v15 = vld [vmem:[%s14881_s0 + $0x50] sm:$0xff] }
 0xcb3   : > { %v6863_v9 = vmul.f32 0.0078125, %v6851_v4  ;;  %v6877_v46 = vmul.f32 %v15786_v41, %v15786_v41  ;;  %v13207_v4 = vcombine.high %v15833_v48, %v15836_v15 }
 0xcb4   : > { %v15793_v21 = vsub.f32 %v15748_v60, %v6864_v24  ;;  %6889 = vadd.xlane.f32.xlu1 %v6878_v2  ;;  %v15839_v24 = vld [vmem:[%s14881_s0 + $0x18] sm:$0xff] }
 0xcb5   : > { %v15796_v26 = vsub.f32 %v15750_v52, %v6863_v9  ;;  %v6857_v36 = vpop.xlane.xlu1 %6856  ;;  %6887 = vadd.xlane.f32.xlu0 %v6877_v46  ;;  %v7466_v2 = vld [vmem:[%s14881_s0 + $0x58] sm:$0xff]  ;;  %v13208_v9 = vcombine.low %v15833_v48, %v15836_v15  ;;  %12594 = vmatprep.subr.bf16.mxu1 %v13207_v4  ;;  %v13227_v4 = vcombine.high %v7472_v50, %v7474_v23 }
 0xcb6   : > { %v6866_v18 = vmul.f32 0.0078125, %v6857_v36  ;;  %v6855_v57 = vpop.xlane.xlu0 %6854  ;;  %v6880_v12 = vmul.f32 %v15793_v21, %v15793_v21  ;;  %v13223_v46 = vcombine.high %v15839_v24, %v7466_v2  ;;  %v13224_v36 = vcombine.low %v15839_v24, %v7466_v2  ;;  %v7475_v2 = vld [vmem:[%s14881_s0 + $0x190] sm:$0xff] }
 0xcb7   : > { %v6865_v11 = vmul.f32 0.0078125, %v6855_v57  ;;  %v6879_v55 = vmul.f32 %v15796_v26, %v15796_v26  ;;  %v13211_v24 = vcombine.high %v7471_v43, %v7473_v13 }
 0xcb8   : > { %v15803_v60 = vsub.f32 %v15754_v49, %v6866_v18  ;;  %6893 = vadd.xlane.f32.xlu1 %v6880_v12  ;;  %v6974_v49 = vld [vmem:[%s14881_s0 + $0x1c8] sm:$0xff] }
 0xcb9   : > { %v15806_v51 = vsub.f32 %v15756_v32, %v6865_v11  ;;  %6891 = vadd.xlane.f32.xlu0 %v6879_v55  ;;  %v13197_v32 = vcombine.high %v6972_v25, %v6974_v49  ;;  %v13198_v34 = vcombine.low %v6972_v25, %v6974_v49 }
 0xcba   : > { %v6882_v22 = vmul.f32 %v15803_v60, %v15803_v60 }
 0xcbb   : > { %v6881_v52 = vmul.f32 %v15806_v51, %v15806_v51  ;;  %12574 = vmatprep.subr.bf16.mxu0 %v13197_v32 }
 0xcbc   : > { %6897 = vadd.xlane.f32.xlu1 %v6882_v22  ;;  %12576 = vmatpush1.bf16.msra.mxu0 %v13198_v34 }
 0xcbd   : > { %6895 = vadd.xlane.f32.xlu0 %v6881_v52  ;;  %12578 = vmatprep.subr.bf16.mxu0 %v13199_v56 }
 0xcc0   : > { %12580 = vmatpush1.bf16.msra.mxu0 %v13200_v62 }
 0xcc1   : > { %12582 = vmatprep.subr.bf16.mxu0 %v13201_v39  ;;  %v7469_v39 = vld [vmem:[%s14881_s0 + $0xd0] sm:$0xff] }
 0xcc2   : > { %v13210_v44 = vcombine.low %v7467_v30, %v7469_v39 }
 0xcc4   : > { %12584 = vmatpush1.bf16.msra.mxu0 %v13202_v1  ;;  %v7468_v1 = vld [vmem:[%s14881_s0 + $0x98] sm:$0xff] }
 0xcc5   : > { %12586 = vmatprep.subr.bf16.mxu0 %v13203_v33  ;;  %v13209_v33 = vcombine.high %v7467_v30, %v7469_v39 }
 0xcc8   : > { %12588 = vmatpush1.bf16.msra.mxu0 %v13204_v40  ;;  %v13225_v40 = vcombine.high %v7468_v1, %v7470_v0 }
 0xcc9   : > { %12590 = vmatprep.subr.bf16.mxu0 %v13205_v5 }
 0xccc   : > { %12592 = vmatpush1.bf16.msra.mxu0 %v13206_v16 }
 0xccd   : > { %12626 = vmatprep.subr.bf16.mxu0 %v13223_v46  ;;  %v7476_v46 = vld [vmem:[%s14881_s0 + $0x198] sm:$0xff] }
 0xd3d   : > { %v6886_v18 = vpop.xlane.xlu1 %6885 }
 0xd3e   : > { %v6900_v57 = vmul.f32 0.0078125, %v6886_v18  ;;  %v6884_v12 = vpop.xlane.xlu0 %6883  ;;  %v13228_v18 = vcombine.low %v7472_v50, %v7474_v23  ;;  %v7493_v50 = vld [vmem:[%s14881_s0 + $0x3d0] sm:$0xff]  ;;  %v7492_v23 = vld [vmem:[%s14881_s0 + $0x398] sm:$0xff] }
 0xd3f   : > { %v6899_v11 = vmul.f32 0.0078125, %v6884_v12 }
 0xd40   : > { %v6908_v55 = vadd.f32 1e-05, %v6900_v57 }
 0xd41   : > { %v6907_v22 = vadd.f32 1e-05, %v6899_v11  ;;  %v6890_v52 = vpop.xlane.xlu1 %6889 }
 0xd42   : > { %13641 = vrsqrt.f32 %v6908_v55  ;;  %v6902_v19 = vmul.f32 0.0078125, %v6890_v52  ;;  %v6888_v27 = vpop.xlane.xlu0 %6887 }
 0xd43   : > { %13643 = vrsqrt.f32 %v6907_v22  ;;  %v6901_v25 = vmul.f32 0.0078125, %v6888_v27  ;;  %v7481_v27 = vld [vmem:[%s14881_s0 + $0x250] sm:$0xff] }
 0xd44   : > { %v6910_v29 = vadd.f32 1e-05, %v6902_v19  ;;  %v7479_v19 = vld [vmem:[%s14881_s0 + $0x210] sm:$0xff] }
 0xd45   : > { %v6909_v49 = vadd.f32 1e-05, %v6901_v25  ;;  %v6894_v61 = vpop.xlane.xlu1 %6893  ;;  %v7480_v25 = vld [vmem:[%s14881_s0 + $0x218] sm:$0xff] }
 0xd46   : > { %v6892_v32 = vpop.xlane.xlu0 %6891  ;;  %v6904_v38 = vmul.f32 0.0078125, %v6894_v61 }
 0xd47   : > { %13645 = vrsqrt.f32 %v6909_v49  ;;  %v6903_v34 = vmul.f32 0.0078125, %v6892_v32 }
 0xd48   : > { %13647 = vrsqrt.f32 %v6910_v29  ;;  %v6912_v56 = vadd.f32 1e-05, %v6904_v38  ;;  %v7482_v29 = vld [vmem:[%s14881_s0 + $0x258] sm:$0xff] }
 0xd49   : > { %v6911_v42 = vadd.f32 1e-05, %v6903_v34  ;;  %v6898_v7 = vpop.xlane.xlu1 %6897 }
 0xd4a   : > { %v6896_v6 = vpop.xlane.xlu0 %6895  ;;  %v6906_v45 = vmul.f32 0.0078125, %v6898_v7 }
 0xd4b   : > { %13649 = vrsqrt.f32 %v6911_v42  ;;  %v6905_v62 = vmul.f32 0.0078125, %v6896_v6  ;;  %v13215_v42 = vcombine.high %v7479_v19, %v7481_v27  ;;  %v13231_v6 = vcombine.high %v7480_v25, %v7482_v29 }
 0xd4c   : > { %v13642_v58 = vpop.eup %13641  ;;  %13651 = vrsqrt.f32 %v6912_v56  ;;  %v6914_v63 = vadd.f32 1e-05, %v6906_v45  ;;  %v7484_v56 = vld [vmem:[%s14881_s0 + $0x298] sm:$0xff] }
 0xd4d   : > { %v13644_v47 = vpop.eup %13643  ;;  %v6924_v3 = vmul.f32 %v13642_v58, %v15773_v59  ;;  %v6913_v59 = vadd.f32 1e-05, %v6905_v62  ;;  %v7483_v58 = vld [vmem:[%s14881_s0 + $0x290] sm:$0xff]  ;;  %v13216_v62 = vcombine.low %v7479_v19, %v7481_v27  ;;  %v7488_v45 = vld [vmem:[%s14881_s0 + $0x318] sm:$0xff] }
 0xd4e   : > { %v6923_v53 = vmul.f32 %v13644_v47, %v15776_v37  ;;  %v7485_v47 = vld [vmem:[%s14881_s0 + $0x2d0] sm:$0xff]  ;;  %v11199_v19 = vld [vmem:[%s14883_s15 + $0x158] sm:$0xff]  }
 0xd4f   : > { %v6938_v37 = vmul.f32 %v15850_v54, %v6924_v3  ;;  %13653 = vrsqrt.f32 %v6913_v59  ;;  %v13232_v3 = vcombine.low %v7480_v25, %v7482_v29  ;;  %v13217_v39 = vcombine.high %v7483_v58, %v7485_v47  ;;  %v7490_v59 = vld [vmem:[%s14881_s0 + $0x358] sm:$0xff] }
 0xd50   : > { %v6937_v31 = vmul.f32 %v15850_v54, %v6923_v53  ;;  %13655 = vrsqrt.f32 %v6914_v63  ;;  %v7494_v63 = vld [vmem:[%s14881_s0 + $0x3d8] sm:$0xff] }
 0xd51   : > { %v13646_v17 = vpop.eup %13645  ;;  %v15875_v5 = vadd.f32 %v15856_v10, %v6938_v37  ;;  %v11215_v27 = vld [vmem:[%s14883_s15 + $0x1d8] sm:$0xff]  }
 0xd52   : > { %v15865_v35 = vadd.f32 %v15856_v10, %v6937_v31  ;;  %v6925_v28 = vmul.f32 %v13646_v17, %v15786_v41  ;;  %v13648_v8 = vpop.eup %13647  ;;  %v13226_v41 = vcombine.low %v7468_v1, %v7470_v0  ;;  %v7487_v0 = vld [vmem:[%s14881_s0 + $0x310] sm:$0xff]  ;;  %v11191_v25 = vld [vmem:[%s14883_s15 + $0x118] sm:$0xff]  }
 0xd53   : > { %v6926_v16 = vmul.f32 %v13648_v8, %v15783_v14  ;;  %v13212_v14 = vcombine.low %v7471_v43, %v7473_v13  ;;  %v7489_v17 = vld [vmem:[%s14881_s0 + $0x350] sm:$0xff]  ;;  %v13235_v43 = vcombine.high %v7488_v45, %v7490_v59  ;;  %v11207_v29 = vld [vmem:[%s14883_s15 + $0x198] sm:$0xff]  }
 0xd54   : > { %7270 = vmatmul.mubr.f32.vlgmr.msra.gmra.mrb[52].mxu1 %v15865_v35  ;;  %7383 = vmatmul.mubr.f32.vlgmr.msra.gmra.mrb[60].mxu0 %v15865_v35  ;;  %v6939_v48 = vmul.f32 %v15850_v54, %v6925_v28  ;;  %v7491_v13 = vld [vmem:[%s14881_s0 + $0x390] sm:$0xff] }
 0xd55   : > { %12596 = vmatpush1.bf16.msra.mxu1 %v13208_v9  ;;  %12628 = vmatpush1.bf16.msra.mxu0 %v13224_v36  ;;  %v13650_v15 = vpop.eup %13649  ;;  %v7477_v9 = vld [vmem:[%s14881_s0 + $0x1d0] sm:$0xff]  ;;  %v7478_v36 = vld [vmem:[%s14881_s0 + $0x1d8] sm:$0xff]  ;;  %v6940_v57 = vmul.f32 %v15850_v54, %v6926_v16 }
 0xd56   : > { %7275 = vmatprep.mubr.f32.mxu1 %v17014_v20  ;;  %7388 = vmatprep.mubr.f32.mxu0 %v17014_v20  ;;  %v15889_v12 = vadd.f32 %v15856_v10, %v6939_v48  ;;  %v6927_v11 = vmul.f32 %v13650_v15, %v15796_v26  ;;  %v13652_v55 = vpop.eup %13651  ;;  %v13213_v22 = vcombine.high %v7475_v2, %v7477_v9 }
 0xd57   : > { %12598 = vmatprep.subr.bf16.mxu1 %v13209_v33  ;;  %12630 = vmatprep.subr.bf16.mxu0 %v13225_v40  ;;  %v13229_v52 = vcombine.high %v7476_v46, %v7478_v36  ;;  %v13214_v26 = vcombine.low %v7475_v2, %v7477_v9  ;;  %v13230_v49 = vcombine.low %v7476_v46, %v7478_v36  ;;  %v11212_v2 = vld [vmem:[%s14883_s15 + $0x1c0] sm:$0xff]   ;;  %v11197_v36 = vld [vmem:[%s14883_s15 + $0x148] sm:$0xff]  }
 0xd58   : > { %7276 = vmatmul.mubr.f32.gmra.mrb[54].mxu1 %v15875_v5  ;;  %7389 = vmatmul.mubr.f32.gmra.mrb[62].mxu0 %v15875_v5  ;;  %17015 = vst [vmem:[#allocation42_spill] sm:$0xff] %v15889_v12  ;;  %v15901_v61 = vadd.f32 %v15856_v10, %v6940_v57  ;;  %v6928_v32 = vmul.f32 %v13652_v55, %v15793_v21  ;;  %v7486_v21 = vld [vmem:[%s14881_s0 + $0x2d8] sm:$0xff]  ;;  %v11188_v9 = vld [vmem:[%s14883_s15 + $0x100] sm:$0xff]   ;;  %v11205_v57 = vld [vmem:[%s14883_s15 + $0x188] sm:$0xff]  }
 0xd59   : > { %12600 = vmatpush1.bf16.msra.mxu1 %v13210_v44  ;;  %12632 = vmatpush1.bf16.msra.mxu0 %v13226_v41  ;;  %v6941_v34 = vmul.f32 %v15850_v54, %v6927_v11  ;;  %v13654_v38 = vpop.eup %13653  ;;  %v13233_v1 = vcombine.high %v7484_v56, %v7486_v21  ;;  %v13234_v37 = vcombine.low %v7484_v56, %v7486_v21  ;;  %v11204_v46 = vld [vmem:[%s14883_s15 + $0x180] sm:$0xff]   ;;  %v11198_v11 = vld [vmem:[%s14883_s15 + $0x150] sm:$0xff]  }
 0xd5a   : > { %7281 = vmatprep.mubr.f32.mxu1 %v17014_v20  ;;  %7394 = vmatprep.mubr.f32.mxu0 %v17014_v20  ;;  %17016 = vst [vmem:[#allocation43_spill] sm:$0xff] %v15901_v61  ;;  %v6942_v53 = vmul.f32 %v15850_v54, %v6928_v32  ;;  %v6929_v30 = vmul.f32 %v13654_v38, %v15806_v51  ;;  %v13656_v31 = vpop.eup %13655  ;;  %v11214_v55 = vld [vmem:[%s14883_s15 + $0x1d0] sm:$0xff]   ;;  %v11192_v32 = vld [vmem:[%s14883_s15 + $0x120] sm:$0xff]   ;;  %v11201_v38 = vld [vmem:[%s14883_s15 + $0x168] sm:$0xff]  }
 0xd5b   : > { %12602 = vmatprep.subr.bf16.mxu1 %v13211_v24  ;;  %12634 = vmatprep.subr.bf16.mxu0 %v13227_v4  ;;  %v15915_v7 = vadd.f32 %v15856_v10, %v6941_v34  ;;  %v13218_v51 = vcombine.low %v7483_v58, %v7485_v47  ;;  %v6930_v8 = vmul.f32 %v13656_v31, %v15803_v60  ;;  %v11208_v34 = vld [vmem:[%s14883_s15 + $0x1a0] sm:$0xff]   ;;  %v11209_v58 = vld [vmem:[%s14883_s15 + $0x1a8] sm:$0xff]   ;;  %v11202_v47 = vld [vmem:[%s14883_s15 + $0x170] sm:$0xff]  }
 0xd5c   : > { %7282 = vmatmul.mubr.f32.gmra.mrb[56].mxu1 %v15889_v12  ;;  %7395 = vmatmul.mubr.f32.gmra.mrb[64].mxu0 %v15889_v12  ;;  %v15927_v28 = vadd.f32 %v15856_v10, %v6942_v53  ;;  %v6943_v33 = vmul.f32 %v15850_v54, %v6929_v30  ;;  %v13219_v40 = vcombine.high %v7487_v0, %v7489_v17  ;;  %v11218_v56 = vld [vmem:[%s14883_s15 + $0x1f0] sm:$0xff]   ;;  %v11219_v53 = vld [vmem:[%s14883_s15 + $0x1f8] sm:$0xff]  }
 0xd5d   : > { %12604 = vmatpush1.bf16.msra.mxu1 %v13212_v14  ;;  %12636 = vmatpush1.bf16.msra.mxu0 %v13228_v18  ;;  %17017 = vst [vmem:[#allocation44_spill] sm:$0xff] %v15915_v7  ;;  %v13220_v60 = vcombine.low %v7487_v0, %v7489_v17  ;;  %v13236_v44 = vcombine.low %v7488_v45, %v7490_v59  ;;  %v11213_v14 = vld [vmem:[%s14883_s15 + $0x1c8] sm:$0xff]   ;;  %v11194_v21 = vld [vmem:[%s14883_s15 + $0x130] sm:$0xff]   ;;  %v11195_v30 = vld [vmem:[%s14883_s15 + $0x138] sm:$0xff]  }
 0xd5e   : > { %7287 = vmatprep.mubr.f32.mxu1 %v17014_v20  ;;  %7400 = vmatprep.mubr.f32.mxu0 %v17014_v20  ;;  %17018 = vst [vmem:[#allocation45_spill] sm:$0xff] %v15927_v28  ;;  %v6944_v41 = vmul.f32 %v15850_v54, %v6930_v8  ;;  %v15941_v16 = vadd.f32 %v15856_v10, %v6943_v33  ;;  %v11189_v18 = vld [vmem:[%s14883_s15 + $0x108] sm:$0xff]   ;;  %v11211_v31 = vld [vmem:[%s14883_s15 + $0x1b8] sm:$0xff]  }
 0xd5f   : > { %12606 = vmatprep.subr.bf16.mxu1 %v13213_v22  ;;  %12638 = vmatprep.subr.bf16.mxu0 %v13229_v52  ;;  %v13221_v48 = vcombine.high %v7491_v13, %v7493_v50  ;;  %v13237_v15 = vcombine.high %v7492_v23, %v7494_v63  ;;  %v13222_v24 = vcombine.low %v7491_v13, %v7493_v50  ;;  %v11190_v22 = vld [vmem:[%s14883_s15 + $0x110] sm:$0xff]  }
 0xd60   : > { %7288 = vmatmul.mubr.f32.gmra.mrb[58].mxu1 %v15901_v61  ;;  %7401 = vmatmul.mubr.f32.gmra.mrb[66].mxu0 %v15901_v61  ;;  %17019 = vst [vmem:[#allocation46_spill] sm:$0xff] %v15941_v16  ;;  %v13238_v4 = vcombine.low %v7492_v23, %v7494_v63  ;;  %v15948_v54 = vadd.f32 %v15856_v10, %v6944_v41  ;;  %v11196_v10 = vld [vmem:[%s14883_s15 + $0x140] sm:$0xff]   ;;  %v11206_v52 = vld [vmem:[%s14883_s15 + $0x190] sm:$0xff]  }
 0xd61   : > { %12608 = vmatpush1.bf16.msra.mxu1 %v13214_v26  ;;  %12640 = vmatpush1.bf16.msra.mxu0 %v13230_v49  ;;  %v11200_v26 = vld [vmem:[%s14883_s15 + $0x160] sm:$0xff]  }
 0xd62   : > { %7293 = vmatprep.mubr.f32.mxu1 %v17014_v20  ;;  %7406 = vmatprep.mubr.f32.mxu0 %v17014_v20  ;;  %17020 = vst [vmem:[#allocation47_spill] sm:$0xff] %v15948_v54  ;;  %v11216_v49 = vld [vmem:[%s14883_s15 + $0x1e0] sm:$0xff]  }
 0xd63   : > { %12610 = vmatprep.subr.bf16.mxu1 %v13215_v42  ;;  %12642 = vmatprep.subr.bf16.mxu0 %v13231_v6  ;;  %v11217_v42 = vld [vmem:[%s14883_s15 + $0x1e8] sm:$0xff]  }
 0xd64   : > { %7294 = vmatmul.mubr.f32.gmra.mrb[60].mxu1 %v15915_v7  ;;  %7407 = vmatmul.mubr.f32.gmra.mrb[68].mxu0 %v15915_v7  ;;  %v11193_v6 = vld [vmem:[%s14883_s15 + $0x128] sm:$0xff]  }
 0xd65   : > { %12612 = vmatpush1.bf16.msra.mxu1 %v13216_v62  ;;  %12644 = vmatpush1.bf16.msra.mxu0 %v13232_v3  ;;  %v11210_v62 = vld [vmem:[%s14883_s15 + $0x1b0] sm:$0xff]   ;;  %v11203_v3 = vld [vmem:[%s14883_s15 + $0x178] sm:$0xff]  }
 0xd66   : > { %7299 = vmatprep.mubr.f32.mxu1 %v17014_v20  ;;  %7412 = vmatprep.mubr.f32.mxu0 %v17014_v20 }
 0xd67   : > { %12614 = vmatprep.subr.bf16.mxu1 %v13217_v39  ;;  %12646 = vmatprep.subr.bf16.mxu0 %v13233_v1  ;;  %v11164_v39 = vld [vmem:[%s14883_s15 + $0x40] sm:$0xff]  }
 0xd68   : > { %7300 = vmatmul.mubr.f32.gmra.mrb[62].mxu1 %v15927_v28  ;;  %7413 = vmatmul.mubr.f32.gmra.mrb[70].mxu0 %v15927_v28  ;;  %v11180_v1 = vld [vmem:[%s14883_s15 + $0xc0] sm:$0xff]  }
 0xd69   : > { %12616 = vmatpush1.bf16.msra.mxu1 %v13218_v51  ;;  %12648 = vmatpush1.bf16.msra.mxu0 %v13234_v37 }
 0xd6a   : > { %7305 = vmatprep.mubr.f32.mxu1 %v17014_v20  ;;  %7418 = vmatprep.mubr.f32.mxu0 %v17014_v20 }
 0xd6b   : > { %12618 = vmatprep.subr.bf16.mxu1 %v13219_v40  ;;  %12650 = vmatprep.subr.bf16.mxu0 %v13235_v43 }
 0xd6c   : > { %7306 = vmatmul.mubr.f32.gmra.mrb[64].mxu1 %v15941_v16  ;;  %7419 = vmatmul.mubr.f32.gmra.mrb[72].mxu0 %v15941_v16 }
 0xd6d   : > { %12620 = vmatpush1.bf16.msra.mxu1 %v13220_v60  ;;  %12652 = vmatpush1.bf16.msra.mxu0 %v13236_v44 }
 0xd6e   : > { %7311 = vmatprep.mubr.f32.mxu1 %v17014_v20  ;;  %7424 = vmatprep.mubr.f32.mxu0 %v17014_v20 }
 0xd6f   : > { %12622 = vmatprep.subr.bf16.mxu1 %v13221_v48  ;;  %12654 = vmatprep.subr.bf16.mxu0 %v13237_v15 }
 0xd70   : > { %7312 = vmatmul.mubr.f32.gmra.mrb[66].mxu1 %v15948_v54  ;;  %7425 = vmatmul.mubr.f32.gmra.mrb[74].mxu0 %v15948_v54 }
 0xd71   : > { %12624 = vmatpush1.bf16.msra.mxu1 %v13222_v24  ;;  %12656 = vmatpush1.bf16.msra.mxu0 %v13238_v4 }
 0xd72   : > { %7773 = vmatprep.mubr.f32.mxu1 %v17014_v20  ;;  %7886 = vmatprep.mubr.f32.mxu0 %v17014_v20 }
 0xd73   : > { %12658 = vmatprep.subr.bf16.mxu1 %v11196_v10  ;;  %12690 = vmatprep.subr.bf16.mxu0 %v11212_v2 }
 0xd74   : > { %7774 = vmatmul.mubr.f32.vlgmr.msra.gmra.mrb[68].mxu1 %v15865_v35  ;;  %7887 = vmatmul.mubr.f32.vlgmr.msra.gmra.mrb[76].mxu0 %v15865_v35 }
 0xd75   : > { %7779 = vmatprep.mubr.f32.mxu1 %v17014_v20  ;;  %7892 = vmatprep.mubr.f32.mxu0 %v17014_v20 }
 0xd76   : > { %12660 = vmatpush3.bf16.msra.mxu1 %v11188_v9  ;;  %12692 = vmatpush3.bf16.msra.mxu0 %v11204_v46 }
 0xd77   : > { %12662 = vmatprep.subr.bf16.mxu1 %v11197_v36  ;;  %12694 = vmatprep.subr.bf16.mxu0 %v11213_v14 }
 0xd78   : > { %7780 = vmatmul.mubr.f32.gmra.mrb[70].mxu1 %v15875_v5  ;;  %7893 = vmatmul.mubr.f32.gmra.mrb[78].mxu0 %v15875_v5 }
 0xd79   : > { %7785 = vmatprep.mubr.f32.mxu1 %v17014_v20  ;;  %7898 = vmatprep.mubr.f32.mxu0 %v17014_v20 }
 0xd7a   : > { %12664 = vmatpush3.bf16.msra.mxu1 %v11189_v18  ;;  %12696 = vmatpush3.bf16.msra.mxu0 %v11205_v57  ;;  %v7687_v57 = vld [vmem:[%s14862_s14 + $0x4] sm:$0xf] }
 0xd7b   : > { %12666 = vmatprep.subr.bf16.mxu1 %v11198_v11  ;;  %12698 = vmatprep.subr.bf16.mxu0 %v11214_v55  ;;  %v17021_v11 = vld [vmem:[#allocation38_spill] sm:$0xff] }
 0xd7c   : > { %7786 = vmatmul.mubr.f32.gmra.mrb[72].mxu1 %v15889_v12  ;;  %7899 = vmatmul.mubr.f32.gmra.mrb[80].mxu0 %v15889_v12  ;;  %v16078_v55 = vsub.s32 3, %v17021_v11 }
 0xd7d   : > { %7791 = vmatprep.mubr.f32.mxu1 %v17014_v20  ;;  %7904 = vmatprep.mubr.f32.mxu0 %v17014_v20 }
 0xd7e   : > { %12668 = vmatpush3.bf16.msra.mxu1 %v11190_v22  ;;  %12700 = vmatpush3.bf16.msra.mxu0 %v11206_v52  ;;  %17022 = vst [vmem:[#allocation38_spill] sm:$0xff] %v16078_v55 }
 0xd7f   : > { %12670 = vmatprep.subr.bf16.mxu1 %v11199_v19  ;;  %12702 = vmatprep.subr.bf16.mxu0 %v11215_v27 }
 0xd80   : > { %7792 = vmatmul.mubr.f32.gmra.mrb[74].mxu1 %v15901_v61  ;;  %7905 = vmatmul.mubr.f32.gmra.mrb[82].mxu0 %v15901_v61 }
 0xd81   : > { %7797 = vmatprep.mubr.f32.mxu1 %v17014_v20  ;;  %7910 = vmatprep.mubr.f32.mxu0 %v17014_v20 }
 0xd82   : > { %12672 = vmatpush3.bf16.msra.mxu1 %v11191_v25  ;;  %12704 = vmatpush3.bf16.msra.mxu0 %v11207_v29  ;;  %v17023_v25 = vld [vmem:[#allocation39_spill] sm:$0xff] }
 0xd83   : > { %12674 = vmatprep.subr.bf16.mxu1 %v11200_v26  ;;  %12706 = vmatprep.subr.bf16.mxu0 %v11216_v49  ;;  %v16089_v29 = vrot.slane %v7687_v57, %v17023_v25  ;;  %v17024_v26 = vld [vmem:[#allocation41_spill] sm:$0xff] }
 0xd84   : > { %7798 = vmatmul.mubr.f32.gmra.mrb[76].mxu1 %v15915_v7  ;;  %7911 = vmatmul.mubr.f32.gmra.mrb[84].mxu0 %v15915_v7  ;;  %v16092_v49 = vrot.slane %v7687_v57, %v17024_v26 }
 0xd85   : > { %7803 = vmatprep.mubr.f32.mxu1 %v17014_v20  ;;  %7916 = vmatprep.mubr.f32.mxu0 %v17014_v20 }
 0xd86   : > { %12676 = vmatpush3.bf16.msra.mxu1 %v11192_v32  ;;  %12708 = vmatpush3.bf16.msra.mxu0 %v11208_v34  ;;  %v17025_v32 = vld [vmem:[#allocation40_spill] sm:$0xff] }
 0xd87   : > { %12678 = vmatprep.subr.bf16.mxu1 %v11201_v38  ;;  %12710 = vmatprep.subr.bf16.mxu0 %v11217_v42  ;;  %v16095_v34 = vrot.slane %v7687_v57, %v17025_v32  ;;  %v16098_v38 = vrot.slane %v7687_v57, %v16078_v55 }
 0xd88   : > { %7804 = vmatmul.mubr.f32.gmra.mrb[78].mxu1 %v15927_v28  ;;  %7917 = vmatmul.mubr.f32.gmra.mrb[86].mxu0 %v15927_v28  ;;  %v11172_v28 = vld [vmem:[%s14883_s15 + $0x80] sm:$0xff]  }
 0xd89   : > { %7809 = vmatprep.mubr.f32.mxu1 %v17014_v20  ;;  %7922 = vmatprep.mubr.f32.mxu0 %v17014_v20 }
 0xd8a   : > { %12680 = vmatpush3.bf16.msra.mxu1 %v11193_v6  ;;  %12712 = vmatpush3.bf16.msra.mxu0 %v11209_v58 }
 0xd8b   : > { %12682 = vmatprep.subr.bf16.mxu1 %v11202_v47  ;;  %12714 = vmatprep.subr.bf16.mxu0 %v11218_v56 }
 0xd8c   : > { %7810 = vmatmul.mubr.f32.gmra.mrb[80].mxu1 %v15941_v16  ;;  %7923 = vmatmul.mubr.f32.gmra.mrb[88].mxu0 %v15941_v16  ;;  %v10607_v16 = vld [vmem:[%s14883_s15] sm:$0xff]  }
 0xd8d   : > { %7815 = vmatprep.mubr.f32.mxu1 %v17014_v20  ;;  %7928 = vmatprep.mubr.f32.mxu0 %v17014_v20 }
 0xd8e   : > { %12684 = vmatpush3.bf16.msra.mxu1 %v11194_v21  ;;  %12716 = vmatpush3.bf16.msra.mxu0 %v11210_v62 }
 0xd8f   : > { %12686 = vmatprep.subr.bf16.mxu1 %v11203_v3  ;;  %12718 = vmatprep.subr.bf16.mxu0 %v11219_v53 }
 0xd90   : > { %7816 = vmatmul.mubr.f32.gmra.mrb[82].mxu1 %v15948_v54  ;;  %7929 = vmatmul.mubr.f32.gmra.mrb[90].mxu0 %v15948_v54 }
 0xd92   : > { %12688 = vmatpush3.bf16.msra.mxu1 %v11195_v30  ;;  %12720 = vmatpush3.bf16.msra.mxu0 %v11211_v31 }
 0xd93   : > { %12722 = vmatprep.subr.bf16.mxu1 %v11164_v39  ;;  %12754 = vmatprep.subr.bf16.mxu0 %v11180_v1 }
 0xe27   : > { %v16020_v0 = vpop.f32.mrb[52].mxu1  ;;  %v16022_v17 = vpop.f32.mrb[60].mxu0 }
 0xe28   : > { %v16024_v45 = vpop.f32.mrb[53].mxu1  ;;  %v16026_v59 = vpop.f32.mrb[61].mxu0 }
 0xe2b   : > { %v16028_v51 = vpop.f32.mrb[54].mxu1  ;;  %v16030_v37 = vpop.f32.mrb[62].mxu0 }
 0xe2c   : > { %v16032_v8 = vpop.f32.mrb[55].mxu1  ;;  %v16034_v33 = vpop.f32.mrb[63].mxu0 }
 0xe2f   : > { %v16036_v40 = vpop.f32.mrb[56].mxu1  ;;  %v16038_v43 = vpop.f32.mrb[64].mxu0 }
 0xe30   : > { %v16040_v13 = vpop.f32.mrb[57].mxu1  ;;  %v16042_v50 = vpop.f32.mrb[65].mxu0 }
 0xe33   : > { %v16044_v23 = vpop.f32.mrb[58].mxu1  ;;  %v16046_v63 = vpop.f32.mrb[66].mxu0 }
 0xe34   : > { %v16048_v60 = vpop.f32.mrb[59].mxu1  ;;  %v16050_v44 = vpop.f32.mrb[67].mxu0 }
 0xe37   : > { %v16052_v41 = vpop.f32.mrb[60].mxu1  ;;  %v16054_v48 = vpop.f32.mrb[68].mxu0 }
 0xe38   : > { %v16056_v15 = vpop.f32.mrb[61].mxu1  ;;  %v16058_v24 = vpop.f32.mrb[69].mxu0 }
 0xe3b   : > { %v16060_v4 = vpop.f32.mrb[62].mxu1  ;;  %v16062_v10 = vpop.f32.mrb[70].mxu0 }
 0xe3c   : > { %v16064_v2 = vpop.f32.mrb[63].mxu1  ;;  %v16066_v9 = vpop.f32.mrb[71].mxu0 }
 0xe3f   : > { %v16068_v46 = vpop.f32.mrb[64].mxu1  ;;  %v16070_v36 = vpop.f32.mrb[72].mxu0 }
 0xe40   : > { %v16072_v14 = vpop.f32.mrb[65].mxu1  ;;  %v16074_v18 = vpop.f32.mrb[73].mxu0 }
 0xe43   : > { %v16080_v22 = vpop.f32.mrb[66].mxu1  ;;  %v16082_v52 = vpop.f32.mrb[74].mxu0 }
 0xe44   : > { %v16084_v19 = vpop.f32.mrb[67].mxu1  ;;  %v16086_v27 = vpop.f32.mrb[75].mxu0 }
 0xe47   : > { %v7775_v42 = vpop.f32.mrb[68].mxu1  ;;  %v7888_v6 = vpop.f32.mrb[76].mxu0 }
 0xe48   : > { %v7776_v58 = vadd.f32 %v7775_v42, %v16089_v29  ;;  %v7889_v47 = vadd.f32 %v7888_v6, %v16092_v49  ;;  %v7777_v56 = vpop.f32.mrb[69].mxu1  ;;  %v7890_v21 = vpop.f32.mrb[77].mxu0 }
 0xe49   : > { %v7778_v62 = vadd.f32 %v7777_v56, %v16095_v34  ;;  %v7891_v3 = vadd.f32 %v7890_v21, %v16098_v38 }
 0xe4a   : > { %v7935_v1 = vmax.f32 %v7776_v58, 0.0  ;;  %v7937_v57 = vmax.f32 %v7889_v47, 0.0 }
 0xe4b   : > { %v7936_v53 = vmax.f32 %v7778_v62, 0.0  ;;  %v7938_v30 = vmax.f32 %v7891_v3, 0.0  ;;  %v7781_v31 = vpop.f32.mrb[70].mxu1  ;;  %v7894_v39 = vpop.f32.mrb[78].mxu0  ;;  %v11165_v62 = vld [vmem:[%s14883_s15 + $0x48] sm:$0xff]  }
 0xe4c   : > { %v7782_v11 = vadd.f32 %v7781_v31, %v16089_v29  ;;  %v7895_v42 = vadd.f32 %v7894_v39, %v16092_v49  ;;  %v7783_v6 = vpop.f32.mrb[71].mxu1  ;;  %v7896_v54 = vpop.f32.mrb[79].mxu0  ;;  %v11181_v3 = vld [vmem:[%s14883_s15 + $0xc8] sm:$0xff]  }
 0xe4d   : > { %v7784_v56 = vadd.f32 %v7783_v6, %v16095_v34  ;;  %v7897_v21 = vadd.f32 %v7896_v54, %v16098_v38  ;;  %8031 = vmatprep.mubr.f32.mxu1 %v7936_v53  ;;  %8136 = vmatprep.mubr.f32.mxu0 %v7938_v30 }
 0xe4e   : > { %8032 = vmatmul.mubr.f32.vlgmr.msra.gmra.mrb[84].mxu1 %v7935_v1  ;;  %8137 = vmatmul.mubr.f32.vlgmr.msra.gmra.mrb[92].mxu0 %v7937_v57  ;;  %v7939_v7 = vmax.f32 %v7782_v11, 0.0  ;;  %v7941_v6 = vmax.f32 %v7895_v42, 0.0  ;;  %v11157_v1 = vld [vmem:[%s14883_s15 + $0x8] sm:$0xff]  }
 0xe4f   : > { %v7940_v58 = vmax.f32 %v7784_v56, 0.0  ;;  %v7942_v47 = vmax.f32 %v7897_v21, 0.0  ;;  %v7787_v31 = vpop.f32.mrb[72].mxu1  ;;  %v7900_v39 = vpop.f32.mrb[80].mxu0  ;;  %12724 = vmatpush3.bf16.msra.mxu1 %v10607_v16  ;;  %12756 = vmatpush3.bf16.msra.mxu0 %v11172_v28  ;;  %v11173_v57 = vld [vmem:[%s14883_s15 + $0x88] sm:$0xff]   ;;  %v11166_v28 = vld [vmem:[%s14883_s15 + $0x50] sm:$0xff]  }
 0xe50   : > { %v7788_v54 = vadd.f32 %v7787_v31, %v16089_v29  ;;  %v7901_v53 = vadd.f32 %v7900_v39, %v16092_v49  ;;  %v7789_v30 = vpop.f32.mrb[73].mxu1  ;;  %v7902_v61 = vpop.f32.mrb[81].mxu0  ;;  %12726 = vmatprep.subr.bf16.mxu1 %v11165_v62  ;;  %12758 = vmatprep.subr.bf16.mxu0 %v11181_v3  ;;  %v11182_v16 = vld [vmem:[%s14883_s15 + $0xd0] sm:$0xff]  }
 0xe51   : > { %v7790_v56 = vadd.f32 %v7789_v30, %v16095_v34  ;;  %v7903_v21 = vadd.f32 %v7902_v61, %v16098_v38  ;;  %8036 = vmatprep.mubr.f32.mxu1 %v7940_v58  ;;  %8141 = vmatprep.mubr.f32.mxu0 %v7942_v47 }
 0xe52   : > { %8037 = vmatmul.mubr.f32.gmra.mrb[86].mxu1 %v7939_v7  ;;  %8142 = vmatmul.mubr.f32.gmra.mrb[94].mxu0 %v7941_v6  ;;  %v7943_v62 = vmax.f32 %v7788_v54, 0.0  ;;  %v7945_v3 = vmax.f32 %v7901_v53, 0.0  ;;  %v11158_v7 = vld [vmem:[%s14883_s15 + $0x10] sm:$0xff]  }
 0xe53   : > { %v7944_v11 = vmax.f32 %v7790_v56, 0.0  ;;  %v7946_v42 = vmax.f32 %v7903_v21, 0.0  ;;  %v7793_v31 = vpop.f32.mrb[74].mxu1  ;;  %v7906_v39 = vpop.f32.mrb[82].mxu0  ;;  %12728 = vmatpush3.bf16.msra.mxu1 %v11157_v1  ;;  %12760 = vmatpush3.bf16.msra.mxu0 %v11173_v57  ;;  %v11174_v6 = vld [vmem:[%s14883_s15 + $0x90] sm:$0xff]   ;;  %v11167_v1 = vld [vmem:[%s14883_s15 + $0x58] sm:$0xff]  }
 0xe54   : > { %v7794_v61 = vadd.f32 %v7793_v31, %v16089_v29  ;;  %v7907_v58 = vadd.f32 %v7906_v39, %v16092_v49  ;;  %v7795_v47 = vpop.f32.mrb[75].mxu1  ;;  %v7908_v30 = vpop.f32.mrb[83].mxu0  ;;  %12730 = vmatprep.subr.bf16.mxu1 %v11166_v28  ;;  %12762 = vmatprep.subr.bf16.mxu0 %v11182_v16  ;;  %v11183_v57 = vld [vmem:[%s14883_s15 + $0xd8] sm:$0xff]  }
 0xe55   : > { %v7796_v56 = vadd.f32 %v7795_v47, %v16095_v34  ;;  %v7909_v21 = vadd.f32 %v7908_v30, %v16098_v38  ;;  %8041 = vmatprep.mubr.f32.mxu1 %v7944_v11  ;;  %8146 = vmatprep.mubr.f32.mxu0 %v7946_v42 }
 0xe56   : > { %8042 = vmatmul.mubr.f32.gmra.mrb[88].mxu1 %v7943_v62  ;;  %8147 = vmatmul.mubr.f32.gmra.mrb[96].mxu0 %v7945_v3  ;;  %v7947_v28 = vmax.f32 %v7794_v61, 0.0  ;;  %v7949_v16 = vmax.f32 %v7907_v58, 0.0  ;;  %v11159_v62 = vld [vmem:[%s14883_s15 + $0x18] sm:$0xff]  }
 0xe57   : > { %v7948_v54 = vmax.f32 %v7796_v56, 0.0  ;;  %v7950_v53 = vmax.f32 %v7909_v21, 0.0  ;;  %v7799_v31 = vpop.f32.mrb[76].mxu1  ;;  %v7912_v39 = vpop.f32.mrb[84].mxu0  ;;  %12732 = vmatpush3.bf16.msra.mxu1 %v11158_v7  ;;  %12764 = vmatpush3.bf16.msra.mxu0 %v11174_v6  ;;  %v11175_v3 = vld [vmem:[%s14883_s15 + $0x98] sm:$0xff]   ;;  %v11168_v7 = vld [vmem:[%s14883_s15 + $0x60] sm:$0xff]  }
 0xe58   : > { %v7800_v47 = vadd.f32 %v7799_v31, %v16089_v29  ;;  %v7913_v11 = vadd.f32 %v7912_v39, %v16092_v49  ;;  %v7801_v42 = vpop.f32.mrb[77].mxu1  ;;  %v7914_v30 = vpop.f32.mrb[85].mxu0  ;;  %12734 = vmatprep.subr.bf16.mxu1 %v11167_v1  ;;  %12766 = vmatprep.subr.bf16.mxu0 %v11183_v57  ;;  %v11184_v6 = vld [vmem:[%s14883_s15 + $0xe0] sm:$0xff]  }
 0xe59   : > { %v7802_v56 = vadd.f32 %v7801_v42, %v16095_v34  ;;  %v7915_v21 = vadd.f32 %v7914_v30, %v16098_v38  ;;  %8046 = vmatprep.mubr.f32.mxu1 %v7948_v54  ;;  %8151 = vmatprep.mubr.f32.mxu0 %v7950_v53  ;;  %v11176_v30 = vld [vmem:[%s14883_s15 + $0xa0] sm:$0xff]  }
 0xe5a   : > { %8047 = vmatmul.mubr.f32.gmra.mrb[90].mxu1 %v7947_v28  ;;  %8152 = vmatmul.mubr.f32.gmra.mrb[98].mxu0 %v7949_v16  ;;  %v7951_v1 = vmax.f32 %v7800_v47, 0.0  ;;  %v7953_v57 = vmax.f32 %v7913_v11, 0.0  ;;  %v11160_v16 = vld [vmem:[%s14883_s15 + $0x20] sm:$0xff]   ;;  %v11185_v47 = vld [vmem:[%s14883_s15 + $0xe8] sm:$0xff]  }
 0xe5b   : > { %v7952_v61 = vmax.f32 %v7802_v56, 0.0  ;;  %v7954_v58 = vmax.f32 %v7915_v21, 0.0  ;;  %v7805_v31 = vpop.f32.mrb[78].mxu1  ;;  %v7918_v39 = vpop.f32.mrb[86].mxu0  ;;  %12736 = vmatpush3.bf16.msra.mxu1 %v11159_v62  ;;  %12768 = vmatpush3.bf16.msra.mxu0 %v11175_v3  ;;  %v11169_v3 = vld [vmem:[%s14883_s15 + $0x68] sm:$0xff]  }
 0xe5c   : > { %v7806_v54 = vadd.f32 %v7805_v31, %v16089_v29  ;;  %v7919_v53 = vadd.f32 %v7918_v39, %v16092_v49  ;;  %v7807_v42 = vpop.f32.mrb[79].mxu1  ;;  %v7920_v28 = vpop.f32.mrb[87].mxu0  ;;  %12738 = vmatprep.subr.bf16.mxu1 %v11168_v7  ;;  %12770 = vmatprep.subr.bf16.mxu0 %v11184_v6  ;;  %v7183_v21 = vld [vmem:[%s14862_s14] sm:$0xf] }
 0xe5d   : > { %v7808_v56 = vadd.f32 %v7807_v42, %v16095_v34  ;;  %v7921_v62 = vadd.f32 %v7920_v28, %v16098_v38  ;;  %8051 = vmatprep.mubr.f32.mxu1 %v7952_v61  ;;  %8156 = vmatprep.mubr.f32.mxu0 %v7954_v58 }
 0xe5e   : > { %8052 = vmatmul.mubr.f32.gmra.mrb[92].mxu1 %v7951_v1  ;;  %8157 = vmatmul.mubr.f32.gmra.mrb[100].mxu0 %v7953_v57  ;;  %v7955_v6 = vmax.f32 %v7806_v54, 0.0  ;;  %v7957_v42 = vmax.f32 %v7919_v53, 0.0  ;;  %v11161_v1 = vld [vmem:[%s14883_s15 + $0x28] sm:$0xff]   ;;  %v11170_v54 = vld [vmem:[%s14883_s15 + $0x70] sm:$0xff]  }
 0xe5f   : > { %v7956_v11 = vmax.f32 %v7808_v56, 0.0  ;;  %v7958_v31 = vmax.f32 %v7921_v62, 0.0  ;;  %v7811_v39 = vpop.f32.mrb[80].mxu1  ;;  %v7924_v7 = vpop.f32.mrb[88].mxu0  ;;  %12740 = vmatpush3.bf16.msra.mxu1 %v11160_v16  ;;  %12772 = vmatpush3.bf16.msra.mxu0 %v11176_v30  ;;  %v11177_v57 = vld [vmem:[%s14883_s15 + $0xa8] sm:$0xff]   ;;  %v16150_v56 = vrot.slane %v7183_v21, %v17025_v32  ;;  %v11186_v53 = vld [vmem:[%s14883_s15 + $0xf0] sm:$0xff]   ;;  %v16157_v62 = vrot.slane %v7183_v21, %v16078_v55 }
 0xe60   : > { %v7812_v61 = vadd.f32 %v7811_v39, %v16089_v29  ;;  %v7925_v58 = vadd.f32 %v7924_v7, %v16092_v49  ;;  %v7813_v28 = vpop.f32.mrb[81].mxu1  ;;  %v7926_v12 = vpop.f32.mrb[89].mxu0  ;;  %12742 = vmatprep.subr.bf16.mxu1 %v11169_v3  ;;  %12774 = vmatprep.subr.bf16.mxu0 %v11185_v47  ;;  %v16160_v3 = vrot.slane %v7183_v21, %v17023_v25 }
 0xe61   : > { %v7814_v16 = vadd.f32 %v7813_v28, %v16095_v34  ;;  %v7927_v30 = vadd.f32 %v7926_v12, %v16098_v38  ;;  %8056 = vmatprep.mubr.f32.mxu1 %v7956_v11  ;;  %8161 = vmatprep.mubr.f32.mxu0 %v7958_v31  ;;  %v16163_v47 = vrot.slane %v7183_v21, %v17024_v26  ;;  %v11162_v31 = vld [vmem:[%s14883_s15 + $0x30] sm:$0xff]  }
 0xe62   : > { %8057 = vmatmul.mubr.f32.gmra.mrb[94].mxu1 %v7955_v6  ;;  %8162 = vmatmul.mubr.f32.gmra.mrb[102].mxu0 %v7957_v42  ;;  %v7959_v28 = vmax.f32 %v7812_v61, 0.0  ;;  %v7961_v6 = vmax.f32 %v7925_v58, 0.0 }
 0xe63   : > { %v7960_v39 = vmax.f32 %v7814_v16, 0.0  ;;  %v7962_v12 = vmax.f32 %v7927_v30, 0.0  ;;  %v7817_v7 = vpop.f32.mrb[82].mxu1  ;;  %v7930_v11 = vpop.f32.mrb[90].mxu0  ;;  %12744 = vmatpush3.bf16.msra.mxu1 %v11161_v1  ;;  %12776 = vmatpush3.bf16.msra.mxu0 %v11177_v57  ;;  %v11178_v16 = vld [vmem:[%s14883_s15 + $0xb0] sm:$0xff]   ;;  %v11171_v30 = vld [vmem:[%s14883_s15 + $0x78] sm:$0xff]   ;;  %v7274_v1 = vadd.f32 %v16024_v45, %v16150_v56 }
 0xe64   : > { %v7818_v42 = vadd.f32 %v7817_v7, %v16089_v29  ;;  %v7931_v55 = vadd.f32 %v7930_v11, %v16092_v49  ;;  %v7819_v21 = vpop.f32.mrb[83].mxu1  ;;  %v7932_v32 = vpop.f32.mrb[91].mxu0  ;;  %12746 = vmatprep.subr.bf16.mxu1 %v11170_v54  ;;  %12778 = vmatprep.subr.bf16.mxu0 %v11186_v53  ;;  %v11187_v29 = vld [vmem:[%s14883_s15 + $0xf8] sm:$0xff]   ;;  %v8387_v57 = vld [vmem:[%s14881_s0 + $0x20] sm:$0xff]  ;;  %v7387_v54 = vadd.f32 %v16026_v59, %v16157_v62  ;;  %v16180_v53 = vld [vmem:[%s14881_s0 + $0x28] sm:$0xff] }
 0xe65   : > { %v7820_v61 = vadd.f32 %v7819_v21, %v16095_v34  ;;  %v7933_v58 = vadd.f32 %v7932_v32, %v16098_v38  ;;  %8061 = vmatprep.mubr.f32.mxu1 %v7960_v39  ;;  %8166 = vmatprep.mubr.f32.mxu0 %v7962_v12  ;;  %v8389_v49 = vld [vmem:[%s14881_s0 + $0x60] sm:$0xff]  ;;  %v16183_v7 = vld [vmem:[%s14881_s0 + $0x68] sm:$0xff]  ;;  %v7272_v32 = vadd.f32 %v16020_v0, %v16160_v3  ;;  %v11163_v59 = vld [vmem:[%s14883_s15 + $0x38] sm:$0xff]  }
 0xe66   : > { %8062 = vmatmul.mubr.f32.gmra.mrb[96].mxu1 %v7959_v28  ;;  %8167 = vmatmul.mubr.f32.gmra.mrb[104].mxu0 %v7961_v6  ;;  %v7963_v38 = vmax.f32 %v7818_v42, 0.0  ;;  %v7965_v39 = vmax.f32 %v7931_v55, 0.0  ;;  %v13239_v12 = vcombine.high %v8387_v57, %v8389_v49  ;;  %v7385_v11 = vadd.f32 %v16022_v17, %v16163_v47  ;;  %v11179_v6 = vld [vmem:[%s14883_s15 + $0xb8] sm:$0xff]   ;;  %v8391_v55 = vld [vmem:[%s14881_s0 + $0xa0] sm:$0xff] }
 0xe67   : > { %v7964_v45 = vmax.f32 %v7820_v61, 0.0  ;;  %v7966_v34 = vmax.f32 %v7933_v58, 0.0  ;;  %12748 = vmatpush3.bf16.msra.mxu1 %v11162_v31  ;;  %12780 = vmatpush3.bf16.msra.mxu0 %v11178_v16  ;;  %v7432_v28 = vmax.f32 %v7274_v1, 0.0  ;;  %v7280_v31 = vadd.f32 %v16032_v8, %v16150_v56  ;;  %v8393_v42 = vld [vmem:[%s14881_s0 + $0xe0] sm:$0xff]  ;;  %v8392_v8 = vld [vmem:[%s14881_s0 + $0xa8] sm:$0xff] }
 0xe68   : > { %12750 = vmatprep.subr.bf16.mxu1 %v11171_v30  ;;  %12782 = vmatprep.subr.bf16.mxu0 %v11187_v29  ;;  %v13255_v0 = vcombine.high %v16180_v53, %v16183_v7  ;;  %v7434_v21 = vmax.f32 %v7387_v54, 0.0  ;;  %v7393_v16 = vadd.f32 %v16034_v33, %v16157_v62  ;;  %v13240_v17 = vcombine.low %v8387_v57, %v8389_v49  ;;  %v8394_v30 = vld [vmem:[%s14881_s0 + $0xe8] sm:$0xff] }
 0xe69   : > { %8066 = vmatprep.mubr.f32.mxu1 %v7964_v45  ;;  %8171 = vmatprep.mubr.f32.mxu0 %v7966_v34  ;;  %v7431_v1 = vmax.f32 %v7272_v32, 0.0  ;;  %v7278_v61 = vadd.f32 %v16028_v51, %v16160_v3  ;;  %v13256_v58 = vcombine.low %v16180_v53, %v16183_v7  ;;  %v13241_v29 = vcombine.high %v8391_v55, %v8393_v42  ;;  %v8395_v45 = vld [vmem:[%s14881_s0 + $0x120] sm:$0xff] }
 0xe6a   : > { %8067 = vmatmul.mubr.f32.gmra.mrb[98].mxu1 %v7963_v38  ;;  %8172 = vmatmul.mubr.f32.gmra.mrb[106].mxu0 %v7965_v39  ;;  %v7433_v33 = vmax.f32 %v7385_v11, 0.0  ;;  %v7391_v54 = vadd.f32 %v16030_v37, %v16163_v47  ;;  %v7436_v57 = vmax.f32 %v7280_v31, 0.0  ;;  %v7286_v49 = vadd.f32 %v16040_v13, %v16150_v56  ;;  %v8397_v51 = vld [vmem:[%s14881_s0 + $0x160] sm:$0xff]  ;;  %v8396_v37 = vld [vmem:[%s14881_s0 + $0x128] sm:$0xff] }
 0xe6b   : > { %12752 = vmatpush3.bf16.msra.mxu1 %v11163_v59  ;;  %8241 = vmatprep.mubr.f32.mxu1 %v7432_v28  ;;  %v7438_v34 = vmax.f32 %v7393_v16, 0.0  ;;  %v7399_v32 = vadd.f32 %v16042_v50, %v16157_v62  ;;  %v13257_v53 = vcombine.high %v8392_v8, %v8394_v30  ;;  %v13242_v7 = vcombine.low %v8391_v55, %v8393_v42  ;;  %v8398_v38 = vld [vmem:[%s14881_s0 + $0x168] sm:$0xff] }
 0xe6c   : > { %12784 = vmatpush3.bf16.msra.mxu0 %v11179_v6  ;;  %8346 = vmatprep.mubr.f32.mxu0 %v7434_v21  ;;  %v7435_v39 = vmax.f32 %v7278_v61, 0.0  ;;  %v7284_v13 = vadd.f32 %v16036_v40, %v16160_v3  ;;  %v13258_v59 = vcombine.low %v8392_v8, %v8394_v30  ;;  %v7437_v11 = vmax.f32 %v7391_v54, 0.0  ;;  %v16222_v6 = vld [vmem:[%s14881_s0 + $0x1a0] sm:$0xff]  ;;  %v8400_v21 = vld [vmem:[%s14881_s0 + $0x1a8] sm:$0xff] }
 0xe6d   : > { %12786 = vmatprep.subr.bf16.mxu1 %v13239_v12  ;;  %12818 = vmatprep.subr.bf16.mxu0 %v13255_v0  ;;  %v13243_v12 = vcombine.high %v8395_v45, %v8397_v51  ;;  %v7397_v50 = vadd.f32 %v16038_v43, %v16163_v47  ;;  %v7440_v28 = vmax.f32 %v7286_v49, 0.0  ;;  %v7292_v31 = vadd.f32 %v16048_v60, %v16150_v56  ;;  %v8401_v0 = vld [vmem:[%s14881_s0 + $0x1e0] sm:$0xff]  ;;  %v8402_v16 = vld [vmem:[%s14881_s0 + $0x1e8] sm:$0xff] }
 0xe6e   : > { %8242 = vmatmul.mubr.f32.vlgmr.msra.gmra.mrb[100].mxu1 %v7431_v1  ;;  %v7442_v40 = vmax.f32 %v7399_v32, 0.0  ;;  %v7405_v55 = vadd.f32 %v16050_v44, %v16157_v62  ;;  %v13259_v42 = vcombine.high %v8396_v37, %v8398_v38  ;;  %v13244_v43 = vcombine.low %v8395_v45, %v8397_v51  ;;  %v8404_v49 = vld [vmem:[%s14881_s0 + $0x228] sm:$0xff] }
 0xe6f   : > { %8347 = vmatmul.mubr.f32.vlgmr.msra.gmra.mrb[108].mxu0 %v7433_v33  ;;  %8246 = vmatprep.mubr.f32.mxu1 %v7436_v57  ;;  %v7439_v60 = vmax.f32 %v7284_v13, 0.0  ;;  %v13260_v8 = vcombine.low %v8396_v37, %v8398_v38  ;;  %v13245_v30 = vcombine.high %v16222_v6, %v8401_v0  ;;  %v7441_v44 = vmax.f32 %v7397_v50, 0.0  ;;  %v8407_v38 = vld [vmem:[%s14881_s0 + $0x2a0] sm:$0xff] }
 0xe70   : > { %8351 = vmatprep.mubr.f32.mxu0 %v7438_v34  ;;  %12788 = vmatpush1.bf16.msra.mxu1 %v13240_v17  ;;  %v7290_v17 = vadd.f32 %v16044_v23, %v16160_v3  ;;  %v7403_v1 = vadd.f32 %v16046_v63, %v16163_v47  ;;  %v7444_v61 = vmax.f32 %v7292_v31, 0.0  ;;  %v8405_v23 = vld [vmem:[%s14881_s0 + $0x260] sm:$0xff]  ;;  %v7446_v33 = vmax.f32 %v7405_v55, 0.0 }
 0xe71   : > { %12820 = vmatpush1.bf16.msra.mxu0 %v13256_v58  ;;  %12790 = vmatprep.subr.bf16.mxu1 %v13241_v29  ;;  %v7298_v58 = vadd.f32 %v16056_v15, %v16150_v56  ;;  %v16237_v29 = vld [vmem:[%s14881_s0 + $0x220] sm:$0xff]  ;;  %v7411_v54 = vadd.f32 %v16058_v24, %v16157_v62  ;;  %v13261_v57 = vcombine.high %v8400_v21, %v8402_v16  ;;  %v8406_v15 = vld [vmem:[%s14881_s0 + $0x268] sm:$0xff] }
 0xe72   : > { %8247 = vmatmul.mubr.f32.gmra.mrb[102].mxu1 %v7435_v39  ;;  %12822 = vmatprep.subr.bf16.mxu0 %v13257_v53  ;;  %v13246_v63 = vcombine.low %v16222_v6, %v8401_v0  ;;  %v7443_v45 = vmax.f32 %v7290_v17, 0.0  ;;  %v7296_v51 = vadd.f32 %v16052_v41, %v16160_v3  ;;  %v13262_v34 = vcombine.low %v8400_v21, %v8402_v16  ;;  %v8409_v39 = vld [vmem:[%s14881_s0 + $0x2e0] sm:$0xff] }
 0xe73   : > { %8352 = vmatmul.mubr.f32.gmra.mrb[110].mxu0 %v7437_v11  ;;  %8251 = vmatprep.mubr.f32.mxu1 %v7440_v28  ;;  %v13247_v24 = vcombine.high %v16237_v29, %v8405_v23  ;;  %v7445_v32 = vmax.f32 %v7403_v1, 0.0  ;;  %v7409_v53 = vadd.f32 %v16054_v48, %v16163_v47  ;;  %v7304_v37 = vadd.f32 %v16064_v2, %v16150_v56  ;;  %v8410_v11 = vld [vmem:[%s14881_s0 + $0x2e8] sm:$0xff]  ;;  %v8411_v55 = vld [vmem:[%s14881_s0 + $0x320] sm:$0xff] }
 0xe74   : > { %8356 = vmatprep.mubr.f32.mxu0 %v7442_v40  ;;  %12792 = vmatpush1.bf16.msra.mxu1 %v13242_v7  ;;  %v7448_v7 = vmax.f32 %v7298_v58, 0.0  ;;  %v7450_v41 = vmax.f32 %v7411_v54, 0.0  ;;  %v7417_v13 = vadd.f32 %v16066_v9, %v16157_v62  ;;  %v13248_v48 = vcombine.low %v16237_v29, %v8405_v23  ;;  %v8415_v23 = vld [vmem:[%s14881_s0 + $0x3a0] sm:$0xff]  ;;  %v8416_v54 = vld [vmem:[%s14881_s0 + $0x3a8] sm:$0xff] }
 0xe75   : > { %12824 = vmatpush1.bf16.msra.mxu0 %v13258_v59  ;;  %12794 = vmatprep.subr.bf16.mxu1 %v13243_v12  ;;  %v13263_v59 = vcombine.high %v8404_v49, %v8406_v15  ;;  %v8408_v12 = vld [vmem:[%s14881_s0 + $0x2a8] sm:$0xff]  ;;  %v7447_v2 = vmax.f32 %v7296_v51, 0.0  ;;  %v7302_v50 = vadd.f32 %v16060_v4, %v16160_v3  ;;  %v13264_v28 = vcombine.low %v8404_v49, %v8406_v15 }
 0xe76   : > { %8252 = vmatmul.mubr.f32.gmra.mrb[104].mxu1 %v7439_v60  ;;  %12826 = vmatprep.subr.bf16.mxu0 %v13259_v42  ;;  %v13249_v31 = vcombine.high %v8407_v38, %v8409_v39  ;;  %v7449_v9 = vmax.f32 %v7409_v53, 0.0  ;;  %v7415_v6 = vadd.f32 %v16062_v10, %v16163_v47  ;;  %v7452_v0 = vmax.f32 %v7304_v37, 0.0  ;;  %v8413_v42 = vld [vmem:[%s14881_s0 + $0x360] sm:$0xff]  ;;  %v8412_v10 = vld [vmem:[%s14881_s0 + $0x328] sm:$0xff]  ;;  %v17031_v37 = vld [vmem:[#allocation47_spill] sm:$0xff] }
 0xe77   : > { %8357 = vmatmul.mubr.f32.gmra.mrb[112].mxu0 %v7441_v44  ;;  %8256 = vmatprep.mubr.f32.mxu1 %v7444_v61  ;;  %v7310_v40 = vadd.f32 %v16072_v14, %v16150_v56  ;;  %v7423_v4 = vadd.f32 %v16074_v18, %v16157_v62  ;;  %v13265_v21 = vcombine.high %v8408_v12, %v8410_v11  ;;  %v8414_v60 = vld [vmem:[%s14881_s0 + $0x368] sm:$0xff]  ;;  %v7451_v17 = vmax.f32 %v7302_v50, 0.0  ;;  %v17029_v53 = vld [vmem:[#allocation45_spill] sm:$0xff]  ;;  %v11246_v50 = vld [vmem:[%s14883_s15 + $0x2d0] sm:$0xff]  }
 0xe78   : > { %8361 = vmatprep.mubr.f32.mxu0 %v7446_v33  ;;  %12796 = vmatpush1.bf16.msra.mxu1 %v13244_v43  ;;  %v7454_v43 = vmax.f32 %v7417_v13, 0.0  ;;  %v13250_v16 = vcombine.low %v8407_v38, %v8409_v39  ;;  %v7308_v14 = vadd.f32 %v16068_v46, %v16160_v3  ;;  %v7453_v18 = vmax.f32 %v7415_v6, 0.0  ;;  %v8417_v33 = vld [vmem:[%s14881_s0 + $0x3e0] sm:$0xff]  ;;  %v11247_v6 = vld [vmem:[%s14883_s15 + $0x2d8] sm:$0xff]  }
 0xe79   : > { %12828 = vmatpush1.bf16.msra.mxu0 %v13260_v8  ;;  %12798 = vmatprep.subr.bf16.mxu1 %v13245_v30  ;;  %v13266_v8 = vcombine.low %v8408_v12, %v8410_v11  ;;  %v13251_v30 = vcombine.high %v8411_v55, %v8413_v42  ;;  %v7421_v44 = vadd.f32 %v16070_v36, %v16163_v47  ;;  %v7456_v1 = vmax.f32 %v7310_v40, 0.0  ;;  %v11228_v38 = vld [vmem:[%s14883_s15 + $0x240] sm:$0xff]   ;;  %v11221_v12 = vld [vmem:[%s14883_s15 + $0x208] sm:$0xff]   ;;  %v11239_v40 = vld [vmem:[%s14883_s15 + $0x298] sm:$0xff]  }
 0xe7a   : > { %8257 = vmatmul.mubr.f32.gmra.mrb[106].mxu1 %v7443_v45  ;;  %12830 = vmatprep.subr.bf16.mxu0 %v13261_v57  ;;  %v7316_v61 = vadd.f32 %v16084_v19, %v16150_v56  ;;  %v7458_v58 = vmax.f32 %v7423_v4, 0.0  ;;  %v7429_v46 = vadd.f32 %v16086_v27, %v16157_v62  ;;  %v13267_v29 = vcombine.high %v8412_v10, %v8414_v60  ;;  %v8418_v57 = vld [vmem:[%s14881_s0 + $0x3e8] sm:$0xff]  ;;  %v11244_v39 = vld [vmem:[%s14883_s15 + $0x2c0] sm:$0xff]  }
 0xe7b   : > { %8362 = vmatmul.mubr.f32.gmra.mrb[114].mxu0 %v7445_v32  ;;  %8261 = vmatprep.mubr.f32.mxu1 %v7448_v7  ;;  %v7455_v36 = vmax.f32 %v7308_v14, 0.0  ;;  %v13252_v19 = vcombine.low %v8411_v55, %v8413_v42  ;;  %v13268_v56 = vcombine.low %v8412_v10, %v8414_v60  ;;  %v7457_v49 = vmax.f32 %v7421_v44, 0.0  ;;  %v17028_v32 = vld [vmem:[#allocation44_spill] sm:$0xff]  ;;  %v17030_v7 = vld [vmem:[#allocation46_spill] sm:$0xff]  ;;  %v11236_v13 = vld [vmem:[%s14883_s15 + $0x280] sm:$0xff]  }
 0xe7c   : > { %8366 = vmatprep.mubr.f32.mxu0 %v7450_v41  ;;  %12800 = vmatpush1.bf16.msra.mxu1 %v13246_v63  ;;  %v7314_v63 = vadd.f32 %v16080_v22, %v16160_v3  ;;  %v7427_v27 = vadd.f32 %v16082_v52, %v16163_v47  ;;  %v7460_v62 = vmax.f32 %v7316_v61, 0.0  ;;  %v13253_v15 = vcombine.high %v8415_v23, %v8417_v33  ;;  %v17026_v52 = vld [vmem:[#allocation42_spill] sm:$0xff]  ;;  %v17027_v47 = vld [vmem:[#allocation43_spill] sm:$0xff]  ;;  %v11220_v41 = vld [vmem:[%s14883_s15 + $0x200] sm:$0xff]  }
 0xe7d   : > { %12832 = vmatpush1.bf16.msra.mxu0 %v13262_v34  ;;  %12802 = vmatprep.subr.bf16.mxu1 %v13247_v24  ;;  %v7462_v45 = vmax.f32 %v7429_v46, 0.0  ;;  %v13269_v51 = vcombine.high %v8416_v54, %v8418_v57  ;;  %v13254_v22 = vcombine.low %v8415_v23, %v8417_v33  ;;  %v13270_v24 = vcombine.low %v8416_v54, %v8418_v57  ;;  %v11237_v11 = vld [vmem:[%s14883_s15 + $0x288] sm:$0xff]   ;;  %v11232_v55 = vld [vmem:[%s14883_s15 + $0x260] sm:$0xff]   ;;  %v11250_v14 = vld [vmem:[%s14883_s15 + $0x2f0] sm:$0xff]  }
 0xe7e   : > { %8262 = vmatmul.mubr.f32.gmra.mrb[108].mxu1 %v7447_v2  ;;  %12834 = vmatprep.subr.bf16.mxu0 %v13263_v59  ;;  %v7459_v34 = vmax.f32 %v7314_v63, 0.0  ;;  %v7461_v3 = vmax.f32 %v7427_v27, 0.0  ;;  %v11229_v59 = vld [vmem:[%s14883_s15 + $0x248] sm:$0xff]   ;;  %v11230_v2 = vld [vmem:[%s14883_s15 + $0x250] sm:$0xff]   ;;  %v11248_v42 = vld [vmem:[%s14883_s15 + $0x2e0] sm:$0xff]  }
 0xe7f   : > { %8367 = vmatmul.mubr.f32.gmra.mrb[116].mxu0 %v7449_v9  ;;  %8266 = vmatprep.mubr.f32.mxu1 %v7452_v0  ;;  %v11231_v9 = vld [vmem:[%s14883_s15 + $0x258] sm:$0xff]   ;;  %v11240_v4 = vld [vmem:[%s14883_s15 + $0x2a0] sm:$0xff]   ;;  %v11225_v10 = vld [vmem:[%s14883_s15 + $0x228] sm:$0xff]  }
 0xe80   : > { %8371 = vmatprep.mubr.f32.mxu0 %v7454_v43  ;;  %12804 = vmatpush1.bf16.msra.mxu1 %v13248_v48  ;;  %v11245_v48 = vld [vmem:[%s14883_s15 + $0x2c8] sm:$0xff]   ;;  %v11223_v0 = vld [vmem:[%s14883_s15 + $0x218] sm:$0xff]   ;;  %v11224_v43 = vld [vmem:[%s14883_s15 + $0x220] sm:$0xff]  }
 0xe81   : > { %12836 = vmatpush1.bf16.msra.mxu0 %v13264_v28  ;;  %12806 = vmatprep.subr.bf16.mxu1 %v13249_v31  ;;  %v11222_v28 = vld [vmem:[%s14883_s15 + $0x210] sm:$0xff]   ;;  %v11241_v60 = vld [vmem:[%s14883_s15 + $0x2a8] sm:$0xff]   ;;  %v11251_v44 = vld [vmem:[%s14883_s15 + $0x2f8] sm:$0xff]  }
 0xe82   : > { %8267 = vmatmul.mubr.f32.gmra.mrb[110].mxu1 %v7451_v17  ;;  %12838 = vmatprep.subr.bf16.mxu0 %v13265_v21  ;;  %v11238_v31 = vld [vmem:[%s14883_s15 + $0x290] sm:$0xff]   ;;  %v11233_v21 = vld [vmem:[%s14883_s15 + $0x268] sm:$0xff]   ;;  %v11243_v61 = vld [vmem:[%s14883_s15 + $0x2b8] sm:$0xff]  }
 0xe83   : > { %8372 = vmatmul.mubr.f32.gmra.mrb[118].mxu0 %v7453_v18  ;;  %8271 = vmatprep.mubr.f32.mxu1 %v7456_v1  ;;  %v11234_v17 = vld [vmem:[%s14883_s15 + $0x270] sm:$0xff]   ;;  %v11235_v18 = vld [vmem:[%s14883_s15 + $0x278] sm:$0xff]  }
 0xe84   : > { %8376 = vmatprep.mubr.f32.mxu0 %v7458_v58  ;;  %12808 = vmatpush1.bf16.msra.mxu1 %v13250_v16  ;;  %v11249_v16 = vld [vmem:[%s14883_s15 + $0x2e8] sm:$0xff]   ;;  %v11227_v1 = vld [vmem:[%s14883_s15 + $0x238] sm:$0xff]   ;;  %v16352_v58 = vld [vmem:[%s14881_s0 + $0x30] sm:$0xff] }
 0xe85   : > { %12840 = vmatpush1.bf16.msra.mxu0 %v13266_v8  ;;  %12810 = vmatprep.subr.bf16.mxu1 %v13251_v30  ;;  %v11226_v8 = vld [vmem:[%s14883_s15 + $0x230] sm:$0xff]   ;;  %v16363_v33 = vld [vmem:[%s14881_s0 + $0x78] sm:$0xff] }
 0xe86   : > { %8272 = vmatmul.mubr.f32.gmra.mrb[112].mxu1 %v7455_v36  ;;  %12842 = vmatprep.subr.bf16.mxu0 %v13267_v29  ;;  %v11242_v30 = vld [vmem:[%s14883_s15 + $0x2b0] sm:$0xff]   ;;  %v16358_v29 = vld [vmem:[%s14881_s0 + $0x38] sm:$0xff] }
 0xe87   : > { %8377 = vmatmul.mubr.f32.gmra.mrb[120].mxu0 %v7457_v49  ;;  %8276 = vmatprep.mubr.f32.mxu1 %v7460_v62  ;;  %v16355_v46 = vld [vmem:[%s14881_s0 + $0x70] sm:$0xff]  ;;  %v13287_v57 = vcombine.high %v16358_v29, %v16363_v33  ;;  %v13288_v36 = vcombine.low %v16358_v29, %v16363_v33 }
 0xe88   : > { %8381 = vmatprep.mubr.f32.mxu0 %v7462_v45  ;;  %12812 = vmatpush1.bf16.msra.mxu1 %v13252_v19  ;;  %v13271_v23 = vcombine.high %v16352_v58, %v16355_v46  ;;  %v13272_v54 = vcombine.low %v16352_v58, %v16355_v46  ;;  %v16444_v29 = vld [vmem:[%s14881_s0 + $0x1b0] sm:$0xff] }
 0xe89   : > { %12844 = vmatpush1.bf16.msra.mxu0 %v13268_v56  ;;  %12814 = vmatprep.subr.bf16.mxu1 %v13253_v15  ;;  %v16447_v33 = vld [vmem:[%s14881_s0 + $0x1f0] sm:$0xff] }
 0xe8a   : > { %8277 = vmatmul.mubr.f32.gmra.mrb[114].mxu1 %v7459_v34  ;;  %12846 = vmatprep.subr.bf16.mxu0 %v13269_v51 }
 0xe8b   : > { %8382 = vmatmul.mubr.f32.gmra.mrb[122].mxu0 %v7461_v3  ;;  %8697 = vmatprep.mubr.f32.mxu1 %v17014_v20 }
 0xe8c   : > { %12816 = vmatpush1.bf16.msra.mxu1 %v13254_v22  ;;  %8810 = vmatprep.mubr.f32.mxu0 %v17014_v20 }
 0xe8d   : > { %12848 = vmatpush1.bf16.msra.mxu0 %v13270_v24  ;;  %12850 = vmatprep.subr.bf16.mxu1 %v11228_v38 }
 0xe8e   : > { %12882 = vmatprep.subr.bf16.mxu0 %v11244_v39 }
 0xe8f   : > { %8698 = vmatmul.mubr.f32.vlgmr.msra.gmra.mrb[116].mxu1 %v15865_v35 }
 0xe90   : > { %8811 = vmatmul.mubr.f32.vlgmr.msra.gmra.mrb[124].mxu0 %v15865_v35  ;;  %8703 = vmatprep.mubr.f32.mxu1 %v17014_v20 }
 0xe91   : > { %8816 = vmatprep.mubr.f32.mxu0 %v17014_v20  ;;  %12852 = vmatpush3.bf16.msra.mxu1 %v11220_v41 }
 0xe92   : > { %12884 = vmatpush3.bf16.msra.mxu0 %v11236_v13  ;;  %12854 = vmatprep.subr.bf16.mxu1 %v11229_v59 }
 0xe93   : > { %8704 = vmatmul.mubr.f32.gmra.mrb[118].mxu1 %v15875_v5  ;;  %12886 = vmatprep.subr.bf16.mxu0 %v11245_v48 }
 0xe94   : > { %8817 = vmatmul.mubr.f32.gmra.mrb[126].mxu0 %v15875_v5  ;;  %8709 = vmatprep.mubr.f32.mxu1 %v17014_v20 }
 0xe95   : > { %8822 = vmatprep.mubr.f32.mxu0 %v17014_v20  ;;  %12856 = vmatpush3.bf16.msra.mxu1 %v11221_v12 }
 0xe96   : > { %12888 = vmatpush3.bf16.msra.mxu0 %v11237_v11  ;;  %12858 = vmatprep.subr.bf16.mxu1 %v11230_v2 }
 0xe97   : > { %8710 = vmatmul.mubr.f32.gmra.mrb[120].mxu1 %v17026_v52  ;;  %12890 = vmatprep.subr.bf16.mxu0 %v11246_v50 }
 0xe98   : > { %8823 = vmatmul.mubr.f32.gmra.mrb[128].mxu0 %v17026_v52  ;;  %8715 = vmatprep.mubr.f32.mxu1 %v17014_v20 }
 0xe99   : > { %8828 = vmatprep.mubr.f32.mxu0 %v17014_v20  ;;  %12860 = vmatpush3.bf16.msra.mxu1 %v11222_v28 }
 0xe9a   : > { %12892 = vmatpush3.bf16.msra.mxu0 %v11238_v31  ;;  %12862 = vmatprep.subr.bf16.mxu1 %v11231_v9 }
 0xe9b   : > { %8716 = vmatmul.mubr.f32.gmra.mrb[122].mxu1 %v17027_v47  ;;  %12894 = vmatprep.subr.bf16.mxu0 %v11247_v6 }
 0xe9c   : > { %8829 = vmatmul.mubr.f32.gmra.mrb[130].mxu0 %v17027_v47  ;;  %8721 = vmatprep.mubr.f32.mxu1 %v17014_v20 }
 0xe9d   : > { %8834 = vmatprep.mubr.f32.mxu0 %v17014_v20  ;;  %12864 = vmatpush3.bf16.msra.mxu1 %v11223_v0 }
 0xe9e   : > { %12896 = vmatpush3.bf16.msra.mxu0 %v11239_v40  ;;  %12866 = vmatprep.subr.bf16.mxu1 %v11232_v55 }
 0xe9f   : > { %8722 = vmatmul.mubr.f32.gmra.mrb[124].mxu1 %v17028_v32  ;;  %12898 = vmatprep.subr.bf16.mxu0 %v11248_v42 }
 0xea0   : > { %8835 = vmatmul.mubr.f32.gmra.mrb[132].mxu0 %v17028_v32  ;;  %8727 = vmatprep.mubr.f32.mxu1 %v17014_v20 }
 0xea1   : > { %8840 = vmatprep.mubr.f32.mxu0 %v17014_v20  ;;  %12868 = vmatpush3.bf16.msra.mxu1 %v11224_v43 }
 0xea2   : > { %12900 = vmatpush3.bf16.msra.mxu0 %v11240_v4  ;;  %12870 = vmatprep.subr.bf16.mxu1 %v11233_v21 }
 0xea3   : > { %8728 = vmatmul.mubr.f32.gmra.mrb[126].mxu1 %v17029_v53  ;;  %12902 = vmatprep.subr.bf16.mxu0 %v11249_v16 }
 0xea4   : > { %8841 = vmatmul.mubr.f32.gmra.mrb[134].mxu0 %v17029_v53  ;;  %8733 = vmatprep.mubr.f32.mxu1 %v17014_v20 }
 0xea5   : > { %8846 = vmatprep.mubr.f32.mxu0 %v17014_v20  ;;  %12872 = vmatpush3.bf16.msra.mxu1 %v11225_v10 }
 0xea6   : > { %12904 = vmatpush3.bf16.msra.mxu0 %v11241_v60  ;;  %12874 = vmatprep.subr.bf16.mxu1 %v11234_v17 }
 0xea7   : > { %8734 = vmatmul.mubr.f32.gmra.mrb[128].mxu1 %v17030_v7  ;;  %12906 = vmatprep.subr.bf16.mxu0 %v11250_v14 }
 0xea8   : > { %8847 = vmatmul.mubr.f32.gmra.mrb[136].mxu0 %v17030_v7  ;;  %8739 = vmatprep.mubr.f32.mxu1 %v17014_v20 }
 0xea9   : > { %8852 = vmatprep.mubr.f32.mxu0 %v17014_v20  ;;  %12876 = vmatpush3.bf16.msra.mxu1 %v11226_v8 }
 0xeaa   : > { %12908 = vmatpush3.bf16.msra.mxu0 %v11242_v30  ;;  %12878 = vmatprep.subr.bf16.mxu1 %v11235_v18 }
 0xeab   : > { %8740 = vmatmul.mubr.f32.gmra.mrb[130].mxu1 %v17031_v37  ;;  %12910 = vmatprep.subr.bf16.mxu0 %v11251_v44 }
 0xeac   : > { %8853 = vmatmul.mubr.f32.gmra.mrb[138].mxu0 %v17031_v37 }
 0xead   : > { %12880 = vmatpush3.bf16.msra.mxu1 %v11227_v1 }
 0xeae   : > { %12912 = vmatpush3.bf16.msra.mxu0 %v11243_v61  ;;  %12914 = vmatprep.subr.bf16.mxu1 %v13271_v23 }
 0xeaf   : > { %12946 = vmatprep.subr.bf16.mxu0 %v13287_v57 }
 0xf21   : > { %v11509_v63 = vpop.f32.mrb[84].mxu1  ;;  %v11565_v19 = vpop.f32.mrb[92].mxu0 }
 0xf22   : > { %v11510_v56 = vpop.f32.mrb[85].mxu1  ;;  %v11566_v49 = vpop.f32.mrb[93].mxu0 }
 0xf23   : > { %v11511_v27 = vadd.f32 %v11510_v56, %v11509_v63  ;;  %v11567_v62 = vadd.f32 %v11566_v49, %v11565_v19 }
 0xf25   : > { %v8139_v15 = vadd.f32 %v11567_v62, %v11511_v27  ;;  %v11512_v45 = vpop.f32.mrb[86].mxu1  ;;  %v11568_v51 = vpop.f32.mrb[94].mxu0 }
 0xf26   : > { %v11513_v34 = vpop.f32.mrb[87].mxu1  ;;  %v11569_v22 = vpop.f32.mrb[95].mxu0 }
 0xf27   : > { %v11514_v3 = vadd.f32 %v11513_v34, %v11512_v45  ;;  %v11570_v24 = vadd.f32 %v11569_v22, %v11568_v51 }
 0xf29   : > { %v8144_v38 = vadd.f32 %v11570_v24, %v11514_v3  ;;  %v11515_v39 = vpop.f32.mrb[88].mxu1  ;;  %v11571_v41 = vpop.f32.mrb[96].mxu0 }
 0xf2a   : > { %v11516_v13 = vpop.f32.mrb[89].mxu1  ;;  %v11572_v59 = vpop.f32.mrb[97].mxu0 }
 0xf2b   : > { %v11517_v48 = vadd.f32 %v11516_v13, %v11515_v39  ;;  %v11573_v12 = vadd.f32 %v11572_v59, %v11571_v41 }
 0xf2d   : > { %v8149_v11 = vadd.f32 %v11573_v12, %v11517_v48  ;;  %v11518_v2 = vpop.f32.mrb[90].mxu1  ;;  %v11574_v50 = vpop.f32.mrb[98].mxu0 }
 0xf2e   : > { %v11519_v28 = vpop.f32.mrb[91].mxu1  ;;  %v11575_v31 = vpop.f32.mrb[99].mxu0 }
 0xf2f   : > { %v11520_v9 = vadd.f32 %v11519_v28, %v11518_v2  ;;  %v11576_v6 = vadd.f32 %v11575_v31, %v11574_v50 }
 0xf31   : > { %v8154_v0 = vadd.f32 %v11576_v6, %v11520_v9  ;;  %v11521_v40 = vpop.f32.mrb[92].mxu1  ;;  %v11577_v55 = vpop.f32.mrb[100].mxu0 }
 0xf32   : > { %v11522_v42 = vpop.f32.mrb[93].mxu1  ;;  %v11578_v43 = vpop.f32.mrb[101].mxu0 }
 0xf33   : > { %v11523_v4 = vadd.f32 %v11522_v42, %v11521_v40  ;;  %v11579_v21 = vadd.f32 %v11578_v43, %v11577_v55 }
 0xf35   : > { %v8159_v16 = vadd.f32 %v11579_v21, %v11523_v4  ;;  %v11524_v10 = vpop.f32.mrb[94].mxu1  ;;  %v11580_v60 = vpop.f32.mrb[102].mxu0 }
 0xf36   : > { %v11525_v17 = vpop.f32.mrb[95].mxu1  ;;  %v11581_v14 = vpop.f32.mrb[103].mxu0 }
 0xf37   : > { %v11526_v8 = vadd.f32 %v11525_v17, %v11524_v10  ;;  %v11582_v30 = vadd.f32 %v11581_v14, %v11580_v60 }
 0xf39   : > { %v8164_v18 = vadd.f32 %v11582_v30, %v11526_v8  ;;  %v11527_v44 = vpop.f32.mrb[96].mxu1  ;;  %v11583_v1 = vpop.f32.mrb[104].mxu0 }
 0xf3a   : > { %v11528_v61 = vpop.f32.mrb[97].mxu1  ;;  %v11584_v23 = vpop.f32.mrb[105].mxu0 }
 0xf3b   : > { %v11529_v57 = vadd.f32 %v11528_v61, %v11527_v44  ;;  %v11585_v63 = vadd.f32 %v11584_v23, %v11583_v1 }
 0xf3d   : > { %v16371_v19 = vadd.f32 %v11585_v63, %v11529_v57  ;;  %v11530_v56 = vpop.f32.mrb[98].mxu1  ;;  %v11586_v49 = vpop.f32.mrb[106].mxu0 }
 0xf3e   : > { %v11531_v27 = vpop.f32.mrb[99].mxu1  ;;  %v11587_v62 = vpop.f32.mrb[107].mxu0 }
 0xf3f   : > { %v11532_v45 = vadd.f32 %v11531_v27, %v11530_v56  ;;  %v11588_v51 = vadd.f32 %v11587_v62, %v11586_v49 }
 0xf41   : > { %v16373_v34 = vadd.f32 %v11588_v51, %v11532_v45  ;;  %v11621_v22 = vpop.f32.mrb[100].mxu1 }
 0xf42   : > { %v11677_v3 = vpop.f32.mrb[108].mxu0  ;;  %v11622_v24 = vpop.f32.mrb[101].mxu1 }
 0xf43   : > { %v11623_v39 = vadd.f32 %v11622_v24, %v11621_v22  ;;  %v11678_v41 = vpop.f32.mrb[109].mxu0 }
 0xf44   : > { %v11679_v13 = vadd.f32 %v11678_v41, %v11677_v3 }
 0xf45   : > { %v8244_v59 = vadd.f32 %v11623_v39, %v8139_v15  ;;  %v11624_v48 = vpop.f32.mrb[102].mxu1 }
 0xf46   : > { %v11680_v12 = vpop.f32.mrb[110].mxu0  ;;  %v11625_v2 = vpop.f32.mrb[103].mxu1 }
 0xf47   : > { %v16375_v50 = vadd.f32 %v11679_v13, %v8244_v59  ;;  %v11626_v28 = vadd.f32 %v11625_v2, %v11624_v48  ;;  %v11681_v31 = vpop.f32.mrb[111].mxu0 }
 0xf48   : > { %v11682_v9 = vadd.f32 %v11681_v31, %v11680_v12  ;;  %v8611_v31 = vld [vmem:[%s14862_s14 + $0x8] sm:$0xf] }
 0xf49   : > { %v8249_v6 = vadd.f32 %v11626_v28, %v8144_v38  ;;  %v11627_v40 = vpop.f32.mrb[104].mxu1 }
 0xf4a   : > { %v11683_v55 = vpop.f32.mrb[112].mxu0  ;;  %v11628_v42 = vpop.f32.mrb[105].mxu1 }
 0xf4b   : > { %v16377_v43 = vadd.f32 %v11682_v9, %v8249_v6  ;;  %v11629_v4 = vadd.f32 %v11628_v42, %v11627_v40  ;;  %v11684_v21 = vpop.f32.mrb[113].mxu0 }
 0xf4c   : > { %v11685_v10 = vadd.f32 %v11684_v21, %v11683_v55 }
 0xf4d   : > { %v8254_v60 = vadd.f32 %v11629_v4, %v8149_v11  ;;  %v11630_v17 = vpop.f32.mrb[106].mxu1 }
 0xf4e   : > { %v11686_v15 = vpop.f32.mrb[114].mxu0  ;;  %v11631_v14 = vpop.f32.mrb[107].mxu1 }
 0xf4f   : > { %v16379_v8 = vadd.f32 %v11685_v10, %v8254_v60  ;;  %v11632_v30 = vadd.f32 %v11631_v14, %v11630_v17  ;;  %v11687_v44 = vpop.f32.mrb[115].mxu0  ;;  %v16395_v10 = vrot.slane %v8611_v31, %v17024_v26  ;;  %v17032_v60 = vld [vmem:[#allocation40_spill] sm:$0xff] }
 0xf50   : > { %v11688_v1 = vadd.f32 %v11687_v44, %v11686_v15  ;;  %v17033_v15 = vld [vmem:[#allocation38_spill] sm:$0xff] }
 0xf51   : > { %v8259_v61 = vadd.f32 %v11632_v30, %v8154_v0  ;;  %v11633_v23 = vpop.f32.mrb[108].mxu1  ;;  %v16402_v14 = vrot.slane %v8611_v31, %v17033_v15 }
 0xf52   : > { %v11689_v38 = vpop.f32.mrb[116].mxu0  ;;  %v11634_v57 = vpop.f32.mrb[109].mxu1 }
 0xf53   : > { %v16381_v63 = vadd.f32 %v11688_v1, %v8259_v61  ;;  %v11635_v56 = vadd.f32 %v11634_v57, %v11633_v23  ;;  %v11690_v49 = vpop.f32.mrb[117].mxu0 }
 0xf54   : > { %v11691_v27 = vadd.f32 %v11690_v49, %v11689_v38  ;;  %v9113_v49 = vld [vmem:[%s14881_s0 + $0xb0] sm:$0xff] }
 0xf55   : > { %v8264_v62 = vadd.f32 %v11635_v56, %v8159_v16  ;;  %v11636_v11 = vpop.f32.mrb[110].mxu1 }
 0xf56   : > { %v11692_v45 = vpop.f32.mrb[118].mxu0  ;;  %v11637_v51 = vpop.f32.mrb[111].mxu1 }
 0xf57   : > { %v16383_v22 = vadd.f32 %v11691_v27, %v8264_v62  ;;  %v11638_v3 = vadd.f32 %v11637_v51, %v11636_v11  ;;  %v11693_v24 = vpop.f32.mrb[119].mxu0  ;;  %v9115_v27 = vld [vmem:[%s14881_s0 + $0xf0] sm:$0xff]  ;;  %v9116_v11 = vld [vmem:[%s14881_s0 + $0xf8] sm:$0xff] }
 0xf58   : > { %v11694_v39 = vadd.f32 %v11693_v24, %v11692_v45 }
 0xf59   : > { %v8269_v41 = vadd.f32 %v11638_v3, %v8164_v18  ;;  %v11639_v0 = vpop.f32.mrb[112].mxu1  ;;  %v16392_v18 = vrot.slane %v8611_v31, %v17023_v25 }
 0xf5a   : > { %v11695_v13 = vpop.f32.mrb[120].mxu0  ;;  %v11640_v59 = vpop.f32.mrb[113].mxu1 }
 0xf5b   : > { %v16385_v48 = vadd.f32 %v11694_v39, %v8269_v41  ;;  %v11641_v12 = vadd.f32 %v11640_v59, %v11639_v0  ;;  %v11696_v2 = vpop.f32.mrb[121].mxu0 }
 0xf5c   : > { %v11697_v28 = vadd.f32 %v11696_v2, %v11695_v13  ;;  %v13273_v13 = vcombine.high %v9113_v49, %v9115_v27 }
 0xf5d   : > { %v8274_v16 = vadd.f32 %v11641_v12, %v16371_v19  ;;  %v11642_v9 = vpop.f32.mrb[114].mxu1  ;;  %v16398_v19 = vrot.slane %v8611_v31, %v17032_v60 }
 0xf5e   : > { %v11698_v6 = vpop.f32.mrb[122].mxu0  ;;  %v11643_v40 = vpop.f32.mrb[115].mxu1 }
 0xf5f   : > { %v16389_v55 = vadd.f32 %v11697_v28, %v8274_v16  ;;  %v11644_v42 = vadd.f32 %v11643_v40, %v11642_v9  ;;  %v11699_v4 = vpop.f32.mrb[123].mxu0  ;;  %v16418_v16 = vld [vmem:[%s14881_s0 + $0x130] sm:$0xff]  ;;  %v16425_v40 = vld [vmem:[%s14881_s0 + $0x138] sm:$0xff] }
 0xf60   : > { %v11700_v21 = vadd.f32 %v11699_v4, %v11698_v6  ;;  %v16421_v9 = vld [vmem:[%s14881_s0 + $0x170] sm:$0xff] }
 0xf61   : > { %v8279_v17 = vadd.f32 %v11644_v42, %v16373_v34  ;;  %v9114_v34 = vld [vmem:[%s14881_s0 + $0xb8] sm:$0xff]  ;;  %v13275_v58 = vcombine.high %v16418_v16, %v16421_v9 }
 0xf62   : > { %v8699_v30 = vpop.f32.mrb[116].mxu1  ;;  %v13289_v31 = vcombine.high %v9114_v34, %v9116_v11  ;;  %v16428_v42 = vld [vmem:[%s14881_s0 + $0x178] sm:$0xff] }
 0xf63   : > { %v16404_v44 = vadd.f32 %v11700_v21, %v8279_v17  ;;  %v8700_v1 = vadd.f32 %v8699_v30, %v16392_v18  ;;  %v8812_v61 = vpop.f32.mrb[124].mxu0  ;;  %v8701_v23 = vpop.f32.mrb[117].mxu1  ;;  %v13274_v17 = vcombine.low %v9113_v49, %v9115_v27  ;;  %v13290_v30 = vcombine.low %v9114_v34, %v9116_v11  ;;  %v16454_v34 = vld [vmem:[%s14881_s0 + $0x1f8] sm:$0xff] }
 0xf64   : > { %v8813_v38 = vadd.f32 %v8812_v61, %v16395_v10  ;;  %v8702_v57 = vadd.f32 %v8701_v23, %v16398_v19  ;;  %v8814_v56 = vpop.f32.mrb[125].mxu0  ;;  %v13291_v27 = vcombine.high %v16425_v40, %v16428_v42 }
 0xf65   : > { %v8815_v62 = vadd.f32 %v8814_v56, %v16402_v14  ;;  %v8859_v3 = vmax.f32 %v8700_v1, 0.0 }
 0xf66   : > { %v8860_v45 = vmax.f32 %v8702_v57, 0.0  ;;  %v8705_v51 = vpop.f32.mrb[118].mxu1  ;;  %v8861_v59 = vmax.f32 %v8813_v38, 0.0 }
 0xf67   : > { %v8862_v24 = vmax.f32 %v8815_v62, 0.0  ;;  %v8706_v39 = vadd.f32 %v8705_v51, %v16392_v18  ;;  %v8818_v41 = vpop.f32.mrb[126].mxu0  ;;  %v8707_v0 = vpop.f32.mrb[119].mxu1  ;;  %v16451_v62 = vld [vmem:[%s14881_s0 + $0x1b8] sm:$0xff]  ;;  %v13276_v51 = vcombine.low %v16418_v16, %v16421_v9  ;;  %v16468_v9 = vld [vmem:[%s14881_s0 + $0x230] sm:$0xff] }
 0xf68   : > { %v8819_v12 = vadd.f32 %v8818_v41, %v16395_v10  ;;  %v8708_v2 = vadd.f32 %v8707_v0, %v16398_v19  ;;  %v8820_v28 = vpop.f32.mrb[127].mxu0  ;;  %8955 = vmatprep.mubr.f32.mxu1 %v8860_v45  ;;  %v13293_v16 = vcombine.high %v16451_v62, %v16454_v34 }
 0xf69   : > { %v8821_v6 = vadd.f32 %v8820_v28, %v16402_v14  ;;  %9060 = vmatprep.mubr.f32.mxu0 %v8862_v24  ;;  %8956 = vmatmul.mubr.f32.vlgmr.msra.gmra.mrb[132].mxu1 %v8859_v3  ;;  %v8863_v1 = vmax.f32 %v8706_v39, 0.0  ;;  %v13292_v3 = vcombine.low %v16425_v40, %v16428_v42  ;;  %v16475_v42 = vld [vmem:[%s14881_s0 + $0x238] sm:$0xff] }
 0xf6a   : > { %v8864_v4 = vmax.f32 %v8708_v2, 0.0  ;;  %9061 = vmatmul.mubr.f32.vlgmr.msra.gmra.mrb[140].mxu0 %v8861_v59  ;;  %v8711_v21 = vpop.f32.mrb[120].mxu1  ;;  %12916 = vmatpush1.bf16.msra.mxu1 %v13272_v54  ;;  %v8865_v46 = vmax.f32 %v8819_v12, 0.0  ;;  %v13277_v59 = vcombine.high %v16444_v29, %v16447_v33 }
 0xf6b   : > { %v8866_v61 = vmax.f32 %v8821_v6, 0.0  ;;  %v8712_v23 = vadd.f32 %v8711_v21, %v16392_v18  ;;  %v8824_v38 = vpop.f32.mrb[128].mxu0  ;;  %12948 = vmatpush1.bf16.msra.mxu0 %v13288_v36  ;;  %v8713_v57 = vpop.f32.mrb[121].mxu1  ;;  %12918 = vmatprep.subr.bf16.mxu1 %v13273_v13  ;;  %v16471_v6 = vld [vmem:[%s14881_s0 + $0x270] sm:$0xff] }
 0xf6c   : > { %v8825_v54 = vadd.f32 %v8824_v38, %v16395_v10  ;;  %v8714_v56 = vadd.f32 %v8713_v57, %v16398_v19  ;;  %v8826_v49 = vpop.f32.mrb[129].mxu0  ;;  %8960 = vmatprep.mubr.f32.mxu1 %v8864_v4  ;;  %12950 = vmatprep.subr.bf16.mxu0 %v13289_v31  ;;  %v16478_v4 = vld [vmem:[%s14881_s0 + $0x278] sm:$0xff] }
 0xf6d   : > { %v8827_v36 = vadd.f32 %v8826_v49, %v16402_v14  ;;  %9065 = vmatprep.mubr.f32.mxu0 %v8866_v61  ;;  %8961 = vmatmul.mubr.f32.gmra.mrb[134].mxu1 %v8863_v1  ;;  %v8867_v24 = vmax.f32 %v8712_v23, 0.0  ;;  %v13294_v1 = vcombine.low %v16451_v62, %v16454_v34  ;;  %v16499_v34 = vld [vmem:[%s14881_s0 + $0x2b8] sm:$0xff] }
 0xf6e   : > { %v8868_v11 = vmax.f32 %v8714_v56, 0.0  ;;  %9066 = vmatmul.mubr.f32.gmra.mrb[142].mxu0 %v8865_v46  ;;  %v8717_v45 = vpop.f32.mrb[122].mxu1  ;;  %12920 = vmatpush1.bf16.msra.mxu1 %v13274_v17  ;;  %v8869_v12 = vmax.f32 %v8825_v54, 0.0  ;;  %v13279_v46 = vcombine.high %v16468_v9, %v16471_v6 }
 0xf6f   : > { %v8870_v39 = vmax.f32 %v8827_v36, 0.0  ;;  %v8718_v41 = vadd.f32 %v8717_v45, %v16392_v18  ;;  %v8830_v0 = vpop.f32.mrb[130].mxu0  ;;  %12952 = vmatpush1.bf16.msra.mxu0 %v13290_v30  ;;  %v8719_v13 = vpop.f32.mrb[123].mxu1  ;;  %12922 = vmatprep.subr.bf16.mxu1 %v13275_v58  ;;  %v13278_v30 = vcombine.low %v16444_v29, %v16447_v33  ;;  %v13295_v29 = vcombine.high %v16475_v42, %v16478_v4  ;;  %v16492_v33 = vld [vmem:[%s14881_s0 + $0x2b0] sm:$0xff] }
 0xf70   : > { %v8831_v2 = vadd.f32 %v8830_v0, %v16395_v10  ;;  %v8720_v28 = vadd.f32 %v8719_v13, %v16398_v19  ;;  %v8832_v31 = vpop.f32.mrb[131].mxu0  ;;  %8965 = vmatprep.mubr.f32.mxu1 %v8868_v11  ;;  %12954 = vmatprep.subr.bf16.mxu0 %v13291_v27  ;;  %v16495_v36 = vld [vmem:[%s14881_s0 + $0x2f0] sm:$0xff]  ;;  %v16502_v11 = vld [vmem:[%s14881_s0 + $0x2f8] sm:$0xff] }
 0xf71   : > { %v8833_v40 = vadd.f32 %v8832_v31, %v16402_v14  ;;  %9070 = vmatprep.mubr.f32.mxu0 %v8870_v39  ;;  %8966 = vmatmul.mubr.f32.gmra.mrb[136].mxu1 %v8867_v24  ;;  %v8871_v61 = vmax.f32 %v8718_v41, 0.0  ;;  %v13296_v24 = vcombine.low %v16475_v42, %v16478_v4  ;;  %v9134_v4 = vld [vmem:[%s14881_s0 + $0x338] sm:$0xff] }
 0xf72   : > { %v8872_v21 = vmax.f32 %v8720_v28, 0.0  ;;  %9071 = vmatmul.mubr.f32.gmra.mrb[144].mxu0 %v8869_v12  ;;  %v8723_v17 = vpop.f32.mrb[124].mxu1  ;;  %12924 = vmatpush1.bf16.msra.mxu1 %v13276_v51  ;;  %v8873_v54 = vmax.f32 %v8831_v2, 0.0  ;;  %v13281_v12 = vcombine.high %v16492_v33, %v16495_v36 }
 0xf73   : > { %v8874_v23 = vmax.f32 %v8833_v40, 0.0  ;;  %v8724_v38 = vadd.f32 %v8723_v17, %v16392_v18  ;;  %v8836_v57 = vpop.f32.mrb[132].mxu0  ;;  %12956 = vmatpush1.bf16.msra.mxu0 %v13292_v3  ;;  %v8725_v58 = vpop.f32.mrb[125].mxu1  ;;  %12926 = vmatprep.subr.bf16.mxu1 %v13277_v59  ;;  %v13280_v3 = vcombine.low %v16468_v9, %v16471_v6  ;;  %v13297_v9 = vcombine.high %v16499_v34, %v16502_v11  ;;  %v9133_v6 = vld [vmem:[%s14881_s0 + $0x330] sm:$0xff] }
 0xf74   : > { %v8837_v56 = vadd.f32 %v8836_v57, %v16395_v10  ;;  %v8726_v49 = vadd.f32 %v8725_v58, %v16398_v19  ;;  %v8838_v27 = vpop.f32.mrb[133].mxu0  ;;  %8970 = vmatprep.mubr.f32.mxu1 %v8872_v21  ;;  %12958 = vmatprep.subr.bf16.mxu0 %v13293_v16  ;;  %v9135_v40 = vld [vmem:[%s14881_s0 + $0x370] sm:$0xff]  ;;  %v9136_v21 = vld [vmem:[%s14881_s0 + $0x378] sm:$0xff] }
 0xf75   : > { %v8839_v62 = vadd.f32 %v8838_v27, %v16402_v14  ;;  %9075 = vmatprep.mubr.f32.mxu0 %v8874_v23  ;;  %8971 = vmatmul.mubr.f32.gmra.mrb[138].mxu1 %v8871_v61  ;;  %v8875_v39 = vmax.f32 %v8724_v38, 0.0  ;;  %v13298_v61 = vcombine.low %v16499_v34, %v16502_v11  ;;  %v9138_v11 = vld [vmem:[%s14881_s0 + $0x3b8] sm:$0xff] }
 0xf76   : > { %v8876_v45 = vmax.f32 %v8726_v49, 0.0  ;;  %9076 = vmatmul.mubr.f32.gmra.mrb[146].mxu0 %v8873_v54  ;;  %v8729_v51 = vpop.f32.mrb[126].mxu1  ;;  %12928 = vmatpush1.bf16.msra.mxu1 %v13278_v30  ;;  %v8877_v2 = vmax.f32 %v8837_v56, 0.0  ;;  %v13283_v54 = vcombine.high %v9133_v6, %v9135_v40 }
 0xf77   : > { %v8878_v41 = vmax.f32 %v8839_v62, 0.0  ;;  %v8730_v0 = vadd.f32 %v8729_v51, %v16392_v18  ;;  %v8842_v13 = vpop.f32.mrb[134].mxu0  ;;  %12960 = vmatpush1.bf16.msra.mxu0 %v13294_v1  ;;  %v8731_v59 = vpop.f32.mrb[127].mxu1  ;;  %12930 = vmatprep.subr.bf16.mxu1 %v13279_v46  ;;  %v13282_v1 = vcombine.low %v16492_v33, %v16495_v36  ;;  %v13299_v33 = vcombine.high %v9134_v4, %v9136_v21  ;;  %v9137_v36 = vld [vmem:[%s14881_s0 + $0x3b0] sm:$0xff] }
 0xf78   : > { %v8843_v28 = vadd.f32 %v8842_v13, %v16395_v10  ;;  %v8732_v31 = vadd.f32 %v8731_v59, %v16398_v19  ;;  %v8844_v16 = vpop.f32.mrb[135].mxu0  ;;  %8975 = vmatprep.mubr.f32.mxu1 %v8876_v45  ;;  %12962 = vmatprep.subr.bf16.mxu0 %v13295_v29  ;;  %v9139_v62 = vld [vmem:[%s14881_s0 + $0x3f0] sm:$0xff]  ;;  %v9140_v45 = vld [vmem:[%s14881_s0 + $0x3f8] sm:$0xff] }
 0xf79   : > { %v8845_v42 = vadd.f32 %v8844_v16, %v16402_v14  ;;  %9080 = vmatprep.mubr.f32.mxu0 %v8878_v41  ;;  %8976 = vmatmul.mubr.f32.gmra.mrb[140].mxu1 %v8875_v39  ;;  %v8879_v23 = vmax.f32 %v8730_v0, 0.0  ;;  %v13300_v39 = vcombine.low %v9134_v4, %v9136_v21 }
 0xf7a   : > { %v8880_v17 = vmax.f32 %v8732_v31, 0.0  ;;  %9081 = vmatmul.mubr.f32.gmra.mrb[148].mxu0 %v8877_v2  ;;  %v8735_v30 = vpop.f32.mrb[128].mxu1  ;;  %12932 = vmatpush1.bf16.msra.mxu1 %v13280_v3  ;;  %v8881_v56 = vmax.f32 %v8843_v28, 0.0  ;;  %v13285_v2 = vcombine.high %v9137_v36, %v9139_v62 }
 0xf7b   : > { %v8882_v38 = vmax.f32 %v8845_v42, 0.0  ;;  %v8736_v57 = vadd.f32 %v8735_v30, %v16392_v18  ;;  %v8848_v58 = vpop.f32.mrb[136].mxu0  ;;  %12964 = vmatpush1.bf16.msra.mxu0 %v13296_v24  ;;  %v8737_v46 = vpop.f32.mrb[129].mxu1  ;;  %12934 = vmatprep.subr.bf16.mxu1 %v13281_v12  ;;  %v13284_v24 = vcombine.low %v9133_v6, %v9135_v40  ;;  %v13301_v42 = vcombine.high %v9138_v11, %v9140_v45  ;;  %v11252_v30 = vld [vmem:[%s14883_s15 + $0x300] sm:$0xff]  }
 0xf7c   : > { %v8849_v49 = vadd.f32 %v8848_v58, %v16395_v10  ;;  %v8738_v27 = vadd.f32 %v8737_v46, %v16398_v19  ;;  %v8850_v29 = vpop.f32.mrb[137].mxu0  ;;  %8980 = vmatprep.mubr.f32.mxu1 %v8880_v17  ;;  %12966 = vmatprep.subr.bf16.mxu0 %v13297_v9  ;;  %v13302_v17 = vcombine.low %v9138_v11, %v9140_v45  ;;  %v16587_v58 = vld [vmem:[%s14883_s15 + $0x3d0] sm:$0xff]   ;;  %v11265_v11 = vld [vmem:[%s14883_s15 + $0x368] sm:$0xff]  }
 0xf7d   : > { %v8851_v34 = vadd.f32 %v8850_v29, %v16402_v14  ;;  %9085 = vmatprep.mubr.f32.mxu0 %v8882_v38  ;;  %8981 = vmatmul.mubr.f32.gmra.mrb[142].mxu1 %v8879_v23  ;;  %v8883_v41 = vmax.f32 %v8736_v57, 0.0  ;;  %v11253_v23 = vld [vmem:[%s14883_s15 + $0x308] sm:$0xff]   ;;  %v11262_v57 = vld [vmem:[%s14883_s15 + $0x350] sm:$0xff]   ;;  %v16602_v29 = vld [vmem:[%s14883_s15 + $0x398] sm:$0xff]  }
 0xf7e   : > { %v8884_v51 = vmax.f32 %v8738_v27, 0.0  ;;  %9086 = vmatmul.mubr.f32.gmra.mrb[150].mxu0 %v8881_v56  ;;  %v8741_v3 = vpop.f32.mrb[130].mxu1  ;;  %12936 = vmatpush1.bf16.msra.mxu1 %v13282_v1  ;;  %v8885_v28 = vmax.f32 %v8849_v49, 0.0  ;;  %v16572_v1 = vld [vmem:[%s14883_s15 + $0x380] sm:$0xff]   ;;  %v16582_v38 = vld [vmem:[%s14883_s15 + $0x388] sm:$0xff]   ;;  %v11254_v46 = vld [vmem:[%s14883_s15 + $0x310] sm:$0xff]  }
 0xf7f   : > { %v8886_v0 = vmax.f32 %v8851_v34, 0.0  ;;  %v8742_v13 = vadd.f32 %v8741_v3, %v16392_v18  ;;  %v8854_v59 = vpop.f32.mrb[138].mxu0  ;;  %12968 = vmatpush1.bf16.msra.mxu0 %v13298_v61  ;;  %v8743_v12 = vpop.f32.mrb[131].mxu1  ;;  %12938 = vmatprep.subr.bf16.mxu1 %v13283_v54  ;;  %v13286_v18 = vcombine.low %v9137_v36, %v9139_v62  ;;  %v16577_v61 = vld [vmem:[%s14883_s15 + $0x3c8] sm:$0xff]   ;;  %v16592_v54 = vld [vmem:[%s14883_s15 + $0x390] sm:$0xff]   ;;  %v11263_v56 = vld [vmem:[%s14883_s15 + $0x358] sm:$0xff]  }
 0xf80   : > { %v8855_v31 = vadd.f32 %v8854_v59, %v16395_v10  ;;  %v8744_v16 = vadd.f32 %v8743_v12, %v16398_v19  ;;  %v8856_v9 = vpop.f32.mrb[139].mxu0  ;;  %8985 = vmatprep.mubr.f32.mxu1 %v8884_v51  ;;  %12970 = vmatprep.subr.bf16.mxu0 %v13299_v33  ;;  %v11260_v19 = vld [vmem:[%s14883_s15 + $0x340] sm:$0xff]   ;;  %v16597_v49 = vld [vmem:[%s14883_s15 + $0x3d8] sm:$0xff]   ;;  %v16617_v45 = vld [vmem:[%s14883_s15 + $0x3e8] sm:$0xff]  }
 0xf81   : > { %v8857_v6 = vadd.f32 %v8856_v9, %v16402_v14  ;;  %9090 = vmatprep.mubr.f32.mxu0 %v8886_v0  ;;  %8986 = vmatmul.mubr.f32.gmra.mrb[144].mxu1 %v8883_v41  ;;  %v8887_v4 = vmax.f32 %v8742_v13, 0.0  ;;  %v11276_v14 = vld [vmem:[%s14883_s15 + $0x3c0] sm:$0xff]   ;;  %v11255_v27 = vld [vmem:[%s14883_s15 + $0x318] sm:$0xff]   ;;  %v11257_v51 = vld [vmem:[%s14883_s15 + $0x328] sm:$0xff]  }
 0xf82   : > { %v8888_v40 = vmax.f32 %v8744_v16, 0.0  ;;  %9091 = vmatmul.mubr.f32.gmra.mrb[152].mxu0 %v8885_v28  ;;  %12940 = vmatpush1.bf16.msra.mxu1 %v13284_v24  ;;  %v8889_v10 = vmax.f32 %v8855_v31, 0.0  ;;  %v11264_v33 = vld [vmem:[%s14883_s15 + $0x360] sm:$0xff]   ;;  %v16622_v3 = vld [vmem:[%s14883_s15 + $0x3a8] sm:$0xff]   ;;  %v11266_v24 = vld [vmem:[%s14883_s15 + $0x370] sm:$0xff]  }
 0xf83   : > { %v8890_v21 = vmax.f32 %v8857_v6, 0.0  ;;  %12972 = vmatpush1.bf16.msra.mxu0 %v13300_v39  ;;  %12942 = vmatprep.subr.bf16.mxu1 %v13285_v2  ;;  %v16607_v36 = vld [vmem:[%s14883_s15 + $0x3e0] sm:$0xff]   ;;  %v16627_v39 = vld [vmem:[%s14883_s15 + $0x3f0] sm:$0xff]   ;;  %v11267_v13 = vld [vmem:[%s14883_s15 + $0x378] sm:$0xff]  }
 0xf84   : > { %8990 = vmatprep.mubr.f32.mxu1 %v8888_v40  ;;  %12974 = vmatprep.subr.bf16.mxu0 %v13301_v42  ;;  %v11256_v62 = vld [vmem:[%s14883_s15 + $0x320] sm:$0xff]   ;;  %v11258_v41 = vld [vmem:[%s14883_s15 + $0x330] sm:$0xff]   ;;  %v16637_v59 = vld [vmem:[%s14883_s15 + $0x3f8] sm:$0xff]  }
 0xf85   : > { %9095 = vmatprep.mubr.f32.mxu0 %v8890_v21  ;;  %8991 = vmatmul.mubr.f32.gmra.mrb[146].mxu1 %v8887_v4  ;;  %v16612_v34 = vld [vmem:[%s14883_s15 + $0x3a0] sm:$0xff]   ;;  %v16632_v0 = vld [vmem:[%s14883_s15 + $0x3b0] sm:$0xff]   ;;  %v11259_v12 = vld [vmem:[%s14883_s15 + $0x338] sm:$0xff]  }
 0xf86   : > { %9096 = vmatmul.mubr.f32.gmra.mrb[154].mxu0 %v8889_v10  ;;  %12944 = vmatpush1.bf16.msra.mxu1 %v13286_v18  ;;  %v16642_v2 = vld [vmem:[%s14883_s15 + $0x3b8] sm:$0xff]  }
 0xf87   : > { %12976 = vmatpush1.bf16.msra.mxu0 %v13302_v17  ;;  %9419 = vmatprep.mubr.f32.mxu1 %v17014_v20 }
 0xf88   : > { %9532 = vmatprep.mubr.f32.mxu0 %v17014_v20  ;;  %12978 = vmatprep.subr.bf16.mxu1 %v11260_v19 }
 0xf89   : > { %9420 = vmatmul.mubr.f32.vlgmr.msra.gmra.mrb[148].mxu1 %v15865_v35  ;;  %13010 = vmatprep.subr.bf16.mxu0 %v11276_v14 }
 0xf8a   : > { %9533 = vmatmul.mubr.f32.vlgmr.msra.gmra.mrb[156].mxu0 %v15865_v35  ;;  %9425 = vmatprep.mubr.f32.mxu1 %v17014_v20 }
 0xf8b   : > { %9538 = vmatprep.mubr.f32.mxu0 %v17014_v20  ;;  %12980 = vmatpush3.bf16.msra.mxu1 %v11252_v30 }
 0xf8c   : > { %13012 = vmatpush3.bf16.msra.mxu0 %v16572_v1 }
 0xf8d   : > { %9426 = vmatmul.mubr.f32.gmra.mrb[150].mxu1 %v15875_v5  ;;  %13014 = vmatprep.subr.bf16.mxu0 %v16577_v61 }
 0xf8e   : > { %9539 = vmatmul.mubr.f32.gmra.mrb[158].mxu0 %v15875_v5  ;;  %9431 = vmatprep.mubr.f32.mxu1 %v17014_v20 }
 0xf8f   : > { %9544 = vmatprep.mubr.f32.mxu0 %v17014_v20 }
 0xf90   : > { %13016 = vmatpush3.bf16.msra.mxu0 %v16582_v38 }
 0xf91   : > { %9432 = vmatmul.mubr.f32.gmra.mrb[152].mxu1 %v17026_v52  ;;  %13018 = vmatprep.subr.bf16.mxu0 %v16587_v58 }
 0xf92   : > { %9545 = vmatmul.mubr.f32.gmra.mrb[160].mxu0 %v17026_v52  ;;  %9437 = vmatprep.mubr.f32.mxu1 %v17014_v20 }
 0xf93   : > { %9550 = vmatprep.mubr.f32.mxu0 %v17014_v20 }
 0xf94   : > { %13020 = vmatpush3.bf16.msra.mxu0 %v16592_v54 }
 0xf95   : > { %9438 = vmatmul.mubr.f32.gmra.mrb[154].mxu1 %v17027_v47  ;;  %13022 = vmatprep.subr.bf16.mxu0 %v16597_v49 }
 0xf96   : > { %9551 = vmatmul.mubr.f32.gmra.mrb[162].mxu0 %v17027_v47  ;;  %9443 = vmatprep.mubr.f32.mxu1 %v17014_v20 }
 0xf97   : > { %9556 = vmatprep.mubr.f32.mxu0 %v17014_v20 }
 0xf98   : > { %13024 = vmatpush3.bf16.msra.mxu0 %v16602_v29 }
 0xf99   : > { %9444 = vmatmul.mubr.f32.gmra.mrb[156].mxu1 %v17028_v32  ;;  %13026 = vmatprep.subr.bf16.mxu0 %v16607_v36 }
 0xf9a   : > { %9557 = vmatmul.mubr.f32.gmra.mrb[164].mxu0 %v17028_v32  ;;  %9449 = vmatprep.mubr.f32.mxu1 %v17014_v20 }
 0xf9b   : > { %9562 = vmatprep.mubr.f32.mxu0 %v17014_v20 }
 0xf9c   : > { %13028 = vmatpush3.bf16.msra.mxu0 %v16612_v34 }
 0xf9d   : > { %9450 = vmatmul.mubr.f32.gmra.mrb[158].mxu1 %v17029_v53  ;;  %13030 = vmatprep.subr.bf16.mxu0 %v16617_v45 }
 0xf9e   : > { %9563 = vmatmul.mubr.f32.gmra.mrb[166].mxu0 %v17029_v53  ;;  %9455 = vmatprep.mubr.f32.mxu1 %v17014_v20 }
 0xf9f   : > { %9568 = vmatprep.mubr.f32.mxu0 %v17014_v20 }
 0xfa0   : > { %13032 = vmatpush3.bf16.msra.mxu0 %v16622_v3 }
 0xfa1   : > { %9456 = vmatmul.mubr.f32.gmra.mrb[160].mxu1 %v17030_v7  ;;  %13034 = vmatprep.subr.bf16.mxu0 %v16627_v39 }
 0xfa2   : > { %9569 = vmatmul.mubr.f32.gmra.mrb[168].mxu0 %v17030_v7  ;;  %9461 = vmatprep.mubr.f32.mxu1 %v17014_v20 }
 0xfa3   : > { %9574 = vmatprep.mubr.f32.mxu0 %v17014_v20  ;;  %v11261_v20 = vld [vmem:[%s14883_s15 + $0x348] sm:$0xff]  }
 0xfa4   : > { %12982 = vmatprep.subr.bf16.mxu1 %v11261_v20  ;;  %13036 = vmatpush3.bf16.msra.mxu0 %v16632_v0 }
 0xfa5   : > { %9462 = vmatmul.mubr.f32.gmra.mrb[162].mxu1 %v17031_v37  ;;  %13038 = vmatprep.subr.bf16.mxu0 %v16637_v59 }
 0xfa6   : > { %9575 = vmatmul.mubr.f32.gmra.mrb[170].mxu0 %v17031_v37  ;;  %12984 = vmatpush3.bf16.msra.mxu1 %v11253_v23 }
 0xfa7   : > { %12986 = vmatprep.subr.bf16.mxu1 %v11262_v57 }
 0xfa8   : > { %13040 = vmatpush3.bf16.msra.mxu0 %v16642_v2 }
 0xfaa   : > { %12988 = vmatpush3.bf16.msra.mxu1 %v11254_v46 }
 0xfab   : > { %12990 = vmatprep.subr.bf16.mxu1 %v11263_v56 }
 0xfae   : > { %12992 = vmatpush3.bf16.msra.mxu1 %v11255_v27 }
 0xfaf   : > { %12994 = vmatprep.subr.bf16.mxu1 %v11264_v33 }
 0xfb2   : > { %12996 = vmatpush3.bf16.msra.mxu1 %v11256_v62 }
 0xfb3   : > { %12998 = vmatprep.subr.bf16.mxu1 %v11265_v11 }
 0xfb6   : > { %13000 = vmatpush3.bf16.msra.mxu1 %v11257_v51 }
 0xfb7   : > { %13002 = vmatprep.subr.bf16.mxu1 %v11266_v24 }
 0xfba   : > { %13004 = vmatpush3.bf16.msra.mxu1 %v11258_v41 }
 0xfbb   : > { %13006 = vmatprep.subr.bf16.mxu1 %v11267_v13 }
 0xfbe   : > { %13008 = vmatpush3.bf16.msra.mxu1 %v11259_v12 }
 0xfbf   : > { %13079 = vmatprep.subr.bf16.mxu1 %v11276_v14 }
0x103c   : > { %v11733_v28 = vpop.f32.mrb[132].mxu1 }
0x103d   : > { %v11789_v31 = vpop.f32.mrb[140].mxu0  ;;  %v11734_v16 = vpop.f32.mrb[133].mxu1 }
0x103e   : > { %v11735_v9 = vadd.f32 %v11734_v16, %v11733_v28  ;;  %v11790_v42 = vpop.f32.mrb[141].mxu0 }
0x103f   : > { %v11791_v6 = vadd.f32 %v11790_v42, %v11789_v31 }
0x1040   : > { %v11736_v40 = vpop.f32.mrb[134].mxu1 }
0x1041   : > { %v9063_v18 = vadd.f32 %v11791_v6, %v11735_v9  ;;  %v11792_v4 = vpop.f32.mrb[142].mxu0  ;;  %v11737_v21 = vpop.f32.mrb[135].mxu1 }
0x1042   : > { %v11738_v17 = vadd.f32 %v11737_v21, %v11736_v40  ;;  %v11793_v10 = vpop.f32.mrb[143].mxu0 }
0x1043   : > { %v16646_v19 = vadd.f32 %v9063_v18, %v16375_v50  ;;  %v11794_v30 = vadd.f32 %v11793_v10, %v11792_v4 }
0x1044   : > { %v11739_v20 = vpop.f32.mrb[136].mxu1 }
0x1045   : > { %v9068_v23 = vadd.f32 %v11794_v30, %v11738_v17  ;;  %v11795_v57 = vpop.f32.mrb[144].mxu0  ;;  %v11740_v14 = vpop.f32.mrb[137].mxu1 }
0x1046   : > { %v11741_v46 = vadd.f32 %v11740_v14, %v11739_v20  ;;  %v11796_v56 = vpop.f32.mrb[145].mxu0 }
0x1047   : > { %v16649_v27 = vadd.f32 %v9068_v23, %v16377_v43  ;;  %v11797_v33 = vadd.f32 %v11796_v56, %v11795_v57 }
0x1048   : > { %v11742_v62 = vpop.f32.mrb[138].mxu1 }
0x1049   : > { %v9073_v11 = vadd.f32 %v11797_v33, %v11741_v46  ;;  %v11798_v51 = vpop.f32.mrb[146].mxu0  ;;  %v11743_v24 = vpop.f32.mrb[139].mxu1 }
0x104a   : > { %v11744_v41 = vadd.f32 %v11743_v24, %v11742_v62  ;;  %v11799_v13 = vpop.f32.mrb[147].mxu0 }
0x104b   : > { %v16652_v50 = vadd.f32 %v9073_v11, %v16379_v8  ;;  %v11800_v12 = vadd.f32 %v11799_v13, %v11798_v51 }
0x104c   : > { %v11745_v28 = vpop.f32.mrb[140].mxu1 }
0x104d   : > { %v9078_v31 = vadd.f32 %v11800_v12, %v11744_v41  ;;  %v11801_v16 = vpop.f32.mrb[148].mxu0  ;;  %v11746_v9 = vpop.f32.mrb[141].mxu1 }
0x104e   : > { %v11747_v42 = vadd.f32 %v11746_v9, %v11745_v28  ;;  %v11802_v6 = vpop.f32.mrb[149].mxu0 }
0x104f   : > { %v16655_v43 = vadd.f32 %v9078_v31, %v16381_v63  ;;  %v11803_v40 = vadd.f32 %v11802_v6, %v11801_v16  ;;  %v9333_v63 = vld [vmem:[%s14862_s14 + $0xc] sm:$0xf] }
0x1050   : > { %v11748_v18 = vpop.f32.mrb[142].mxu1  ;;  %v16665_v12 = vrot.slane %v9333_v63, %v17023_v25  ;;  %v16668_v31 = vrot.slane %v9333_v63, %v17024_v26  ;;  %v16671_v16 = vrot.slane %v9333_v63, %v17032_v60 }
0x1051   : > { %v9083_v4 = vadd.f32 %v11803_v40, %v11747_v42  ;;  %v11804_v21 = vpop.f32.mrb[150].mxu0  ;;  %v11749_v17 = vpop.f32.mrb[143].mxu1  ;;  %v16677_v42 = vrot.slane %v9333_v63, %v17033_v15 }
0x1052   : > { %v11750_v10 = vadd.f32 %v11749_v17, %v11748_v18  ;;  %v11805_v30 = vpop.f32.mrb[151].mxu0 }
0x1053   : > { %v16658_v8 = vadd.f32 %v9083_v4, %v16383_v22  ;;  %v11806_v20 = vadd.f32 %v11805_v30, %v11804_v21 }
0x1054   : > { %v11751_v23 = vpop.f32.mrb[144].mxu1 }
0x1055   : > { %v9088_v57 = vadd.f32 %v11806_v20, %v11750_v10  ;;  %v11807_v14 = vpop.f32.mrb[152].mxu0  ;;  %v11752_v46 = vpop.f32.mrb[145].mxu1 }
0x1056   : > { %v11753_v56 = vadd.f32 %v11752_v46, %v11751_v23  ;;  %v11808_v33 = vpop.f32.mrb[153].mxu0 }
0x1057   : > { %v16662_v62 = vadd.f32 %v9088_v57, %v16385_v48  ;;  %v11809_v11 = vadd.f32 %v11808_v33, %v11807_v14 }
0x1058   : > { %v11754_v51 = vpop.f32.mrb[146].mxu1 }
0x1059   : > { %v9093_v24 = vadd.f32 %v11809_v11, %v11753_v56  ;;  %v11810_v41 = vpop.f32.mrb[154].mxu0  ;;  %v11755_v13 = vpop.f32.mrb[147].mxu1 }
0x105a   : > { %v11756_v22 = vadd.f32 %v11755_v13, %v11754_v51  ;;  %v11811_v28 = vpop.f32.mrb[155].mxu0 }
0x105b   : > { %v16674_v9 = vadd.f32 %v9093_v24, %v16389_v55  ;;  %v11812_v48 = vadd.f32 %v11811_v28, %v11810_v41 }
0x105c   : > { %v9421_v6 = vpop.f32.mrb[148].mxu1 }
0x105d   : > { %v9098_v40 = vadd.f32 %v11812_v48, %v11756_v22  ;;  %v9422_v25 = vadd.f32 %v9421_v6, %v16665_v12  ;;  %v9534_v18 = vpop.f32.mrb[156].mxu0  ;;  %v9423_v4 = vpop.f32.mrb[149].mxu1 }
0x105e   : > { %v9535_v21 = vadd.f32 %v9534_v18, %v16668_v31  ;;  %v9424_v26 = vadd.f32 %v9423_v4, %v16671_v16  ;;  %v9536_v17 = vpop.f32.mrb[157].mxu0 }
0x105f   : > { %v16683_v60 = vadd.f32 %v9098_v40, %v16404_v44  ;;  %v9537_v55 = vadd.f32 %v9536_v17, %v16677_v42  ;;  %v9581_v15 = vmax.f32 %v9422_v25, 0.0 }
0x1060   : > { %v9582_v10 = vmax.f32 %v9424_v26, 0.0  ;;  %v9427_v30 = vpop.f32.mrb[150].mxu1  ;;  %v9583_v46 = vmax.f32 %v9535_v21, 0.0 }
0x1061   : > { %v9584_v20 = vmax.f32 %v9537_v55, 0.0  ;;  %v9428_v23 = vadd.f32 %v9427_v30, %v16665_v12  ;;  %v9540_v57 = vpop.f32.mrb[158].mxu0  ;;  %v9429_v14 = vpop.f32.mrb[151].mxu1 }
0x1062   : > { %v9541_v56 = vadd.f32 %v9540_v57, %v16668_v31  ;;  %v9430_v33 = vadd.f32 %v9429_v14, %v16671_v16  ;;  %v9542_v63 = vpop.f32.mrb[159].mxu0  ;;  %9677 = vmatprep.mubr.f32.mxu1 %v9582_v10 }
0x1063   : > { %v9543_v44 = vadd.f32 %v9542_v63, %v16677_v42  ;;  %9782 = vmatprep.mubr.f32.mxu0 %v9584_v20  ;;  %9678 = vmatmul.mubr.f32.vlgmr.msra.gmra.mrb[164].mxu1 %v9581_v15  ;;  %v9585_v24 = vmax.f32 %v9428_v23, 0.0 }
0x1064   : > { %v9586_v11 = vmax.f32 %v9430_v33, 0.0  ;;  %9783 = vmatmul.mubr.f32.vlgmr.msra.gmra.mrb[172].mxu0 %v9583_v46  ;;  %v9433_v51 = vpop.f32.mrb[152].mxu1  ;;  %13087 = vmatpush3.bf16.msra.mxu1 %v16572_v1  ;;  %v9587_v48 = vmax.f32 %v9541_v56, 0.0 }
0x1065   : > { %v9588_v41 = vmax.f32 %v9543_v44, 0.0  ;;  %v9434_v13 = vadd.f32 %v9433_v51, %v16665_v12  ;;  %v9546_v22 = vpop.f32.mrb[160].mxu0  ;;  %v9435_v28 = vpop.f32.mrb[153].mxu1  ;;  %13080 = vmatprep.subr.bf16.mxu1 %v16577_v61 }
0x1066   : > { %v9547_v6 = vadd.f32 %v9546_v22, %v16668_v31  ;;  %v9436_v40 = vadd.f32 %v9435_v28, %v16671_v16  ;;  %v9548_v25 = vpop.f32.mrb[161].mxu0  ;;  %9682 = vmatprep.mubr.f32.mxu1 %v9586_v11 }
0x1067   : > { %v9549_v18 = vadd.f32 %v9548_v25, %v16677_v42  ;;  %9787 = vmatprep.mubr.f32.mxu0 %v9588_v41  ;;  %9683 = vmatmul.mubr.f32.gmra.mrb[166].mxu1 %v9585_v24  ;;  %v9589_v21 = vmax.f32 %v9434_v13, 0.0 }
0x1068   : > { %v9590_v1 = vmax.f32 %v9436_v40, 0.0  ;;  %9788 = vmatmul.mubr.f32.gmra.mrb[174].mxu0 %v9587_v48  ;;  %v9439_v4 = vpop.f32.mrb[154].mxu1  ;;  %13088 = vmatpush3.bf16.msra.mxu1 %v16582_v38  ;;  %v9591_v10 = vmax.f32 %v9547_v6, 0.0 }
0x1069   : > { %v9592_v26 = vmax.f32 %v9549_v18, 0.0  ;;  %v9440_v61 = vadd.f32 %v9439_v4, %v16665_v12  ;;  %v9552_v17 = vpop.f32.mrb[162].mxu0  ;;  %v9441_v55 = vpop.f32.mrb[155].mxu1  ;;  %13081 = vmatprep.subr.bf16.mxu1 %v16587_v58 }
0x106a   : > { %v9553_v30 = vadd.f32 %v9552_v17, %v16668_v31  ;;  %v9442_v15 = vadd.f32 %v9441_v55, %v16671_v16  ;;  %v9554_v20 = vpop.f32.mrb[163].mxu0  ;;  %9687 = vmatprep.mubr.f32.mxu1 %v9590_v1 }
0x106b   : > { %v9555_v23 = vadd.f32 %v9554_v20, %v16677_v42  ;;  %9792 = vmatprep.mubr.f32.mxu0 %v9592_v26  ;;  %9688 = vmatmul.mubr.f32.gmra.mrb[168].mxu1 %v9589_v21  ;;  %v9593_v14 = vmax.f32 %v9440_v61, 0.0 }
0x106c   : > { %v9594_v38 = vmax.f32 %v9442_v15, 0.0  ;;  %9793 = vmatmul.mubr.f32.gmra.mrb[176].mxu0 %v9591_v10  ;;  %v9445_v57 = vpop.f32.mrb[156].mxu1  ;;  %13089 = vmatpush3.bf16.msra.mxu1 %v16592_v54  ;;  %v9595_v63 = vmax.f32 %v9553_v30, 0.0 }
0x106d   : > { %v9596_v46 = vmax.f32 %v9555_v23, 0.0  ;;  %v9446_v58 = vadd.f32 %v9445_v57, %v16665_v12  ;;  %v9558_v56 = vpop.f32.mrb[164].mxu0  ;;  %v9447_v33 = vpop.f32.mrb[157].mxu1  ;;  %13082 = vmatprep.subr.bf16.mxu1 %v16597_v49 }
0x106e   : > { %v9448_v44 = vadd.f32 %v9447_v33, %v16671_v16  ;;  %v9560_v11 = vpop.f32.mrb[165].mxu0  ;;  %9692 = vmatprep.mubr.f32.mxu1 %v9594_v38  ;;  %v9559_v15 = vadd.f32 %v9558_v56, %v16668_v31 }
0x106f   : > { %9797 = vmatprep.mubr.f32.mxu0 %v9596_v46  ;;  %9693 = vmatmul.mubr.f32.gmra.mrb[170].mxu1 %v9593_v14  ;;  %v9597_v54 = vmax.f32 %v9446_v58, 0.0  ;;  %v9561_v55 = vadd.f32 %v9560_v11, %v16677_v42 }
0x1070   : > { %v9598_v51 = vmax.f32 %v9448_v44, 0.0  ;;  %9798 = vmatmul.mubr.f32.gmra.mrb[178].mxu0 %v9595_v63  ;;  %v9451_v24 = vpop.f32.mrb[158].mxu1  ;;  %13090 = vmatpush3.bf16.msra.mxu1 %v16602_v29 }
0x1071   : > { %v9452_v41 = vadd.f32 %v9451_v24, %v16665_v12  ;;  %v9564_v13 = vpop.f32.mrb[166].mxu0  ;;  %v9453_v22 = vpop.f32.mrb[159].mxu1  ;;  %13083 = vmatprep.subr.bf16.mxu1 %v16607_v36 }
0x1072   : > { %v9454_v49 = vadd.f32 %v9453_v22, %v16671_v16  ;;  %v9566_v28 = vpop.f32.mrb[167].mxu0  ;;  %9697 = vmatprep.mubr.f32.mxu1 %v9598_v51 }
0x1073   : > { %9698 = vmatmul.mubr.f32.gmra.mrb[172].mxu1 %v9597_v54  ;;  %v9601_v40 = vmax.f32 %v9452_v41, 0.0  ;;  %v9567_v20 = vadd.f32 %v9566_v28, %v16677_v42 }
0x1074   : > { %v9602_v48 = vmax.f32 %v9454_v49, 0.0  ;;  %v9457_v6 = vpop.f32.mrb[160].mxu1  ;;  %13091 = vmatpush3.bf16.msra.mxu1 %v16612_v34 }
0x1075   : > { %v9458_v25 = vadd.f32 %v9457_v6, %v16665_v12  ;;  %v9570_v29 = vpop.f32.mrb[168].mxu0  ;;  %v9459_v18 = vpop.f32.mrb[161].mxu1  ;;  %13084 = vmatprep.subr.bf16.mxu1 %v16617_v45  ;;  %v9604_v23 = vmax.f32 %v9567_v20, 0.0  ;;  %v16735_v6 = vld [vmem:[%s1072_s4] ss:$0 sm:$0xff] }
0x1076   : > { %v9460_v1 = vadd.f32 %v9459_v18, %v16671_v16  ;;  %v9572_v4 = vpop.f32.mrb[169].mxu0  ;;  %9702 = vmatprep.mubr.f32.mxu1 %v9602_v48  ;;  %v9571_v57 = vadd.f32 %v9570_v29, %v16668_v31 }
0x1077   : > { %9703 = vmatmul.mubr.f32.gmra.mrb[174].mxu1 %v9601_v40  ;;  %v9605_v26 = vmax.f32 %v9458_v25, 0.0  ;;  %v9573_v38 = vadd.f32 %v9572_v4, %v16677_v42 }
0x1078   : > { %v9606_v36 = vmax.f32 %v9460_v1, 0.0  ;;  %v9463_v21 = vpop.f32.mrb[162].mxu1  ;;  %13092 = vmatpush3.bf16.msra.mxu1 %v16622_v3  ;;  %v9607_v46 = vmax.f32 %v9571_v57, 0.0 }
0x1079   : > { %v9464_v61 = vadd.f32 %v9463_v21, %v16665_v12  ;;  %v9576_v34 = vpop.f32.mrb[170].mxu0  ;;  %v9465_v17 = vpop.f32.mrb[163].mxu1  ;;  %13085 = vmatprep.subr.bf16.mxu1 %v16627_v39  ;;  %v9600_v12 = vmax.f32 %v9561_v55, 0.0  ;;  %v9599_v39 = vmax.f32 %v9559_v15, 0.0 }
0x107a   : > { %v9466_v45 = vadd.f32 %v9465_v17, %v16671_v16  ;;  %v9578_v10 = vpop.f32.mrb[171].mxu0  ;;  %9707 = vmatprep.mubr.f32.mxu1 %v9606_v36  ;;  %v9565_v16 = vadd.f32 %v9564_v13, %v16668_v31 }
0x107b   : > { %9708 = vmatmul.mubr.f32.gmra.mrb[176].mxu1 %v9605_v26  ;;  %v9609_v3 = vmax.f32 %v9464_v61, 0.0  ;;  %v9579_v14 = vadd.f32 %v9578_v10, %v16677_v42 }
0x107c   : > { %v9610_v30 = vmax.f32 %v9466_v45, 0.0  ;;  %13093 = vmatpush3.bf16.msra.mxu1 %v16632_v0  ;;  %v9603_v0 = vmax.f32 %v9565_v16, 0.0 }
0x107d   : > { %13086 = vmatprep.subr.bf16.mxu1 %v16637_v59  ;;  %v9608_v59 = vmax.f32 %v9573_v38, 0.0  ;;  %v9612_v58 = vmax.f32 %v9579_v14, 0.0 }
0x107e   : > { %9712 = vmatprep.mubr.f32.mxu1 %v9610_v30 }
0x107f   : > { %9713 = vmatmul.mubr.f32.gmra.mrb[178].mxu1 %v9609_v3 }
0x1080   : > { %13094 = vmatpush3.bf16.msra.mxu1 %v16642_v2  ;;  %9802 = vmatprep.mubr.f32.mxu1 %v9600_v12  ;;  %v9577_v2 = vadd.f32 %v9576_v34, %v16668_v31 }
0x1082   : > { %v9611_v56 = vmax.f32 %v9577_v2, 0.0 }
0x1083   : > { %9803 = vmatmul.mubr.f32.vlgmr.msra.gmra.mrb[180].mxu1 %v9599_v39 }
0x1084   : > { %9807 = vmatprep.mubr.f32.mxu1 %v9604_v23 }
0x1087   : > { %9808 = vmatmul.mubr.f32.gmra.mrb[182].mxu1 %v9603_v0 }
0x1088   : > { %9812 = vmatprep.mubr.f32.mxu1 %v9608_v59 }
0x108b   : > { %9813 = vmatmul.mubr.f32.gmra.mrb[184].mxu1 %v9607_v46 }
0x108c   : > { %9817 = vmatprep.mubr.f32.mxu1 %v9612_v58 }
0x108f   : > { %9818 = vmatmul.mubr.f32.gmra.mrb[186].mxu1 %v9611_v56 }
0x1136   : > { %v11845_v33 = vpop.f32.mrb[164].mxu1 }
0x1137   : > { %v11901_v63 = vpop.f32.mrb[172].mxu0  ;;  %v11846_v44 = vpop.f32.mrb[165].mxu1 }
0x1138   : > { %v11847_v11 = vadd.f32 %v11846_v44, %v11845_v33  ;;  %v11902_v51 = vpop.f32.mrb[173].mxu0 }
0x1139   : > { %v11903_v24 = vadd.f32 %v11902_v51, %v11901_v63 }
0x113a   : > { %v11848_v54 = vpop.f32.mrb[166].mxu1 }
0x113b   : > { %v9785_v41 = vadd.f32 %v11903_v24, %v11847_v11  ;;  %v11904_v42 = vpop.f32.mrb[174].mxu0  ;;  %v11849_v13 = vpop.f32.mrb[167].mxu1 }
0x113c   : > { %v11850_v22 = vadd.f32 %v11849_v13, %v11848_v54  ;;  %v11905_v49 = vpop.f32.mrb[175].mxu0 }
0x113d   : > { %v9823_v31 = vadd.f32 %v9785_v41, %v16646_v19  ;;  %v11906_v28 = vadd.f32 %v11905_v49, %v11904_v42 }
0x113e   : > { %v11851_v48 = vpop.f32.mrb[168].mxu1 }
0x113f   : > { %v9790_v40 = vadd.f32 %v11906_v28, %v11850_v22  ;;  %v11907_v25 = vpop.f32.mrb[176].mxu0  ;;  %v11852_v29 = vpop.f32.mrb[169].mxu1  ;;  %v9831_v18 = vadd.f32 %v9823_v31, %v15865_v35 }
0x1140   : > { %v11853_v1 = vadd.f32 %v11852_v29, %v11851_v48  ;;  %v11908_v4 = vpop.f32.mrb[177].mxu0 }
0x1141   : > { %v9824_v36 = vadd.f32 %v9790_v40, %v16649_v27  ;;  %v11909_v21 = vadd.f32 %v11908_v4, %v11907_v25  ;;  %v16740_v19 = vadd.f32 %v16735_v6, %v9831_v18 }
0x1142   : > { %v11854_v26 = vpop.f32.mrb[170].mxu1 }
0x1143   : > { %v9795_v61 = vadd.f32 %v11909_v21, %v11853_v1  ;;  %v11910_v34 = vpop.f32.mrb[178].mxu0  ;;  %9856 = vadd.xlane.f32.xlu0 %v16740_v19  ;;  %v11855_v17 = vpop.f32.mrb[171].mxu1  ;;  %v9832_v55 = vadd.f32 %v9824_v36, %v15875_v5 }
0x1144   : > { %v11856_v45 = vadd.f32 %v11855_v17, %v11854_v26  ;;  %v11911_v10 = vpop.f32.mrb[179].mxu0 }
0x1145   : > { %v9825_v35 = vadd.f32 %v9795_v61, %v16652_v50  ;;  %v11912_v30 = vadd.f32 %v11911_v10, %v11910_v34  ;;  %v9847_v15 = vadd.f32 %v16735_v6, %v9832_v55 }
0x1146   : > { %v11857_v27 = vpop.f32.mrb[172].mxu1 }
0x1147   : > { %v9800_v3 = vadd.f32 %v11912_v30, %v11856_v45  ;;  %9858 = vadd.xlane.f32.xlu1 %v9847_v15  ;;  %v11858_v12 = vpop.f32.mrb[173].mxu1  ;;  %v9833_v20 = vadd.f32 %v9825_v35, %v17026_v52 }
0x1148   : > { %v11859_v39 = vadd.f32 %v11858_v12, %v11857_v27 }
0x1149   : > { %v9826_v16 = vadd.f32 %v9800_v3, %v16655_v43  ;;  %v9848_v23 = vadd.f32 %v16735_v6, %v9833_v20 }
0x114a   : > { %v11860_v38 = vpop.f32.mrb[174].mxu1 }
0x114b   : > { %9860 = vadd.xlane.f32.xlu0 %v9848_v23  ;;  %v11861_v5 = vpop.f32.mrb[175].mxu1  ;;  %v9834_v0 = vadd.f32 %v9826_v16, %v17027_v47 }
0x114c   : > { %v11862_v50 = vadd.f32 %v11861_v5, %v11860_v38 }
0x114d   : > { %v9849_v57 = vadd.f32 %v16735_v6, %v9834_v0 }
0x114e   : > { %v11863_v59 = vpop.f32.mrb[176].mxu1 }
0x114f   : > { %9862 = vadd.xlane.f32.xlu1 %v9849_v57  ;;  %v11864_v14 = vpop.f32.mrb[177].mxu1 }
0x1150   : > { %v11865_v46 = vadd.f32 %v11864_v14, %v11863_v59 }
0x1152   : > { %v11866_v2 = vpop.f32.mrb[178].mxu1 }
0x1153   : > { %v11867_v58 = vpop.f32.mrb[179].mxu1 }
0x1154   : > { %v11868_v52 = vadd.f32 %v11867_v58, %v11866_v2 }
0x1156   : > { %v11913_v56 = vpop.f32.mrb[180].mxu1 }
0x1157   : > { %v11914_v33 = vpop.f32.mrb[181].mxu1 }
0x1158   : > { %v11915_v43 = vadd.f32 %v11914_v33, %v11913_v56 }
0x115a   : > { %v9805_v63 = vadd.f32 %v11915_v43, %v11859_v39  ;;  %v11916_v44 = vpop.f32.mrb[182].mxu1 }
0x115b   : > { %v11917_v11 = vpop.f32.mrb[183].mxu1 }
0x115c   : > { %v9827_v51 = vadd.f32 %v9805_v63, %v16658_v8  ;;  %v11918_v24 = vadd.f32 %v11917_v11, %v11916_v44 }
0x115e   : > { %v9810_v47 = vadd.f32 %v11918_v24, %v11862_v50  ;;  %v11919_v54 = vpop.f32.mrb[184].mxu1  ;;  %v9835_v41 = vadd.f32 %v9827_v51, %v17028_v32 }
0x115f   : > { %v11920_v42 = vpop.f32.mrb[185].mxu1 }
0x1160   : > { %v9828_v13 = vadd.f32 %v9810_v47, %v16662_v62  ;;  %v11921_v22 = vadd.f32 %v11920_v42, %v11919_v54  ;;  %v9850_v49 = vadd.f32 %v16735_v6, %v9835_v41  ;;  %v10558_v47 = vld [vmem:[%s1075_s27] ss:$0 sm:$0xff] }
0x1161   : > { %v10559_v42 = vld [vmem:[%s1078_s18] ss:$0 sm:$0xff]  ;;  %s17037_s18 = sld [smem:[#allocation34_spill]] }
0x1162   : > { %v9815_v31 = vadd.f32 %v11921_v22, %v11865_v46  ;;  %v11922_v28 = vpop.f32.mrb[186].mxu1  ;;  %9864 = vadd.xlane.f32.xlu0 %v9850_v49  ;;  %v9836_v48 = vadd.f32 %v9828_v13, %v17029_v53 }
0x1163   : > { %v11923_v40 = vpop.f32.mrb[187].mxu1 }
0x1164   : > { %v9829_v25 = vadd.f32 %v9815_v31, %v16674_v9  ;;  %v11924_v8 = vadd.f32 %v11923_v40, %v11922_v28  ;;  %v9851_v29 = vadd.f32 %v16735_v6, %v9836_v48 }
0x1166   : > { %v9820_v18 = vadd.f32 %v11924_v8, %v11868_v52  ;;  %9866 = vadd.xlane.f32.xlu1 %v9851_v29  ;;  %v9837_v32 = vadd.f32 %v9829_v25, %v17030_v7 }
0x1167   : > { %p10560_p9 = scmp.ne.s32.totalorder %s17037_s18, 1 }
0x1168   : > { %v9830_v62 = vadd.f32 %v9820_v18, %v16683_v60  ;;  %v9852_v1 = vadd.f32 %v16735_v6, %v9837_v32  ;;  %vm14237_vm3 = vmmov (!%p10560_p9), 0   ;;  %vm9985_vm4 = vcmask (!%p10560_p9), 523264   ;;  %s17038_s7 = sld [smem:[#allocation50_spill]] (!%p10560_p9) }
0x116a   : > { %9868 = vadd.xlane.f32.xlu0 %v9852_v1  ;;  %v9838_v4 = vadd.f32 %v9830_v62, %v17031_v37 }
0x116c   : > { %v9853_v36 = vadd.f32 %v16735_v6, %v9838_v4 }
0x116e   : > { %9870 = vadd.xlane.f32.xlu1 %v9853_v36 }
0x11d0   : > { %v9857_v53 = vpop.xlane.xlu0 %9856 }
0x11d1   : > { %v9872_v21 = vmul.f32 0.0078125, %v9857_v53 }
0x11d3   : > { %v9880_v9 = vsub.f32 %v16740_v19, %v9872_v21 }
0x11d4   : > { %v9859_v26 = vpop.xlane.xlu1 %9858 }
0x11d5   : > { %v9873_v61 = vmul.f32 0.0078125, %v9859_v26  ;;  %v9888_v34 = vmul.f32 %v9880_v9, %v9880_v9 }
0x11d7   : > { %v9881_v17 = vsub.f32 %v9847_v15, %v9873_v61  ;;  %9896 = vadd.xlane.f32.xlu0 %v9888_v34 }
0x11d8   : > { %v9861_v7 = vpop.xlane.xlu0 %9860 }
0x11d9   : > { %v9874_v55 = vmul.f32 0.0078125, %v9861_v7  ;;  %v9889_v60 = vmul.f32 %v9881_v17, %v9881_v17 }
0x11db   : > { %v9882_v45 = vsub.f32 %v9848_v23, %v9874_v55  ;;  %9898 = vadd.xlane.f32.xlu1 %v9889_v60 }
0x11dc   : > { %v9863_v10 = vpop.xlane.xlu1 %9862 }
0x11dd   : > { %v9875_v35 = vmul.f32 0.0078125, %v9863_v10  ;;  %v9890_v37 = vmul.f32 %v9882_v45, %v9882_v45 }
0x11df   : > { %v9883_v30 = vsub.f32 %v9849_v57, %v9875_v35  ;;  %9900 = vadd.xlane.f32.xlu0 %v9890_v37 }
0x11e1   : > { %v9891_v6 = vmul.f32 %v9883_v30, %v9883_v30 }
0x11e3   : > { %9902 = vadd.xlane.f32.xlu1 %v9891_v6 }
0x11ef   : > { %v9865_v27 = vpop.xlane.xlu0 %9864 }
0x11f0   : > { %v9876_v3 = vmul.f32 0.0078125, %v9865_v27 }
0x11f2   : > { %v16764_v19 = vsub.f32 %v9850_v49, %v9876_v3 }
0x11f3   : > { %v9867_v12 = vpop.xlane.xlu1 %9866 }
0x11f4   : > { %v9877_v20 = vmul.f32 0.0078125, %v9867_v12  ;;  %v9892_v15 = vmul.f32 %v16764_v19, %v16764_v19 }
0x11f6   : > { %v16768_v39 = vsub.f32 %v9851_v29, %v9877_v20  ;;  %9904 = vadd.xlane.f32.xlu0 %v9892_v15 }
0x11f7   : > { %v9869_v16 = vpop.xlane.xlu0 %9868 }
0x11f8   : > { %v9878_v23 = vmul.f32 0.0078125, %v9869_v16  ;;  %v9893_v38 = vmul.f32 %v16768_v39, %v16768_v39 }
0x11fa   : > { %v16772_v5 = vsub.f32 %v9852_v1, %v9878_v23  ;;  %9906 = vadd.xlane.f32.xlu1 %v9893_v38 }
0x11fb   : > { %v9871_v0 = vpop.xlane.xlu1 %9870 }
0x11fc   : > { %v9879_v50 = vmul.f32 0.0078125, %v9871_v0  ;;  %v9894_v57 = vmul.f32 %v16772_v5, %v16772_v5 }
0x11fe   : > { %v16776_v59 = vsub.f32 %v9853_v36, %v9879_v50  ;;  %9908 = vadd.xlane.f32.xlu0 %v9894_v57  ;;  %v11119_v50 = vld [vmem:[#allocation14] sm:$0xff] (!%p10560_p9)   ;;  %v14236_v57 = vmov (!%p10560_p9), 0.0|0.0  }
0x11ff   : > { %13041 = vmatprep.subr.bf16.mxu0 (!%p10560_p9), %v14236_v57  ;;  %13053 = vmatprep.subr.bf16.mxu1 (!%p10560_p9), %v14236_v57 }
0x1200   : > { %v9895_v14 = vmul.f32 %v16776_v59, %v16776_v59  ;;  %13055 = vmatpush3.bf16.msra.mxu1 (!%p10560_p9), %v11119_v50 }
0x1201   : > { %13056 = vmatprep.subr.bf16.mxu1 (!%p10560_p9), %v14236_v57 }
0x1202   : > { %9910 = vadd.xlane.f32.xlu1 %v9895_v14  ;;  %v14238_v14 = vmov (!%p10560_p9), 0.0  }
0x1203   : > { %12391 = vmatprep.mubr.msk.f32.mxu0 (!%p10560_p9), %vm14237_vm3, %v14238_v14  ;;  %12426 = vmatprep.mubr.msk.f32.mxu1 (!%p10560_p9), %vm14237_vm3, %v14238_v14 }
0x1264   : > { %v9897_v46 = vpop.xlane.xlu0 %9896 }
0x1265   : > { %v9912_v2 = vmul.f32 0.0078125, %v9897_v46 }
0x1267   : > { %v9920_v58 = vadd.f32 1e-05, %v9912_v2  ;;  %v11285_v2 = vld [vmem:[#allocation14 + $0x10] sm:$0xff] (!%p10560_p9)  }
0x1268   : > { %v9899_v52 = vpop.xlane.xlu1 %9898 }
0x1269   : > { %13657 = vrsqrt.f32 %v9920_v58  ;;  %v9913_v56 = vmul.f32 0.0078125, %v9899_v52  ;;  %v11286_v52 = vld [vmem:[#allocation14 + $0x18] sm:$0xff] (!%p10560_p9)  }
0x126b   : > { %v9921_v33 = vadd.f32 1e-05, %v9913_v56  ;;  %v9984_v56 = vld [vmem:[#allocation6] sm:$0xff] (!%p10560_p9) }
0x126c   : > { %v9901_v43 = vpop.xlane.xlu0 %9900 }
0x126d   : > { %13659 = vrsqrt.f32 %v9921_v33  ;;  %v9914_v63 = vmul.f32 0.0078125, %v9901_v43  ;;  %v11287_v33 = vld [vmem:[#allocation14 + $0x20] sm:$0xff] (!%p10560_p9)   ;;  %v11288_v43 = vld [vmem:[#allocation14 + $0x28] sm:$0xff] (!%p10560_p9)  }
0x126f   : > { %v9922_v44 = vadd.f32 1e-05, %v9914_v63  ;;  %v11289_v63 = vld [vmem:[#allocation14 + $0x30] sm:$0xff] (!%p10560_p9)  }
0x1270   : > { %v9903_v11 = vpop.xlane.xlu1 %9902 }
0x1271   : > { %13661 = vrsqrt.f32 %v9922_v44  ;;  %v9915_v51 = vmul.f32 0.0078125, %v9903_v11  ;;  %v11290_v44 = vld [vmem:[#allocation14 + $0x38] sm:$0xff] (!%p10560_p9)   ;;  %v10168_v11 = vld [vmem:[%s17038_s7] sm:$0xff] (!%p10560_p9) }
0x1272   : > { %vm10169_vm5 = vcmp.gt.f32.partialorder (!%p10560_p9), %v10168_v11, 0.0 }
0x1273   : > { %v13658_v24 = vpop.eup %13657  ;;  %v9923_v54 = vadd.f32 1e-05, %v9915_v51  ;;  %v14239_v51 = vmov (!%p10560_p9), 0  }
0x1274   : > { %v9936_v41 = vmul.f32 %v13658_v24, %v9880_v9  ;;  %13689 = vset.pattern.permute.xlu0 (!%p10560_p9), %v14239_v51  ;;  %v10170_v24 = vsel (!%p10560_p9), %vm10169_vm5, 1, %v14239_v51 }
0x1275   : > { %13663 = vrsqrt.f32 %v9923_v54  ;;  %10172 = vperm.xlu0 (!%p10560_p9), %13689, %v10170_v24  }
0x1276   : > { %v9950_v13 = vmul.f32 %v10558_v47, %v9936_v41 }
0x1277   : > { %v13660_v22 = vpop.eup %13659 }
0x1278   : > { %v9964_v49 = vadd.f32 %v10559_v42, %v9950_v13  ;;  %v9937_v31 = vmul.f32 %v13660_v22, %v9881_v17 }
0x127a   : > { %9972 = vst [vmem:[#allocation2] sm:$0xff] %v9964_v49  ;;  %v9951_v28 = vmul.f32 %v10558_v47, %v9937_v31 }
0x127b   : > { %v13662_v48 = vpop.eup %13661 }
0x127c   : > { %v9965_v40 = vadd.f32 %v10559_v42, %v9951_v28  ;;  %v9938_v25 = vmul.f32 %v13662_v48, %v9882_v45 }
0x127e   : > { %9973 = vst [vmem:[#allocation2 + $0x8] sm:$0xff] %v9965_v40  ;;  %v9952_v8 = vmul.f32 %v10558_v47, %v9938_v25 }
0x127f   : > { %v13664_v29 = vpop.eup %13663 }
0x1280   : > { %v9966_v18 = vadd.f32 %v10559_v42, %v9952_v8  ;;  %v9939_v32 = vmul.f32 %v13664_v29, %v9883_v30 }
0x1282   : > { %9974 = vst [vmem:[#allocation2 + $0x10] sm:$0xff] %v9966_v18  ;;  %v9953_v62 = vmul.f32 %v10558_v47, %v9939_v32 }
0x1283   : > { %v9905_v1 = vpop.xlane.xlu0 %9904 }
0x1284   : > { %v9967_v4 = vadd.f32 %v10559_v42, %v9953_v62  ;;  %v9916_v36 = vmul.f32 0.0078125, %v9905_v1 }
0x1286   : > { %9975 = vst [vmem:[#allocation2 + $0x18] sm:$0xff] %v9967_v4  ;;  %v9924_v53 = vadd.f32 1e-05, %v9916_v36 }
0x1287   : > { %v9907_v21 = vpop.xlane.xlu1 %9906 }
0x1288   : > { %13665 = vrsqrt.f32 %v9924_v53  ;;  %v9917_v9 = vmul.f32 0.0078125, %v9907_v21 }
0x128a   : > { %v9925_v26 = vadd.f32 1e-05, %v9917_v9 }
0x128b   : > { %v9909_v61 = vpop.xlane.xlu0 %9908 }
0x128c   : > { %13667 = vrsqrt.f32 %v9925_v26  ;;  %v9918_v34 = vmul.f32 0.0078125, %v9909_v61 }
0x128e   : > { %v9926_v17 = vadd.f32 1e-05, %v9918_v34 }
0x128f   : > { %v9911_v7 = vpop.xlane.xlu1 %9910 }
0x1290   : > { %13669 = vrsqrt.f32 %v9926_v17  ;;  %v9919_v55 = vmul.f32 0.0078125, %v9911_v7 }
0x1292   : > { %v13666_v60 = vpop.eup %13665  ;;  %v9927_v45 = vadd.f32 1e-05, %v9919_v55 }
0x1293   : > { %v9940_v10 = vmul.f32 %v13666_v60, %v16764_v19 }
0x1294   : > { %13671 = vrsqrt.f32 %v9927_v45 }
0x1295   : > { %v9954_v35 = vmul.f32 %v10558_v47, %v9940_v10 }
0x1296   : > { %v13668_v37 = vpop.eup %13667 }
0x1297   : > { %v9968_v30 = vadd.f32 %v10559_v42, %v9954_v35  ;;  %v9941_v6 = vmul.f32 %v13668_v37, %v16768_v39  ;;  %v13042_v39 = vpack.c.bf16 (!%p10560_p9), %v9965_v40, %v9964_v49 }
0x1299   : > { %9976 = vst [vmem:[#allocation2 + $0x20] sm:$0xff] %v9968_v30  ;;  %v9955_v27 = vmul.f32 %v10558_v47, %v9941_v6  ;;  %13043 = vmatpush3.bf16.msra.mxu0 (!%p10560_p9), %v13042_v39 }
0x129a   : > { %v13670_v3 = vpop.eup %13669  ;;  %13044 = vmatprep.subr.bf16.mxu0 (!%p10560_p9), %v14236_v57 }
0x129b   : > { %v9969_v12 = vadd.f32 %v10559_v42, %v9955_v27  ;;  %v9942_v20 = vmul.f32 %v13670_v3, %v16772_v5  ;;  %v13045_v5 = vpack.c.bf16 (!%p10560_p9), %v9967_v4, %v9966_v18 }
0x129d   : > { %9977 = vst [vmem:[#allocation2 + $0x28] sm:$0xff] %v9969_v12  ;;  %v9956_v15 = vmul.f32 %v10558_v47, %v9942_v20  ;;  %13046 = vmatpush3.bf16.msra.mxu0 (!%p10560_p9), %v13045_v5  ;;  %v13048_v46 = vpack.c.bf16 (!%p10560_p9), %v9969_v12, %v9968_v30 }
0x129e   : > { %v13672_v16 = vpop.eup %13671  ;;  %13047 = vmatprep.subr.bf16.mxu0 (!%p10560_p9), %v14236_v57 }
0x129f   : > { %v9970_v23 = vadd.f32 %v10559_v42, %v9956_v15  ;;  %v9943_v38 = vmul.f32 %v13672_v16, %v16776_v59  ;;  %9983 = sbr.rel (%p10560_p9) target bundleno = 5206 (0x1456), region = 176  ;;  %v11284_v59 = vld [vmem:[#allocation14 + $0x8] sm:$0xff] (!%p10560_p9)  }
0x12a0   : > { %13058 = vmatpush3.bf16.msra.mxu1 (!%p10560_p9), %v11284_v59 }
0x12a1   : > { %9978 = vst [vmem:[#allocation2 + $0x30] sm:$0xff] %v9970_v23  ;;  %v9957_v19 = vmul.f32 %v10558_v47, %v9943_v38  ;;  %13059 = vmatprep.subr.bf16.mxu1 (!%p10560_p9), %v14236_v57  ;;  %13049 = vmatpush3.bf16.msra.mxu0 (!%p10560_p9), %v13048_v46 }
0x12a2   : > { %13050 = vmatprep.subr.bf16.mxu0 (!%p10560_p9), %v14236_v57 }
0x12a3   : > { %v9971_v0 = vadd.f32 %v10559_v42, %v9957_v19  ;;  %v10562_v42 = vld [vmem:[#allocation15] ss:$0 sm:$0xff] (!%p10560_p9) }
0x12a4   : > { %13061 = vmatpush3.bf16.msra.mxu1 (!%p10560_p9), %v11285_v2 }
0x12a5   : > { %9979 = vst [vmem:[#allocation2 + $0x38] sm:$0xff] %v9971_v0  ;;  %v13051_v58 = vpack.c.bf16 (!%p10560_p9), %v9971_v0, %v9970_v23  ;;  %13062 = vmatprep.subr.bf16.mxu1 (!%p10560_p9), %v14236_v57 }
0x12a7   : > { %13052 = vmatpush3.bf16.msra.mxu0 %v13051_v58 }
0x12a8   : > { %13064 = vmatpush3.bf16.msra.mxu1 %v11286_v52 }
0x12a9   : > { %13065 = vmatprep.subr.bf16.mxu1 %v14236_v57 }
0x12aa   : > { %12392 = vmatmul.mubr.msk.f32.vlgmr.msra.gmra.mrb[0].mxu0 %vm9985_vm4, %v9984_v56 }
0x12ac   : > { %13067 = vmatpush3.bf16.msra.mxu1 %v11287_v33 }
0x12ad   : > { %13068 = vmatprep.subr.bf16.mxu1 %v14236_v57 }
0x12b0   : > { %13070 = vmatpush3.bf16.msra.mxu1 %v11288_v43 }
0x12b1   : > { %13071 = vmatprep.subr.bf16.mxu1 %v14236_v57 }
0x12b4   : > { %13073 = vmatpush3.bf16.msra.mxu1 %v11289_v63 }
0x12b5   : > { %13074 = vmatprep.subr.bf16.mxu1 %v14236_v57 }
0x12b8   : > { %13076 = vmatpush3.bf16.msra.mxu1 %v11290_v44 }
0x12f4   : > { %v10173_v41 = vpop.permute.xlu0 %10172 }
0x12f5   : > { %vm10174_vm6 = vcmp.eq.s32.totalorder %v10173_v41, 1 }
0x137d   : > { %v10055_v47 = vpop.f32.mrb[0].mxu0 }
0x137e   : > { %v12393_v54 = vpop.f32.mrb[1].mxu0  ;;  %12427 = vmatmul.mubr.f32.vlgmr.msra.gmra.mrb[0].mxu1 %v10055_v47 }
0x1451   : > { %v10164_v13 = vpop.f32.mrb[0].mxu1 }
0x1452   : > { %v10165_v22 = vadd.f32 %v10562_v42, %v10164_v13  ;;  %v12428_v49 = vpop.f32.mrb[1].mxu1 }
0x1454   : > { %v10175_v31 = vsel %vm10174_vm6, %v10165_v22, 0.0 }
0x1455   : > { %10176 = vst [vmem:[#allocation24] sm:$0xff] %v10175_v31 }
0x1456 PF: > { %s17039_s30 = sld [smem:[#allocation34_spill]]  ;;  %s14240_s5 = smov [#allocation24]  }
0x1457   : > { %s10184_s11 = sshll.u32 %s14240_s5, 4  ;;  %s10185_s11 = int_to_ptr.vmem [resolvable:$true] %s10184_s11 }
0x1458   : > { %s14124_s28 = scalar_lea.vmem %s10185_s11, 128  ;;  %p14131_p4 = scmp.lt.s32.totalorder %s10185_s11, %s10185_s11 }
0x1459   : > { %p14125_p12 = scmp.ne.s32.totalorder %s10185_s11, %s14124_s28  ;;  %p14132_p2 = scmp.lt.s32.totalorder %s14124_s28, %s14124_s28 }
0x145b   : > { %p14133_p11 = por %p14132_p2, %p14131_p4 }
0x145c   : > { %p13423_p3 = scmp.eq.s32.totalorder %s17039_s30, 1 }
0x145e   : > { %p14126_p5 = pnand %p14125_p12, %p13423_p3 }
0x1460   : > { %p14127_p1 = pneg %p14126_p5 }
0x1462   : > { %p14134_p8 = pnand %p14133_p11, %p14127_p1 }
0x1464   : > { %14137 = shalt.err (!%p14134_p8)
}
0x1465   : > { %s17040_s1 = sld [smem:[#allocation70_spill]] }
0x146b   : > { %s14138_s26 = scalar_lea.hbm %s17040_s1, 128 }
0x146c   : > { %p14139_p0 = scmp.ne.s32.totalorder %s17040_s1, %s14138_s26  ;;  %p14144_p7 = scmp.lt.u32.totalorder %s14138_s26, %s17040_s1 }
0x146e   : > { %p14140_p6 = pnand %p14139_p0, %p13423_p3 }
0x1470   : > { %p14141_p13 = pneg %p14140_p6 }
0x1472   : > { %p14146_p10 = pnand %p14144_p7, %p14141_p13 }
0x1474   : > { %14149 = shalt.err (!%p14146_p10)
}
0x1475   : > { %13356 = dma.vmem_to_hbm [thread:$0]  (%p13423_p3), %s10185_s11, 128, %s17040_s1, [#allocation5]  }
0x1476   : > { %14191 = dma.done.wait (%p13423_p3), [#allocation5], 128  }
0x1477   : > { %14193 = vsyncadd (%p13423_p3), [#allocation5], 4294967168 }
0x1478 PF: > { %s17041_s30 = sld [smem:[#allocation35_spill]]  ;;  %s17042_s3 = sld [smem:[#allocation32_spill]] }
0x1479   : > { %s17043_s28 = sld [smem:[#allocation33_spill]]  ;;  %s17044_s29 = sld [smem:[#allocation36_spill]] }
0x147e   : > { %p35_p9 = scmp.ge.s32.totalorder %s17041_s30, 4  }
0x1480   :  { %37 = sbr.rel (!%p35_p9) target bundleno = 31 (0x1f), region = 265 }
0x1487   :  { %10197 = vsyncpa [#allocation4], 1 }
0x1488   :  { %10199 = vsyncpa [#allocation4 + $0x1], 1 }
0x1489   :  { %10200 = vsyncpa [#allocation7], 1 }
0x148a   :  { %10201 = vsyncpa [#allocation10], 1 }
0x148b   :  { %10202 = vsyncpa [#allocation13], 1 }
0x148c   :  { %10203 = vsyncpa [#allocation16], 1 }
0x148d   :  { %10204 = vsyncpa [#allocation5], 1 }
0x148e   :  { %10206 = vsyncpa [#allocation5 + $0x1], 1 }

</bundles_post_ra>
